<compile_context>
chip_gen: v7x
topology: tpu7x:2x2x1
jax: 0.10.0
libtpu: 0.0.40
codegen_flags: <defaults>
</compile_context>

<pallas_src>
import functools

import jax
import jax.numpy as jnp
from jax.experimental import pallas as pl
from jax.experimental.pallas import tpu as pltpu


# Lane padding on each side of the flattened h buffer (must be >= (k//2)*(W+1)
# and a multiple of 128 so the h writeback is vreg-aligned).
_H_PAD = 128


# ----------------------------------------------------------------------------
# Fused kernel: one grid step = one (batch, timestep) of the recurrence.
# ----------------------------------------------------------------------------
def _sa_clstm_kernel(xp_ref, wx_ref, whc_ref, gnp_ref,
                     whq_ref, bh_ref, wm_ref, bm_ref,
                     wz1h_ref, wz1m_ref, bz1_ref,
                     wz2z_ref, wz2h_ref, bz2_ref,
                     out_ref,
                     hext_ref, c_ref, m_ref,
                     *, C, HW, W, K, num_groups, eps):
    f32 = jnp.float32
    bf16 = jnp.bfloat16
    C4 = 4 * C
    t = pl.program_id(1)

    @pl.when(t == 0)
    def _init():
        hext_ref[...] = jnp.zeros_like(hext_ref)
        c_ref[...] = jnp.zeros_like(c_ref)
        m_ref[...] = jnp.zeros_like(m_ref)

    # ---- ConvLSTM gate pre-activations: x part (single im2col matmul) -------
    acc = jnp.dot(wx_ref[...], xp_ref[0, 0], preferred_element_type=f32)  # (4C,HW)

    # ---- recurrent KxK conv on previous h (shifted views of padded buffer) --
    hwin = hext_ref[...]                                   # (C, HW + 2*PAD) bf16
    j_idx = jax.lax.broadcasted_iota(jnp.int32, (C, HW), 1) % W
    half = K // 2
    for ki in range(K):
        for kj in range(K):
            off = (ki - half) * W + (kj - half)
            sh = hwin[:, _H_PAD + off:_H_PAD + off + HW]   # (C, HW)
            dj = kj - half
            if dj < 0:                                     # mask left-edge wrap
                sh = jnp.where(j_idx >= -dj, sh, jnp.zeros_like(sh))
            elif dj > 0:                                   # mask right-edge wrap
                sh = jnp.where(j_idx < W - dj, sh, jnp.zeros_like(sh))
            acc = acc + jnp.dot(whc_ref[ki * K + kj], sh,
                                preferred_element_type=f32)
    acc = acc + gnp_ref[0]                                 # conv bias (4C, 1)

    # ---- GroupNorm (stats per group over full-lane (gs, HW) blocks) ---------
    gs = C4 // num_groups
    inv_cnt = 1.0 / float(HW * gs)
    normed = []
    for g in range(num_groups):
        blk = acc[g * gs:(g + 1) * gs, :]
        mu = jnp.sum(blk) * inv_cnt
        var = jnp.sum(blk * blk) * inv_cnt - mu * mu
        normed.append((blk - mu) * jax.lax.rsqrt(var + eps))
    gates = jnp.concatenate(normed, axis=0)
    gates = gates * gnp_ref[1] + gnp_ref[2]                # gamma / beta (4C,1)

    # ---- cell update (sublane-aligned gate slices, full-lane elementwise) ---
    ingate = jax.nn.sigmoid(gates[0 * C:1 * C, :])
    forgetgate = jax.nn.sigmoid(gates[1 * C:2 * C, :])
    cellgate = jnp.tanh(gates[2 * C:3 * C, :])
    outgate = jax.nn.sigmoid(gates[3 * C:4 * C, :])

    c_new = c_ref[...] * forgetgate + ingate * cellgate    # (C, HW) f32
    c_ref[...] = c_new
    h_cell = outgate * jnp.tanh(c_new)

    # ---- SAM (self-attention memory) ----------------------------------------
    m_prev = m_ref[...]
    hb = h_cell.astype(bf16)
    mb = m_prev.astype(bf16)

    qkv = jnp.dot(whq_ref[...], hb, preferred_element_type=f32) + bh_ref[...]
    mkv = jnp.dot(wm_ref[...], mb, preferred_element_type=f32) + bm_ref[...]
    q = qkv[0:C, :].astype(bf16)
    kh = qkv[C:2 * C, :].astype(bf16)
    vh = qkv[2 * C:3 * C, :].astype(bf16)
    km = mkv[0:C, :].astype(bf16)
    vm = mkv[C:2 * C, :].astype(bf16)

    # one MXU pass for both score blocks: (HW, 2*HW), split at lane 256
    k_cat = jnp.concatenate([kh, km], axis=1)              # (C, 2*HW)
    scores = jax.lax.dot_general(q, k_cat, (((0,), (0,)), ((), ())),
                                 preferred_element_type=f32)

    def _softmax(s):
        s = s - jnp.max(s, axis=-1, keepdims=True)
        e = jnp.exp(s)
        return e * pl.reciprocal(jnp.sum(e, axis=-1, keepdims=True), approx=True)

    ah = _softmax(scores[:, 0:HW]).astype(bf16)            # (HW, HW)
    am = _softmax(scores[:, HW:2 * HW]).astype(bf16)

    # Zh = Vh @ Ah, Zm = Vm @ Am  (channel-major, matches the NCHW module)
    zh = jnp.dot(vh, ah, preferred_element_type=f32)       # (C, HW)
    zm = jnp.dot(vm, am, preferred_element_type=f32)

    z = (jnp.dot(wz1h_ref[...], zh.astype(bf16), preferred_element_type=f32)
         + jnp.dot(wz1m_ref[...], zm.astype(bf16), preferred_element_type=f32)
         + bz1_ref[...])                                   # (C, HW)
    g2 = (jnp.dot(wz2z_ref[...], z.astype(bf16), preferred_element_type=f32)
          + jnp.dot(wz2h_ref[...], hb, preferred_element_type=f32)
          + bz2_ref[...])                                  # (3C, HW)

    o_sam = jax.nn.sigmoid(g2[0:C, :])
    g_sam = jnp.tanh(g2[C:2 * C, :])
    i_sam = jax.nn.sigmoid(g2[2 * C:3 * C, :])
    m_new = g_sam * i_sam + (1.0 - i_sam) * m_prev
    h_new = o_sam * m_new

    # ---- state writeback + lane-dense packed output (h | c | m) -------------
    m_ref[...] = m_new
    hext_ref[:, _H_PAD:_H_PAD + HW] = h_new.astype(bf16)
    out_ref[0, 0] = jnp.concatenate([h_new, c_new, m_new], axis=0)


# ----------------------------------------------------------------------------
# Host wrapper (NCHW in / NCHW out, like the PyTorch module)
# ----------------------------------------------------------------------------
def sa_clstm_forward(inputs, params, *, feature_num, kernel_size):
    """inputs: (B, T, Cin, H, W) f32. Returns ((B,T,C,H,W), (h, c, m) NCHW)."""
    B, T, Cin, H, W = inputs.shape
    C = feature_num
    C4 = 4 * C
    HW = H * W
    k = kernel_size
    num_groups = C4 // 32
    pad = (k - 1) // 2
    assert C4 % 32 == 0 and k % 2 == 1
    assert (k // 2) * (W + 1) <= _H_PAD

    bf = jnp.bfloat16

    # im2col of x for all (B, T) at once; patch axis ordered ((ki*k+kj)*Cin+ci).
    xp = jnp.pad(inputs, ((0, 0), (0, 0), (0, 0), (pad, pad), (pad, pad)))
    pieces = [xp[:, :, :, ki:ki + H, kj:kj + W]
              for ki in range(k) for kj in range(k)]
    x_patch = jnp.stack(pieces, axis=2).reshape(B, T, k * k * Cin, HW)
    KP = k * k * Cin
    KP_pad = ((KP + 15) // 16) * 16
    if KP_pad != KP:
        x_patch = jnp.pad(x_patch, ((0, 0), (0, 0), (0, KP_pad - KP), (0, 0)))
    x_patch = x_patch.astype(bf)

    # Split the KxK conv weight into the x part (im2col layout) and the
    # recurrent-h part (one (4C, C) matrix per kernel offset).
    cw = params['conv_w']                                  # (4C, Cin+C, k, k)
    w_x = jnp.transpose(cw[:, :Cin], (0, 2, 3, 1)).reshape(C4, KP)
    if KP_pad != KP:
        w_x = jnp.pad(w_x, ((0, 0), (0, KP_pad - KP)))
    w_x = w_x.astype(bf)
    w_hc = jnp.transpose(cw[:, Cin:], (2, 3, 0, 1)).reshape(k * k, C4, C).astype(bf)
    gnp = jnp.stack([params['conv_b'], params['gn_gamma'],
                     params['gn_beta']], axis=0).reshape(3, C4, 1)

    wh_s = params['wh'].astype(bf)
    bh_s = params['bh'].reshape(3 * C, 1)
    wm_s = params['wm'].astype(bf)
    bm_s = params['bm'].reshape(2 * C, 1)
    wz1h = params['wz1'][:, :C].astype(bf)
    wz1m = params['wz1'][:, C:].astype(bf)
    bz1_s = params['bz1'].reshape(C, 1)
    wz2z = params['wz2'][:, :C].astype(bf)
    wz2h = params['wz2'][:, C:].astype(bf)
    bz2_s = params['bz2'].reshape(3 * C, 1)

    kernel = functools.partial(_sa_clstm_kernel, C=C, HW=HW, W=W, K=k,
                               num_groups=num_groups, eps=1e-5)
    full2 = lambda b, t: (0, 0)
    full3 = lambda b, t: (0, 0, 0)

    out = pl.pallas_call(
        kernel,
        out_shape=jax.ShapeDtypeStruct((B, T, 3 * C, HW), jnp.float32),
        grid=(B, T),
        in_specs=[
            pl.BlockSpec((1, 1, KP_pad, HW), lambda b, t: (b, t, 0, 0)),  # x im2col
            pl.BlockSpec((C4, KP_pad), full2),        # w_x
            pl.BlockSpec((k * k, C4, C), full3),      # recurrent conv weights
            pl.BlockSpec((3, C4, 1), full3),          # conv bias / gamma / beta
            pl.BlockSpec((3 * C, C), full2),          # SAM h_conv weight
            pl.BlockSpec((3 * C, 1), full2),          # SAM h_conv bias
            pl.BlockSpec((2 * C, C), full2),          # SAM m_conv weight
            pl.BlockSpec((2 * C, 1), full2),          # SAM m_conv bias
            pl.BlockSpec((C, C), full2),              # wz1 (Zh half)
            pl.BlockSpec((C, C), full2),              # wz1 (Zm half)
            pl.BlockSpec((C, 1), full2),              # bz1
            pl.BlockSpec((3 * C, C), full2),          # wz2 (Z half)
            pl.BlockSpec((3 * C, C), full2),          # wz2 (h half)
            pl.BlockSpec((3 * C, 1), full2),          # bz2
        ],
        out_specs=pl.BlockSpec((1, 1, 3 * C, HW), lambda b, t: (b, t, 0, 0)),
        scratch_shapes=[
            pltpu.VMEM((C, HW + 2 * _H_PAD), jnp.bfloat16),  # padded previous h
            pltpu.VMEM((C, HW), jnp.float32),                # c state
            pltpu.VMEM((C, HW), jnp.float32),                # m state
        ],
        compiler_params=pltpu.CompilerParams(
            dimension_semantics=("parallel", "arbitrary")),
    )(x_patch, w_x, w_hc, gnp, wh_s, bh_s, wm_s, bm_s,
      wz1h, wz1m, bz1_s, wz2z, wz2h, bz2_s)

    out_seq = out[:, :, 0:C, :].reshape(B, T, C, H, W)
    h_last = out[:, -1, 0:C, :].reshape(B, C, H, W)
    c_last = out[:, -1, C:2 * C, :].reshape(B, C, H, W)
    m_last = out[:, -1, 2 * C:3 * C, :].reshape(B, C, H, W)
    return out_seq, (h_last, c_last, m_last)


# ----------------------------------------------------------------------------
# Pure-JAX NCHW reference (validation only)
# ----------------------------------------------------------------------------
def _sam_ref(h, m, p, C):
    B, _, H, W = h.shape
    hf = h.reshape(B, C, H * W)
    mf = m.reshape(B, C, H * W)
    qkv = jnp.einsum('oc,bcp->bop', p['wh'], hf) + p['bh'][None, :, None]
    q, k, v = qkv[:, :C], qkv[:, C:2 * C], qkv[:, 2 * C:]
    mkv = jnp.einsum('oc,bcp->bop', p['wm'], mf) + p['bm'][None, :, None]
    km, vm = mkv[:, :C], mkv[:, C:]
    ah = jax.nn.softmax(jnp.einsum('bcp,bcq->bpq', q, k), axis=-1)
    am = jax.nn.softmax(jnp.einsum('bcp,bcq->bpq', q, km), axis=-1)
    zh = jnp.einsum('bcp,bpq->bcq', v, ah)
    zm = jnp.einsum('bcp,bpq->bcq', vm, am)
    z = (jnp.einsum('oc,bcp->bop', p['wz1'], jnp.concatenate([zh, zm], axis=1))
         + p['bz1'][None, :, None])
    g2 = (jnp.einsum('oc,bcp->bop', p['wz2'], jnp.concatenate([z, hf], axis=1))
          + p['bz2'][None, :, None])
    o, g, i = g2[:, :C], g2[:, C:2 * C], g2[:, 2 * C:]
    i = jax.nn.sigmoid(i)
    om = jnp.tanh(g) * i + (1.0 - i) * mf
    oh = jax.nn.sigmoid(o) * om
    return oh.reshape(B, C, H, W), om.reshape(B, C, H, W)


def _forward_ref(inputs, params, *, feature_num, kernel_size):
    B, T, Cin, H, W = inputs.shape
    C = feature_num
    C4 = 4 * C
    num_groups = C4 // 32
    gs = C4 // num_groups
    pad = (kernel_size - 1) // 2
    h = jnp.zeros((B, C, H, W), jnp.float32)
    c = jnp.zeros((B, C, H, W), jnp.float32)
    m = jnp.zeros((B, C, H, W), jnp.float32)
    outs = []
    for t in range(T):
        comb = jnp.concatenate([inputs[:, t], h], axis=1)
        gates = jax.lax.conv_general_dilated(
            comb, params['conv_w'], window_strides=(1, 1),
            padding=[(pad, pad), (pad, pad)],
            dimension_numbers=('NCHW', 'OIHW', 'NCHW'))
        gates = gates + params['conv_b'][None, :, None, None]
        gr = gates.reshape(B, num_groups, gs, H, W)
        mu = jnp.mean(gr, axis=(2, 3, 4), keepdims=True)
        var = jnp.mean((gr - mu) ** 2, axis=(2, 3, 4), keepdims=True)
        gates = ((gr - mu) * jax.lax.rsqrt(var + 1e-5)).reshape(B, C4, H, W)
        gates = (gates * params['gn_gamma'][None, :, None, None]
                 + params['gn_beta'][None, :, None, None])
        i_g = jax.nn.sigmoid(gates[:, 0:C])
        f_g = jax.nn.sigmoid(gates[:, C:2 * C])
        g_g = jnp.tanh(gates[:, 2 * C:3 * C])
        o_g = jax.nn.sigmoid(gates[:, 3 * C:4 * C])
        c = c * f_g + i_g * g_g
        h_cell = o_g * jnp.tanh(c)
        h, m = _sam_ref(h_cell, m, params, C)
        outs.append(h)
    return jnp.stack(outs, axis=1), (h, c, m)


# ----------------------------------------------------------------------------
# Synthetic parameters (PyTorch-like layouts: (out, in, kh, kw) / (out, in))
# ----------------------------------------------------------------------------
def init_params(key, in_channels, feature_num, kernel_size):
    C = feature_num
    k = kernel_size
    cin_tot = in_channels + C
    keys = jax.random.split(key, 10)

    def rnd(kk, shape, fan_in):
        return jax.random.normal(kk, shape, jnp.float32) / jnp.sqrt(float(fan_in))

    return {
        'conv_w': rnd(keys[0], (4 * C, cin_tot, k, k), k * k * cin_tot),
        'conv_b': rnd(keys[1], (4 * C,), k * k * cin_tot),
        'gn_gamma': jnp.ones((4 * C,), jnp.float32),
        'gn_beta': jnp.zeros((4 * C,), jnp.float32),
        'wh': rnd(keys[2], (3 * C, C), C),
        'bh': rnd(keys[3], (3 * C,), C),
        'wm': rnd(keys[4], (2 * C, C), C),
        'bm': rnd(keys[5], (2 * C,), C),
        'wz1': rnd(keys[6], (C, 2 * C), 2 * C),
        'bz1': rnd(keys[7], (C,), 2 * C),
        'wz2': rnd(keys[8], (3 * C, 2 * C), 2 * C),
        'bz2': rnd(keys[9], (3 * C,), 2 * C),
    }


if __name__ == "__main__":
    key = jax.random.PRNGKey(0)
    B, T, Cin, H, W = 2, 4, 4, 16, 16
    feature_num = 32            # GroupNorm(num_groups=4, channels=128)
    kernel_size = 3

    kp, kx = jax.random.split(key)
    params = init_params(kp, Cin, feature_num, kernel_size)
    inputs = jax.random.normal(kx, (B, T, Cin, H, W), jnp.float32)

    fwd = jax.jit(functools.partial(sa_clstm_forward, feature_num=feature_num,
                                    kernel_size=kernel_size))
    out, (h, c, m) = fwd(inputs, params)
    jax.block_until_ready(out)

    ref = jax.jit(functools.partial(_forward_ref, feature_num=feature_num,
                                    kernel_size=kernel_size))
    out_r, (h_r, c_r, m_r) = ref(inputs, params)
    jax.block_until_ready(out_r)

    # bf16 MXU inputs inside the kernel vs a pure-f32 reference -> loose-ish tol.
    for a, b in ((out, out_r), (h, h_r), (c, c_r), (m, m_r)):
        err = float(jnp.max(jnp.abs(a - b)))
        assert jnp.allclose(a, b, rtol=5e-2, atol=5e-2), err

    print("KERNEL_OK")
</pallas_src>

<mosaic_0001>
module attributes {stable_mosaic.version = 11 : i64} {
  func.func @_sa_clstm_kernel(%arg0: i32, %arg1: i32, %arg2: memref<1x1x48x256xbf16, #tpu.memory_space<vmem>>, %arg3: memref<128x48xbf16, #tpu.memory_space<vmem>>, %arg4: memref<9x128x32xbf16, #tpu.memory_space<vmem>>, %arg5: memref<3x128x1xf32, #tpu.memory_space<vmem>>, %arg6: memref<96x32xbf16, #tpu.memory_space<vmem>>, %arg7: memref<96x1xf32, #tpu.memory_space<vmem>>, %arg8: memref<64x32xbf16, #tpu.memory_space<vmem>>, %arg9: memref<64x1xf32, #tpu.memory_space<vmem>>, %arg10: memref<32x32xbf16, #tpu.memory_space<vmem>>, %arg11: memref<32x32xbf16, #tpu.memory_space<vmem>>, %arg12: memref<32x1xf32, #tpu.memory_space<vmem>>, %arg13: memref<96x32xbf16, #tpu.memory_space<vmem>>, %arg14: memref<96x32xbf16, #tpu.memory_space<vmem>>, %arg15: memref<96x1xf32, #tpu.memory_space<vmem>>, %arg16: memref<1x1x96x256xf32, #tpu.memory_space<vmem>>, %arg17: memref<32x512xbf16, #tpu.memory_space<vmem>>, %arg18: memref<32x256xf32, #tpu.memory_space<vmem>>, %arg19: memref<32x256xf32, #tpu.memory_space<vmem>>) attributes {dimension_semantics = [#tpu.dimension_semantics<parallel>, #tpu.dimension_semantics<arbitrary>], iteration_bounds = array<i64: 2, 4>, scalar_prefetch = 0 : i64, scratch_operands = 3 : i64, tpu.core_type = #tpu.core_type<tc>, window_params = [{transform_indices = @transform_0, window_bounds = array<i64: 1, 1, 48, 256>}, {pipeline_mode = #tpu.pipeline_mode<synchronous>, transform_indices = @transform_1, window_bounds = array<i64: 128, 48>}, {pipeline_mode = #tpu.pipeline_mode<synchronous>, transform_indices = @transform_2, window_bounds = array<i64: 9, 128, 32>}, {pipeline_mode = #tpu.pipeline_mode<synchronous>, transform_indices = @transform_3, window_bounds = array<i64: 3, 128, 1>}, {pipeline_mode = #tpu.pipeline_mode<synchronous>, transform_indices = @transform_4, window_bounds = array<i64: 96, 32>}, {pipeline_mode = #tpu.pipeline_mode<synchronous>, transform_indices = @transform_5, window_bounds = array<i64: 96, 1>}, {pipeline_mode = #tpu.pipeline_mode<synchronous>, transform_indices = @transform_6, window_bounds = array<i64: 64, 32>}, {pipeline_mode = #tpu.pipeline_mode<synchronous>, transform_indices = @transform_7, window_bounds = array<i64: 64, 1>}, {pipeline_mode = #tpu.pipeline_mode<synchronous>, transform_indices = @transform_8, window_bounds = array<i64: 32, 32>}, {pipeline_mode = #tpu.pipeline_mode<synchronous>, transform_indices = @transform_9, window_bounds = array<i64: 32, 32>}, {pipeline_mode = #tpu.pipeline_mode<synchronous>, transform_indices = @transform_10, window_bounds = array<i64: 32, 1>}, {pipeline_mode = #tpu.pipeline_mode<synchronous>, transform_indices = @transform_11, window_bounds = array<i64: 96, 32>}, {pipeline_mode = #tpu.pipeline_mode<synchronous>, transform_indices = @transform_12, window_bounds = array<i64: 96, 32>}, {pipeline_mode = #tpu.pipeline_mode<synchronous>, transform_indices = @transform_13, window_bounds = array<i64: 96, 1>}, {transform_indices = @transform_14, window_bounds = array<i64: 1, 1, 96, 256>}]} {
    %c0_i32 = arith.constant 0 : i32
    %0 = arith.cmpi eq, %arg1, %c0_i32 : i32
    %1 = arith.extui %0 : i1 to i32
    %c0_i32_0 = arith.constant 0 : i32
    %2 = arith.cmpi ne, %1, %c0_i32_0 : i32
    scf.if %2 {
      %cst_132 = arith.constant 0.000000e+00 : bf16
      %311 = vector.broadcast %cst_132 : bf16 to vector<32x512xbf16>
      %c0_133 = arith.constant 0 : index
      %c0_134 = arith.constant 0 : index
      %312 = vector.load %arg17[%c0_133, %c0_134] : memref<32x512xbf16, #tpu.memory_space<vmem>>, vector<32x512xbf16>
      tpu.vector_store %arg17[%c0_133, %c0_134], %311 {strides = array<i32>} : memref<32x512xbf16, #tpu.memory_space<vmem>>, vector<32x512xbf16>,
      %cst_135 = arith.constant 0.000000e+00 : f32
      %313 = vector.broadcast %cst_135 : f32 to vector<32x256xf32>
      %c0_136 = arith.constant 0 : index
      %c0_137 = arith.constant 0 : index
      %314 = vector.load %arg18[%c0_136, %c0_137] : memref<32x256xf32, #tpu.memory_space<vmem>>, vector<32x256xf32>
      tpu.vector_store %arg18[%c0_136, %c0_137], %313 {strides = array<i32>} : memref<32x256xf32, #tpu.memory_space<vmem>>, vector<32x256xf32>,
      %cst_138 = arith.constant 0.000000e+00 : f32
      %315 = vector.broadcast %cst_138 : f32 to vector<32x256xf32>
      %c0_139 = arith.constant 0 : index
      %c0_140 = arith.constant 0 : index
      %316 = vector.load %arg19[%c0_139, %c0_140] : memref<32x256xf32, #tpu.memory_space<vmem>>, vector<32x256xf32>
      tpu.vector_store %arg19[%c0_139, %c0_140], %315 {strides = array<i32>} : memref<32x256xf32, #tpu.memory_space<vmem>>, vector<32x256xf32>,
    } else {
    }
    %c0 = arith.constant 0 : index
    %c0_1 = arith.constant 0 : index
    %3 = vector.load %arg3[%c0, %c0_1] : memref<128x48xbf16, #tpu.memory_space<vmem>>, vector<128x48xbf16>
    %c0_2 = arith.constant 0 : index
    %c0_3 = arith.constant 0 : index
    %c0_4 = arith.constant 0 : index
    %c0_5 = arith.constant 0 : index
    %4 = vector.load %arg2[%c0_2, %c0_3, %c0_4, %c0_5] : memref<1x1x48x256xbf16, #tpu.memory_space<vmem>>, vector<1x1x48x256xbf16>
    %5 = vector.shape_cast %4 : vector<1x1x48x256xbf16> to vector<48x256xbf16>
    %cst = arith.constant dense<0.000000e+00> : vector<128x256xf32>
    %6 = tpu.matmul %3, %5, %cst {dimension_numbers = #tpu.dot_dimension_numbers<[1], [0], [0], [1], [0, 0, 1, 1], [], []>} : vector<128x48xbf16>, vector<48x256xbf16>, vector<128x256xf32> -> vector<128x256xf32>
    %c0_6 = arith.constant 0 : index
    %c0_7 = arith.constant 0 : index
    %7 = vector.load %arg17[%c0_6, %c0_7] : memref<32x512xbf16, #tpu.memory_space<vmem>>, vector<32x512xbf16>
    %8 = tpu.iota {dimensions = array<i32: 1>} : vector<32x256xi32>
    %c16_i32 = arith.constant 16 : i32
    %c0_i32_8 = arith.constant 0 : i32
    %9 = arith.cmpi eq, %c16_i32, %c0_i32_8 : i32
    %c1_i32 = arith.constant 1 : i32
    %10 = arith.select %9, %c1_i32, %c16_i32 : i32
    %11 = vector.broadcast %10 : i32 to vector<32x256xi32>
    %12 = arith.remsi %8, %11 : vector<32x256xi32>
    %c0_i32_9 = arith.constant 0 : i32
    %13 = vector.broadcast %c0_i32_9 : i32 to vector<32x256xi32>
    %14 = arith.cmpi ne, %12, %13 : vector<32x256xi32>
    %c0_i32_10 = arith.constant 0 : i32
    %15 = vector.broadcast %c0_i32_10 : i32 to vector<32x256xi32>
    %16 = arith.cmpi slt, %12, %15 : vector<32x256xi32>
    %c0_i32_11 = arith.constant 0 : i32
    %17 = arith.cmpi slt, %10, %c0_i32_11 : i32
    %18 = vector.broadcast %17 : i1 to vector<32x256xi1>
    %19 = vector.broadcast %18 : vector<32x256xi1> to vector<32x256xi1>
    %20 = arith.xori %16, %19 : vector<32x256xi1>
    %21 = arith.andi %20, %14 : vector<32x256xi1>
    %22 = vector.broadcast %10 : i32 to vector<32x256xi32>
    %23 = arith.addi %12, %22 : vector<32x256xi32>
    %24 = arith.select %21, %23, %12 : vector<32x256xi1>, vector<32x256xi32>
    %25 = vector.extract_strided_slice %7 {offsets = [0, 111], sizes = [32, 256], strides = [1, 1]} : vector<32x512xbf16> to vector<32x256xbf16>
    %c1_i32_12 = arith.constant 1 : i32
    %26 = vector.broadcast %c1_i32_12 : i32 to vector<32x256xi32>
    %27 = arith.cmpi sge, %24, %26 : vector<32x256xi32>
    %cst_13 = arith.constant 0.000000e+00 : bf16
    %28 = vector.broadcast %cst_13 : bf16 to vector<32x256xbf16>
    %29 = arith.select %27, %25, %28 : vector<32x256xi1>, vector<32x256xbf16>
    %c0_14 = arith.constant 0 : index
    %c0_15 = arith.constant 0 : index
    %c0_16 = arith.constant 0 : index
    %30 = vector.load %arg4[%c0_14, %c0_15, %c0_16] : memref<9x128x32xbf16, #tpu.memory_space<vmem>>, vector<1x128x32xbf16>
    %31 = vector.shape_cast %30 : vector<1x128x32xbf16> to vector<128x32xbf16>
    %cst_17 = arith.constant dense<0.000000e+00> : vector<128x256xf32>
    %32 = tpu.matmul %31, %29, %cst_17 {dimension_numbers = #tpu.dot_dimension_numbers<[1], [0], [0], [1], [0, 0, 1, 1], [], []>} : vector<128x32xbf16>, vector<32x256xbf16>, vector<128x256xf32> -> vector<128x256xf32>
    %33 = arith.addf %6, %32 : vector<128x256xf32>
    %34 = vector.extract_strided_slice %7 {offsets = [0, 112], sizes = [32, 256], strides = [1, 1]} : vector<32x512xbf16> to vector<32x256xbf16>
    %c1 = arith.constant 1 : index
    %c0_18 = arith.constant 0 : index
    %c0_19 = arith.constant 0 : index
    %35 = vector.load %arg4[%c1, %c0_18, %c0_19] : memref<9x128x32xbf16, #tpu.memory_space<vmem>>, vector<1x128x32xbf16>
    %36 = vector.shape_cast %35 : vector<1x128x32xbf16> to vector<128x32xbf16>
    %cst_20 = arith.constant dense<0.000000e+00> : vector<128x256xf32>
    %37 = tpu.matmul %36, %34, %cst_20 {dimension_numbers = #tpu.dot_dimension_numbers<[1], [0], [0], [1], [0, 0, 1, 1], [], []>} : vector<128x32xbf16>, vector<32x256xbf16>, vector<128x256xf32> -> vector<128x256xf32>
    %38 = arith.addf %33, %37 : vector<128x256xf32>
    %39 = vector.extract_strided_slice %7 {offsets = [0, 113], sizes = [32, 256], strides = [1, 1]} : vector<32x512xbf16> to vector<32x256xbf16>
    %c15_i32 = arith.constant 15 : i32
    %40 = vector.broadcast %c15_i32 : i32 to vector<32x256xi32>
    %41 = arith.cmpi slt, %24, %40 : vector<32x256xi32>
    %cst_21 = arith.constant 0.000000e+00 : bf16
    %42 = vector.broadcast %cst_21 : bf16 to vector<32x256xbf16>
    %43 = arith.select %41, %39, %42 : vector<32x256xi1>, vector<32x256xbf16>
    %c2 = arith.constant 2 : index
    %c0_22 = arith.constant 0 : index
    %c0_23 = arith.constant 0 : index
    %44 = vector.load %arg4[%c2, %c0_22, %c0_23] : memref<9x128x32xbf16, #tpu.memory_space<vmem>>, vector<1x128x32xbf16>
    %45 = vector.shape_cast %44 : vector<1x128x32xbf16> to vector<128x32xbf16>
    %cst_24 = arith.constant dense<0.000000e+00> : vector<128x256xf32>
    %46 = tpu.matmul %45, %43, %cst_24 {dimension_numbers = #tpu.dot_dimension_numbers<[1], [0], [0], [1], [0, 0, 1, 1], [], []>} : vector<128x32xbf16>, vector<32x256xbf16>, vector<128x256xf32> -> vector<128x256xf32>
    %47 = arith.addf %38, %46 : vector<128x256xf32>
    %48 = vector.extract_strided_slice %7 {offsets = [0, 127], sizes = [32, 256], strides = [1, 1]} : vector<32x512xbf16> to vector<32x256xbf16>
    %c1_i32_25 = arith.constant 1 : i32
    %49 = vector.broadcast %c1_i32_25 : i32 to vector<32x256xi32>
    %50 = arith.cmpi sge, %24, %49 : vector<32x256xi32>
    %cst_26 = arith.constant 0.000000e+00 : bf16
    %51 = vector.broadcast %cst_26 : bf16 to vector<32x256xbf16>
    %52 = arith.select %50, %48, %51 : vector<32x256xi1>, vector<32x256xbf16>
    %c3 = arith.constant 3 : index
    %c0_27 = arith.constant 0 : index
    %c0_28 = arith.constant 0 : index
    %53 = vector.load %arg4[%c3, %c0_27, %c0_28] : memref<9x128x32xbf16, #tpu.memory_space<vmem>>, vector<1x128x32xbf16>
    %54 = vector.shape_cast %53 : vector<1x128x32xbf16> to vector<128x32xbf16>
    %cst_29 = arith.constant dense<0.000000e+00> : vector<128x256xf32>
    %55 = tpu.matmul %54, %52, %cst_29 {dimension_numbers = #tpu.dot_dimension_numbers<[1], [0], [0], [1], [0, 0, 1, 1], [], []>} : vector<128x32xbf16>, vector<32x256xbf16>, vector<128x256xf32> -> vector<128x256xf32>
    %56 = arith.addf %47, %55 : vector<128x256xf32>
    %57 = vector.extract_strided_slice %7 {offsets = [0, 128], sizes = [32, 256], strides = [1, 1]} : vector<32x512xbf16> to vector<32x256xbf16>
    %c4 = arith.constant 4 : index
    %c0_30 = arith.constant 0 : index
    %c0_31 = arith.constant 0 : index
    %58 = vector.load %arg4[%c4, %c0_30, %c0_31] : memref<9x128x32xbf16, #tpu.memory_space<vmem>>, vector<1x128x32xbf16>
    %59 = vector.shape_cast %58 : vector<1x128x32xbf16> to vector<128x32xbf16>
    %cst_32 = arith.constant dense<0.000000e+00> : vector<128x256xf32>
    %60 = tpu.matmul %59, %57, %cst_32 {dimension_numbers = #tpu.dot_dimension_numbers<[1], [0], [0], [1], [0, 0, 1, 1], [], []>} : vector<128x32xbf16>, vector<32x256xbf16>, vector<128x256xf32> -> vector<128x256xf32>
    %61 = arith.addf %56, %60 : vector<128x256xf32>
    %62 = vector.extract_strided_slice %7 {offsets = [0, 129], sizes = [32, 256], strides = [1, 1]} : vector<32x512xbf16> to vector<32x256xbf16>
    %c15_i32_33 = arith.constant 15 : i32
    %63 = vector.broadcast %c15_i32_33 : i32 to vector<32x256xi32>
    %64 = arith.cmpi slt, %24, %63 : vector<32x256xi32>
    %cst_34 = arith.constant 0.000000e+00 : bf16
    %65 = vector.broadcast %cst_34 : bf16 to vector<32x256xbf16>
    %66 = arith.select %64, %62, %65 : vector<32x256xi1>, vector<32x256xbf16>
    %c5 = arith.constant 5 : index
    %c0_35 = arith.constant 0 : index
    %c0_36 = arith.constant 0 : index
    %67 = vector.load %arg4[%c5, %c0_35, %c0_36] : memref<9x128x32xbf16, #tpu.memory_space<vmem>>, vector<1x128x32xbf16>
    %68 = vector.shape_cast %67 : vector<1x128x32xbf16> to vector<128x32xbf16>
    %cst_37 = arith.constant dense<0.000000e+00> : vector<128x256xf32>
    %69 = tpu.matmul %68, %66, %cst_37 {dimension_numbers = #tpu.dot_dimension_numbers<[1], [0], [0], [1], [0, 0, 1, 1], [], []>} : vector<128x32xbf16>, vector<32x256xbf16>, vector<128x256xf32> -> vector<128x256xf32>
    %70 = arith.addf %61, %69 : vector<128x256xf32>
    %71 = vector.extract_strided_slice %7 {offsets = [0, 143], sizes = [32, 256], strides = [1, 1]} : vector<32x512xbf16> to vector<32x256xbf16>
    %c1_i32_38 = arith.constant 1 : i32
    %72 = vector.broadcast %c1_i32_38 : i32 to vector<32x256xi32>
    %73 = arith.cmpi sge, %24, %72 : vector<32x256xi32>
    %cst_39 = arith.constant 0.000000e+00 : bf16
    %74 = vector.broadcast %cst_39 : bf16 to vector<32x256xbf16>
    %75 = arith.select %73, %71, %74 : vector<32x256xi1>, vector<32x256xbf16>
    %c6 = arith.constant 6 : index
    %c0_40 = arith.constant 0 : index
    %c0_41 = arith.constant 0 : index
    %76 = vector.load %arg4[%c6, %c0_40, %c0_41] : memref<9x128x32xbf16, #tpu.memory_space<vmem>>, vector<1x128x32xbf16>
    %77 = vector.shape_cast %76 : vector<1x128x32xbf16> to vector<128x32xbf16>
    %cst_42 = arith.constant dense<0.000000e+00> : vector<128x256xf32>
    %78 = tpu.matmul %77, %75, %cst_42 {dimension_numbers = #tpu.dot_dimension_numbers<[1], [0], [0], [1], [0, 0, 1, 1], [], []>} : vector<128x32xbf16>, vector<32x256xbf16>, vector<128x256xf32> -> vector<128x256xf32>
    %79 = arith.addf %70, %78 : vector<128x256xf32>
    %80 = vector.extract_strided_slice %7 {offsets = [0, 144], sizes = [32, 256], strides = [1, 1]} : vector<32x512xbf16> to vector<32x256xbf16>
    %c7 = arith.constant 7 : index
    %c0_43 = arith.constant 0 : index
    %c0_44 = arith.constant 0 : index
    %81 = vector.load %arg4[%c7, %c0_43, %c0_44] : memref<9x128x32xbf16, #tpu.memory_space<vmem>>, vector<1x128x32xbf16>
    %82 = vector.shape_cast %81 : vector<1x128x32xbf16> to vector<128x32xbf16>
    %cst_45 = arith.constant dense<0.000000e+00> : vector<128x256xf32>
    %83 = tpu.matmul %82, %80, %cst_45 {dimension_numbers = #tpu.dot_dimension_numbers<[1], [0], [0], [1], [0, 0, 1, 1], [], []>} : vector<128x32xbf16>, vector<32x256xbf16>, vector<128x256xf32> -> vector<128x256xf32>
    %84 = arith.addf %79, %83 : vector<128x256xf32>
    %85 = vector.extract_strided_slice %7 {offsets = [0, 145], sizes = [32, 256], strides = [1, 1]} : vector<32x512xbf16> to vector<32x256xbf16>
    %c15_i32_46 = arith.constant 15 : i32
    %86 = vector.broadcast %c15_i32_46 : i32 to vector<32x256xi32>
    %87 = arith.cmpi slt, %24, %86 : vector<32x256xi32>
    %cst_47 = arith.constant 0.000000e+00 : bf16
    %88 = vector.broadcast %cst_47 : bf16 to vector<32x256xbf16>
    %89 = arith.select %87, %85, %88 : vector<32x256xi1>, vector<32x256xbf16>
    %c8 = arith.constant 8 : index
    %c0_48 = arith.constant 0 : index
    %c0_49 = arith.constant 0 : index
    %90 = vector.load %arg4[%c8, %c0_48, %c0_49] : memref<9x128x32xbf16, #tpu.memory_space<vmem>>, vector<1x128x32xbf16>
    %91 = vector.shape_cast %90 : vector<1x128x32xbf16> to vector<128x32xbf16>
    %cst_50 = arith.constant dense<0.000000e+00> : vector<128x256xf32>
    %92 = tpu.matmul %91, %89, %cst_50 {dimension_numbers = #tpu.dot_dimension_numbers<[1], [0], [0], [1], [0, 0, 1, 1], [], []>} : vector<128x32xbf16>, vector<32x256xbf16>, vector<128x256xf32> -> vector<128x256xf32>
    %93 = arith.addf %84, %92 : vector<128x256xf32>
    %c0_51 = arith.constant 0 : index
    %c0_52 = arith.constant 0 : index
    %c0_53 = arith.constant 0 : index
    %94 = vector.load %arg5[%c0_51, %c0_52, %c0_53] : memref<3x128x1xf32, #tpu.memory_space<vmem>>, vector<1x128x1xf32>
    %95 = vector.shape_cast %94 : vector<1x128x1xf32> to vector<128x1xf32>
    %96 = vector.broadcast %95 : vector<128x1xf32> to vector<128x256xf32>
    %97 = arith.addf %93, %96 : vector<128x256xf32>
    %98 = vector.extract_strided_slice %97 {offsets = [0, 0], sizes = [32, 256], strides = [1, 1]} : vector<128x256xf32> to vector<32x256xf32>
    %99 = vector.shape_cast %98 : vector<32x256xf32> to vector<1x32x256xf32>
    %cst_54 = arith.constant dense<0.000000e+00> : vector<1xf32>
    %100 = vector.multi_reduction <add>, %99, %cst_54 [1, 2] : vector<1x32x256xf32> to vector<1xf32>
    %101 = vector.shape_cast %100 : vector<1xf32> to vector<1x1x1xf32>
    %102 = vector.extract %101[0, 0, 0] : f32 from vector<1x1x1xf32>
    %cst_55 = arith.constant 1.22070313E-4 : f32
    %103 = arith.mulf %102, %cst_55 : f32
    %104 = arith.mulf %98, %98 : vector<32x256xf32>
    %105 = vector.shape_cast %104 : vector<32x256xf32> to vector<1x32x256xf32>
    %cst_56 = arith.constant dense<0.000000e+00> : vector<1xf32>
    %106 = vector.multi_reduction <add>, %105, %cst_56 [1, 2] : vector<1x32x256xf32> to vector<1xf32>
    %107 = vector.shape_cast %106 : vector<1xf32> to vector<1x1x1xf32>
    %108 = vector.extract %107[0, 0, 0] : f32 from vector<1x1x1xf32>
    %cst_57 = arith.constant 1.22070313E-4 : f32
    %109 = arith.mulf %108, %cst_57 : f32
    %110 = arith.mulf %103, %103 : f32
    %111 = arith.subf %109, %110 : f32
    %112 = vector.broadcast %103 : f32 to vector<32x256xf32>
    %113 = arith.subf %98, %112 : vector<32x256xf32>
    %cst_58 = arith.constant 9.99999974E-6 : f32
    %114 = arith.addf %111, %cst_58 : f32
    %115 = math.rsqrt %114 : f32
    %116 = vector.broadcast %115 : f32 to vector<32x256xf32>
    %117 = arith.mulf %113, %116 : vector<32x256xf32>
    %118 = vector.extract_strided_slice %97 {offsets = [32, 0], sizes = [32, 256], strides = [1, 1]} : vector<128x256xf32> to vector<32x256xf32>
    %119 = vector.shape_cast %118 : vector<32x256xf32> to vector<1x32x256xf32>
    %cst_59 = arith.constant dense<0.000000e+00> : vector<1xf32>
    %120 = vector.multi_reduction <add>, %119, %cst_59 [1, 2] : vector<1x32x256xf32> to vector<1xf32>
    %121 = vector.shape_cast %120 : vector<1xf32> to vector<1x1x1xf32>
    %122 = vector.extract %121[0, 0, 0] : f32 from vector<1x1x1xf32>
    %cst_60 = arith.constant 1.22070313E-4 : f32
    %123 = arith.mulf %122, %cst_60 : f32
    %124 = arith.mulf %118, %118 : vector<32x256xf32>
    %125 = vector.shape_cast %124 : vector<32x256xf32> to vector<1x32x256xf32>
    %cst_61 = arith.constant dense<0.000000e+00> : vector<1xf32>
    %126 = vector.multi_reduction <add>, %125, %cst_61 [1, 2] : vector<1x32x256xf32> to vector<1xf32>
    %127 = vector.shape_cast %126 : vector<1xf32> to vector<1x1x1xf32>
    %128 = vector.extract %127[0, 0, 0] : f32 from vector<1x1x1xf32>
    %cst_62 = arith.constant 1.22070313E-4 : f32
    %129 = arith.mulf %128, %cst_62 : f32
    %130 = arith.mulf %123, %123 : f32
    %131 = arith.subf %129, %130 : f32
    %132 = vector.broadcast %123 : f32 to vector<32x256xf32>
    %133 = arith.subf %118, %132 : vector<32x256xf32>
    %cst_63 = arith.constant 9.99999974E-6 : f32
    %134 = arith.addf %131, %cst_63 : f32
    %135 = math.rsqrt %134 : f32
    %136 = vector.broadcast %135 : f32 to vector<32x256xf32>
    %137 = arith.mulf %133, %136 : vector<32x256xf32>
    %138 = vector.extract_strided_slice %97 {offsets = [64, 0], sizes = [32, 256], strides = [1, 1]} : vector<128x256xf32> to vector<32x256xf32>
    %139 = vector.shape_cast %138 : vector<32x256xf32> to vector<1x32x256xf32>
    %cst_64 = arith.constant dense<0.000000e+00> : vector<1xf32>
    %140 = vector.multi_reduction <add>, %139, %cst_64 [1, 2] : vector<1x32x256xf32> to vector<1xf32>
    %141 = vector.shape_cast %140 : vector<1xf32> to vector<1x1x1xf32>
    %142 = vector.extract %141[0, 0, 0] : f32 from vector<1x1x1xf32>
    %cst_65 = arith.constant 1.22070313E-4 : f32
    %143 = arith.mulf %142, %cst_65 : f32
    %144 = arith.mulf %138, %138 : vector<32x256xf32>
    %145 = vector.shape_cast %144 : vector<32x256xf32> to vector<1x32x256xf32>
    %cst_66 = arith.constant dense<0.000000e+00> : vector<1xf32>
    %146 = vector.multi_reduction <add>, %145, %cst_66 [1, 2] : vector<1x32x256xf32> to vector<1xf32>
    %147 = vector.shape_cast %146 : vector<1xf32> to vector<1x1x1xf32>
    %148 = vector.extract %147[0, 0, 0] : f32 from vector<1x1x1xf32>
    %cst_67 = arith.constant 1.22070313E-4 : f32
    %149 = arith.mulf %148, %cst_67 : f32
    %150 = arith.mulf %143, %143 : f32
    %151 = arith.subf %149, %150 : f32
    %152 = vector.broadcast %143 : f32 to vector<32x256xf32>
    %153 = arith.subf %138, %152 : vector<32x256xf32>
    %cst_68 = arith.constant 9.99999974E-6 : f32
    %154 = arith.addf %151, %cst_68 : f32
    %155 = math.rsqrt %154 : f32
    %156 = vector.broadcast %155 : f32 to vector<32x256xf32>
    %157 = arith.mulf %153, %156 : vector<32x256xf32>
    %158 = vector.extract_strided_slice %97 {offsets = [96, 0], sizes = [32, 256], strides = [1, 1]} : vector<128x256xf32> to vector<32x256xf32>
    %159 = vector.shape_cast %158 : vector<32x256xf32> to vector<1x32x256xf32>
    %cst_69 = arith.constant dense<0.000000e+00> : vector<1xf32>
    %160 = vector.multi_reduction <add>, %159, %cst_69 [1, 2] : vector<1x32x256xf32> to vector<1xf32>
    %161 = vector.shape_cast %160 : vector<1xf32> to vector<1x1x1xf32>
    %162 = vector.extract %161[0, 0, 0] : f32 from vector<1x1x1xf32>
    %cst_70 = arith.constant 1.22070313E-4 : f32
    %163 = arith.mulf %162, %cst_70 : f32
    %164 = arith.mulf %158, %158 : vector<32x256xf32>
    %165 = vector.shape_cast %164 : vector<32x256xf32> to vector<1x32x256xf32>
    %cst_71 = arith.constant dense<0.000000e+00> : vector<1xf32>
    %166 = vector.multi_reduction <add>, %165, %cst_71 [1, 2] : vector<1x32x256xf32> to vector<1xf32>
    %167 = vector.shape_cast %166 : vector<1xf32> to vector<1x1x1xf32>
    %168 = vector.extract %167[0, 0, 0] : f32 from vector<1x1x1xf32>
    %cst_72 = arith.constant 1.22070313E-4 : f32
    %169 = arith.mulf %168, %cst_72 : f32
    %170 = arith.mulf %163, %163 : f32
    %171 = arith.subf %169, %170 : f32
    %172 = vector.broadcast %163 : f32 to vector<32x256xf32>
    %173 = arith.subf %158, %172 : vector<32x256xf32>
    %cst_73 = arith.constant 9.99999974E-6 : f32
    %174 = arith.addf %171, %cst_73 : f32
    %175 = math.rsqrt %174 : f32
    %176 = vector.broadcast %175 : f32 to vector<32x256xf32>
    %177 = arith.mulf %173, %176 : vector<32x256xf32>
    %178 = tpu.concatenate %117, %137, %157, %177 in 0 : vector<32x256xf32>, vector<32x256xf32>, vector<32x256xf32>, vector<32x256xf32> -> vector<128x256xf32>
    %c1_74 = arith.constant 1 : index
    %c0_75 = arith.constant 0 : index
    %c0_76 = arith.constant 0 : index
    %179 = vector.load %arg5[%c1_74, %c0_75, %c0_76] : memref<3x128x1xf32, #tpu.memory_space<vmem>>, vector<1x128x1xf32>
    %180 = vector.shape_cast %179 : vector<1x128x1xf32> to vector<128x1xf32>
    %181 = vector.broadcast %180 : vector<128x1xf32> to vector<128x256xf32>
    %182 = arith.mulf %178, %181 : vector<128x256xf32>
    %c2_77 = arith.constant 2 : index
    %c0_78 = arith.constant 0 : index
    %c0_79 = arith.constant 0 : index
    %183 = vector.load %arg5[%c2_77, %c0_78, %c0_79] : memref<3x128x1xf32, #tpu.memory_space<vmem>>, vector<1x128x1xf32>
    %184 = vector.shape_cast %183 : vector<1x128x1xf32> to vector<128x1xf32>
    %185 = vector.broadcast %184 : vector<128x1xf32> to vector<128x256xf32>
    %186 = arith.addf %182, %185 : vector<128x256xf32>
    %187 = vector.extract_strided_slice %186 {offsets = [0, 0], sizes = [32, 256], strides = [1, 1]} : vector<128x256xf32> to vector<32x256xf32>
    %188 = arith.negf %187 : vector<32x256xf32>
    %189 = math.exp %188 : vector<32x256xf32>
    %cst_80 = arith.constant 1.000000e+00 : f32
    %190 = vector.broadcast %cst_80 : f32 to vector<32x256xf32>
    %191 = arith.addf %190, %189 : vector<32x256xf32>
    %192 = arith.divf %190, %191 : vector<32x256xf32>
    %193 = vector.extract_strided_slice %186 {offsets = [32, 0], sizes = [32, 256], strides = [1, 1]} : vector<128x256xf32> to vector<32x256xf32>
    %194 = arith.negf %193 : vector<32x256xf32>
    %195 = math.exp %194 : vector<32x256xf32>
    %cst_81 = arith.constant 1.000000e+00 : f32
    %196 = vector.broadcast %cst_81 : f32 to vector<32x256xf32>
    %197 = arith.addf %196, %195 : vector<32x256xf32>
    %198 = arith.divf %196, %197 : vector<32x256xf32>
    %199 = vector.extract_strided_slice %186 {offsets = [64, 0], sizes = [32, 256], strides = [1, 1]} : vector<128x256xf32> to vector<32x256xf32>
    %200 = math.tanh %199 : vector<32x256xf32>
    %201 = vector.extract_strided_slice %186 {offsets = [96, 0], sizes = [32, 256], strides = [1, 1]} : vector<128x256xf32> to vector<32x256xf32>
    %202 = arith.negf %201 : vector<32x256xf32>
    %203 = math.exp %202 : vector<32x256xf32>
    %cst_82 = arith.constant 1.000000e+00 : f32
    %204 = vector.broadcast %cst_82 : f32 to vector<32x256xf32>
    %205 = arith.addf %204, %203 : vector<32x256xf32>
    %206 = arith.divf %204, %205 : vector<32x256xf32>
    %c0_83 = arith.constant 0 : index
    %c0_84 = arith.constant 0 : index
    %207 = vector.load %arg18[%c0_83, %c0_84] : memref<32x256xf32, #tpu.memory_space<vmem>>, vector<32x256xf32>
    %208 = arith.mulf %207, %198 : vector<32x256xf32>
    %209 = arith.mulf %192, %200 : vector<32x256xf32>
    %210 = arith.addf %208, %209 : vector<32x256xf32>
    %c0_85 = arith.constant 0 : index
    %c0_86 = arith.constant 0 : index
    %211 = vector.load %arg18[%c0_85, %c0_86] : memref<32x256xf32, #tpu.memory_space<vmem>>, vector<32x256xf32>
    tpu.vector_store %arg18[%c0_85, %c0_86], %210 {strides = array<i32>} : memref<32x256xf32, #tpu.memory_space<vmem>>, vector<32x256xf32>,
    %212 = math.tanh %210 : vector<32x256xf32>
    %213 = arith.mulf %206, %212 : vector<32x256xf32>
    %c0_87 = arith.constant 0 : index
    %c0_88 = arith.constant 0 : index
    %214 = vector.load %arg19[%c0_87, %c0_88] : memref<32x256xf32, #tpu.memory_space<vmem>>, vector<32x256xf32>
    %215 = arith.truncf %213 : vector<32x256xf32> to vector<32x256xbf16>
    %216 = arith.truncf %214 : vector<32x256xf32> to vector<32x256xbf16>
    %c0_89 = arith.constant 0 : index
    %c0_90 = arith.constant 0 : index
    %217 = vector.load %arg6[%c0_89, %c0_90] : memref<96x32xbf16, #tpu.memory_space<vmem>>, vector<96x32xbf16>
    %cst_91 = arith.constant dense<0.000000e+00> : vector<96x256xf32>
    %218 = tpu.matmul %217, %215, %cst_91 {dimension_numbers = #tpu.dot_dimension_numbers<[1], [0], [0], [1], [0, 0, 1, 1], [], []>} : vector<96x32xbf16>, vector<32x256xbf16>, vector<96x256xf32> -> vector<96x256xf32>
    %c0_92 = arith.constant 0 : index
    %c0_93 = arith.constant 0 : index
    %219 = vector.load %arg7[%c0_92, %c0_93] : memref<96x1xf32, #tpu.memory_space<vmem>>, vector<96x1xf32>
    %220 = vector.broadcast %219 : vector<96x1xf32> to vector<96x256xf32>
    %221 = arith.addf %218, %220 : vector<96x256xf32>
    %c0_94 = arith.constant 0 : index
    %c0_95 = arith.constant 0 : index
    %222 = vector.load %arg8[%c0_94, %c0_95] : memref<64x32xbf16, #tpu.memory_space<vmem>>, vector<64x32xbf16>
    %cst_96 = arith.constant dense<0.000000e+00> : vector<64x256xf32>
    %223 = tpu.matmul %222, %216, %cst_96 {dimension_numbers = #tpu.dot_dimension_numbers<[1], [0], [0], [1], [0, 0, 1, 1], [], []>} : vector<64x32xbf16>, vector<32x256xbf16>, vector<64x256xf32> -> vector<64x256xf32>
    %c0_97 = arith.constant 0 : index
    %c0_98 = arith.constant 0 : index
    %224 = vector.load %arg9[%c0_97, %c0_98] : memref<64x1xf32, #tpu.memory_space<vmem>>, vector<64x1xf32>
    %225 = vector.broadcast %224 : vector<64x1xf32> to vector<64x256xf32>
    %226 = arith.addf %223, %225 : vector<64x256xf32>
    %227 = vector.extract_strided_slice %221 {offsets = [0, 0], sizes = [32, 256], strides = [1, 1]} : vector<96x256xf32> to vector<32x256xf32>
    %228 = arith.truncf %227 : vector<32x256xf32> to vector<32x256xbf16>
    %229 = vector.extract_strided_slice %221 {offsets = [32, 0], sizes = [32, 256], strides = [1, 1]} : vector<96x256xf32> to vector<32x256xf32>
    %230 = arith.truncf %229 : vector<32x256xf32> to vector<32x256xbf16>
    %231 = vector.extract_strided_slice %221 {offsets = [64, 0], sizes = [32, 256], strides = [1, 1]} : vector<96x256xf32> to vector<32x256xf32>
    %232 = arith.truncf %231 : vector<32x256xf32> to vector<32x256xbf16>
    %233 = vector.extract_strided_slice %226 {offsets = [0, 0], sizes = [32, 256], strides = [1, 1]} : vector<64x256xf32> to vector<32x256xf32>
    %234 = arith.truncf %233 : vector<32x256xf32> to vector<32x256xbf16>
    %235 = vector.extract_strided_slice %226 {offsets = [32, 0], sizes = [32, 256], strides = [1, 1]} : vector<64x256xf32> to vector<32x256xf32>
    %236 = arith.truncf %235 : vector<32x256xf32> to vector<32x256xbf16>
    %237 = tpu.concatenate %230, %234 in 1 : vector<32x256xbf16>, vector<32x256xbf16> -> vector<32x512xbf16>
    %cst_99 = arith.constant dense<0.000000e+00> : vector<256x512xf32>
    %238 = tpu.matmul %228, %237, %cst_99 {dimension_numbers = #tpu.dot_dimension_numbers<[0], [0], [1], [1], [0, 1, 1, 1], [], []>} : vector<32x256xbf16>, vector<32x512xbf16>, vector<256x512xf32> -> vector<256x512xf32>
    %239 = vector.extract_strided_slice %238 {offsets = [0, 0], sizes = [256, 256], strides = [1, 1]} : vector<256x512xf32> to vector<256x256xf32>
    %cst_100 = arith.constant dense<0xFF800000> : vector<256xf32>
    %240 = vector.multi_reduction <maximumf>, %239, %cst_100 [1] : vector<256x256xf32> to vector<256xf32>
    %241 = vector.shape_cast %240 : vector<256xf32> to vector<256x1xf32>
    %242 = vector.broadcast %241 : vector<256x1xf32> to vector<256x256xf32>
    %243 = arith.subf %239, %242 : vector<256x256xf32>
    %244 = math.exp %243 : vector<256x256xf32>
    %cst_101 = arith.constant dense<0.000000e+00> : vector<256xf32>
    %245 = vector.multi_reduction <add>, %244, %cst_101 [1] : vector<256x256xf32> to vector<256xf32>
    %246 = vector.shape_cast %245 : vector<256xf32> to vector<256x1xf32>
    %247 = tpu.reciprocal %246 {approx = true} : vector<256x1xf32> -> vector<256x1xf32>
    %248 = vector.broadcast %247 : vector<256x1xf32> to vector<256x256xf32>
    %249 = arith.mulf %244, %248 : vector<256x256xf32>
    %250 = arith.truncf %249 : vector<256x256xf32> to vector<256x256xbf16>
    %251 = vector.extract_strided_slice %238 {offsets = [0, 256], sizes = [256, 256], strides = [1, 1]} : vector<256x512xf32> to vector<256x256xf32>
    %cst_102 = arith.constant dense<0xFF800000> : vector<256xf32>
    %252 = vector.multi_reduction <maximumf>, %251, %cst_102 [1] : vector<256x256xf32> to vector<256xf32>
    %253 = vector.shape_cast %252 : vector<256xf32> to vector<256x1xf32>
    %254 = vector.broadcast %253 : vector<256x1xf32> to vector<256x256xf32>
    %255 = arith.subf %251, %254 : vector<256x256xf32>
    %256 = math.exp %255 : vector<256x256xf32>
    %cst_103 = arith.constant dense<0.000000e+00> : vector<256xf32>
    %257 = vector.multi_reduction <add>, %256, %cst_103 [1] : vector<256x256xf32> to vector<256xf32>
    %258 = vector.shape_cast %257 : vector<256xf32> to vector<256x1xf32>
    %259 = tpu.reciprocal %258 {approx = true} : vector<256x1xf32> -> vector<256x1xf32>
    %260 = vector.broadcast %259 : vector<256x1xf32> to vector<256x256xf32>
    %261 = arith.mulf %256, %260 : vector<256x256xf32>
    %262 = arith.truncf %261 : vector<256x256xf32> to vector<256x256xbf16>
    %cst_104 = arith.constant dense<0.000000e+00> : vector<32x256xf32>
    %263 = tpu.matmul %232, %250, %cst_104 {dimension_numbers = #tpu.dot_dimension_numbers<[1], [0], [0], [1], [0, 0, 1, 1], [], []>} : vector<32x256xbf16>, vector<256x256xbf16>, vector<32x256xf32> -> vector<32x256xf32>
    %cst_105 = arith.constant dense<0.000000e+00> : vector<32x256xf32>
    %264 = tpu.matmul %236, %262, %cst_105 {dimension_numbers = #tpu.dot_dimension_numbers<[1], [0], [0], [1], [0, 0, 1, 1], [], []>} : vector<32x256xbf16>, vector<256x256xbf16>, vector<32x256xf32> -> vector<32x256xf32>
    %c0_106 = arith.constant 0 : index
    %c0_107 = arith.constant 0 : index
    %265 = vector.load %arg10[%c0_106, %c0_107] : memref<32x32xbf16, #tpu.memory_space<vmem>>, vector<32x32xbf16>
    %266 = arith.truncf %263 : vector<32x256xf32> to vector<32x256xbf16>
    %cst_108 = arith.constant dense<0.000000e+00> : vector<32x256xf32>
    %267 = tpu.matmul %265, %266, %cst_108 {dimension_numbers = #tpu.dot_dimension_numbers<[1], [0], [0], [1], [0, 0, 1, 1], [], []>} : vector<32x32xbf16>, vector<32x256xbf16>, vector<32x256xf32> -> vector<32x256xf32>
    %c0_109 = arith.constant 0 : index
    %c0_110 = arith.constant 0 : index
    %268 = vector.load %arg11[%c0_109, %c0_110] : memref<32x32xbf16, #tpu.memory_space<vmem>>, vector<32x32xbf16>
    %269 = arith.truncf %264 : vector<32x256xf32> to vector<32x256xbf16>
    %cst_111 = arith.constant dense<0.000000e+00> : vector<32x256xf32>
    %270 = tpu.matmul %268, %269, %cst_111 {dimension_numbers = #tpu.dot_dimension_numbers<[1], [0], [0], [1], [0, 0, 1, 1], [], []>} : vector<32x32xbf16>, vector<32x256xbf16>, vector<32x256xf32> -> vector<32x256xf32>
    %271 = arith.addf %267, %270 : vector<32x256xf32>
    %c0_112 = arith.constant 0 : index
    %c0_113 = arith.constant 0 : index
    %272 = vector.load %arg12[%c0_112, %c0_113] : memref<32x1xf32, #tpu.memory_space<vmem>>, vector<32x1xf32>
    %273 = vector.broadcast %272 : vector<32x1xf32> to vector<32x256xf32>
    %274 = arith.addf %271, %273 : vector<32x256xf32>
    %c0_114 = arith.constant 0 : index
    %c0_115 = arith.constant 0 : index
    %275 = vector.load %arg13[%c0_114, %c0_115] : memref<96x32xbf16, #tpu.memory_space<vmem>>, vector<96x32xbf16>
    %276 = arith.truncf %274 : vector<32x256xf32> to vector<32x256xbf16>
    %cst_116 = arith.constant dense<0.000000e+00> : vector<96x256xf32>
    %277 = tpu.matmul %275, %276, %cst_116 {dimension_numbers = #tpu.dot_dimension_numbers<[1], [0], [0], [1], [0, 0, 1, 1], [], []>} : vector<96x32xbf16>, vector<32x256xbf16>, vector<96x256xf32> -> vector<96x256xf32>
    %c0_117 = arith.constant 0 : index
    %c0_118 = arith.constant 0 : index
    %278 = vector.load %arg14[%c0_117, %c0_118] : memref<96x32xbf16, #tpu.memory_space<vmem>>, vector<96x32xbf16>
    %cst_119 = arith.constant dense<0.000000e+00> : vector<96x256xf32>
    %279 = tpu.matmul %278, %215, %cst_119 {dimension_numbers = #tpu.dot_dimension_numbers<[1], [0], [0], [1], [0, 0, 1, 1], [], []>} : vector<96x32xbf16>, vector<32x256xbf16>, vector<96x256xf32> -> vector<96x256xf32>
    %280 = arith.addf %277, %279 : vector<96x256xf32>
    %c0_120 = arith.constant 0 : index
    %c0_121 = arith.constant 0 : index
    %281 = vector.load %arg15[%c0_120, %c0_121] : memref<96x1xf32, #tpu.memory_space<vmem>>, vector<96x1xf32>
    %282 = vector.broadcast %281 : vector<96x1xf32> to vector<96x256xf32>
    %283 = arith.addf %280, %282 : vector<96x256xf32>
    %284 = vector.extract_strided_slice %283 {offsets = [0, 0], sizes = [32, 256], strides = [1, 1]} : vector<96x256xf32> to vector<32x256xf32>
    %285 = arith.negf %284 : vector<32x256xf32>
    %286 = math.exp %285 : vector<32x256xf32>
    %cst_122 = arith.constant 1.000000e+00 : f32
    %287 = vector.broadcast %cst_122 : f32 to vector<32x256xf32>
    %288 = arith.addf %287, %286 : vector<32x256xf32>
    %289 = arith.divf %287, %288 : vector<32x256xf32>
    %290 = vector.extract_strided_slice %283 {offsets = [32, 0], sizes = [32, 256], strides = [1, 1]} : vector<96x256xf32> to vector<32x256xf32>
    %291 = math.tanh %290 : vector<32x256xf32>
    %292 = vector.extract_strided_slice %283 {offsets = [64, 0], sizes = [32, 256], strides = [1, 1]} : vector<96x256xf32> to vector<32x256xf32>
    %293 = arith.negf %292 : vector<32x256xf32>
    %294 = math.exp %293 : vector<32x256xf32>
    %cst_123 = arith.constant 1.000000e+00 : f32
    %295 = vector.broadcast %cst_123 : f32 to vector<32x256xf32>
    %296 = arith.addf %295, %294 : vector<32x256xf32>
    %297 = arith.divf %295, %296 : vector<32x256xf32>
    %298 = arith.mulf %291, %297 : vector<32x256xf32>
    %cst_124 = arith.constant 1.000000e+00 : f32
    %299 = vector.broadcast %cst_124 : f32 to vector<32x256xf32>
    %300 = arith.subf %299, %297 : vector<32x256xf32>
    %301 = arith.mulf %300, %214 : vector<32x256xf32>
    %302 = arith.addf %298, %301 : vector<32x256xf32>
    %303 = arith.mulf %289, %302 : vector<32x256xf32>
    %c0_125 = arith.constant 0 : index
    %c0_126 = arith.constant 0 : index
    %304 = vector.load %arg19[%c0_125, %c0_126] : memref<32x256xf32, #tpu.memory_space<vmem>>, vector<32x256xf32>
    tpu.vector_store %arg19[%c0_125, %c0_126], %302 {strides = array<i32>} : memref<32x256xf32, #tpu.memory_space<vmem>>, vector<32x256xf32>,
    %305 = arith.truncf %303 : vector<32x256xf32> to vector<32x256xbf16>
    %c0_127 = arith.constant 0 : index
    %c128 = arith.constant 128 : index
    %306 = vector.load %arg17[%c0_127, %c128] : memref<32x512xbf16, #tpu.memory_space<vmem>>, vector<32x256xbf16>
    tpu.vector_store %arg17[%c0_127, %c128], %305 {strides = array<i32>} : memref<32x512xbf16, #tpu.memory_space<vmem>>, vector<32x256xbf16>,
    %307 = tpu.concatenate %303, %210, %302 in 0 : vector<32x256xf32>, vector<32x256xf32>, vector<32x256xf32> -> vector<96x256xf32>
    %c0_128 = arith.constant 0 : index
    %c0_129 = arith.constant 0 : index
    %c0_130 = arith.constant 0 : index
    %c0_131 = arith.constant 0 : index
    %308 = vector.load %arg16[%c0_128, %c0_129, %c0_130, %c0_131] : memref<1x1x96x256xf32, #tpu.memory_space<vmem>>, vector<1x1x96x256xf32>
    %309 = vector.shape_cast %308 : vector<1x1x96x256xf32> to vector<96x256xf32>
    %310 = vector.shape_cast %307 : vector<96x256xf32> to vector<1x1x96x256xf32>
    tpu.vector_store %arg16[%c0_128, %c0_129, %c0_130, %c0_131], %310 {strides = array<i32>} : memref<1x1x96x256xf32, #tpu.memory_space<vmem>>, vector<1x1x96x256xf32>,
    return
  }
  func.func @transform_0(%arg0: i32, %arg1: i32) -> (i32, i32, i32, i32) {
    %c0_i32 = arith.constant 0 : i32
    %c0_i32_0 = arith.constant 0 : i32
    %c0_i32_1 = arith.constant 0 : i32
    return %arg0, %arg1, %c0_i32, %c0_i32_0 : i32, i32, i32, i32
  }
  func.func @transform_1(%arg0: i32, %arg1: i32) -> (i32, i32) {
    %c0_i32 = arith.constant 0 : i32
    %c0_i32_0 = arith.constant 0 : i32
    %c0_i32_1 = arith.constant 0 : i32
    return %c0_i32, %c0_i32_0 : i32, i32
  }
  func.func @transform_2(%arg0: i32, %arg1: i32) -> (i32, i32, i32) {
    %c0_i32 = arith.constant 0 : i32
    %c0_i32_0 = arith.constant 0 : i32
    %c0_i32_1 = arith.constant 0 : i32
    %c0_i32_2 = arith.constant 0 : i32
    return %c0_i32, %c0_i32_0, %c0_i32_1 : i32, i32, i32
  }
  func.func @transform_3(%arg0: i32, %arg1: i32) -> (i32, i32, i32) {
    %c0_i32 = arith.constant 0 : i32
    %c0_i32_0 = arith.constant 0 : i32
    %c0_i32_1 = arith.constant 0 : i32
    %c0_i32_2 = arith.constant 0 : i32
    return %c0_i32, %c0_i32_0, %c0_i32_1 : i32, i32, i32
  }
  func.func @transform_4(%arg0: i32, %arg1: i32) -> (i32, i32) {
    %c0_i32 = arith.constant 0 : i32
    %c0_i32_0 = arith.constant 0 : i32
    %c0_i32_1 = arith.constant 0 : i32
    return %c0_i32, %c0_i32_0 : i32, i32
  }
  func.func @transform_5(%arg0: i32, %arg1: i32) -> (i32, i32) {
    %c0_i32 = arith.constant 0 : i32
    %c0_i32_0 = arith.constant 0 : i32
    %c0_i32_1 = arith.constant 0 : i32
    return %c0_i32, %c0_i32_0 : i32, i32
  }
  func.func @transform_6(%arg0: i32, %arg1: i32) -> (i32, i32) {
    %c0_i32 = arith.constant 0 : i32
    %c0_i32_0 = arith.constant 0 : i32
    %c0_i32_1 = arith.constant 0 : i32
    return %c0_i32, %c0_i32_0 : i32, i32
  }
  func.func @transform_7(%arg0: i32, %arg1: i32) -> (i32, i32) {
    %c0_i32 = arith.constant 0 : i32
    %c0_i32_0 = arith.constant 0 : i32
    %c0_i32_1 = arith.constant 0 : i32
    return %c0_i32, %c0_i32_0 : i32, i32
  }
  func.func @transform_8(%arg0: i32, %arg1: i32) -> (i32, i32) {
    %c0_i32 = arith.constant 0 : i32
    %c0_i32_0 = arith.constant 0 : i32
    %c0_i32_1 = arith.constant 0 : i32
    return %c0_i32, %c0_i32_0 : i32, i32
  }
  func.func @transform_9(%arg0: i32, %arg1: i32) -> (i32, i32) {
    %c0_i32 = arith.constant 0 : i32
    %c0_i32_0 = arith.constant 0 : i32
    %c0_i32_1 = arith.constant 0 : i32
    return %c0_i32, %c0_i32_0 : i32, i32
  }
  func.func @transform_10(%arg0: i32, %arg1: i32) -> (i32, i32) {
    %c0_i32 = arith.constant 0 : i32
    %c0_i32_0 = arith.constant 0 : i32
    %c0_i32_1 = arith.constant 0 : i32
    return %c0_i32, %c0_i32_0 : i32, i32
  }
  func.func @transform_11(%arg0: i32, %arg1: i32) -> (i32, i32) {
    %c0_i32 = arith.constant 0 : i32
    %c0_i32_0 = arith.constant 0 : i32
    %c0_i32_1 = arith.constant 0 : i32
    return %c0_i32, %c0_i32_0 : i32, i32
  }
  func.func @transform_12(%arg0: i32, %arg1: i32) -> (i32, i32) {
    %c0_i32 = arith.constant 0 : i32
    %c0_i32_0 = arith.constant 0 : i32
    %c0_i32_1 = arith.constant 0 : i32
    return %c0_i32, %c0_i32_0 : i32, i32
  }
  func.func @transform_13(%arg0: i32, %arg1: i32) -> (i32, i32) {
    %c0_i32 = arith.constant 0 : i32
    %c0_i32_0 = arith.constant 0 : i32
    %c0_i32_1 = arith.constant 0 : i32
    return %c0_i32, %c0_i32_0 : i32, i32
  }
  func.func @transform_14(%arg0: i32, %arg1: i32) -> (i32, i32, i32, i32) {
    %c0_i32 = arith.constant 0 : i32
    %c0_i32_0 = arith.constant 0 : i32
    %c0_i32_1 = arith.constant 0 : i32
    return %arg0, %arg1, %c0_i32, %c0_i32_0 : i32, i32, i32, i32
  }
}

</mosaic_0001>

<bundles_post_ra>
// kernel: sa_clstm_forward.1
= control target key start
LH: loop header
LB: loop body
LE: loop exit
PB: predicated region body
PF: predicated region fallthrough
CT: control target
= control target key end

     0   :  { %s8583_s29 = smov 0   ;;  %s8585_s30 = smov 0   ;;  %s11459_s0 = inlined_call_operand.vmem [shape: bf16[2,4,48,256], index: 0, kind: input, shape index: {}]   ;;  %s11460_s1 = inlined_call_operand.vmem [shape: bf16[128,48], index: 1, kind: input, shape index: {}]   ;;  %s11461_s2 = inlined_call_operand.vmem [shape: bf16[9,128,32], index: 2, kind: input, shape index: {}]   ;;  %s11462_s3 = inlined_call_operand.vmem [shape: f32[3,128,1], index: 3, kind: input, shape index: {}]   ;;  %s11463_s4 = inlined_call_operand.vmem [shape: bf16[96,32], index: 4, kind: input, shape index: {}]   ;;  %s11464_s5 = inlined_call_operand.vmem [shape: f32[96,1], index: 5, kind: input, shape index: {}]   ;;  %s11465_s6 = inlined_call_operand.vmem [shape: bf16[64,32], index: 6, kind: input, shape index: {}]   ;;  %s11466_s7 = inlined_call_operand.vmem [shape: f32[64,1], index: 7, kind: input, shape index: {}]   ;;  %s11467_s8 = inlined_call_operand.vmem [shape: bf16[32,32], index: 8, kind: input, shape index: {}]   ;;  %s11468_s9 = inlined_call_operand.vmem [shape: bf16[32,32], index: 9, kind: input, shape index: {}]   ;;  %s11469_s10 = inlined_call_operand.vmem [shape: f32[32,1], index: 10, kind: input, shape index: {}]   ;;  %s11470_s11 = inlined_call_operand.vmem [shape: bf16[96,32], index: 11, kind: input, shape index: {}]   ;;  %s11471_s12 = inlined_call_operand.vmem [shape: bf16[96,32], index: 12, kind: input, shape index: {}]   ;;  %s11472_s13 = inlined_call_operand.vmem [shape: f32[96,1], index: 13, kind: input, shape index: {}]   ;;  %s11473_s14 = inlined_call_operand.vmem [shape: f32[2,4,96,256], index: 14, kind: output, shape index: {}]  }
   0x1   :  { %11622 = sst [smem:[#allocation121_spill]] %s11470_s11  ;;  %s8587_s15 = smov 0  }
   0x2   :  { %s8589_s16 = smov 0   ;;  %s8591_s17 = smov 0  }
   0x3 LB: > { %11623 = sst [smem:[#allocation5_spill]] %s8487_s15  ;;  %s33_s18 = sadd.s32 1, %s8487_s15  ;;  %s8495_s17 = sphi %s8591_s17, %s24_s17   ;;  %s8491_s16 = sphi %s8589_s16, %s11940_s16   ;;  %s8487_s15 = sphi %s8587_s15, %s11939_s15   ;;  %s8483_s30 = sphi %s8585_s30, %s11938_s30   ;;  %s8479_s29 = sphi %s8583_s29, %s11937_s29  }
   0x4   : > { %11624 = sst [smem:[#allocation6_spill]] %s8491_s16  ;;  %s36_s19 = sadd.s32 1, %s8491_s16 }
   0x5   : > { %11625 = sst [smem:[#allocation7_spill]] %s8495_s17  ;;  %p34_p0 = scmp.ge.s32.totalorder %s33_s18, 4 }
   0x6   : > { %p6873_p1 = scmp.ge.s32.totalorder %s8495_s17, 1  ;;  %p432_p2 = scmp.lt.s32.totalorder %s8495_s17, 9 }
   0x7   : > { %s11942_s18 = smov (%p34_p0, %s33_s18), 0  ;;  %s11944_s19 = smov (!%p34_p0, %s36_s19), %s8491_s16 }
   0x8   : > { %11626 = sst [smem:[#allocation8_spill]] %s11942_s18  ;;  %p433_p3 = pnand %p6873_p1, %p432_p2 }
   0x9   : > { %p38_p4 = scmp.ge.s32.totalorder %s11944_s19, 2 }
   0xa   : > { %436 = sbr.rel (%p433_p3) target bundleno = 3625 (0xe29), region = 76 }
   0xb   : > { %s11946_s19 = smov (%p38_p4, %s11944_s19), 0 }
   0xc   : > { %11627 = sst [smem:[#allocation9_spill]] %s11946_s19 }
  0x11   : > { %p486_p5 = scmp.lt.s32.totalorder %s8483_s30, 1  ;;  %p488_p6 = scmp.lt.s32.totalorder %s8479_s29, 3 }
  0x12   : > { %p6876_p7 = scmp.ne.s32.totalorder %s8479_s29, 0 }
  0x13   : > { %s11948_s30 = smov (!%p486_p5, %s8483_s30), 1  ;;  %v8497_v0 = vmov (!%p6876_p7), 0   ;;  %v8498_v1 = vmov (!%p6876_p7), 0.0  }
  0x14   : > { %s489_s20 = scalar_select %p488_p6, %s8479_s29, 3 }
  0x15   : > { %s7654_s21 = smul.u32 48, %s11948_s30  ;;  %511 = vst [vmem:[#allocation2] sm:$0xff] (!%p6876_p7), %v8497_v0  ;;  %512 = vst [vmem:[#allocation2 + $0x8] sm:$0xff] (!%p6876_p7), %v8497_v0 }
  0x16   : > { %s7653_s22 = smul.u32 12, %s489_s20  ;;  %513 = vst [vmem:[#allocation2 + $0x10] sm:$0xff] (!%p6876_p7), %v8497_v0  ;;  %514 = vst [vmem:[#allocation2 + $0x18] sm:$0xff] (!%p6876_p7), %v8497_v0 }
  0x17   : > { %s7655_s23 = smul.u32 24, %s489_s20  ;;  %515 = vst [vmem:[#allocation2 + $0x20] sm:$0xff] (!%p6876_p7), %v8497_v0  ;;  %516 = vst [vmem:[#allocation2 + $0x28] sm:$0xff] (!%p6876_p7), %v8497_v0 }
  0x18   : > { %s492_s24 = sadd.s32 %s7654_s21, %s7653_s22  ;;  %s7656_s25 = smul.u32 96, %s11948_s30  ;;  %517 = vst [vmem:[#allocation2 + $0x30] sm:$0xff] (!%p6876_p7), %v8497_v0  ;;  %518 = vst [vmem:[#allocation2 + $0x38] sm:$0xff] (!%p6876_p7), %v8497_v0 }
  0x19   : > { %s6874_s26 = sshll.u32 %s492_s24, 2  ;;  %510 = sbr.rel (%p6876_p7) target bundleno = 33 (0x21), region = 80  ;;  %519 = vst [vmem:[#allocation3] sm:$0xff] (!%p6876_p7), %v8498_v1  ;;  %520 = vst [vmem:[#allocation3 + $0x8] sm:$0xff] (!%p6876_p7), %v8498_v1 }
  0x1a   : > { %s8620_s18 = scalar_lea.vmem %s11459_s0, %s6874_s26  ;;  %s501_s16 = sadd.s32 %s7656_s25, %s7655_s23  ;;  %521 = vst [vmem:[#allocation3 + $0x10] sm:$0xff] (!%p6876_p7), %v8498_v1  ;;  %522 = vst [vmem:[#allocation3 + $0x18] sm:$0xff] (!%p6876_p7), %v8498_v1 }
  0x1b   : > { %s6875_s19 = sshll.u32 %s501_s16, 3  ;;  %523 = vst [vmem:[#allocation3 + $0x20] sm:$0xff] (!%p6876_p7), %v8498_v1  ;;  %524 = vst [vmem:[#allocation3 + $0x28] sm:$0xff] (!%p6876_p7), %v8498_v1 }
  0x1c   : > { %s8625_s11 = scalar_lea.vmem %s11473_s14, %s6875_s19  ;;  %525 = vst [vmem:[#allocation3 + $0x30] sm:$0xff] (!%p6876_p7), %v8498_v1  ;;  %526 = vst [vmem:[#allocation3 + $0x38] sm:$0xff] (!%p6876_p7), %v8498_v1 }
  0x1d   : > { %527 = vst [vmem:[#allocation4] sm:$0xff] (!%p6876_p7), %v8498_v1  ;;  %528 = vst [vmem:[#allocation4 + $0x8] sm:$0xff] (!%p6876_p7), %v8498_v1 }
  0x1e   : > { %529 = vst [vmem:[#allocation4 + $0x10] sm:$0xff] (!%p6876_p7), %v8498_v1  ;;  %530 = vst [vmem:[#allocation4 + $0x18] sm:$0xff] (!%p6876_p7), %v8498_v1 }
  0x1f   : > { %531 = vst [vmem:[#allocation4 + $0x20] sm:$0xff] (!%p6876_p7), %v8498_v1  ;;  %532 = vst [vmem:[#allocation4 + $0x28] sm:$0xff] (!%p6876_p7), %v8498_v1 }
  0x20   : > { %533 = vst [vmem:[#allocation4 + $0x30] sm:$0xff] %v8498_v1  ;;  %534 = vst [vmem:[#allocation4 + $0x38] sm:$0xff] %v8498_v1 }
  0x21 PF: > { %v565_v2 = vlaneseq  ;;  %v11478_v3 = vmov 0   ;;  %s8500_s29 = smov 111   ;;  %v8646_v17 = vld [vmem:[#allocation2] sm:$0xff]  ;;  %vm608_vm7 = vcmask 908288   ;;  %s8501_s30 = smov 17   ;;  %v8651_v20 = vld [vmem:[#allocation2 + $0x10] sm:$0xff] }
  0x22   : > { %759 = vmatprep.mubr.bf16.mxu0 %v11478_v3  ;;  %779 = vmatprep.mubr.bf16.mxu1 %v11478_v3  ;;  %v8653_v21 = vld [vmem:[#allocation2 + $0x30] sm:$0xff]  ;;  %v8660_v26 = vld [vmem:[#allocation2 + $0x8] sm:$0xff]  ;;  %s8502_s15 = smov 16   ;;  %v8670_v30 = vld [vmem:[#allocation2 + $0x20] sm:$0xff]  ;;  %s8503_s16 = smov 113   ;;  %vm693_vm10 = vcmask 138240  }
  0x23   : > { %v566_v4 = vand.u32 127, %v565_v2  ;;  %v597_v5 = vshrl.u32 %v565_v2, 7  ;;  %7732 = vset.pattern.permute.xlu0 %v11478_v3  ;;  %7733 = vset.pattern.permute.xlu1 %v11478_v3  ;;  %v8665_v28 = vld [vmem:[#allocation2 + $0x28] sm:$0xff]  ;;  %v7734_v46 = vld [vmem:[%s11461_s2] sm:$0xff]   ;;  %vm702_vm12 = vcmask 261120   ;;  %s8504_s20 = smov 15  }
  0x24   : > { %v7737_v42 = vld [vmem:[%s8620_s18 + $0x4] ss:$8 sps:$4 sm:$0xff]   ;;  %v7735_v48 = vld [vmem:[%s8620_s18] ss:$8 sps:$4 sm:$0xff]   ;;  %v7740_v49 = vld [vmem:[%s8620_s18 + $0x14] ss:$8 sps:$4 sm:$0xff]  }
  0x25   : > { %v567_v6 = vadd.s32 128, %v566_v4  ;;  %v572_v7 = vand.u32 15, %v566_v4  ;;  %v598_v8 = vsub.s32 0, %v597_v5  ;;  %v602_v10 = vsub.s32 4, %v597_v5  ;;  %v7738_v51 = vld [vmem:[%s8620_s18 + $0x10] ss:$8 sps:$4 sm:$0xff]  }
  0x26   : > { %vm1317_vm13 = vcmask 924672   ;;  %s8505_s21 = smov 127   ;;  %v7744_v52 = vld [vmem:[%s8620_s18 + $0x24] ss:$8 sps:$4 sm:$0xff]   ;;  %v7742_v57 = vld [vmem:[%s8620_s18 + $0x20] ss:$8 sps:$4 sm:$0xff]  }
  0x27   : > { %v579_v9 = vand.u32 15, %v567_v6  ;;  %vm592_vm0 = vcmp.ge.s32.totalorder %v572_v7, 1  ;;  %vm1301_vm3 = vcmp.lt.s32.totalorder %v572_v7, 15  ;;  %v7741_v55 = vld [vmem:[%s11461_s2 + $0x8] sm:$0xff]   ;;  %v7745_v62 = vld [vmem:[%s11460_s1] sm:$0xff]   ;;  %s8507_s24 = smov 112  }
  0x28   : > { %v7746_v7 = vld [vmem:[%s11460_s1 + $0x8] sm:$0xff]  }
  0x29   : > { %vm593_vm1 = vcmp.ge.s32.totalorder %v579_v9, 1  ;;  %vm1302_vm4 = vcmp.lt.s32.totalorder %v579_v9, 15  ;;  %v7748_v9 = vld [vmem:[%s11460_s1 + $0x18] sm:$0xff]  }
  0x2a   : > { %vm594_vm2 = vmpackc.low %vm593_vm1, %vm592_vm0  ;;  %vm1123_vm0 = vcmask 130048   ;;  %vm910_vm1 = vcmask 392192  }
  0x2b   : > { %v595_v11 = vsel %vm594_vm2, 65537, %v11478_v3  ;;  %vm1303_vm5 = vmpackc.low %vm1302_vm4, %vm1301_vm3  ;;  %vm1585_vm3 = vcmask 1039360  }
  0x2c   : > { %v8633_v12 = vrot.slane %v595_v11, %v598_v8  ;;  %v8637_v13 = vrot.slane %v595_v11, %v602_v10  ;;  %v1304_v14 = vsel %vm1303_vm5, 65537, %v11478_v3  ;;  %v7750_v11 = vld [vmem:[%s11460_s1 + $0x28] sm:$0xff]  }
  0x2d   : > { %v8642_v15 = vrot.slane %v1304_v14, %v602_v10  ;;  %v8644_v16 = vrot.slane %v1304_v14, %v598_v8  ;;  %v7747_v8 = vld [vmem:[%s11460_s1 + $0x10] sm:$0xff]   ;;  %v7749_v10 = vld [vmem:[%s11460_s1 + $0x20] sm:$0xff]  }
  0x2e   : > { %604 = vrot.lane.b32.xlu0 %v8633_v12, %s8500_s29  ;;  %v7751_v14 = vld [vmem:[%s11460_s1 + $0x30] sm:$0xff]  }
  0x32   : > { %606 = vrot.lane.b32.xlu0 %v8637_v13, %s8500_s29 }
  0xa0   : > { %v605_v18 = vpop.permute.xlu0 %604 }
  0xa1   : > { %vm610_vm6 = vcmp.ne.s16.totalorder %v605_v18, 0 }
  0xa2   : > { %v613_v19 = vsel %vm610_vm6, %v8646_v17, 0  ;;  %v616_v31 = vsel %vm610_vm6, %v8670_v30, 0  ;;  %vm1403_vm6 = vcmask 121856  }
  0xa3   : > { %681 = vrot.lane.b32.xlu0 %v613_v19, %s8501_s30  ;;  %v7753_v19 = vld [vmem:[%s11461_s2 + $0x40] sm:$0xff]  }
  0xa4   : > { %v607_v22 = vpop.permute.xlu0 %606 }
  0xa5   : > { %vm612_vm8 = vcmp.ne.s16.totalorder %v607_v22, 0  ;;  %v609_v23 = vsel %vm608_vm7, %v605_v18, %v607_v22  ;;  %v7752_v18 = vld [vmem:[%s11460_s1 + $0x38] sm:$0xff]   ;;  %v7754_v22 = vld [vmem:[%s11461_s2 + $0x48] sm:$0xff]  }
  0xa6   : > { %v615_v24 = vsel %vm612_vm8, %v8651_v20, 0  ;;  %v618_v25 = vsel %vm612_vm8, %v8653_v21, 0  ;;  %vm611_vm9 = vcmp.ne.s16.totalorder %v609_v23, 0  ;;  %v7755_v23 = vld [vmem:[%s11461_s2 + $0x50] sm:$0xff]   ;;  %vm1671_vm8 = vcmask 7168  }
  0xa7   : > { %685 = vrot.lane.b32.xlu1 %v615_v24, %s8501_s30  ;;  %691 = vrot.lane.b32.xlu0 %v618_v25, %s8501_s30  ;;  %v614_v27 = vsel %vm611_vm9, %v8660_v26, 0  ;;  %v617_v29 = vsel %vm611_vm9, %v8665_v28, 0  ;;  %v7756_v24 = vld [vmem:[%s11461_s2 + $0x58] sm:$0xff]   ;;  %v7757_v25 = vld [vmem:[%s11461_s2 + $0x60] sm:$0xff]  }
  0xab   : > { %683 = vrot.lane.b32.xlu1 %v614_v27, %s8501_s30  ;;  %1113 = vrot.lane.b32.xlu0 %v8660_v26, %s8502_s15 }
  0xaf   : > { %689 = vrot.lane.b32.xlu1 %v617_v29, %s8501_s30  ;;  %1111 = vrot.lane.b32.xlu0 %v8646_v17, %s8502_s15 }
  0xb3   : > { %687 = vrot.lane.b32.xlu1 %v616_v31, %s8501_s30  ;;  %1315 = vrot.lane.b32.xlu0 %v8642_v15, %s8503_s16  ;;  %v7758_v31 = vld [vmem:[%s11461_s2 + $0x68] sm:$0xff]  }
  0xb7   : > { %1115 = vrot.lane.b32.xlu1 %v8651_v20, %s8502_s15  ;;  %1121 = vrot.lane.b32.xlu0 %v8653_v21, %s8502_s15 }
  0xbb   : > { %1313 = vrot.lane.b32.xlu1 %v8644_v16, %s8503_s16 }
  0xbf   : > { %1119 = vrot.lane.b32.xlu1 %v8665_v28, %s8502_s15 }
  0xc3   : > { %1117 = vrot.lane.b32.xlu1 %v8670_v30, %s8502_s15  ;;  %s8506_s15 = smov 1  }
 0x115   : > { %v682_v32 = vpop.permute.xlu0 %681 }
 0x119   : > { %v686_v33 = vpop.permute.xlu1 %685  ;;  %v692_v34 = vpop.permute.xlu0 %691 }
 0x11d   : > { %v684_v35 = vpop.permute.xlu1 %683  ;;  %v8683_v36 = vpop.permute.xlu0 %1113 }
 0x11e   : > { %v695_v37 = vsel %vm693_vm10, %v684_v35, %v686_v33  ;;  %v694_v38 = vsel %vm693_vm10, %v682_v32, %v684_v35  ;;  %v7759_v35 = vld [vmem:[%s11461_s2 + $0x70] sm:$0xff]  }
 0x11f   : > { %727 = vmatprep.subr.bf16.mxu0 %v695_v37  ;;  %7329 = vmatprep.subr.bf16.mxu1 %v695_v37 }
 0x120   : > { %728 = vmatpush1.bf16.msra.mxu0 %v694_v38  ;;  %7331 = vmatpush1.bf16.msra.mxu1 %v694_v38 }
 0x121   : > { %v690_v39 = vpop.permute.xlu1 %689  ;;  %v1112_v40 = vpop.permute.xlu0 %1111 }
 0x122   : > { %v697_v41 = vsel %vm693_vm10, %v690_v39, %v692_v34  ;;  %v1124_v2 = vsel %vm1123_vm0, %v1112_v40, %v8683_v36 }
 0x123   : > { %729 = vmatprep.subr.bf16.mxu0 %v697_v41  ;;  %7330 = vmatprep.subr.bf16.mxu1 %v697_v41 }
 0x125   : > { %v688_v43 = vpop.permute.xlu1 %687  ;;  %v1316_v44 = vpop.permute.xlu0 %1315 }
 0x126   : > { %v696_v45 = vsel %vm693_vm10, %v688_v43, %v690_v39  ;;  %vm1321_vm11 = vcmp.ne.s16.totalorder %v1316_v44, 0 }
 0x127   : > { %730 = vmatpush1.bf16.msra.mxu0 %v696_v45  ;;  %7332 = vmatpush1.bf16.msra.mxu1 %v696_v45  ;;  %v1324_v47 = vsel %vm1321_vm11, %v8651_v20, 0  ;;  %v1327_v4 = vsel %vm1321_vm11, %v8653_v21, 0 }
 0x128   : > { %1395 = vrot.lane.b32.xlu1 %v1324_v47, %s8504_s20  ;;  %935 = vmatprep.subr.bf16.mxu0 %v7737_v42 }
 0x129   : > { %v1116_v50 = vpop.permute.xlu1 %1115  ;;  %v1122_v63 = vpop.permute.xlu0 %1121 }
 0x12a   : > { %6885 = vmatmul.mubr.msk.bf16.vlgmr.msra.gmra.mrb[0].mxu0 %vm702_vm12, %v7734_v46  ;;  %v1125_v59 = vsel %vm1123_vm0, %v8683_v36, %v1116_v50  ;;  %v7760_v46 = vld [vmem:[%s11461_s2 + $0x78] sm:$0xff]   ;;  %v7761_v50 = vld [vmem:[%s11461_s2 + $0x80] sm:$0xff]  }
 0x12b   : > { %936 = vmatpush1.bf16.msra.mxu0 %v7735_v48  ;;  %769 = vmatprep.mubr.bf16.mxu0 %v11478_v3 }
 0x12c   : > { %1581 = vrot.lane.b32.xlu1 %v8633_v12, %s8505_s21  ;;  %937 = vmatprep.subr.bf16.mxu0 %v7740_v49 }
 0x12d   : > { %v1314_v53 = vpop.permute.xlu1 %1313 }
 0x12e   : > { %vm1319_vm14 = vcmp.ne.s16.totalorder %v1314_v53, 0  ;;  %v1318_v54 = vsel %vm1317_vm13, %v1314_v53, %v1316_v44  ;;  %v7765_v53 = vld [vmem:[%s11461_s2 + $0xa0] sm:$0xff]  }
 0x12f   : > { %938 = vmatpush1.bf16.msra.mxu0 %v7738_v51  ;;  %v1322_v56 = vsel %vm1319_vm14, %v8646_v17, 0  ;;  %vm1320_vm15 = vcmp.ne.s16.totalorder %v1318_v54, 0  ;;  %v1325_v60 = vsel %vm1319_vm14, %v8670_v30, 0  ;;  %v7763_v51 = vld [vmem:[%s11461_s2 + $0x90] sm:$0xff]   ;;  %v7766_v54 = vld [vmem:[%s11461_s2 + $0xa8] sm:$0xff]  }
 0x130   : > { %1391 = vrot.lane.b32.xlu0 %v1322_v56, %s8504_s20  ;;  %v1326_v58 = vsel %vm1320_vm15, %v8665_v28, 0  ;;  %939 = vmatprep.subr.bf16.mxu0 %v7744_v52  ;;  %v1323_v0 = vsel %vm1320_vm15, %v8660_v26, 0  ;;  %v7764_v52 = vld [vmem:[%s11461_s2 + $0x98] sm:$0xff]  }
 0x131   : > { %1399 = vrot.lane.b32.xlu1 %v1326_v58, %s8504_s20  ;;  %v1120_v61 = vpop.permute.xlu1 %1119  ;;  %v7768_v56 = vld [vmem:[%s11461_s2 + $0xb8] sm:$0xff]  }
 0x132   : > { %6886 = vmatmul.mubr.msk.bf16.gmra.mrb[4].mxu0 %vm702_vm12, %v7741_v55  ;;  %v1127_v1 = vsel %vm1123_vm0, %v1120_v61, %v1122_v63  ;;  %v7767_v55 = vld [vmem:[%s11461_s2 + $0xb0] sm:$0xff]  }
 0x133   : > { %940 = vmatpush1.bf16.msra.mxu0 %v7742_v57  ;;  %967 = vmatprep.mubr.bf16.mxu0 %v11478_v3 }
 0x134   : > { %1583 = vrot.lane.b32.xlu0 %v8637_v13, %s8505_s21  ;;  %1156 = vmatprep.subr.bf16.mxu0 %v1125_v59 }
 0x135   : > { %1397 = vrot.lane.b32.xlu1 %v1325_v60, %s8504_s20  ;;  %v1118_v5 = vpop.permute.xlu1 %1117 }
 0x136   : > { %v1126_v6 = vsel %vm1123_vm0, %v1118_v5, %v1120_v61  ;;  %v7769_v5 = vld [vmem:[%s11461_s2 + $0xc0] sm:$0xff]  }
 0x138   : > { %1393 = vrot.lane.b32.xlu0 %v1323_v0, %s8504_s20 }
 0x13a   : > { %6907 = vmatmul.mubr.msk.bf16.vlgmr.msra.gmra.mrb[0].mxu0 %vm910_vm1, %v7745_v62 }
 0x13b   : > { %1157 = vmatpush1.bf16.msra.mxu0 %v1124_v2  ;;  %977 = vmatprep.mubr.bf16.mxu0 %v11478_v3 }
 0x13c   : > { %1401 = vrot.lane.b32.xlu0 %v1327_v4, %s8504_s20  ;;  %1158 = vmatprep.subr.bf16.mxu0 %v1127_v1 }
 0x13f   : > { %1159 = vmatpush1.bf16.msra.mxu0 %v1126_v6 }
 0x142   : > { %6908 = vmatmul.mubr.msk.bf16.gmra.mrb[4].mxu0 %vm910_vm1, %v7746_v7  ;;  %v8888_v7 = vld [vmem:[#allocation2 + $0x18] sm:$0xff] }
 0x143   : > { %987 = vmatprep.mubr.bf16.mxu0 %v11478_v3 }
 0x14a   : > { %6909 = vmatmul.mubr.msk.bf16.gmra.mrb[8].mxu0 %vm910_vm1, %v7747_v8 }
 0x14b   : > { %997 = vmatprep.mubr.bf16.mxu0 %v11478_v3 }
 0x152   : > { %6910 = vmatmul.mubr.msk.bf16.gmra.mrb[12].mxu0 %vm910_vm1, %v7748_v9 }
 0x153   : > { %1007 = vmatprep.mubr.bf16.mxu0 %v11478_v3 }
 0x15a   : > { %6911 = vmatmul.mubr.msk.bf16.gmra.mrb[16].mxu0 %vm910_vm1, %v7749_v10 }
 0x15b   : > { %1017 = vmatprep.mubr.bf16.mxu0 %v11478_v3 }
 0x162   : > { %6912 = vmatmul.mubr.msk.bf16.gmra.mrb[20].mxu0 %vm910_vm1, %v7750_v11  ;;  %v7770_v11 = vld [vmem:[%s11461_s2 + $0xc8] sm:$0xff]  }
 0x163   : > { %1027 = vmatprep.mubr.bf16.mxu0 %v11478_v3 }
 0x16a   : > { %6913 = vmatmul.mubr.msk.bf16.gmra.mrb[24].mxu0 %vm910_vm1, %v7751_v14 }
 0x16b   : > { %1037 = vmatprep.mubr.bf16.mxu0 %v11478_v3 }
 0x172   : > { %6914 = vmatmul.mubr.msk.bf16.gmra.mrb[28].mxu0 %vm910_vm1, %v7752_v18  ;;  %v8910_v18 = vld [vmem:[#allocation2 + $0x38] sm:$0xff] }
 0x173   : > { %1188 = vmatprep.mubr.bf16.mxu0 %v11478_v3 }
 0x17a   : > { %6939 = vmatmul.mubr.msk.bf16.vlgmr.msra.gmra.mrb[0].mxu0 %vm702_vm12, %v7753_v19 }
 0x17b   : > { %1198 = vmatprep.mubr.bf16.mxu0 %v11478_v3 }
 0x182   : > { %6940 = vmatmul.mubr.msk.bf16.gmra.mrb[4].mxu0 %vm702_vm12, %v7754_v22 }
 0x183   : > { %1208 = vmatprep.mubr.bf16.mxu0 %v11478_v3 }
 0x18a   : > { %6941 = vmatmul.mubr.msk.bf16.gmra.mrb[8].mxu0 %vm702_vm12, %v7755_v23  ;;  %v7772_v23 = vld [vmem:[%s11461_s2 + $0xd8] sm:$0xff]  }
 0x18b   : > { %1218 = vmatprep.mubr.bf16.mxu0 %v11478_v3 }
 0x192   : > { %6942 = vmatmul.mubr.msk.bf16.gmra.mrb[12].mxu0 %vm702_vm12, %v7756_v24  ;;  %v7773_v24 = vld [vmem:[%s11461_s2 + $0xe0] sm:$0xff]  }
 0x193   : > { %1228 = vmatprep.mubr.bf16.mxu0 %v11478_v3 }
 0x19a   : > { %v1396_v27 = vpop.permute.xlu1 %1395  ;;  %6943 = vmatmul.mubr.msk.bf16.gmra.mrb[16].mxu0 %vm702_vm12, %v7757_v25  ;;  %v7774_v25 = vld [vmem:[%s11461_s2 + $0xe8] sm:$0xff]  }
 0x19b   : > { %1238 = vmatprep.mubr.bf16.mxu0 %v11478_v3 }
 0x19e   : > { %v1582_v29 = vpop.permute.xlu1 %1581 }
 0x19f   : > { %vm1587_vm2 = vcmp.ne.s16.totalorder %v1582_v29, 0 }
 0x1a0   : > { %v1590_v32 = vsel %vm1587_vm2, %v8646_v17, 0  ;;  %v1593_v49 = vsel %vm1587_vm2, %v8670_v30, 0  ;;  %v7762_v30 = vld [vmem:[%s11461_s2 + $0x88] sm:$0xff]   ;;  %vm2678_vm2 = vcmask 916480  }
 0x1a1   : > { %1659 = vrot.lane.b32.xlu0 %v1590_v32, %s8506_s15  ;;  %v7778_v32 = vld [vmem:[%s11461_s2 + $0x108] sm:$0xff]  }
 0x1a2   : > { %v1392_v33 = vpop.permute.xlu0 %1391  ;;  %6944 = vmatmul.mubr.msk.bf16.gmra.mrb[20].mxu0 %vm702_vm12, %v7758_v31  ;;  %v7777_v31 = vld [vmem:[%s11461_s2 + $0x100] sm:$0xff]  }
 0x1a3   : > { %1248 = vmatprep.mubr.bf16.mxu0 %v11478_v3  ;;  %v1400_v36 = vpop.permute.xlu1 %1399 }
 0x1a6   : > { %v1584_v34 = vpop.permute.xlu0 %1583 }
 0x1a7   : > { %vm1589_vm4 = vcmp.ne.s16.totalorder %v1584_v34, 0  ;;  %v1586_v37 = vsel %vm1585_vm3, %v1582_v29, %v1584_v34  ;;  %v1398_v43 = vpop.permute.xlu1 %1397  ;;  %v7776_v29 = vld [vmem:[%s11461_s2 + $0xf8] sm:$0xff]  }
 0x1a8   : > { %v1592_v17 = vsel %vm1589_vm4, %v8651_v20, 0  ;;  %vm1588_vm5 = vcmp.ne.s16.totalorder %v1586_v37, 0  ;;  %v1595_v44 = vsel %vm1589_vm4, %v8653_v21, 0  ;;  %v1406_v48 = vsel %vm1403_vm6, %v1398_v43, %v1400_v36  ;;  %v7780_v34 = vld [vmem:[%s11461_s2 + $0x118] sm:$0xff]   ;;  %v7783_v37 = vld [vmem:[%s11461_s2 + $0x130] sm:$0xff]  }
 0x1a9   : > { %1663 = vrot.lane.b32.xlu1 %v1592_v17, %s8506_s15  ;;  %v1591_v38 = vsel %vm1588_vm5, %v8660_v26, 0  ;;  %v1594_v42 = vsel %vm1588_vm5, %v8665_v28, 0 }
 0x1aa   : > { %1661 = vrot.lane.b32.xlu0 %v1591_v38, %s8506_s15  ;;  %v1394_v39 = vpop.permute.xlu0 %1393  ;;  %6945 = vmatmul.mubr.msk.bf16.gmra.mrb[24].mxu0 %vm702_vm12, %v7759_v35  ;;  %v7781_v35 = vld [vmem:[%s11461_s2 + $0x120] sm:$0xff]  }
 0x1ab   : > { %v1405_v40 = vsel %vm1403_vm6, %v1394_v39, %v1396_v27  ;;  %v1404_v41 = vsel %vm1403_vm6, %v1392_v33, %v1394_v39  ;;  %1258 = vmatprep.mubr.bf16.mxu0 %v11478_v3  ;;  %v7775_v27 = vld [vmem:[%s11461_s2 + $0xf0] sm:$0xff]   ;;  %v7784_v39 = vld [vmem:[%s11461_s2 + $0x138] sm:$0xff]  }
 0x1ac   : > { %1436 = vmatprep.subr.bf16.mxu0 %v1405_v40  ;;  %v7779_v33 = vld [vmem:[%s11461_s2 + $0x110] sm:$0xff]  }
 0x1ad   : > { %1667 = vrot.lane.b32.xlu1 %v1594_v42, %s8506_s15  ;;  %1437 = vmatpush1.bf16.msra.mxu0 %v1404_v41 }
 0x1ae   : > { %1669 = vrot.lane.b32.xlu0 %v1595_v44, %s8506_s15  ;;  %v1402_v45 = vpop.permute.xlu0 %1401 }
 0x1af   : > { %v1407_v47 = vsel %vm1403_vm6, %v1400_v36, %v1402_v45  ;;  %v7782_v36 = vld [vmem:[%s11461_s2 + $0x128] sm:$0xff]  }
 0x1b0   : > { %1438 = vmatprep.subr.bf16.mxu0 %v1407_v47 }
 0x1b1   : > { %1665 = vrot.lane.b32.xlu1 %v1593_v49, %s8506_s15  ;;  %1439 = vmatpush1.bf16.msra.mxu0 %v1406_v48 }
 0x1b2   : > { %2075 = vrot.lane.b32.xlu0 %v8644_v16, %s8506_s15  ;;  %6946 = vmatmul.mubr.msk.bf16.gmra.mrb[28].mxu0 %vm702_vm12, %v7760_v46 }
 0x1b3   : > { %1468 = vmatprep.mubr.bf16.mxu0 %v11478_v3 }
 0x1b5   : > { %2077 = vrot.lane.b32.xlu1 %v8642_v15, %s8506_s15 }
 0x1ba   : > { %6971 = vmatmul.mubr.msk.bf16.vlgmr.msra.gmra.mrb[0].mxu0 %vm702_vm12, %v7761_v50 }
 0x1bb   : > { %1478 = vmatprep.mubr.bf16.mxu0 %v11478_v3 }
 0x1c2   : > { %6972 = vmatmul.mubr.msk.bf16.gmra.mrb[4].mxu0 %vm702_vm12, %v7762_v30 }
 0x1c3   : > { %1488 = vmatprep.mubr.bf16.mxu0 %v11478_v3 }
 0x1ca   : > { %6973 = vmatmul.mubr.msk.bf16.gmra.mrb[8].mxu0 %vm702_vm12, %v7763_v51 }
 0x1cb   : > { %1498 = vmatprep.mubr.bf16.mxu0 %v11478_v3 }
 0x1d2   : > { %6974 = vmatmul.mubr.msk.bf16.gmra.mrb[12].mxu0 %vm702_vm12, %v7764_v52 }
 0x1d3   : > { %1508 = vmatprep.mubr.bf16.mxu0 %v11478_v3 }
 0x1da   : > { %6975 = vmatmul.mubr.msk.bf16.gmra.mrb[16].mxu0 %vm702_vm12, %v7765_v53 }
 0x1db   : > { %1518 = vmatprep.mubr.bf16.mxu0 %v11478_v3 }
 0x1e2   : > { %6976 = vmatmul.mubr.msk.bf16.gmra.mrb[20].mxu0 %vm702_vm12, %v7766_v54 }
 0x1e3   : > { %1528 = vmatprep.mubr.bf16.mxu0 %v11478_v3 }
 0x1ea   : > { %6977 = vmatmul.mubr.msk.bf16.gmra.mrb[24].mxu0 %vm702_vm12, %v7767_v55  ;;  %v7785_v55 = vld [vmem:[%s11461_s2 + $0x140] sm:$0xff]  }
 0x1eb   : > { %1538 = vmatprep.mubr.bf16.mxu0 %v11478_v3 }
 0x1f2   : > { %6978 = vmatmul.mubr.msk.bf16.gmra.mrb[28].mxu0 %vm702_vm12, %v7768_v56 }
 0x1f3   : > { %1736 = vmatprep.mubr.bf16.mxu0 %v11478_v3 }
 0x213   : > { %v1660_v57 = vpop.permute.xlu0 %1659 }
 0x21b   : > { %v1664_v58 = vpop.permute.xlu1 %1663 }
 0x21c   : > { %v1662_v59 = vpop.permute.xlu0 %1661 }
 0x21d   : > { %v1673_v60 = vsel %vm1671_vm8, %v1662_v59, %v1664_v58  ;;  %v1672_v61 = vsel %vm1671_vm8, %v1660_v57, %v1662_v59  ;;  %v7786_v57 = vld [vmem:[%s11461_s2 + $0x148] sm:$0xff]   ;;  %v7788_v58 = vld [vmem:[%s11461_s2 + $0x158] sm:$0xff]  }
 0x21e   : > { %1704 = vmatprep.subr.bf16.mxu0 %v1673_v60  ;;  %v7790_v59 = vld [vmem:[%s11461_s2 + $0x168] sm:$0xff]   ;;  %v7791_v60 = vld [vmem:[%s11461_s2 + $0x170] sm:$0xff]  }
 0x21f   : > { %v1668_v62 = vpop.permute.xlu1 %1667  ;;  %1705 = vmatpush1.bf16.msra.mxu0 %v1672_v61  ;;  %v7792_v61 = vld [vmem:[%s11461_s2 + $0x178] sm:$0xff]  }
 0x220   : > { %v1670_v63 = vpop.permute.xlu0 %1669 }
 0x221   : > { %v1675_v0 = vsel %vm1671_vm8, %v1668_v62, %v1670_v63 }
 0x222   : > { %1706 = vmatprep.subr.bf16.mxu0 %v1675_v0 }
 0x223   : > { %v1666_v1 = vpop.permute.xlu1 %1665 }
 0x224   : > { %v1674_v2 = vsel %vm1671_vm8, %v1666_v1, %v1668_v62  ;;  %v2076_v4 = vpop.permute.xlu0 %2075 }
 0x225   : > { %vm2080_vm9 = vcmp.ne.s16.totalorder %v2076_v4, 0  ;;  %1707 = vmatpush1.bf16.msra.mxu0 %v1674_v2 }
 0x226   : > { %v2083_v6 = vsel %vm2080_vm9, %v8660_v26, 0  ;;  %1930 = vmatprep.subr.bf16.mxu0 %v8651_v20  ;;  %v2086_v22 = vsel %vm2080_vm9, %v8665_v28, 0 }
 0x227   : > { %v2078_v8 = vpop.permute.xlu1 %2077  ;;  %2152 = vrot.lane.b32.xlu0 %v2083_v6, %s8505_s21 }
 0x228   : > { %v2079_v9 = vsel %vm1671_vm8, %v2076_v4, %v2078_v8  ;;  %vm2082_vm11 = vcmp.ne.s16.totalorder %v2078_v8, 0  ;;  %7003 = vmatmul.mubr.msk.bf16.vlgmr.msra.gmra.mrb[0].mxu0 %vm702_vm12, %v7769_v5 }
 0x229   : > { %v2085_v10 = vsel %vm2082_vm11, %v8888_v7, 0  ;;  %1746 = vmatprep.mubr.bf16.mxu0 %v11478_v3  ;;  %1931 = vmatpush1.bf16.msra.mxu0 %v8660_v26  ;;  %vm2081_vm14 = vcmp.ne.s16.totalorder %v2079_v9, 0 }
 0x22a   : > { %2156 = vrot.lane.b32.xlu1 %v2085_v10, %s8505_s21  ;;  %1932 = vmatprep.subr.bf16.mxu0 %v8653_v21  ;;  %v2084_v14 = vsel %vm2081_vm14, %v8651_v20, 0  ;;  %v2087_v19 = vsel %vm2081_vm14, %v8653_v21, 0 }
 0x22b   : > { %2343 = vrot.lane.b32.xlu0 %v8637_v13, %s8504_s20  ;;  %v2088_v13 = vsel %vm2082_vm11, %v8910_v18, 0 }
 0x22d   : > { %1933 = vmatpush1.bf16.msra.mxu0 %v8665_v28 }
 0x22e   : > { %2341 = vrot.lane.b32.xlu1 %v8633_v12, %s8504_s20  ;;  %v7771_v12 = vld [vmem:[%s11461_s2 + $0xd0] sm:$0xff]  }
 0x22f   : > { %2154 = vrot.lane.b32.xlu0 %v2084_v14, %s8505_s21 }
 0x230   : > { %7004 = vmatmul.mubr.msk.bf16.gmra.mrb[4].mxu0 %vm702_vm12, %v7770_v11  ;;  %v7793_v11 = vld [vmem:[%s11461_s2 + $0x180] sm:$0xff]  }
 0x231   : > { %1756 = vmatprep.mubr.bf16.mxu0 %v11478_v3 }
 0x232   : > { %2160 = vrot.lane.b32.xlu1 %v2087_v19, %s8505_s21 }
 0x233   : > { %2162 = vrot.lane.b32.xlu0 %v2088_v13, %s8505_s21 }
 0x236   : > { %2158 = vrot.lane.b32.xlu1 %v2086_v22, %s8505_s21 }
 0x238   : > { %7005 = vmatmul.mubr.msk.bf16.gmra.mrb[8].mxu0 %vm702_vm12, %v7771_v12 }
 0x239   : > { %1766 = vmatprep.mubr.bf16.mxu0 %v11478_v3 }
 0x240   : > { %7006 = vmatmul.mubr.msk.bf16.gmra.mrb[12].mxu0 %vm702_vm12, %v7772_v23 }
 0x241   : > { %1776 = vmatprep.mubr.bf16.mxu0 %v11478_v3 }
 0x248   : > { %7007 = vmatmul.mubr.msk.bf16.gmra.mrb[16].mxu0 %vm702_vm12, %v7773_v24 }
 0x249   : > { %1786 = vmatprep.mubr.bf16.mxu0 %v11478_v3 }
 0x250   : > { %7008 = vmatmul.mubr.msk.bf16.gmra.mrb[20].mxu0 %vm702_vm12, %v7774_v25  ;;  %v7794_v25 = vld [vmem:[%s11461_s2 + $0x188] sm:$0xff]  }
 0x251   : > { %1796 = vmatprep.mubr.bf16.mxu0 %v11478_v3 }
 0x258   : > { %7009 = vmatmul.mubr.msk.bf16.gmra.mrb[24].mxu0 %vm702_vm12, %v7775_v27 }
 0x259   : > { %1806 = vmatprep.mubr.bf16.mxu0 %v11478_v3 }
 0x260   : > { %7010 = vmatmul.mubr.msk.bf16.gmra.mrb[28].mxu0 %vm702_vm12, %v7776_v29 }
 0x261   : > { %1962 = vmatprep.mubr.bf16.mxu0 %v11478_v3 }
 0x268   : > { %7035 = vmatmul.mubr.msk.bf16.vlgmr.msra.gmra.mrb[0].mxu0 %vm702_vm12, %v7777_v31 }
 0x269   : > { %1972 = vmatprep.mubr.bf16.mxu0 %v11478_v3 }
 0x270   : > { %7036 = vmatmul.mubr.msk.bf16.gmra.mrb[4].mxu0 %vm702_vm12, %v7778_v32 }
 0x271   : > { %1982 = vmatprep.mubr.bf16.mxu0 %v11478_v3 }
 0x278   : > { %7037 = vmatmul.mubr.msk.bf16.gmra.mrb[8].mxu0 %vm702_vm12, %v7779_v33 }
 0x279   : > { %1992 = vmatprep.mubr.bf16.mxu0 %v11478_v3 }
 0x280   : > { %7038 = vmatmul.mubr.msk.bf16.gmra.mrb[12].mxu0 %vm702_vm12, %v7780_v34 }
 0x281   : > { %2002 = vmatprep.mubr.bf16.mxu0 %v11478_v3 }
 0x288   : > { %7039 = vmatmul.mubr.msk.bf16.gmra.mrb[16].mxu0 %vm702_vm12, %v7781_v35 }
 0x289   : > { %2012 = vmatprep.mubr.bf16.mxu0 %v11478_v3 }
 0x290   : > { %7040 = vmatmul.mubr.msk.bf16.gmra.mrb[20].mxu0 %vm702_vm12, %v7782_v36 }
 0x291   : > { %2022 = vmatprep.mubr.bf16.mxu0 %v11478_v3 }
 0x298   : > { %7041 = vmatmul.mubr.msk.bf16.gmra.mrb[24].mxu0 %vm702_vm12, %v7783_v37 }
 0x299   : > { %v2153_v17 = vpop.permute.xlu0 %2152  ;;  %2032 = vmatprep.mubr.bf16.mxu0 %v11478_v3 }
 0x29c   : > { %v2157_v38 = vpop.permute.xlu1 %2156 }
 0x29d   : > { %v2344_v40 = vpop.permute.xlu0 %2343 }
 0x29e   : > { %vm2348_vm15 = vcmp.ne.s16.totalorder %v2344_v40, 0 }
 0x29f   : > { %v2351_v41 = vsel %vm2348_vm15, %v8888_v7, 0  ;;  %v2354_v56 = vsel %vm2348_vm15, %v8910_v18, 0 }
 0x2a0   : > { %v2342_v42 = vpop.permute.xlu1 %2341  ;;  %2422 = vrot.lane.b32.xlu1 %v2351_v41, %s8503_s16  ;;  %7042 = vmatmul.mubr.msk.bf16.gmra.mrb[28].mxu0 %vm702_vm12, %v7784_v39  ;;  %v7798_v39 = vld [vmem:[%s11461_s2 + $0x1a8] sm:$0xff]   ;;  %v7799_v41 = vld [vmem:[%s11461_s2 + $0x1b0] sm:$0xff]  }
 0x2a1   : > { %v2345_v43 = vsel %vm1403_vm6, %v2342_v42, %v2344_v40  ;;  %vm2346_vm0 = vcmp.ne.s16.totalorder %v2342_v42, 0  ;;  %v2155_v44 = vpop.permute.xlu0 %2154  ;;  %2228 = vmatprep.mubr.bf16.mxu0 %v11478_v3  ;;  %v7817_v40 = vld [vmem:[%s11461_s2 + $0x28] sm:$0xff]   ;;  %v7819_v42 = vld [vmem:[%s11461_s2 + $0x30] sm:$0xff]  }
 0x2a2   : > { %vm2347_vm1 = vcmp.ne.s16.totalorder %v2345_v43, 0  ;;  %v2164_v45 = vsel %vm1585_vm3, %v2153_v17, %v2155_v44  ;;  %v2349_v46 = vsel %vm2346_vm0, %v8660_v26, 0  ;;  %v2165_v47 = vsel %vm1585_vm3, %v2155_v44, %v2157_v38  ;;  %v7797_v17 = vld [vmem:[%s11461_s2 + $0x1a0] sm:$0xff]   ;;  %v7800_v43 = vld [vmem:[%s11461_s2 + $0x1b8] sm:$0xff]  }
 0x2a3   : > { %2418 = vrot.lane.b32.xlu0 %v2349_v46, %s8503_s16  ;;  %2196 = vmatprep.subr.bf16.mxu0 %v2165_v47  ;;  %v2353_v48 = vsel %vm2347_vm1, %v8653_v21, 0  ;;  %v2350_v30 = vsel %vm2347_vm1, %v8651_v20, 0  ;;  %v2352_v52 = vsel %vm2346_vm0, %v8665_v28, 0  ;;  %v7815_v38 = vld [vmem:[%s11461_s2 + $0x20] sm:$0xff]   ;;  %v7821_v44 = vld [vmem:[%s11461_s2 + $0x38] sm:$0xff]   ;;  %v3123_v47 = vld [vmem:[%s11462_s3 + $0x8] sm:$0xff] }
 0x2a4   : > { %2426 = vrot.lane.b32.xlu1 %v2353_v48, %s8503_s16  ;;  %v2161_v49 = vpop.permute.xlu1 %2160  ;;  %2197 = vmatpush1.bf16.msra.mxu0 %v2164_v45  ;;  %v7801_v45 = vld [vmem:[%s11461_s2 + $0x1c0] sm:$0xff]   ;;  %v3125_v48 = vld [vmem:[%s11462_s3 + $0x18] sm:$0xff] }
 0x2a5   : > { %v2163_v50 = vpop.permute.xlu0 %2162  ;;  %v3122_v46 = vld [vmem:[%s11462_s3] sm:$0xff] }
 0x2a6   : > { %v2167_v51 = vsel %vm1585_vm3, %v2161_v49, %v2163_v50  ;;  %v7802_v50 = vld [vmem:[%s11461_s2 + $0x1c8] sm:$0xff]  }
 0x2a7   : > { %2420 = vrot.lane.b32.xlu0 %v2350_v30, %s8503_s16  ;;  %2198 = vmatprep.subr.bf16.mxu0 %v2167_v51  ;;  %v3127_v30 = vld [vmem:[%s11462_s3 + $0x28] sm:$0xff]  ;;  %v3126_v51 = vld [vmem:[%s11462_s3 + $0x20] sm:$0xff] }
 0x2a8   : > { %2424 = vrot.lane.b32.xlu1 %v2352_v52, %s8503_s16  ;;  %v2159_v53 = vpop.permute.xlu1 %2158  ;;  %v3129_v52 = vld [vmem:[%s11462_s3 + $0x38] sm:$0xff] }
 0x2a9   : > { %v2166_v54 = vsel %vm1585_vm3, %v2159_v53, %v2161_v49  ;;  %v3124_v49 = vld [vmem:[%s11462_s3 + $0x10] sm:$0xff] }
 0x2aa   : > { %2199 = vmatpush1.bf16.msra.mxu0 %v2166_v54  ;;  %v3128_v53 = vld [vmem:[%s11462_s3 + $0x30] sm:$0xff] }
 0x2ab   : > { %2428 = vrot.lane.b32.xlu0 %v2354_v56, %s8503_s16  ;;  %v7803_v54 = vld [vmem:[%s11461_s2 + $0x1d0] sm:$0xff]   ;;  %v7805_v56 = vld [vmem:[%s11461_s2 + $0x1e0] sm:$0xff]  }
 0x2ac   : > { %2670 = vrot.lane.b32.xlu1 %v8888_v7, %s8507_s24 }
 0x2ad   : > { %7067 = vmatmul.mubr.msk.bf16.vlgmr.msra.gmra.mrb[0].mxu0 %vm702_vm12, %v7785_v55  ;;  %v7804_v55 = vld [vmem:[%s11461_s2 + $0x1d8] sm:$0xff]  }
 0x2ae   : > { %2238 = vmatprep.mubr.bf16.mxu0 %v11478_v3 }
 0x2af   : > { %2668 = vrot.lane.b32.xlu0 %v8651_v20, %s8507_s24 }
 0x2b0   : > { %2856 = vrot.lane.b32.xlu1 %v8644_v16, %s8501_s30  ;;  %v7787_v16 = vld [vmem:[%s11461_s2 + $0x150] sm:$0xff]  }
 0x2b3   : > { %2666 = vrot.lane.b32.xlu0 %v8660_v26, %s8507_s24 }
 0x2b4   : > { %2674 = vrot.lane.b32.xlu1 %v8653_v21, %s8507_s24 }
 0x2b5   : > { %7068 = vmatmul.mubr.msk.bf16.gmra.mrb[4].mxu0 %vm702_vm12, %v7786_v57  ;;  %v7806_v57 = vld [vmem:[%s11461_s2 + $0x1e8] sm:$0xff]  }
 0x2b6   : > { %2248 = vmatprep.mubr.bf16.mxu0 %v11478_v3 }
 0x2b7   : > { %2858 = vrot.lane.b32.xlu0 %v8642_v15, %s8501_s30  ;;  %v7789_v15 = vld [vmem:[%s11461_s2 + $0x160] sm:$0xff]  }
 0x2b8   : > { %2672 = vrot.lane.b32.xlu1 %v8665_v28, %s8507_s24 }
 0x2bb   : > { %2676 = vrot.lane.b32.xlu0 %v8910_v18, %s8507_s24 }
 0x2bd   : > { %7069 = vmatmul.mubr.msk.bf16.gmra.mrb[8].mxu0 %vm702_vm12, %v7787_v16  ;;  %v7807_v16 = vld [vmem:[%s11461_s2 + $0x1f0] sm:$0xff]  }
 0x2be   : > { %2258 = vmatprep.mubr.bf16.mxu0 %v11478_v3 }
 0x2c5   : > { %7070 = vmatmul.mubr.msk.bf16.gmra.mrb[12].mxu0 %vm702_vm12, %v7788_v58  ;;  %v7808_v58 = vld [vmem:[%s11461_s2 + $0x1f8] sm:$0xff]  }
 0x2c6   : > { %2268 = vmatprep.mubr.bf16.mxu0 %v11478_v3 }
 0x2cd   : > { %7071 = vmatmul.mubr.msk.bf16.gmra.mrb[16].mxu0 %vm702_vm12, %v7789_v15 }
 0x2ce   : > { %2278 = vmatprep.mubr.bf16.mxu0 %v11478_v3 }
 0x2d5   : > { %7072 = vmatmul.mubr.msk.bf16.gmra.mrb[20].mxu0 %vm702_vm12, %v7790_v59 }
 0x2d6   : > { %2288 = vmatprep.mubr.bf16.mxu0 %v11478_v3 }
 0x2dd   : > { %7073 = vmatmul.mubr.msk.bf16.gmra.mrb[24].mxu0 %vm702_vm12, %v7791_v60 }
 0x2de   : > { %2298 = vmatprep.mubr.bf16.mxu0 %v11478_v3 }
 0x2e5   : > { %7074 = vmatmul.mubr.msk.bf16.gmra.mrb[28].mxu0 %vm702_vm12, %v7792_v61 }
 0x2e6   : > { %2494 = vmatprep.mubr.bf16.mxu0 %v11478_v3 }
 0x312   : > { %v2423_v62 = vpop.permute.xlu1 %2422 }
 0x315   : > { %v2419_v63 = vpop.permute.xlu0 %2418 }
 0x316   : > { %v2427_v0 = vpop.permute.xlu1 %2426 }
 0x319   : > { %v2421_v1 = vpop.permute.xlu0 %2420 }
 0x31a   : > { %v2425_v2 = vpop.permute.xlu1 %2424  ;;  %v2431_v4 = vsel %vm1317_vm13, %v2421_v1, %v2423_v62  ;;  %v2430_v5 = vsel %vm1317_vm13, %v2419_v63, %v2421_v1 }
 0x31b   : > { %2462 = vmatprep.subr.bf16.mxu0 %v2431_v4  ;;  %v2432_v10 = vsel %vm1317_vm13, %v2425_v2, %v2427_v0 }
 0x31c   : > { %2463 = vmatpush1.bf16.msra.mxu0 %v2430_v5  ;;  %v7809_v5 = vld [vmem:[%s11461_s2 + $0x200] sm:$0xff]  }
 0x31d   : > { %v2429_v6 = vpop.permute.xlu0 %2428 }
 0x31e   : > { %v2433_v8 = vsel %vm1317_vm13, %v2427_v0, %v2429_v6  ;;  %v2671_v9 = vpop.permute.xlu1 %2670  ;;  %v7810_v6 = vld [vmem:[%s11461_s2 + $0x208] sm:$0xff]  }
 0x31f   : > { %2464 = vmatprep.subr.bf16.mxu0 %v2433_v8  ;;  %v7812_v8 = vld [vmem:[%s11461_s2 + $0x210] sm:$0xff]  }
 0x320   : > { %2465 = vmatpush1.bf16.msra.mxu0 %v2432_v10  ;;  %v7816_v10 = vld [vmem:[%s11461_s2 + $0x220] sm:$0xff]  }
 0x321   : > { %v2669_v14 = vpop.permute.xlu0 %2668 }
 0x322   : > { %v2680_v19 = vsel %vm2678_vm2, %v2669_v14, %v2671_v9  ;;  %v2857_v13 = vpop.permute.xlu1 %2856  ;;  %v7814_v9 = vld [vmem:[%s11461_s2 + $0x218] sm:$0xff]  }
 0x323   : > { %2711 = vmatprep.subr.bf16.mxu0 %v2680_v19  ;;  %7099 = vmatmul.mubr.msk.bf16.vlgmr.msra.gmra.mrb[0].mxu0 %vm702_vm12, %v7793_v11  ;;  %vm2861_vm3 = vcmp.ne.s16.totalorder %v2857_v13, 0  ;;  %v7818_v11 = vld [vmem:[%s11461_s2 + $0x228] sm:$0xff]   ;;  %v7822_v19 = vld [vmem:[%s11461_s2 + $0x238] sm:$0xff]  }
 0x324   : > { %v2864_v12 = vsel %vm2861_vm3, %v8660_v26, 0  ;;  %2504 = vmatprep.mubr.bf16.mxu0 %v11478_v3  ;;  %v2867_v37 = vsel %vm2861_vm3, %v8665_v28, 0  ;;  %v7813_v28 = vld [vmem:[%s11461_s2 + $0x18] sm:$0xff]  }
 0x325   : > { %v2667_v22 = vpop.permute.xlu0 %2666  ;;  %2933 = vrot.lane.b32.xlu0 %v2864_v12, %s8500_s29 }
 0x326   : > { %v2679_v23 = vsel %vm2678_vm2, %v2667_v22, %v2669_v14  ;;  %v2675_v24 = vpop.permute.xlu1 %2674  ;;  %v7820_v14 = vld [vmem:[%s11461_s2 + $0x230] sm:$0xff]  }
 0x327   : > { %2712 = vmatpush1.bf16.msra.mxu0 %v2679_v23 }
 0x329   : > { %v2859_v27 = vpop.permute.xlu0 %2858 }
 0x32a   : > { %vm2863_vm13 = vcmp.ne.s16.totalorder %v2859_v27, 0  ;;  %v2860_v29 = vsel %vm693_vm10, %v2857_v13, %v2859_v27  ;;  %v2673_v31 = vpop.permute.xlu1 %2672 }
 0x32b   : > { %v2866_v26 = vsel %vm2863_vm13, %v8888_v7, 0  ;;  %vm2862_vm4 = vcmp.ne.s16.totalorder %v2860_v29, 0  ;;  %7100 = vmatmul.mubr.msk.bf16.gmra.mrb[4].mxu0 %vm702_vm12, %v7794_v25  ;;  %v2681_v34 = vsel %vm2678_vm2, %v2673_v31, %v2675_v24  ;;  %v7795_v7 = vld [vmem:[%s11461_s2 + $0x190] sm:$0xff]  }
 0x32c   : > { %2937 = vrot.lane.b32.xlu1 %v2866_v26, %s8500_s29  ;;  %v2865_v32 = vsel %vm2862_vm4, %v8651_v20, 0  ;;  %2514 = vmatprep.mubr.bf16.mxu0 %v11478_v3  ;;  %v2868_v36 = vsel %vm2862_vm4, %v8653_v21, 0  ;;  %v2869_v20 = vsel %vm2863_vm13, %v8910_v18, 0  ;;  %v7811_v21 = vld [vmem:[%s11461_s2 + $0x10] sm:$0xff]   ;;  %v7796_v18 = vld [vmem:[%s11461_s2 + $0x198] sm:$0xff]  }
 0x32d   : > { %2935 = vrot.lane.b32.xlu0 %v2865_v32, %s8500_s29  ;;  %v2677_v33 = vpop.permute.xlu0 %2676  ;;  %6887 = vmatmul.mubr.msk.bf16.vlgmr.msra.gmra.mrb[0].mxu1 %vm702_vm12, %v7811_v21 }
 0x32e   : > { %v2682_v35 = vsel %vm2678_vm2, %v2675_v24, %v2677_v33  ;;  %789 = vmatprep.mubr.bf16.mxu1 %v11478_v3 }
 0x32f   : > { %2713 = vmatprep.subr.bf16.mxu0 %v2682_v35 }
 0x330   : > { %2941 = vrot.lane.b32.xlu1 %v2868_v36, %s8500_s29  ;;  %2714 = vmatpush1.bf16.msra.mxu0 %v2681_v34 }
 0x331   : > { %2943 = vrot.lane.b32.xlu0 %v2869_v20, %s8500_s29 }
 0x333   : > { %7101 = vmatmul.mubr.msk.bf16.gmra.mrb[8].mxu0 %vm702_vm12, %v7795_v7 }
 0x334   : > { %2939 = vrot.lane.b32.xlu1 %v2867_v37, %s8500_s29  ;;  %2524 = vmatprep.mubr.bf16.mxu0 %v11478_v3 }
 0x335   : > { %6888 = vmatmul.mubr.msk.bf16.gmra.mrb[4].mxu1 %vm702_vm12, %v7813_v28  ;;  %3140 = vperm.xlu0 %7732, %v3122_v46  }
 0x336   : > { %799 = vmatprep.mubr.bf16.mxu1 %v11478_v3 }
 0x338   : > { %3145 = vperm.xlu1 %7733, %v3123_v47  }
 0x339   : > { %3155 = vperm.xlu0 %7732, %v3125_v48  }
 0x33b   : > { %7102 = vmatmul.mubr.msk.bf16.gmra.mrb[12].mxu0 %vm702_vm12, %v7796_v18 }
 0x33c   : > { %2534 = vmatprep.mubr.bf16.mxu0 %v11478_v3  ;;  %3150 = vperm.xlu1 %7733, %v3124_v49  }
 0x33d   : > { %6889 = vmatmul.mubr.msk.bf16.gmra.mrb[8].mxu1 %vm702_vm12, %v7815_v38  ;;  %3165 = vperm.xlu0 %7732, %v3127_v30  }
 0x33e   : > { %809 = vmatprep.mubr.bf16.mxu1 %v11478_v3 }
 0x340   : > { %3160 = vperm.xlu1 %7733, %v3126_v51  }
 0x341   : > { %3175 = vperm.xlu0 %7732, %v3129_v52  }
 0x343   : > { %7103 = vmatmul.mubr.msk.bf16.gmra.mrb[16].mxu0 %vm702_vm12, %v7797_v17 }
 0x344   : > { %2544 = vmatprep.mubr.bf16.mxu0 %v11478_v3  ;;  %3170 = vperm.xlu1 %7733, %v3128_v53  }
 0x345   : > { %6890 = vmatmul.mubr.msk.bf16.gmra.mrb[12].mxu1 %vm702_vm12, %v7817_v40 }
 0x346   : > { %819 = vmatprep.mubr.bf16.mxu1 %v11478_v3 }
 0x34b   : > { %7104 = vmatmul.mubr.msk.bf16.gmra.mrb[20].mxu0 %vm702_vm12, %v7798_v39 }
 0x34c   : > { %2554 = vmatprep.mubr.bf16.mxu0 %v11478_v3 }
 0x34d   : > { %6891 = vmatmul.mubr.msk.bf16.gmra.mrb[16].mxu1 %vm702_vm12, %v7819_v42 }
 0x34e   : > { %829 = vmatprep.mubr.bf16.mxu1 %v11478_v3 }
 0x353   : > { %7105 = vmatmul.mubr.msk.bf16.gmra.mrb[24].mxu0 %vm702_vm12, %v7799_v41 }
 0x354   : > { %2564 = vmatprep.mubr.bf16.mxu0 %v11478_v3 }
 0x355   : > { %6892 = vmatmul.mubr.msk.bf16.gmra.mrb[20].mxu1 %vm702_vm12, %v7821_v44 }
 0x356   : > { %4160 = vmatprep.mubr.bf16.mxu1 %v11478_v3 }
 0x35b   : > { %7106 = vmatmul.mubr.msk.bf16.gmra.mrb[28].mxu0 %vm702_vm12, %v7800_v43 }
 0x35c   : > { %2743 = vmatprep.mubr.bf16.mxu0 %v11478_v3 }
 0x363   : > { %7131 = vmatmul.mubr.msk.bf16.vlgmr.msra.gmra.mrb[0].mxu0 %vm702_vm12, %v7801_v45 }
 0x364   : > { %2753 = vmatprep.mubr.bf16.mxu0 %v11478_v3 }
 0x36b   : > { %7132 = vmatmul.mubr.msk.bf16.gmra.mrb[4].mxu0 %vm702_vm12, %v7802_v50 }
 0x36c   : > { %2763 = vmatprep.mubr.bf16.mxu0 %v11478_v3 }
 0x373   : > { %7133 = vmatmul.mubr.msk.bf16.gmra.mrb[8].mxu0 %vm702_vm12, %v7803_v54 }
 0x374   : > { %2773 = vmatprep.mubr.bf16.mxu0 %v11478_v3 }
 0x37b   : > { %7134 = vmatmul.mubr.msk.bf16.gmra.mrb[12].mxu0 %vm702_vm12, %v7804_v55 }
 0x37c   : > { %2783 = vmatprep.mubr.bf16.mxu0 %v11478_v3 }
 0x383   : > { %7135 = vmatmul.mubr.msk.bf16.gmra.mrb[16].mxu0 %vm702_vm12, %v7805_v56 }
 0x384   : > { %2793 = vmatprep.mubr.bf16.mxu0 %v11478_v3 }
 0x38b   : > { %7136 = vmatmul.mubr.msk.bf16.gmra.mrb[20].mxu0 %vm702_vm12, %v7806_v57 }
 0x38c   : > { %2803 = vmatprep.mubr.bf16.mxu0 %v11478_v3 }
 0x393   : > { %7137 = vmatmul.mubr.msk.bf16.gmra.mrb[24].mxu0 %vm702_vm12, %v7807_v16 }
 0x394   : > { %2813 = vmatprep.mubr.bf16.mxu0 %v11478_v3 }
 0x397   : > { %v2934_v15 = vpop.permute.xlu0 %2933 }
 0x39b   : > { %7138 = vmatmul.mubr.msk.bf16.gmra.mrb[28].mxu0 %vm702_vm12, %v7808_v58 }
 0x39c   : > { %3009 = vmatprep.mubr.bf16.mxu0 %v11478_v3 }
 0x39e   : > { %v2938_v59 = vpop.permute.xlu1 %2937 }
 0x39f   : > { %v2936_v60 = vpop.permute.xlu0 %2935 }
 0x3a0   : > { %v2946_v61 = vsel %vm608_vm7, %v2936_v60, %v2938_v59  ;;  %v2945_v62 = vsel %vm608_vm7, %v2934_v15, %v2936_v60 }
 0x3a1   : > { %2977 = vmatprep.subr.bf16.mxu0 %v2946_v61 }
 0x3a2   : > { %v2942_v63 = vpop.permute.xlu1 %2941  ;;  %2978 = vmatpush1.bf16.msra.mxu0 %v2945_v62 }
 0x3a3   : > { %v2944_v0 = vpop.permute.xlu0 %2943 }
 0x3a4   : > { %v2948_v1 = vsel %vm608_vm7, %v2942_v63, %v2944_v0 }
 0x3a5   : > { %2979 = vmatprep.subr.bf16.mxu0 %v2948_v1 }
 0x3a6   : > { %v2940_v2 = vpop.permute.xlu1 %2939 }
 0x3a7   : > { %v2947_v4 = vsel %vm608_vm7, %v2940_v2, %v2942_v63 }
 0x3a8   : > { %2980 = vmatpush1.bf16.msra.mxu0 %v2947_v4 }
 0x3ab   : > { %7163 = vmatmul.mubr.msk.bf16.vlgmr.msra.gmra.mrb[0].mxu0 %vm702_vm12, %v7809_v5 }
 0x3ac   : > { %3019 = vmatprep.mubr.bf16.mxu0 %v11478_v3 }
 0x3b3   : > { %7164 = vmatmul.mubr.msk.bf16.gmra.mrb[4].mxu0 %vm702_vm12, %v7810_v6 }
 0x3b4   : > { %3029 = vmatprep.mubr.bf16.mxu0 %v11478_v3  ;;  %v3141_v40 = vpop.permute.xlu0 %3140 }
 0x3b7   : > { %v3146_v44 = vpop.permute.xlu1 %3145 }
 0x3b8   : > { %v3156_v60 = vpop.permute.xlu0 %3155 }
 0x3bb   : > { %7165 = vmatmul.mubr.msk.bf16.gmra.mrb[8].mxu0 %vm702_vm12, %v7812_v8  ;;  %v3151_v55 = vpop.permute.xlu1 %3150 }
 0x3bc   : > { %3039 = vmatprep.mubr.bf16.mxu0 %v11478_v3 }
 0x3c3   : > { %7166 = vmatmul.mubr.msk.bf16.gmra.mrb[12].mxu0 %vm702_vm12, %v7814_v9 }
 0x3c4   : > { %3049 = vmatprep.mubr.bf16.mxu0 %v11478_v3 }
 0x3cb   : > { %7167 = vmatmul.mubr.msk.bf16.gmra.mrb[16].mxu0 %vm702_vm12, %v7816_v10 }
 0x3cc   : > { %3059 = vmatprep.mubr.bf16.mxu0 %v11478_v3 }
 0x3d3   : > { %7168 = vmatmul.mubr.msk.bf16.gmra.mrb[20].mxu0 %vm702_vm12, %v7818_v11 }
 0x3d4   : > { %3069 = vmatprep.mubr.bf16.mxu0 %v11478_v3 }
 0x3db   : > { %7169 = vmatmul.mubr.msk.bf16.gmra.mrb[24].mxu0 %vm702_vm12, %v7820_v14 }
 0x3dc   : > { %3079 = vmatprep.mubr.bf16.mxu0 %v11478_v3 }
 0x3e3   : > { %7170 = vmatmul.mubr.msk.bf16.gmra.mrb[28].mxu0 %vm702_vm12, %v7822_v19 }
 0x400   : > { %v9265_v13 = vpop.f32.mrb[0].mxu1 }
 0x401   : > { %v9267_v12 = vpop.f32.mrb[1].mxu1 }
 0x402   : > { %v9269_v22 = vpop.f32.mrb[2].mxu1 }
 0x403   : > { %v9271_v23 = vpop.f32.mrb[3].mxu1 }
 0x408   : > { %v9273_v24 = vpop.f32.mrb[4].mxu1 }
 0x409   : > { %v9275_v25 = vpop.f32.mrb[5].mxu1 }
 0x40a   : > { %v9277_v27 = vpop.f32.mrb[6].mxu1 }
 0x40b   : > { %v9279_v29 = vpop.f32.mrb[7].mxu1 }
 0x410   : > { %v9281_v31 = vpop.f32.mrb[8].mxu1 }
 0x411   : > { %v9283_v26 = vpop.f32.mrb[9].mxu1 }
 0x412   : > { %v9285_v32 = vpop.f32.mrb[10].mxu1 }
 0x413   : > { %v9287_v33 = vpop.f32.mrb[11].mxu1 }
 0x418   : > { %v9289_v34 = vpop.f32.mrb[12].mxu1 }
 0x419   : > { %v9291_v35 = vpop.f32.mrb[13].mxu1 }
 0x41a   : > { %v9293_v36 = vpop.f32.mrb[14].mxu1 }
 0x41b   : > { %v9295_v7 = vpop.f32.mrb[15].mxu1 }
 0x420   : > { %v9297_v20 = vpop.f32.mrb[16].mxu1 }
 0x421   : > { %v9299_v37 = vpop.f32.mrb[17].mxu1 }
 0x422   : > { %v9301_v21 = vpop.f32.mrb[18].mxu1 }
 0x423   : > { %v9303_v18 = vpop.f32.mrb[19].mxu1 }
 0x428   : > { %v9305_v28 = vpop.f32.mrb[20].mxu1 }
 0x429   : > { %v9307_v17 = vpop.f32.mrb[21].mxu1 }
 0x42a   : > { %v9309_v38 = vpop.f32.mrb[22].mxu1 }
 0x42b   : > { %v9311_v39 = vpop.f32.mrb[23].mxu1 }
 0x47e   : > { %v3011_v41 = vpop.f32.mrb[0].mxu0 }
 0x47f   : > { %v9313_v42 = vadd.f32 %v3141_v40, %v3011_v41  ;;  %v3013_v43 = vpop.f32.mrb[1].mxu0 }
 0x480   : > { %v9315_v45 = vadd.f32 %v3141_v40, %v3013_v43  ;;  %v3015_v46 = vpop.f32.mrb[2].mxu0 }
 0x481   : > { %v3267_v47 = vmul.f32 %v9313_v42, %v9313_v42  ;;  %v9319_v48 = vadd.f32 %v3146_v44, %v3015_v46  ;;  %v3017_v49 = vpop.f32.mrb[3].mxu0 }
 0x482   : > { %v3250_v50 = vadd.f32 %v9315_v45, %v9313_v42  ;;  %v3268_v30 = vmul.f32 %v9315_v45, %v9315_v45  ;;  %v9325_v51 = vadd.f32 %v3146_v44, %v3017_v49 }
 0x483   : > { %v3269_v52 = vmul.f32 %v9319_v48, %v9319_v48 }
 0x484   : > { %v3275_v53 = vadd.f32 %v3268_v30, %v3267_v47  ;;  %v3251_v54 = vadd.f32 %v3250_v50, %v9319_v48  ;;  %v3270_v16 = vmul.f32 %v9325_v51, %v9325_v51 }
 0x486   : > { %v3276_v56 = vadd.f32 %v3275_v53, %v3269_v52  ;;  %v3252_v57 = vadd.f32 %v3251_v54, %v9325_v51  ;;  %v3021_v58 = vpop.f32.mrb[4].mxu0 }
 0x487   : > { %v9333_v15 = vadd.f32 %v3151_v55, %v3021_v58  ;;  %v3023_v59 = vpop.f32.mrb[5].mxu0 }
 0x488   : > { %v3277_v61 = vadd.f32 %v3276_v56, %v3270_v16  ;;  %v9335_v62 = vadd.f32 %v3151_v55, %v3023_v59  ;;  %v3025_v63 = vpop.f32.mrb[6].mxu0 }
 0x489   : > { %v3253_v0 = vadd.f32 %v3252_v57, %v9333_v15  ;;  %v3271_v1 = vmul.f32 %v9333_v15, %v9333_v15  ;;  %v9340_v2 = vadd.f32 %v3156_v60, %v3025_v63  ;;  %v3027_v4 = vpop.f32.mrb[7].mxu0 }
 0x48a   : > { %v3272_v5 = vmul.f32 %v9335_v62, %v9335_v62  ;;  %v9345_v9 = vadd.f32 %v3156_v60, %v3027_v4  ;;  %v3161_v4 = vpop.permute.xlu1 %3160 }
 0x48b   : > { %v3278_v6 = vadd.f32 %v3277_v61, %v3271_v1  ;;  %v3254_v8 = vadd.f32 %v3253_v0, %v9335_v62  ;;  %v3273_v10 = vmul.f32 %v9340_v2, %v9340_v2 }
 0x48c   : > { %v3274_v44 = vmul.f32 %v9345_v9, %v9345_v9 }
 0x48d   : > { %v3255_v11 = vadd.f32 %v3254_v8, %v9340_v2  ;;  %v3279_v14 = vadd.f32 %v3278_v6, %v3272_v5 }
 0x48e   : > { %v3031_v19 = vpop.f32.mrb[8].mxu0 }
 0x48f   : > { %v7333_v40 = vadd.f32 %v3031_v19, %v9265_v13  ;;  %v3033_v41 = vpop.f32.mrb[9].mxu0  ;;  %v3256_v43 = vadd.f32 %v3255_v11, %v9345_v9  ;;  %v3280_v46 = vadd.f32 %v3279_v14, %v3273_v10 }
 0x490   : > { %v7334_v47 = vadd.f32 %v3033_v41, %v9267_v12  ;;  %v3035_v49 = vpop.f32.mrb[10].mxu0 }
 0x491   : > { %v7335_v50 = vadd.f32 %v3035_v49, %v9269_v22  ;;  %3257 = vadd.xlane.f32.xlu1 %v3256_v43  ;;  %v3037_v30 = vpop.f32.mrb[11].mxu0  ;;  %v3281_v52 = vadd.f32 %v3280_v46, %v3274_v44  ;;  %v9397_v8 = vadd.f32 %v7333_v40, %v3161_v4 }
 0x492   : > { %v7336_v53 = vadd.f32 %v3037_v30, %v9271_v23  ;;  %v9399_v10 = vadd.f32 %v7334_v47, %v3161_v4 }
 0x493   : > { %3282 = vadd.xlane.f32.xlu0 %v3281_v52  ;;  %v3333_v14 = vmul.f32 %v9397_v8, %v9397_v8 }
 0x494   : > { %v3316_v43 = vadd.f32 %v9399_v10, %v9397_v8 }
 0x496   : > { %v3041_v54 = vpop.f32.mrb[12].mxu0 }
 0x497   : > { %v7337_v13 = vadd.f32 %v3041_v54, %v9273_v24  ;;  %v3043_v55 = vpop.f32.mrb[13].mxu0  ;;  %v3131_v24 = vld [vmem:[%s11462_s3 + $0x48] sm:$0xff] }
 0x498   : > { %v9359_v56 = vadd.f32 %v3043_v55, %v9275_v25  ;;  %v3045_v57 = vpop.f32.mrb[14].mxu0  ;;  %v3171_v55 = vpop.permute.xlu1 %3170 }
 0x499   : > { %v9362_v16 = vadd.f32 %v3045_v57, %v9277_v27  ;;  %v3047_v12 = vpop.f32.mrb[15].mxu0 }
 0x49a   : > { %v9365_v22 = vadd.f32 %v3047_v12, %v9279_v29 }
 0x49e   : > { %v3051_v58 = vpop.f32.mrb[16].mxu0 }
 0x49f   : > { %v9368_v59 = vadd.f32 %v3051_v58, %v9281_v31  ;;  %v3053_v23 = vpop.f32.mrb[17].mxu0  ;;  %v3132_v31 = vld [vmem:[%s11462_s3 + $0x50] sm:$0xff] }
 0x4a0   : > { %v9374_v25 = vadd.f32 %v3053_v23, %v9283_v26  ;;  %v3055_v60 = vpop.f32.mrb[18].mxu0  ;;  %v3130_v26 = vld [vmem:[%s11462_s3 + $0x40] sm:$0xff] }
 0x4a1   : > { %v9377_v27 = vadd.f32 %v3055_v60, %v9285_v32  ;;  %v3057_v61 = vpop.f32.mrb[19].mxu0 }
 0x4a2   : > { %v9380_v29 = vadd.f32 %v3057_v61, %v9287_v33  ;;  %3185 = vperm.xlu1 %7733, %v3131_v24  }
 0x4a6   : > { %3190 = vperm.xlu1 %7733, %v3132_v31   ;;  %v3061_v63 = vpop.f32.mrb[20].mxu0 }
 0x4a7   : > { %v9389_v0 = vadd.f32 %v3061_v63, %v9289_v34  ;;  %v3063_v32 = vpop.f32.mrb[21].mxu0  ;;  %v3133_v34 = vld [vmem:[%s11462_s3 + $0x58] sm:$0xff] }
 0x4a8   : > { %v9392_v1 = vadd.f32 %v3063_v32, %v9291_v35  ;;  %v3065_v33 = vpop.f32.mrb[22].mxu0  ;;  %v3166_v35 = vpop.permute.xlu0 %3165 }
 0x4a9   : > { %v9395_v5 = vadd.f32 %v3065_v33, %v9293_v36  ;;  %3180 = vperm.xlu0 %7732, %v3130_v26   ;;  %v3067_v6 = vpop.f32.mrb[23].mxu0  ;;  %v3334_v36 = vmul.f32 %v9399_v10, %v9399_v10  ;;  %v9411_v19 = vadd.f32 %v7335_v50, %v3166_v35  ;;  %v9430_v54 = vadd.f32 %v7336_v53, %v3166_v35 }
 0x4aa   : > { %v9402_v11 = vadd.f32 %v3067_v6, %v9295_v7 }
 0x4ab   : > { %v3341_v30 = vadd.f32 %v3334_v36, %v3333_v14  ;;  %v3335_v50 = vmul.f32 %v9411_v19, %v9411_v19  ;;  %v3336_v24 = vmul.f32 %v9430_v54, %v9430_v54 }
 0x4ac   : > { %v3176_v33 = vpop.permute.xlu0 %3175 }
 0x4ad   : > { %3195 = vperm.xlu0 %7732, %v3133_v34   ;;  %v3342_v57 = vadd.f32 %v3341_v30, %v3335_v50  ;;  %v9462_v34 = vadd.f32 %v9365_v22, %v3176_v33  ;;  %v3136_v22 = vld [vmem:[%s11462_s3 + $0x70] sm:$0xff] }
 0x4ae   : > { %v3071_v40 = vpop.f32.mrb[24].mxu0 }
 0x4af   : > { %v9414_v41 = vadd.f32 %v3071_v40, %v9297_v20  ;;  %v3073_v7 = vpop.f32.mrb[25].mxu0  ;;  %v3317_v20 = vadd.f32 %v3316_v43, %v9411_v19  ;;  %v3340_v36 = vmul.f32 %v9462_v34, %v9462_v34  ;;  %v3135_v40 = vld [vmem:[%s11462_s3 + $0x68] sm:$0xff]  ;;  %v3137_v43 = vld [vmem:[%s11462_s3 + $0x78] sm:$0xff] }
 0x4b0   : > { %v9419_v44 = vadd.f32 %v3073_v7, %v9299_v37  ;;  %v3075_v46 = vpop.f32.mrb[26].mxu0  ;;  %v9432_v37 = vadd.f32 %v7337_v13, %v3171_v55  ;;  %v3343_v13 = vadd.f32 %v3342_v57, %v3336_v24  ;;  %v3134_v7 = vld [vmem:[%s11462_s3 + $0x60] sm:$0xff] }
 0x4b1   : > { %v9422_v47 = vadd.f32 %v3075_v46, %v9301_v21  ;;  %v3077_v49 = vpop.f32.mrb[27].mxu0  ;;  %v3318_v23 = vadd.f32 %v3317_v20, %v9430_v54 }
 0x4b2   : > { %v9427_v52 = vadd.f32 %v3077_v49, %v9303_v18  ;;  %v3337_v31 = vmul.f32 %v9432_v37, %v9432_v37 }
 0x4b3   : > { %v3319_v26 = vadd.f32 %v3318_v23, %v9432_v37 }
 0x4b4   : > { %v3344_v32 = vadd.f32 %v3343_v13, %v3337_v31 }
 0x4b6   : > { %v3081_v12 = vpop.f32.mrb[28].mxu0 }
 0x4b7   : > { %v9435_v21 = vadd.f32 %v3081_v12, %v9305_v28  ;;  %v3083_v58 = vpop.f32.mrb[29].mxu0  ;;  %v9449_v28 = vadd.f32 %v9359_v56, %v3171_v55 }
 0x4b8   : > { %v9441_v18 = vadd.f32 %v3083_v58, %v9307_v17  ;;  %v3085_v60 = vpop.f32.mrb[30].mxu0 }
 0x4b9   : > { %v9444_v53 = vadd.f32 %v3085_v60, %v9309_v38  ;;  %v3087_v61 = vpop.f32.mrb[31].mxu0  ;;  %v3338_v17 = vmul.f32 %v9449_v28, %v9449_v28  ;;  %v9458_v38 = vadd.f32 %v9362_v16, %v3176_v33  ;;  %v3320_v4 = vadd.f32 %v3319_v26, %v9449_v28 }
 0x4ba   : > { %v9452_v63 = vadd.f32 %v3087_v61, %v9311_v39 }
 0x4bb   : > { %v3345_v6 = vadd.f32 %v3344_v32, %v3338_v17  ;;  %v3321_v56 = vadd.f32 %v3320_v4, %v9458_v38  ;;  %v3339_v39 = vmul.f32 %v9458_v38, %v9458_v38 }
 0x4bd   : > { %v3346_v35 = vadd.f32 %v3345_v6, %v3339_v39  ;;  %v3322_v14 = vadd.f32 %v3321_v56, %v9462_v34 }
 0x4bf   : > { %v3347_v16 = vadd.f32 %v3346_v35, %v3340_v36 }
 0x4ca   : > { %3323 = vadd.xlane.f32.xlu1 %v3322_v14 }
 0x4cc   : > { %3348 = vadd.xlane.f32.xlu0 %v3347_v16 }
 0x4db   : > { %3205 = vperm.xlu1 %7733, %v3135_v40  }
 0x4df   : > { %3210 = vperm.xlu1 %7733, %v3136_v22  }
 0x4e2   : > { %3200 = vperm.xlu0 %7732, %v3134_v7  }
 0x4e6   : > { %3215 = vperm.xlu0 %7732, %v3137_v43  }
 0x51e   : > { %v3258_v46 = vpop.xlane.xlu1 %3257 }
 0x51f   : > { %v3259_v49 = vrot.slane %v3258_v46, 4 }
 0x520   : > { %v3283_v30 = vpop.xlane.xlu0 %3282 }
 0x521   : > { %v3260_v50 = vadd.f32 %v3259_v49, %v3258_v46  ;;  %v3284_v20 = vrot.slane %v3283_v30, 4 }
 0x522   : > { %v3186_v12 = vpop.permute.xlu1 %3185 }
 0x523   : > { %v3285_v55 = vadd.f32 %v3284_v20, %v3283_v30  ;;  %v3261_v57 = vrot.slane %v3260_v50, 2  ;;  %v9483_v13 = vadd.f32 %v9377_v27, %v3186_v12  ;;  %v9492_v4 = vadd.f32 %v9380_v29, %v3186_v12 }
 0x525   : > { %v3262_v58 = vadd.f32 %v3261_v57, %v3260_v50  ;;  %v3286_v23 = vrot.slane %v3285_v55, 2  ;;  %v3402_v36 = vmul.f32 %v9492_v4, %v9492_v4 }
 0x526   : > { %v3191_v32 = vpop.permute.xlu1 %3190 }
 0x527   : > { %v3263_v24 = vrot.slane %v3262_v58, 1  ;;  %v3287_v60 = vadd.f32 %v3286_v23, %v3285_v55  ;;  %v9503_v39 = vadd.f32 %v9389_v0, %v3191_v32  ;;  %v9509_v16 = vadd.f32 %v9392_v1, %v3191_v32 }
 0x528   : > { %v3181_v61 = vpop.permute.xlu0 %3180 }
 0x529   : > { %v9486_v31 = vadd.f32 %v9368_v59, %v3181_v61  ;;  %v9489_v26 = vadd.f32 %v9374_v25, %v3181_v61  ;;  %v3264_v17 = vadd.f32 %v3263_v24, %v3262_v58  ;;  %v3288_v33 = vrot.slane %v3287_v60, 1 }
 0x52a   : > { %v3401_v25 = vmul.f32 %v9483_v13, %v9483_v13  ;;  %v3403_v7 = vmul.f32 %v9503_v39, %v9503_v39  ;;  %v3404_v1 = vmul.f32 %v9509_v16, %v9509_v16 }
 0x52b   : > { %v3382_v6 = vadd.f32 %v9489_v26, %v9486_v31  ;;  %v3399_v56 = vmul.f32 %v9486_v31, %v9486_v31  ;;  %v3400_v27 = vmul.f32 %v9489_v26, %v9489_v26  ;;  %7657 = vpush %v3264_v17  ;;  %v3289_v59 = vadd.f32 %v3288_v33, %v3287_v60 }
 0x52c   : > { %v3196_v14 = vpop.permute.xlu0 %3195 }
 0x52d   : > { %v3383_v29 = vadd.f32 %v3382_v6, %v9483_v13  ;;  %v3407_v35 = vadd.f32 %v3400_v27, %v3399_v56  ;;  %7659 = vpush %v3289_v59  ;;  %v9515_v0 = vadd.f32 %v9395_v5, %v3196_v14  ;;  %v9519_v49 = vadd.f32 %v9402_v11, %v3196_v14 }
 0x52f   : > { %v3384_v40 = vadd.f32 %v3383_v29, %v9492_v4  ;;  %v3408_v22 = vadd.f32 %v3407_v35, %v3401_v25  ;;  %v3405_v55 = vmul.f32 %v9515_v0, %v9515_v0  ;;  %v3406_v12 = vmul.f32 %v9519_v49, %v9519_v49 }
 0x531   : > { %v3385_v43 = vadd.f32 %v3384_v40, %v9503_v39  ;;  %v3409_v46 = vadd.f32 %v3408_v22, %v3402_v36 }
 0x533   : > { %v3386_v30 = vadd.f32 %v3385_v43, %v9509_v16  ;;  %v3410_v50 = vadd.f32 %v3409_v46, %v3403_v7 }
 0x535   : > { %v3387_v20 = vadd.f32 %v3386_v30, %v9515_v0  ;;  %v3411_v57 = vadd.f32 %v3410_v50, %v3404_v1 }
 0x537   : > { %v3388_v5 = vadd.f32 %v3387_v20, %v9519_v49  ;;  %v3412_v58 = vadd.f32 %v3411_v57, %v3405_v55 }
 0x539   : > { %3389 = vadd.xlane.f32.xlu1 %v3388_v5  ;;  %v3413_v11 = vadd.f32 %v3412_v58, %v3406_v12 }
 0x53b   : > { %3414 = vadd.xlane.f32.xlu0 %v3413_v11 }
 0x557   : > { %v3324_v23 = vpop.xlane.xlu1 %3323 }
 0x558   : > { %v3325_v60 = vrot.slane %v3324_v23, 4 }
 0x559   : > { %v3349_v24 = vpop.xlane.xlu0 %3348 }
 0x55a   : > { %v3350_v61 = vrot.slane %v3349_v24, 4  ;;  %v3326_v32 = vadd.f32 %v3325_v60, %v3324_v23 }
 0x55b   : > { %v3206_v17 = vpop.permute.xlu1 %3205 }
 0x55c   : > { %s7658_s20 = spop %7657  ;;  %v3351_v33 = vadd.f32 %v3350_v61, %v3349_v24  ;;  %v9535_v6 = vadd.f32 %v9422_v47, %v3206_v17  ;;  %v9544_v29 = vadd.f32 %v9427_v52, %v3206_v17  ;;  %v3327_v36 = vrot.slane %v3326_v32, 2 }
 0x55d   : > { %s9530_s22 = smul.f32 0.00012207031, %s7658_s20 }
 0x55e   : > { %s7660_s18 = spop %7659  ;;  %v3468_v46 = vmul.f32 %v9544_v29, %v9544_v29  ;;  %v3328_v20 = vadd.f32 %v3327_v36, %v3326_v32  ;;  %v7175_v36 = vld [vmem:[%s11462_s3 + $0xa0] sm:$0xff] }
 0x55f   : > { %s3292_s23 = smul.f32 %s9530_s22, %s9530_s22  ;;  %v3211_v25 = vpop.permute.xlu1 %3210 }
 0x560   : > { %s3291_s24 = smul.f32 0.00012207031, %s7660_s18  ;;  %v9555_v22 = vadd.f32 %v9435_v21, %v3211_v25  ;;  %v9561_v30 = vadd.f32 %v9441_v18, %v3211_v25  ;;  %v3329_v24 = vrot.slane %v3328_v20, 1 }
 0x561   : > { %v3201_v56 = vpop.permute.xlu0 %3200 }
 0x562   : > { %s3293_s25 = ssub.f32 %s3291_s24, %s3292_s23  ;;  %v9538_v27 = vadd.f32 %v9414_v41, %v3201_v56  ;;  %v9541_v59 = vadd.f32 %v9419_v44, %v3201_v56  ;;  %v3467_v41 = vmul.f32 %v9535_v6, %v9535_v6  ;;  %v3352_v44 = vrot.slane %v3351_v33, 2 }
 0x563   : > { %v3469_v21 = vmul.f32 %v9555_v22, %v9555_v22  ;;  %v3470_v11 = vmul.f32 %v9561_v30, %v9561_v30  ;;  %v3330_v25 = vadd.f32 %v3329_v24, %v3328_v20  ;;  %v7178_v20 = vld [vmem:[%s11462_s3 + $0xb8] sm:$0xff] }
 0x564   : > { %s3303_s21 = sadd.f32 1e-05, %s3293_s25  ;;  %v3448_v35 = vadd.f32 %v9541_v59, %v9538_v27  ;;  %v3465_v47 = vmul.f32 %v9538_v27, %v9538_v27  ;;  %v3466_v14 = vmul.f32 %v9541_v59, %v9541_v59  ;;  %v3353_v55 = vadd.f32 %v3352_v44, %v3351_v33  ;;  %v7176_v44 = vld [vmem:[%s11462_s3 + $0xa8] sm:$0xff] }
 0x565   : > { %v3216_v43 = vpop.permute.xlu0 %3215 }
 0x566   : > { %v3304_v40 = vstv %s3303_s21  ;;  %v3449_v52 = vadd.f32 %v3448_v35, %v9535_v6  ;;  %v3473_v7 = vadd.f32 %v3466_v14, %v3465_v47  ;;  %v9567_v57 = vadd.f32 %v9444_v53, %v3216_v43  ;;  %v7172_v14 = vld [vmem:[%s11462_s3 + $0x88] sm:$0xff] }
 0x567   : > { %7849 = vrsqrt.f32 %v3304_v40  ;;  %v9571_v58 = vadd.f32 %v9452_v63, %v3216_v43  ;;  %v3354_v60 = vrot.slane %v3353_v55, 1  ;;  %v7187_v40 = vld [vmem:[%s11462_s3 + $0x100] sm:$0xff]  ;;  %v7192_v43 = vld [vmem:[%s11462_s3 + $0x128] sm:$0xff] }
 0x568   : > { %v3450_v1 = vadd.f32 %v3449_v52, %v9544_v29  ;;  %v3474_v50 = vadd.f32 %v3473_v7, %v3467_v41  ;;  %v3471_v53 = vmul.f32 %v9567_v57, %v9567_v57  ;;  %v7171_v41 = vld [vmem:[%s11462_s3 + $0x80] sm:$0xff]  ;;  %v7188_v52 = vld [vmem:[%s11462_s3 + $0x108] sm:$0xff] }
 0x569   : > { %v3472_v63 = vmul.f32 %v9571_v58, %v9571_v58  ;;  %v3355_v35 = vadd.f32 %v3354_v60, %v3353_v55  ;;  %v7191_v7 = vld [vmem:[%s11462_s3 + $0x120] sm:$0xff]  ;;  %v7189_v55 = vld [vmem:[%s11462_s3 + $0x110] sm:$0xff] }
 0x56a   : > { %v3451_v5 = vadd.f32 %v3450_v1, %v9555_v22  ;;  %v3475_v12 = vadd.f32 %v3474_v50, %v3468_v46  ;;  %v7173_v46 = vld [vmem:[%s11462_s3 + $0x90] sm:$0xff]  ;;  %v7174_v1 = vld [vmem:[%s11462_s3 + $0x98] sm:$0xff] }
 0x56b   : > { %v7177_v50 = vld [vmem:[%s11462_s3 + $0xb0] sm:$0xff] }
 0x56c   : > { %v3452_v18 = vadd.f32 %v3451_v5, %v9561_v30  ;;  %v3476_v23 = vadd.f32 %v3475_v12, %v3469_v21  ;;  %v7190_v21 = vld [vmem:[%s11462_s3 + $0x118] sm:$0xff]  ;;  %v7193_v5 = vld [vmem:[%s11462_s3 + $0x130] sm:$0xff]  ;;  %v3294_v12 = vstv %s9530_s22 }
 0x56d   : > { %v3298_v24 = vsub.f32 %v9325_v51, %v3294_v12  ;;  %v3295_v60 = vsub.f32 %v9313_v42, %v3294_v12  ;;  %v7180_v42 = vld [vmem:[%s11462_s3 + $0xc8] sm:$0xff] }
 0x56e   : > { %v3453_v61 = vadd.f32 %v3452_v18, %v9567_v57  ;;  %v3477_v17 = vadd.f32 %v3476_v23, %v3470_v11  ;;  %v7194_v18 = vld [vmem:[%s11462_s3 + $0x138] sm:$0xff]  ;;  %v7179_v11 = vld [vmem:[%s11462_s3 + $0xc0] sm:$0xff]  ;;  %v3297_v23 = vsub.f32 %v9319_v48, %v3294_v12 }
 0x570   : > { %v3454_v32 = vadd.f32 %v3453_v61, %v9571_v58  ;;  %v3478_v33 = vadd.f32 %v3477_v17, %v3471_v53  ;;  %v3296_v61 = vsub.f32 %v9315_v45, %v3294_v12  ;;  %v3299_v53 = vsub.f32 %v9333_v15, %v3294_v12 }
 0x571   : > { %v7850_v56 = vpop.eup %7849 }
 0x572   : > { %7661 = vpush %v7850_v56  ;;  %3455 = vadd.xlane.f32.xlu0 %v3454_v32  ;;  %v3479_v47 = vadd.f32 %v3478_v33, %v3472_v63  ;;  %v3300_v32 = vsub.f32 %v9335_v62, %v3294_v12  ;;  %v3301_v63 = vsub.f32 %v9340_v2, %v3294_v12  ;;  %v7183_v62 = vld [vmem:[%s11462_s3 + $0xe0] sm:$0xff] }
 0x573   : > { %7663 = vpush %v3330_v25  ;;  %v3302_v33 = vsub.f32 %v9345_v9, %v3294_v12 }
 0x574   : > { %7665 = vpush %v3355_v35  ;;  %3480 = vadd.xlane.f32.xlu1 %v3479_v47  ;;  %v7184_v35 = vld [vmem:[%s11462_s3 + $0xe8] sm:$0xff]  ;;  %v7195_v47 = vld [vmem:[%s11462_s3 + $0x140] sm:$0xff] }
 0x585   : > { %3538 = vperm.xlu1 %7733, %v7172_v14  }
 0x588   : > { %3533 = vperm.xlu0 %7732, %v7171_v41   ;;  %v7196_v41 = vld [vmem:[%s11462_s3 + $0x148] sm:$0xff] }
 0x589   : > { %3553 = vperm.xlu1 %7733, %v7175_v36   ;;  %v7199_v36 = vld [vmem:[%s11462_s3 + $0x160] sm:$0xff] }
 0x58c   : > { %3558 = vperm.xlu0 %7732, %v7176_v44   ;;  %v7200_v44 = vld [vmem:[%s11462_s3 + $0x168] sm:$0xff] }
 0x58d   : > { %3662 = vperm.xlu1 %7733, %v7187_v40   ;;  %v7181_v40 = vld [vmem:[%s11462_s3 + $0xd0] sm:$0xff] }
 0x590   : > { %3667 = vperm.xlu0 %7732, %v7188_v52   ;;  %v7182_v52 = vld [vmem:[%s11462_s3 + $0xd8] sm:$0xff] }
 0x591   : > { %3682 = vperm.xlu1 %7733, %v7191_v7   ;;  %v7185_v7 = vld [vmem:[%s11462_s3 + $0xf0] sm:$0xff] }
 0x594   : > { %3687 = vperm.xlu0 %7732, %v7192_v43  }
 0x595   : > { %3543 = vperm.xlu1 %7733, %v7173_v46   ;;  %v7186_v46 = vld [vmem:[%s11462_s3 + $0xf8] sm:$0xff] }
 0x598   : > { %3548 = vperm.xlu0 %7732, %v7174_v1   ;;  %v7197_v1 = vld [vmem:[%s11462_s3 + $0x150] sm:$0xff] }
 0x599   : > { %3563 = vperm.xlu1 %7733, %v7177_v50   ;;  %v7198_v50 = vld [vmem:[%s11462_s3 + $0x158] sm:$0xff] }
 0x59c   : > { %3568 = vperm.xlu0 %7732, %v7178_v20   ;;  %v7201_v20 = vld [vmem:[%s11462_s3 + $0x170] sm:$0xff] }
 0x59d   : > { %3672 = vperm.xlu1 %7733, %v7189_v55   ;;  %v7202_v55 = vld [vmem:[%s11462_s3 + $0x178] sm:$0xff] }
 0x5a0   : > { %3677 = vperm.xlu0 %7732, %v7190_v21   ;;  %v4008_v21 = vld [vmem:[%s11464_s5] sm:$0xff] }
 0x5a1   : > { %3692 = vperm.xlu1 %7733, %v7193_v5   ;;  %v4009_v5 = vld [vmem:[%s11464_s5 + $0x8] sm:$0xff] }
 0x5a3   : > { %s7662_s30 = spop %7661 }
 0x5a4   : > { %v3307_v17 = vstv %s7662_s30  ;;  %s7664_s22 = spop %7663  ;;  %3697 = vperm.xlu0 %7732, %v7194_v18   ;;  %v4010_v18 = vld [vmem:[%s11464_s5 + $0x10] sm:$0xff] }
 0x5a5   : > { %s9642_s15 = smul.f32 0.00012207031, %s7664_s22  ;;  %s7666_s17 = spop %7665  ;;  %3573 = vperm.xlu1 %7733, %v7179_v11   ;;  %v9647_v45 = vmul.f32 %v3307_v17, %v3297_v23  ;;  %v9649_v48 = vmul.f32 %v3307_v17, %v3298_v24  ;;  %v9651_v51 = vmul.f32 %v3307_v17, %v3295_v60  ;;  %v9653_v15 = vmul.f32 %v3307_v17, %v3296_v61  ;;  %v4011_v61 = vld [vmem:[%s11464_s5 + $0x18] sm:$0xff] }
 0x5a6   : > { %s3357_s20 = smul.f32 0.00012207031, %s7666_s17  ;;  %v9658_v2 = vmul.f32 %v3307_v17, %v3299_v53  ;;  %v9660_v9 = vmul.f32 %v3307_v17, %v3300_v32  ;;  %v9662_v56 = vmul.f32 %v3307_v17, %v3301_v63  ;;  %v9664_v25 = vmul.f32 %v3307_v17, %v3302_v33  ;;  %v4012_v53 = vld [vmem:[%s11464_s5 + $0x20] sm:$0xff]  ;;  %v4013_v63 = vld [vmem:[%s11464_s5 + $0x28] sm:$0xff] }
 0x5a7   : > { %s3358_s24 = smul.f32 %s9642_s15, %s9642_s15 }
 0x5a8   : > { %3578 = vperm.xlu0 %7732, %v7180_v42  }
 0x5a9   : > { %s3359_s25 = ssub.f32 %s3357_s20, %s3358_s24  ;;  %3593 = vperm.xlu1 %7733, %v7183_v62   ;;  %v4014_v62 = vld [vmem:[%s11464_s5 + $0x30] sm:$0xff] }
 0x5ab   : > { %s3369_s28 = sadd.f32 1e-05, %s3359_s25 }
 0x5ac   : > { %3598 = vperm.xlu0 %7732, %v7184_v35  }
 0x5ad   : > { %v3370_v14 = vstv %s3369_s28  ;;  %3702 = vperm.xlu1 %7733, %v7195_v47  }
 0x5ae   : > { %7851 = vrsqrt.f32 %v3370_v14 }
 0x5b0   : > { %3707 = vperm.xlu0 %7732, %v7196_v41   ;;  %v4015_v41 = vld [vmem:[%s11464_s5 + $0x38] sm:$0xff] }
 0x5b1   : > { %3722 = vperm.xlu1 %7733, %v7199_v36  }
 0x5b4   : > { %3727 = vperm.xlu0 %7732, %v7200_v44  }
 0x5b5   : > { %3583 = vperm.xlu1 %7733, %v7181_v40   ;;  %v4229_v40 = vld [vmem:[%s11466_s7] sm:$0xff] }
 0x5b8   : > { %v7852_v43 = vpop.eup %7851  ;;  %3588 = vperm.xlu0 %7732, %v7182_v52  }
 0x5b9   : > { %7667 = vpush %v7852_v43  ;;  %3603 = vperm.xlu1 %7733, %v7185_v7  }
 0x5bc   : > { %3608 = vperm.xlu0 %7732, %v7186_v46  }
 0x5bd   : > { %3712 = vperm.xlu1 %7733, %v7197_v1  }
 0x5c0   : > { %3717 = vperm.xlu0 %7732, %v7198_v50  }
 0x5c1   : > { %3732 = vperm.xlu1 %7733, %v7201_v20  }
 0x5c4   : > { %3737 = vperm.xlu0 %7732, %v7202_v55  }
 0x5c5   : > { %4022 = vperm.xlu1 %7733, %v4008_v21  }
 0x5c6   : > { %v3390_v12 = vpop.xlane.xlu1 %3389 }
 0x5c7   : > { %v3391_v11 = vrot.slane %v3390_v12, 4 }
 0x5c8   : > { %v3415_v23 = vpop.xlane.xlu0 %3414  ;;  %4027 = vperm.xlu0 %7732, %v4009_v5  }
 0x5c9   : > { %v3392_v24 = vadd.f32 %v3391_v11, %v3390_v12  ;;  %v3416_v60 = vrot.slane %v3415_v23, 4  ;;  %4032 = vperm.xlu1 %7733, %v4010_v18  }
 0x5cb   : > { %v3417_v17 = vadd.f32 %v3416_v60, %v3415_v23  ;;  %v3393_v32 = vrot.slane %v3392_v24, 2 }
 0x5cc   : > { %4037 = vperm.xlu0 %7732, %v4011_v61  }
 0x5cd   : > { %4042 = vperm.xlu1 %7733, %v4012_v53   ;;  %v3394_v33 = vadd.f32 %v3393_v32, %v3392_v24  ;;  %v3418_v42 = vrot.slane %v3417_v17, 2 }
 0x5cf   : > { %v3395_v35 = vrot.slane %v3394_v33, 1  ;;  %v3419_v47 = vadd.f32 %v3418_v42, %v3417_v17 }
 0x5d0   : > { %4047 = vperm.xlu0 %7732, %v4013_v63  }
 0x5d1   : > { %4052 = vperm.xlu1 %7733, %v4014_v62   ;;  %v3396_v14 = vadd.f32 %v3395_v35, %v3394_v33  ;;  %v3420_v36 = vrot.slane %v3419_v47, 1 }
 0x5d3   : > { %7669 = vpush %v3396_v14  ;;  %v3421_v44 = vadd.f32 %v3420_v36, %v3419_v47  ;;  %v9743_v36 = vstv %s9642_s15 }
 0x5d4   : > { %4057 = vperm.xlu0 %7732, %v4015_v41  }
 0x5d5   : > { %7671 = vpush %v3421_v44 }
 0x5d8   : > { %4239 = vperm.xlu0 %7732, %v4229_v40  }
 0x5ea   : > { %s9734_s21 = spop %7667 }
 0x5ff   : > { %v3456_v7 = vpop.xlane.xlu0 %3455 }
 0x600   : > { %v3457_v43 = vrot.slane %v3456_v7, 4 }
 0x601   : > { %v3481_v52 = vpop.xlane.xlu1 %3480 }
 0x602   : > { %v3482_v1 = vrot.slane %v3481_v52, 4  ;;  %v3458_v20 = vadd.f32 %v3457_v43, %v3456_v7  ;;  %v3361_v7 = vsub.f32 %v9397_v8, %v9743_v36 }
 0x604   : > { %s7670_s16 = spop %7669  ;;  %v3483_v21 = vadd.f32 %v3482_v1, %v3481_v52  ;;  %v3459_v18 = vrot.slane %v3458_v20, 2  ;;  %v3373_v52 = vstv %s9734_s21 }
 0x605   : > { %s9736_s26 = smul.f32 0.00012207031, %s7670_s16  ;;  %v3539_v46 = vpop.permute.xlu1 %3538  ;;  %s11934_s16 = sld [smem:[#allocation121_spill]] }
 0x606   : > { %s7672_s27 = spop %7671  ;;  %v3484_v23 = vrot.slane %v3483_v21, 2  ;;  %v3460_v61 = vadd.f32 %v3459_v18, %v3458_v20  ;;  %v3613_v18 = vmul.f32 %v3539_v46, %v9647_v45  ;;  %v3365_v45 = vsub.f32 %v9432_v37, %v9743_v36 }
 0x607   : > { %s3424_s28 = smul.f32 %s9736_s26, %s9736_s26  ;;  %v3534_v50 = vpop.permute.xlu0 %3533 }
 0x608   : > { %s3423_s30 = smul.f32 0.00012207031, %s7672_s27  ;;  %v3485_v53 = vadd.f32 %v3484_v23, %v3483_v21  ;;  %v3461_v32 = vrot.slane %v3460_v61, 1  ;;  %v3611_v44 = vmul.f32 %v3534_v50, %v9651_v51  ;;  %v3612_v20 = vmul.f32 %v3534_v50, %v9653_v15 }
 0x609   : > { %v3554_v55 = vpop.permute.xlu1 %3553  ;;  %v3362_v21 = vsub.f32 %v9399_v10, %v9743_v36  ;;  %v3363_v23 = vsub.f32 %v9411_v19, %v9743_v36  ;;  %v3614_v51 = vmul.f32 %v3539_v46, %v9649_v48  ;;  %v3366_v48 = vsub.f32 %v9449_v28, %v9743_v36 }
 0x60a   : > { %s3425_s22 = ssub.f32 %s3423_s30, %s3424_s28  ;;  %v3486_v33 = vrot.slane %v3485_v53, 1  ;;  %v3462_v35 = vadd.f32 %v3461_v32, %v3460_v61  ;;  %v3378_v28 = vmul.f32 %v3373_v52, %v3365_v45 }
 0x60b   : > { %v3559_v5 = vpop.permute.xlu0 %3558  ;;  %v3375_v61 = vmul.f32 %v3373_v52, %v3362_v21 }
 0x60c   : > { %s3435_s17 = sadd.f32 1e-05, %s3425_s22  ;;  %v3487_v47 = vadd.f32 %v3486_v33, %v3485_v53  ;;  %v3364_v53 = vsub.f32 %v9430_v54, %v9743_v36  ;;  %v3376_v33 = vmul.f32 %v3373_v52, %v3363_v23  ;;  %v3367_v54 = vsub.f32 %v9458_v38, %v9743_v36 }
 0x60d   : > { %v3663_v12 = vpop.permute.xlu1 %3662 }
 0x60e   : > { %v3436_v11 = vstv %s3435_s17  ;;  %v3740_v43 = vadd.f32 %v3663_v12, %v3611_v44  ;;  %v3741_v8 = vadd.f32 %v3663_v12, %v3612_v20  ;;  %v3377_v10 = vmul.f32 %v3373_v52, %v3364_v53 }
 0x60f   : > { %7853 = vrsqrt.f32 %v3436_v11  ;;  %v3668_v24 = vpop.permute.xlu0 %3667  ;;  %v3374_v11 = vmul.f32 %v3373_v52, %v3361_v7  ;;  %v3621_v44 = vmul.f32 %v3559_v5, %v3376_v33 }
 0x610   : > { %v3742_v15 = vadd.f32 %v3668_v24, %v3613_v18  ;;  %v3622_v12 = vmul.f32 %v3559_v5, %v3377_v10  ;;  %v7204_v7 = vmul.f32 -1.442695, %v3741_v8 }
 0x611   : > { %v3683_v60 = vpop.permute.xlu1 %3682  ;;  %v3619_v32 = vmul.f32 %v3554_v55, %v3374_v11 }
 0x613   : > { %v3688_v17 = vpop.permute.xlu0 %3687  ;;  %v3748_v19 = vadd.f32 %v3683_v60, %v3619_v32 }
 0x614   : > { %v3750_v20 = vadd.f32 %v3688_v17, %v3621_v44  ;;  %v3751_v18 = vadd.f32 %v3688_v17, %v3622_v12 }
 0x615   : > { %v3544_v63 = vpop.permute.xlu1 %3543  ;;  %v7211_v23 = vmul.f32 -1.442695, %v3748_v19 }
 0x616   : > { %v3615_v37 = vmul.f32 %v3544_v63, %v9658_v2  ;;  %v3616_v11 = vmul.f32 %v3544_v63, %v9660_v9  ;;  %v7213_v53 = vmul.f32 -1.442695, %v3750_v20  ;;  %v7214_v9 = vmul.f32 -1.442695, %v3751_v18 }
 0x617   : > { %v3549_v42 = vpop.permute.xlu0 %3548 }
 0x618   : > { %v3617_v38 = vmul.f32 %v3549_v42, %v9662_v56  ;;  %v3380_v56 = vmul.f32 %v3373_v52, %v3367_v54 }
 0x619   : > { %v7854_v62 = vpop.eup %7853  ;;  %v3564_v14 = vpop.permute.xlu1 %3563 }
 0x61a   : > { %7673 = vpush %v7854_v62  ;;  %v7203_v62 = vmul.f32 -1.442695, %v3740_v43  ;;  %v3623_v2 = vmul.f32 %v3564_v14, %v3378_v28 }
 0x61b   : > { %7675 = vpush %v3462_v35  ;;  %v9740_v41 = vpop.permute.xlu0 %3568  ;;  %v3620_v35 = vmul.f32 %v3554_v55, %v3375_v61  ;;  %v3368_v55 = vsub.f32 %v9462_v34, %v9743_v36  ;;  %v3618_v34 = vmul.f32 %v3549_v42, %v9664_v25 }
 0x61c   : > { %7677 = vpush %v3487_v47  ;;  %v3743_v47 = vadd.f32 %v3668_v24, %v3614_v51  ;;  %7855 = vpow2.f32 %v7203_v62  ;;  %v7205_v24 = vmul.f32 -1.442695, %v3742_v15  ;;  %v3379_v51 = vmul.f32 %v3373_v52, %v3366_v48 }
 0x61d   : > { %v3673_v40 = vpop.permute.xlu1 %3672  ;;  %v3749_v43 = vadd.f32 %v3683_v60, %v3620_v35  ;;  %7857 = vpow2.f32 %v7204_v7  ;;  %v3381_v15 = vmul.f32 %v3373_v52, %v3368_v55  ;;  %v3625_v25 = vmul.f32 %v9740_v41, %v3380_v56 }
 0x61e   : > { %v7206_v21 = vmul.f32 -1.442695, %v3743_v47  ;;  %v3744_v5 = vadd.f32 %v3673_v40, %v3615_v37  ;;  %v3745_v36 = vadd.f32 %v3673_v40, %v3616_v11  ;;  %7859 = vpow2.f32 %v7205_v24 }
 0x61f   : > { %v3678_v1 = vpop.permute.xlu0 %3677  ;;  %v7212_v60 = vmul.f32 -1.442695, %v3749_v43  ;;  %v3624_v63 = vmul.f32 %v3564_v14, %v3379_v51  ;;  %v3626_v47 = vmul.f32 %v9740_v41, %v3381_v15 }
 0x620   : > { %v3746_v8 = vadd.f32 %v3678_v1, %v3617_v38  ;;  %7861 = vpow2.f32 %v7206_v21  ;;  %v3747_v32 = vadd.f32 %v3678_v1, %v3618_v34  ;;  %v7207_v33 = vmul.f32 -1.442695, %v3744_v5 }
 0x621   : > { %v3693_v50 = vpop.permute.xlu1 %3692  ;;  %7863 = vpow2.f32 %v7211_v23  ;;  %v7208_v35 = vmul.f32 -1.442695, %v3745_v36 }
 0x622   : > { %v3752_v62 = vadd.f32 %v3693_v50, %v3623_v2  ;;  %7865 = vpow2.f32 %v7212_v60  ;;  %v3753_v10 = vadd.f32 %v3693_v50, %v3624_v63  ;;  %v7209_v42 = vmul.f32 -1.442695, %v3746_v8 }
 0x623   : > { %v3698_v46 = vpop.permute.xlu0 %3697  ;;  %7867 = vpow2.f32 %v7213_v53  ;;  %v7210_v45 = vmul.f32 -1.442695, %v3747_v32 }
 0x624   : > { %7869 = vpow2.f32 %v7214_v9  ;;  %v7215_v1 = vmul.f32 -1.442695, %v3752_v62  ;;  %v3754_v44 = vadd.f32 %v3698_v46, %v3625_v25  ;;  %v7216_v52 = vmul.f32 -1.442695, %v3753_v10 }
 0x625   : > { %v9769_v61 = vpop.permute.xlu1 %3573  ;;  %7871 = vpow2.f32 %v7207_v33  ;;  %v3755_v48 = vadd.f32 %v3698_v46, %v3626_v47  ;;  %v3426_v62 = vstv %s9736_s26  ;;  %s11935_s26 = smov %s11934_s16 }
 0x626   : > { %v7856_v14 = vpop.eup %7855  ;;  %7873 = vpow2.f32 %v7208_v35  ;;  %v7217_v7 = vmul.f32 -1.442695, %v3754_v44  ;;  %v3428_v44 = vsub.f32 %v9489_v26, %v3426_v62 }
 0x627   : > { %v9772_v17 = vpop.permute.xlu0 %3578  ;;  %7875 = vpow2.f32 %v7209_v42  ;;  %v7858_v50 = vpop.eup %7857  ;;  %v3796_v54 = vadd.f32 1.0, %v7856_v14  ;;  %v7218_v55 = vmul.f32 -1.442695, %v3755_v48  ;;  %v3429_v48 = vsub.f32 %v9483_v13, %v3426_v62 }
 0x628   : > { %7877 = vpow2.f32 %v7210_v45  ;;  %v7860_v12 = vpop.eup %7859  ;;  %v3797_v20 = vadd.f32 1.0, %v7858_v50  ;;  %v3430_v50 = vsub.f32 %v9492_v4, %v3426_v62 }
 0x629   : > { %v9775_v40 = vpop.permute.xlu1 %3593  ;;  %7879 = vpow2.f32 %v7215_v1  ;;  %v3798_v18 = vadd.f32 1.0, %v7860_v12  ;;  %v3427_v1 = vsub.f32 %v9486_v31, %v3426_v62  ;;  %v3434_v31 = vsub.f32 %v9519_v49, %v3426_v62 }
 0x62a   : > { %v7862_v41 = vpop.eup %7861  ;;  %7881 = vpow2.f32 %v7216_v52 }
 0x62b   : > { %v9778_v19 = vpop.permute.xlu0 %3598  ;;  %v7864_v24 = vpop.eup %7863  ;;  %7883 = vrcp.f32 %v3796_v54  ;;  %v3799_v11 = vadd.f32 1.0, %v7862_v41  ;;  %v3431_v54 = vsub.f32 %v9503_v39, %v3426_v62  ;;  %v3433_v41 = vsub.f32 %v9515_v0, %v3426_v62 }
 0x62c   : > { %v7866_v21 = vpop.eup %7865  ;;  %7885 = vpow2.f32 %v7217_v7  ;;  %v3844_v23 = vadd.f32 1.0, %v7864_v24  ;;  %v3432_v7 = vsub.f32 %v9509_v16, %v3426_v62 }
 0x62d   : > { %v9780_v43 = vpop.permute.xlu1 %3702  ;;  %v7868_v46 = vpop.eup %7867  ;;  %7887 = vpow2.f32 %v7218_v55  ;;  %v3845_v51 = vadd.f32 1.0, %v7866_v21 }
 0x62e   : > { %v7870_v28 = vpop.eup %7869  ;;  %7889 = vrcp.f32 %v3797_v20  ;;  %v3846_v34 = vadd.f32 1.0, %v7868_v46 }
 0x62f   : > { %v9782_v37 = vpop.permute.xlu0 %3707  ;;  %v7872_v38 = vpop.eup %7871  ;;  %7891 = vrcp.f32 %v3798_v18  ;;  %v3847_v53 = vadd.f32 1.0, %v7870_v28 }
 0x630   : > { %v7874_v60 = vpop.eup %7873  ;;  %7893 = vrcp.f32 %v3799_v11  ;;  %v3800_v9 = vadd.f32 1.0, %v7872_v38 }
 0x631   : > { %v9784_v5 = vpop.permute.xlu1 %3722  ;;  %v7876_v36 = vpop.eup %7875  ;;  %7895 = vrcp.f32 %v3844_v23  ;;  %v3801_v32 = vadd.f32 1.0, %v7874_v60 }
 0x632   : > { %v7878_v8 = vpop.eup %7877  ;;  %7897 = vrcp.f32 %v3845_v51  ;;  %v3802_v33 = vadd.f32 1.0, %v7876_v36 }
 0x633   : > { %v9786_v2 = vpop.permute.xlu0 %3727  ;;  %v7880_v63 = vpop.eup %7879  ;;  %7899 = vrcp.f32 %v3846_v34  ;;  %v3803_v15 = vadd.f32 1.0, %v7878_v8 }
 0x634   : > { %v7882_v56 = vpop.eup %7881  ;;  %7901 = vrcp.f32 %v3847_v53  ;;  %v3848_v25 = vadd.f32 1.0, %v7880_v63 }
 0x635   : > { %v3584_v35 = vpop.permute.xlu1 %3583  ;;  %v9789_v10 = vpop.eup %7883  ;;  %7903 = vrcp.f32 %v3800_v9  ;;  %v3849_v47 = vadd.f32 1.0, %v7882_v56 }
 0x636   : > { %v7886_v42 = vpop.eup %7885  ;;  %7905 = vrcp.f32 %v3801_v32 }
 0x637   : > { %v3589_v45 = vpop.permute.xlu0 %3588  ;;  %v7888_v14 = vpop.eup %7887  ;;  %7907 = vrcp.f32 %v3802_v33  ;;  %v3850_v55 = vadd.f32 1.0, %v7886_v42 }
 0x638   : > { %v9793_v52 = vpop.eup %7889  ;;  %7909 = vrcp.f32 %v3803_v15  ;;  %v3851_v24 = vadd.f32 1.0, %v7888_v14 }
 0x639   : > { %v9798_v12 = vpop.eup %7891  ;;  %7911 = vrcp.f32 %v3848_v25  ;;  %v9805_v13 = vpop.permute.xlu1 %3603 }
 0x63a   : > { %v9803_v26 = vpop.eup %7893  ;;  %7913 = vrcp.f32 %v3849_v47 }
 0x63b   : > { %v7896_v39 = vpop.eup %7895  ;;  %v9809_v0 = vpop.permute.xlu0 %3608  ;;  %7915 = vrcp.f32 %v3850_v55  ;;  %v3926_v55 = vld [vmem:[#allocation3 + $0x10] sm:$0xff] }
 0x63c   : > { %v7898_v16 = vpop.eup %7897  ;;  %7917 = vrcp.f32 %v3851_v24 }
 0x63d   : > { %v7900_v38 = vpop.eup %7899  ;;  %v3713_v15 = vpop.permute.xlu1 %3712 }
 0x63e   : > { %v7902_v53 = vpop.eup %7901 }
 0x63f   : > { %v7904_v63 = vpop.eup %7903 }
 0x64b   : > { %s7674_s15 = spop %7673 }
 0x64c   : > { %v3439_v4 = vstv %s7674_s15  ;;  %s7676_s19 = spop %7675 }
 0x64d   : > { %v3440_v20 = vmul.f32 %v3439_v4, %v3427_v1  ;;  %v3441_v21 = vmul.f32 %v3439_v4, %v3428_v44  ;;  %v3442_v18 = vmul.f32 %v3439_v4, %v3429_v48  ;;  %v3443_v46 = vmul.f32 %v3439_v4, %v3430_v50  ;;  %s9807_s29 = smul.f32 0.00012207031, %s7676_s19  ;;  %s7678_s20 = spop %7677 }
 0x64e   : > { %v3444_v49 = vmul.f32 %v3439_v4, %v3431_v54  ;;  %v3445_v11 = vmul.f32 %v3439_v4, %v3432_v7  ;;  %v3446_v28 = vmul.f32 %v3439_v4, %v3433_v41  ;;  %v3447_v23 = vmul.f32 %v3439_v4, %v3434_v31  ;;  %s3489_s23 = smul.f32 0.00012207031, %s7678_s20  ;;  %v3924_v54 = vld [vmem:[#allocation3] sm:$0xff]  ;;  %v3925_v41 = vld [vmem:[#allocation3 + $0x8] sm:$0xff] }
 0x64f   : > { %v3627_v51 = vmul.f32 %v9769_v61, %v3440_v20  ;;  %v3628_v60 = vmul.f32 %v9769_v61, %v3441_v21  ;;  %v3629_v34 = vmul.f32 %v9772_v17, %v3442_v18  ;;  %v3630_v36 = vmul.f32 %v9772_v17, %v3443_v46  ;;  %s3490_s18 = smul.f32 %s9807_s29, %s9807_s29  ;;  %v7906_v61 = vpop.eup %7905  ;;  %v3927_v20 = vld [vmem:[#allocation3 + $0x18] sm:$0xff] }
 0x650   : > { %v3631_v8 = vmul.f32 %v3584_v35, %v3444_v49  ;;  %v3632_v9 = vmul.f32 %v3584_v35, %v3445_v11  ;;  %v3633_v32 = vmul.f32 %v3589_v45, %v3446_v28  ;;  %v3634_v25 = vmul.f32 %v3589_v45, %v3447_v23  ;;  %v7908_v42 = vpop.eup %7907  ;;  %v3718_v35 = vpop.permute.xlu0 %3717  ;;  %v3928_v49 = vld [vmem:[#allocation3 + $0x20] sm:$0xff] }
 0x651   : > { %v3756_v56 = vadd.f32 %v9780_v43, %v3627_v51  ;;  %v3757_v33 = vadd.f32 %v9780_v43, %v3628_v60  ;;  %v3758_v62 = vadd.f32 %v9782_v37, %v3629_v34  ;;  %s3491_s24 = ssub.f32 %s3489_s23, %s3490_s18  ;;  %v3759_v17 = vadd.f32 %v9782_v37, %v3630_v36  ;;  %v9821_v14 = vpop.eup %7909  ;;  %v3929_v51 = vld [vmem:[#allocation3 + $0x28] sm:$0xff] }
 0x652   : > { %v3760_v47 = vadd.f32 %v3713_v15, %v3631_v8  ;;  %v3761_v1 = vadd.f32 %v3713_v15, %v3632_v9  ;;  %v7912_v44 = vpop.eup %7911  ;;  %v3762_v43 = vadd.f32 %v3718_v35, %v3633_v32  ;;  %v3763_v50 = vadd.f32 %v3718_v35, %v3634_v25 }
 0x653   : > { %7919 = vtanh.f32 %v3756_v56  ;;  %s3501_s25 = sadd.f32 1e-05, %s3491_s24  ;;  %v7914_v48 = vpop.eup %7913  ;;  %v3932_v4 = vmul.f32 %v7896_v39, %v3924_v54  ;;  %v3933_v46 = vmul.f32 %v7898_v16, %v3925_v41  ;;  %v3934_v23 = vmul.f32 %v7900_v38, %v3926_v55  ;;  %v3930_v39 = vld [vmem:[#allocation3 + $0x30] sm:$0xff] }
 0x654   : > { %7921 = vtanh.f32 %v3757_v33  ;;  %v7916_v37 = vpop.eup %7915  ;;  %v3935_v8 = vmul.f32 %v7902_v53, %v3927_v20  ;;  %v3936_v32 = vmul.f32 %v7912_v44, %v3928_v49  ;;  %v3937_v33 = vmul.f32 %v7914_v48, %v3929_v51  ;;  %v3733_v49 = vpop.permute.xlu1 %3732 }
 0x655   : > { %7923 = vtanh.f32 %v3758_v62  ;;  %v3502_v45 = vstv %s3501_s25  ;;  %v7918_v7 = vpop.eup %7917  ;;  %v3938_v15 = vmul.f32 %v7916_v37, %v3930_v39 }
 0x656   : > { %7925 = vtanh.f32 %v3759_v17 }
 0x657   : > { %7927 = vtanh.f32 %v3760_v47 }
 0x658   : > { %7929 = vtanh.f32 %v3761_v1 }
 0x659   : > { %7931 = vtanh.f32 %v3762_v43 }
 0x65a   : > { %7933 = vtanh.f32 %v3763_v50 }
 0x65b   : > { %7935 = vrsqrt.f32 %v3502_v45 }
 0x65d   : > { %v7920_v31 = vpop.eup %7919 }
 0x65e   : > { %v7922_v24 = vpop.eup %7921  ;;  %v3940_v21 = vmul.f32 %v7920_v31, %v9789_v10 }
 0x65f   : > { %v7924_v18 = vpop.eup %7923  ;;  %v3941_v11 = vmul.f32 %v7922_v24, %v9793_v52  ;;  %v3931_v52 = vld [vmem:[#allocation3 + $0x38] sm:$0xff] }
 0x660   : > { %v7926_v28 = vpop.eup %7925  ;;  %v3942_v60 = vmul.f32 %v7924_v18, %v9798_v12  ;;  %v9826_v34 = vadd.f32 %v3940_v21, %v3932_v4  ;;  %v3939_v47 = vmul.f32 %v7918_v7, %v3931_v52 }
 0x661   : > { %v7928_v36 = vpop.eup %7927  ;;  %v3943_v9 = vmul.f32 %v7926_v28, %v9803_v26  ;;  %v9829_v10 = vadd.f32 %v3941_v11, %v3933_v46  ;;  %v3738_v11 = vpop.permute.xlu0 %3737 }
 0x662   : > { %v7930_v16 = vpop.eup %7929  ;;  %v9831_v56 = vadd.f32 %v3942_v60, %v3934_v23  ;;  %3956 = vst [vmem:[#allocation3] sm:$0xff] %v9826_v34  ;;  %6758 = vst [vmem:[%s8625_s11 + $0x40] sm:$0xff] %v9826_v34  ;;  %v3944_v12 = vmul.f32 %v7928_v36, %v7904_v63  ;;  %7937 = vtanh.f32 %v9826_v34 }
 0x663   : > { %v7932_v38 = vpop.eup %7931  ;;  %v9836_v53 = vadd.f32 %v3943_v9, %v3935_v8  ;;  %3957 = vst [vmem:[#allocation3 + $0x8] sm:$0xff] %v9829_v10  ;;  %6759 = vst [vmem:[%s8625_s11 + $0x48] sm:$0xff] %v9829_v10  ;;  %v3945_v26 = vmul.f32 %v7930_v16, %v7906_v61  ;;  %7939 = vtanh.f32 %v9829_v10 }
 0x664   : > { %v7934_v62 = vpop.eup %7933  ;;  %3958 = vst [vmem:[#allocation3 + $0x10] sm:$0xff] %v9831_v56  ;;  %6760 = vst [vmem:[%s8625_s11 + $0x50] sm:$0xff] %v9831_v56  ;;  %v3946_v25 = vmul.f32 %v7932_v38, %v7908_v42  ;;  %v9844_v63 = vadd.f32 %v3944_v12, %v3936_v32  ;;  %7941 = vtanh.f32 %v9831_v56 }
 0x665   : > { %v7936_v17 = vpop.eup %7935  ;;  %3959 = vst [vmem:[#allocation3 + $0x18] sm:$0xff] %v9836_v53  ;;  %6761 = vst [vmem:[%s8625_s11 + $0x58] sm:$0xff] %v9836_v53  ;;  %v3947_v61 = vmul.f32 %v7934_v62, %v9821_v14  ;;  %v9850_v35 = vadd.f32 %v3945_v26, %v3937_v33  ;;  %v3492_v14 = vstv %s9807_s29 }
 0x666   : > { %7679 = vpush %v7936_v17  ;;  %v9852_v1 = vadd.f32 %v3946_v25, %v3938_v15  ;;  %3960 = vst [vmem:[#allocation3 + $0x20] sm:$0xff] %v9844_v63  ;;  %v3493_v44 = vsub.f32 %v9538_v27, %v3492_v14  ;;  %v3494_v43 = vsub.f32 %v9541_v59, %v3492_v14 }
 0x667   : > { %6762 = vst [vmem:[%s8625_s11 + $0x60] sm:$0xff] %v9844_v63  ;;  %v9857_v42 = vadd.f32 %v3947_v61, %v3939_v47  ;;  %3961 = vst [vmem:[#allocation3 + $0x28] sm:$0xff] %v9850_v35  ;;  %v3495_v48 = vsub.f32 %v9535_v6, %v3492_v14  ;;  %v3496_v50 = vsub.f32 %v9544_v29, %v3492_v14 }
 0x668   : > { %6763 = vst [vmem:[%s8625_s11 + $0x68] sm:$0xff] %v9850_v35  ;;  %3962 = vst [vmem:[#allocation3 + $0x30] sm:$0xff] %v9852_v1  ;;  %v3497_v45 = vsub.f32 %v9555_v22, %v3492_v14  ;;  %v3498_v37 = vsub.f32 %v9561_v30, %v3492_v14  ;;  %v3499_v54 = vsub.f32 %v9567_v57, %v3492_v14 }
 0x669   : > { %6764 = vst [vmem:[%s8625_s11 + $0x70] sm:$0xff] %v9852_v1  ;;  %3963 = vst [vmem:[#allocation3 + $0x38] sm:$0xff] %v9857_v42  ;;  %v3500_v7 = vsub.f32 %v9571_v58, %v3492_v14 }
 0x66a   : > { %6765 = vst [vmem:[%s8625_s11 + $0x78] sm:$0xff] %v9857_v42 }
 0x66c   : > { %v7938_v34 = vpop.eup %7937 }
 0x66d   : > { %v7940_v52 = vpop.eup %7939 }
 0x66e   : > { %v7942_v10 = vpop.eup %7941 }
 0x697   : > { %s7680_s21 = spop %7679 }
 0x698   : > { %v3505_v41 = vstv %s7680_s21 }
 0x699   : > { %v3506_v31 = vmul.f32 %v3505_v41, %v3493_v44  ;;  %v3507_v55 = vmul.f32 %v3505_v41, %v3494_v43  ;;  %v3508_v24 = vmul.f32 %v3505_v41, %v3495_v48  ;;  %v3509_v27 = vmul.f32 %v3505_v41, %v3496_v50 }
 0x69a   : > { %v3510_v4 = vmul.f32 %v3505_v41, %v3497_v45  ;;  %v3511_v59 = vmul.f32 %v3505_v41, %v3498_v37  ;;  %v3512_v20 = vmul.f32 %v3505_v41, %v3499_v54  ;;  %v3513_v6 = vmul.f32 %v3505_v41, %v3500_v7 }
 0x69b   : > { %v3635_v29 = vmul.f32 %v9775_v40, %v3506_v31  ;;  %v3636_v22 = vmul.f32 %v9775_v40, %v3507_v55  ;;  %v3637_v21 = vmul.f32 %v9778_v19, %v3508_v24  ;;  %v3638_v30 = vmul.f32 %v9778_v19, %v3509_v27 }
 0x69c   : > { %v3639_v57 = vmul.f32 %v9805_v13, %v3510_v4  ;;  %v3640_v58 = vmul.f32 %v9805_v13, %v3511_v59  ;;  %v3641_v18 = vmul.f32 %v9809_v0, %v3512_v20  ;;  %v3642_v46 = vmul.f32 %v9809_v0, %v3513_v6 }
 0x69d   : > { %v3764_v28 = vadd.f32 %v9784_v5, %v3635_v29  ;;  %v3765_v23 = vadd.f32 %v9784_v5, %v3636_v22  ;;  %v3766_v40 = vadd.f32 %v9786_v2, %v3637_v21  ;;  %v3767_v51 = vadd.f32 %v9786_v2, %v3638_v30 }
 0x69e   : > { %v3768_v60 = vadd.f32 %v3733_v49, %v3639_v57  ;;  %v3770_v19 = vadd.f32 %v3738_v11, %v3641_v18  ;;  %v3769_v36 = vadd.f32 %v3733_v49, %v3640_v58  ;;  %v3771_v0 = vadd.f32 %v3738_v11, %v3642_v46  ;;  %v3981_v18 = vld [vmem:[#allocation4 + $0x8] sm:$0xff]  ;;  %v3983_v46 = vld [vmem:[#allocation4 + $0x18] sm:$0xff] }
 0x69f   : > { %v7219_v13 = vmul.f32 -1.442695, %v3764_v28  ;;  %v7221_v8 = vmul.f32 -1.442695, %v3766_v40  ;;  %v7220_v9 = vmul.f32 -1.442695, %v3765_v23  ;;  %v3993_v11 = vpack.c.bf16 %v3983_v46, %v3981_v18 }
 0x6a0   : > { %v7223_v39 = vmul.f32 -1.442695, %v3768_v60  ;;  %v7225_v5 = vmul.f32 -1.442695, %v3770_v19  ;;  %v7222_v16 = vmul.f32 -1.442695, %v3767_v51 }
 0x6a1   : > { %7943 = vpow2.f32 %v7219_v13  ;;  %v7224_v2 = vmul.f32 -1.442695, %v3769_v36  ;;  %v7226_v32 = vmul.f32 -1.442695, %v3771_v0  ;;  %v3980_v28 = vld [vmem:[#allocation4] sm:$0xff]  ;;  %v3982_v23 = vld [vmem:[#allocation4 + $0x10] sm:$0xff] }
 0x6a2   : > { %7945 = vpow2.f32 %v7221_v8  ;;  %v3985_v40 = vld [vmem:[#allocation4 + $0x28] sm:$0xff]  ;;  %v3987_v51 = vld [vmem:[#allocation4 + $0x38] sm:$0xff]  ;;  %v7823_v60 = vld [vmem:[%s11463_s4] sm:$0xff]   ;;  %v3992_v19 = vpack.c.bf16 %v3982_v23, %v3980_v28 }
 0x6a3   : > { %7947 = vpow2.f32 %v7223_v39  ;;  %v3995_v36 = vpack.c.bf16 %v3987_v51, %v3985_v40  ;;  %v3984_v13 = vld [vmem:[#allocation4 + $0x20] sm:$0xff]  ;;  %v3986_v8 = vld [vmem:[#allocation4 + $0x30] sm:$0xff]  ;;  %v7824_v39 = vld [vmem:[%s11463_s4 + $0x8] sm:$0xff]  }
 0x6a4   : > { %7949 = vpow2.f32 %v7225_v5  ;;  %v3994_v0 = vpack.c.bf16 %v3986_v8, %v3984_v13  ;;  %v7826_v5 = vld [vmem:[%s11463_s4 + $0x18] sm:$0xff]  }
 0x6a5   : > { %7951 = vpow2.f32 %v7220_v9  ;;  %v7825_v9 = vld [vmem:[%s11463_s4 + $0x10] sm:$0xff]  }
 0x6a6   : > { %7953 = vpow2.f32 %v7222_v16  ;;  %v7827_v16 = vld [vmem:[%s11463_s4 + $0x20] sm:$0xff]  }
 0x6a7   : > { %7955 = vpow2.f32 %v7224_v2  ;;  %v7828_v2 = vld [vmem:[%s11463_s4 + $0x28] sm:$0xff]  }
 0x6a8   : > { %7957 = vpow2.f32 %v7226_v32  ;;  %v7829_v32 = vld [vmem:[%s11465_s6] sm:$0xff]  }
 0x6a9   : > { %7959 = vtanh.f32 %v9836_v53 }
 0x6aa   : > { %7961 = vtanh.f32 %v9844_v63 }
 0x6ab   : > { %v7944_v56 = vpop.eup %7943  ;;  %7963 = vtanh.f32 %v9850_v35 }
 0x6ac   : > { %v7946_v12 = vpop.eup %7945  ;;  %v3900_v38 = vadd.f32 1.0, %v7944_v56  ;;  %7965 = vtanh.f32 %v9852_v1 }
 0x6ad   : > { %v7948_v33 = vpop.eup %7947  ;;  %v3902_v26 = vadd.f32 1.0, %v7946_v12  ;;  %7967 = vtanh.f32 %v9857_v42  ;;  %v4023_v12 = vpop.permute.xlu1 %4022 }
 0x6ae   : > { %v7950_v62 = vpop.eup %7949  ;;  %7969 = vrcp.f32 %v3900_v38  ;;  %v3904_v15 = vadd.f32 1.0, %v7948_v33  ;;  %v4028_v33 = vpop.permute.xlu0 %4027 }
 0x6af   : > { %v7952_v25 = vpop.eup %7951  ;;  %7971 = vrcp.f32 %v3902_v26  ;;  %v3906_v53 = vadd.f32 1.0, %v7950_v62 }
 0x6b0   : > { %v7954_v17 = vpop.eup %7953  ;;  %v3901_v47 = vadd.f32 1.0, %v7952_v25  ;;  %7973 = vrcp.f32 %v3904_v15 }
 0x6b1   : > { %v7956_v63 = vpop.eup %7955  ;;  %v3903_v61 = vadd.f32 1.0, %v7954_v17  ;;  %7975 = vrcp.f32 %v3906_v53 }
 0x6b2   : > { %v7958_v35 = vpop.eup %7957  ;;  %7977 = vrcp.f32 %v3901_v47  ;;  %v3905_v14 = vadd.f32 1.0, %v7956_v63 }
 0x6b3   : > { %v7960_v1 = vpop.eup %7959  ;;  %7979 = vrcp.f32 %v3903_v61  ;;  %v3907_v44 = vadd.f32 1.0, %v7958_v35  ;;  %v4033_v35 = vpop.permute.xlu1 %4032 }
 0x6b4   : > { %v7962_v43 = vpop.eup %7961  ;;  %7981 = vrcp.f32 %v3905_v14 }
 0x6b5   : > { %v7964_v42 = vpop.eup %7963  ;;  %7983 = vrcp.f32 %v3907_v44 }
 0x6b6   : > { %v7966_v48 = vpop.eup %7965 }
 0x6b7   : > { %v7968_v50 = vpop.eup %7967 }
 0x6b8   : > { %v7970_v45 = vpop.eup %7969 }
 0x6b9   : > { %v7972_v37 = vpop.eup %7971  ;;  %v3972_v54 = vmul.f32 %v7970_v45, %v7938_v34  ;;  %v7830_v34 = vld [vmem:[%s11465_s6 + $0x8] sm:$0xff]  }
 0x6ba   : > { %v7974_v7 = vpop.eup %7973  ;;  %v3974_v41 = vmul.f32 %v7972_v37, %v7942_v10  ;;  %v7832_v10 = vld [vmem:[%s11465_s6 + $0x18] sm:$0xff]  }
 0x6bb   : > { %v7976_v31 = vpop.eup %7975  ;;  %v3976_v55 = vmul.f32 %v7974_v7, %v7962_v43 }
 0x6bc   : > { %v7978_v24 = vpop.eup %7977  ;;  %v9897_v27 = vpack.c.bf16 %v3974_v41, %v3972_v54  ;;  %v3978_v4 = vmul.f32 %v7976_v31, %v7966_v48  ;;  %v4043_v41 = vpop.permute.xlu1 %4042 }
 0x6bd   : > { %v7980_v59 = vpop.eup %7979  ;;  %v3973_v20 = vmul.f32 %v7978_v24, %v7940_v52  ;;  %v7831_v52 = vld [vmem:[%s11465_s6 + $0x10] sm:$0xff]  }
 0x6be   : > { %11628 = vst [vmem:[#allocation10_spill] sm:$0xff] %v9897_v27  ;;  %v7982_v6 = vpop.eup %7981  ;;  %v3975_v29 = vmul.f32 %v7980_v59, %v7960_v1  ;;  %v9899_v22 = vpack.c.bf16 %v3978_v4, %v3976_v55  ;;  %v4038_v1 = vpop.permute.xlu0 %4037 }
 0x6bf   : > { %v7984_v21 = vpop.eup %7983  ;;  %v3977_v30 = vmul.f32 %v7982_v6, %v7964_v42 }
 0x6c0   : > { %11629 = vst [vmem:[#allocation11_spill] sm:$0xff] %v9899_v22  ;;  %v9901_v57 = vpack.c.bf16 %v3975_v29, %v3973_v20  ;;  %v3979_v58 = vmul.f32 %v7984_v21, %v7968_v50  ;;  %v4053_v18 = vpop.permute.xlu1 %4052 }
 0x6c2   : > { %11630 = vst [vmem:[#allocation12_spill] sm:$0xff] %v9901_v57  ;;  %4128 = vmatprep.subr.bf16.mxu1 %v9901_v57  ;;  %v9904_v49 = vpack.c.bf16 %v3979_v58, %v3977_v30  ;;  %v4048_v55 = vpop.permute.xlu0 %4047 }
 0x6c3   : > { %4129 = vmatpush1.bf16.msra.mxu1 %v9897_v27 }
 0x6c4   : > { %11631 = vst [vmem:[#allocation13_spill] sm:$0xff] %v9904_v49  ;;  %4130 = vmatprep.subr.bf16.mxu1 %v9904_v49 }
 0x6c7   : > { %4131 = vmatpush1.bf16.msra.mxu1 %v9899_v22 }
 0x6c8   : > { %4309 = vmatprep.subr.bf16.mxu1 %v3993_v11  ;;  %v4058_v11 = vpop.permute.xlu0 %4057 }
 0x6ca   : > { %7233 = vmatmul.mubr.msk.bf16.vlgmr.msra.gmra.mrb[24].mxu1 %vm702_vm12, %v7823_v60 }
 0x6cb   : > { %4170 = vmatprep.mubr.bf16.mxu1 %v11478_v3  ;;  %4310 = vmatpush1.bf16.msra.mxu1 %v3992_v19 }
 0x6cc   : > { %4311 = vmatprep.subr.bf16.mxu1 %v3995_v36 }
 0x6cf   : > { %4312 = vmatpush1.bf16.msra.mxu1 %v3994_v0 }
 0x6d2   : > { %7234 = vmatmul.mubr.msk.bf16.gmra.mrb[28].mxu1 %vm702_vm12, %v7824_v39 }
 0x6d3   : > { %4180 = vmatprep.mubr.bf16.mxu1 %v11478_v3 }
 0x6da   : > { %7235 = vmatmul.mubr.msk.bf16.gmra.mrb[32].mxu1 %vm702_vm12, %v7825_v9 }
 0x6db   : > { %4190 = vmatprep.mubr.bf16.mxu1 %v11478_v3 }
 0x6e2   : > { %7236 = vmatmul.mubr.msk.bf16.gmra.mrb[36].mxu1 %vm702_vm12, %v7826_v5  ;;  %v4230_v5 = vld [vmem:[%s11466_s7 + $0x8] sm:$0xff] }
 0x6e3   : > { %4200 = vmatprep.mubr.bf16.mxu1 %v11478_v3 }
 0x6ea   : > { %7237 = vmatmul.mubr.msk.bf16.gmra.mrb[40].mxu1 %vm702_vm12, %v7827_v16 }
 0x6eb   : > { %4210 = vmatprep.mubr.bf16.mxu1 %v11478_v3 }
 0x6f2   : > { %7238 = vmatmul.mubr.msk.bf16.gmra.mrb[44].mxu1 %vm702_vm12, %v7828_v2 }
 0x6f3   : > { %4341 = vmatprep.mubr.bf16.mxu1 %v11478_v3 }
 0x6fa   : > { %7243 = vmatmul.mubr.msk.bf16.vlgmr.msra.gmra.mrb[48].mxu1 %vm702_vm12, %v7829_v32 }
 0x6fb   : > { %4351 = vmatprep.mubr.bf16.mxu1 %v11478_v3 }
 0x702   : > { %7244 = vmatmul.mubr.msk.bf16.gmra.mrb[52].mxu1 %vm702_vm12, %v7830_v34 }
 0x703   : > { %4361 = vmatprep.mubr.bf16.mxu1 %v11478_v3 }
 0x70a   : > { %7245 = vmatmul.mubr.msk.bf16.gmra.mrb[56].mxu1 %vm702_vm12, %v7831_v52  ;;  %v4231_v52 = vld [vmem:[%s11466_s7 + $0x10] sm:$0xff] }
 0x70b   : > { %4371 = vmatprep.mubr.bf16.mxu1 %v11478_v3 }
 0x712   : > { %7246 = vmatmul.mubr.msk.bf16.gmra.mrb[60].mxu1 %vm702_vm12, %v7832_v10  ;;  %v4232_v10 = vld [vmem:[%s11466_s7 + $0x18] sm:$0xff] }
 0x713   : > { %4514 = vmatprep.mubr.bf16.mxu1 %v11478_v3 }
 0x79d   : > { %v4162_v56 = vpop.f32.mrb[24].mxu1 }
 0x79e   : > { %v4164_v38 = vpop.f32.mrb[25].mxu1  ;;  %v4163_v62 = vadd.f32 %v4162_v56, %v4023_v12 }
 0x79f   : > { %v4166_v26 = vpop.f32.mrb[26].mxu1  ;;  %v4165_v53 = vadd.f32 %v4164_v38, %v4023_v12  ;;  %v4017_v12 = vld [vmem:[%s11464_s5 + $0x48] sm:$0xff] }
 0x7a0   : > { %v4167_v15 = vadd.f32 %v4166_v26, %v4028_v33  ;;  %v4168_v25 = vpop.f32.mrb[27].mxu1 }
 0x7a1   : > { %v4169_v17 = vadd.f32 %v4168_v25, %v4028_v33  ;;  %v4016_v33 = vld [vmem:[%s11464_s5 + $0x40] sm:$0xff]  ;;  %v4018_v25 = vld [vmem:[%s11464_s5 + $0x50] sm:$0xff] }
 0x7a2   : > { %v4382_v47 = vpack.c.bf16 %v4167_v15, %v4163_v62  ;;  %v4019_v15 = vld [vmem:[%s11464_s5 + $0x58] sm:$0xff] }
 0x7a3   : > { %v4383_v63 = vpack.c.bf16 %v4169_v17, %v4165_v53 }
 0x7a4   : > { %4402 = vxpose.xlu1.c.b16.start [1/2] (short) %v4382_v47, 128 }
 0x7a5   : > { %v4172_v61 = vpop.f32.mrb[28].mxu1  ;;  %4418 = vxpose.xlu0.c.b16.start [1/2] (short) %v4383_v63, 128 }
 0x7a6   : > { %v4174_v14 = vpop.f32.mrb[29].mxu1  ;;  %v4173_v43 = vadd.f32 %v4172_v61, %v4033_v35 }
 0x7a7   : > { %v4176_v44 = vpop.f32.mrb[30].mxu1  ;;  %v4175_v50 = vadd.f32 %v4174_v14, %v4033_v35  ;;  %v4240_v14 = vpop.permute.xlu0 %4239 }
 0x7a8   : > { %v4177_v42 = vadd.f32 %v4176_v44, %v4038_v1  ;;  %v4178_v48 = vpop.f32.mrb[31].mxu1 }
 0x7a9   : > { %v4179_v45 = vadd.f32 %v4178_v48, %v4038_v1 }
 0x7aa   : > { %v4384_v37 = vpack.c.bf16 %v4177_v42, %v4173_v43 }
 0x7ab   : > { %v4385_v54 = vpack.c.bf16 %v4179_v45, %v4175_v50 }
 0x7ac   : > { %4403 = vxpose.xlu1.c.b16.end [2/2] (short) %v4384_v37, 128 }
 0x7ad   : > { %v4182_v7 = vpop.f32.mrb[32].mxu1  ;;  %4419 = vxpose.xlu0.c.b16.end [2/2] (short) %v4385_v54, 128 }
 0x7ae   : > { %v4184_v31 = vpop.f32.mrb[33].mxu1  ;;  %v4183_v4 = vadd.f32 %v4182_v7, %v4043_v41 }
 0x7af   : > { %v4186_v24 = vpop.f32.mrb[34].mxu1  ;;  %v4185_v6 = vadd.f32 %v4184_v31, %v4043_v41 }
 0x7b0   : > { %v4187_v59 = vadd.f32 %v4186_v24, %v4048_v55  ;;  %v4188_v20 = vpop.f32.mrb[35].mxu1 }
 0x7b1   : > { %v4189_v29 = vadd.f32 %v4188_v20, %v4048_v55 }
 0x7b2   : > { %v4386_v21 = vpack.c.bf16 %v4187_v59, %v4183_v4 }
 0x7b3   : > { %v4387_v30 = vpack.c.bf16 %v4189_v29, %v4185_v6 }
 0x7b5   : > { %v4192_v58 = vpop.f32.mrb[36].mxu1  ;;  %4482 = vmatprep.subr.bf16.mxu1 %v4387_v30 }
 0x7b6   : > { %v4194_v46 = vpop.f32.mrb[37].mxu1  ;;  %4483 = vmatpush1.bf16.msra.mxu1 %v4386_v21  ;;  %v4193_v23 = vadd.f32 %v4192_v58, %v4053_v18 }
 0x7b7   : > { %v4196_v28 = vpop.f32.mrb[38].mxu1  ;;  %v4195_v60 = vadd.f32 %v4194_v46, %v4053_v18 }
 0x7b8   : > { %v4197_v40 = vadd.f32 %v4196_v28, %v4058_v11  ;;  %v4198_v51 = vpop.f32.mrb[39].mxu1 }
 0x7b9   : > { %v4199_v19 = vadd.f32 %v4198_v51, %v4058_v11 }
 0x7ba   : > { %v4388_v36 = vpack.c.bf16 %v4197_v40, %v4193_v23 }
 0x7bb   : > { %v4389_v13 = vpack.c.bf16 %v4199_v19, %v4195_v60 }
 0x7bd   : > { %4484 = vmatprep.subr.bf16.mxu1 %v4389_v13  ;;  %v9959_v8 = vpop.f32.mrb[40].mxu1 }
 0x7be   : > { %4485 = vmatpush1.bf16.msra.mxu1 %v4388_v36  ;;  %v9961_v0 = vpop.f32.mrb[41].mxu1 }
 0x7bf   : > { %v9963_v39 = vpop.f32.mrb[42].mxu1 }
 0x7c0   : > { %v9965_v9 = vpop.f32.mrb[43].mxu1 }
 0x7c5   : > { %v9970_v16 = vpop.f32.mrb[44].mxu1 }
 0x7c6   : > { %v9972_v2 = vpop.f32.mrb[45].mxu1 }
 0x7c7   : > { %v9974_v32 = vpop.f32.mrb[46].mxu1 }
 0x7c8   : > { %4244 = vperm.xlu1 %7733, %v4230_v5   ;;  %v9976_v34 = vpop.f32.mrb[47].mxu1 }
 0x7cc   : > { %4249 = vperm.xlu1 %7733, %v4231_v52  }
 0x7cd   : > { %v4343_v56 = vpop.f32.mrb[48].mxu1 }
 0x7ce   : > { %v4345_v38 = vpop.f32.mrb[49].mxu1  ;;  %4254 = vperm.xlu0 %7732, %v4232_v10   ;;  %v4344_v59 = vadd.f32 %v4343_v56, %v4240_v14 }
 0x7cf   : > { %v4347_v26 = vpop.f32.mrb[50].mxu1  ;;  %v4346_v20 = vadd.f32 %v4345_v38, %v4240_v14 }
 0x7d0   : > { %4067 = vperm.xlu1 %7733, %v4017_v12   ;;  %v4349_v62 = vpop.f32.mrb[51].mxu1 }
 0x7d2   : > { %4062 = vperm.xlu0 %7732, %v4016_v33  }
 0x7d4   : > { %4077 = vperm.xlu1 %7733, %v4019_v15  }
 0x7d5   : > { %v4353_v53 = vpop.f32.mrb[52].mxu1 }
 0x7d6   : > { %4072 = vperm.xlu0 %7732, %v4018_v25   ;;  %v4355_v17 = vpop.f32.mrb[53].mxu1 }
 0x7d7   : > { %v4357_v47 = vpop.f32.mrb[54].mxu1 }
 0x7d8   : > { %v4359_v63 = vpop.f32.mrb[55].mxu1 }
 0x7dd   : > { %v10055_v36 = vpop.f32.mrb[56].mxu1 }
 0x7de   : > { %11632 = vst [vmem:[#allocation14_spill] sm:$0xff] %v10055_v36  ;;  %v10069_v56 = vpop.f32.mrb[57].mxu1 }
 0x7df   : > { %11635 = vst [vmem:[#allocation17_spill] sm:$0xff] %v10069_v56  ;;  %v10071_v38 = vpop.f32.mrb[58].mxu1 }
 0x7e0   : > { %11636 = vst [vmem:[#allocation18_spill] sm:$0xff] %v10071_v38  ;;  %v10075_v33 = vpop.f32.mrb[59].mxu1 }
 0x7e1   : > { %11637 = vst [vmem:[#allocation19_spill] sm:$0xff] %v10075_v33 }
 0x7e5   : > { %v10093_v25 = vpop.f32.mrb[60].mxu1 }
 0x7e6   : > { %11642 = vst [vmem:[#allocation24_spill] sm:$0xff] %v10093_v25 }
 0x80e   : > { %v9996_v61 = vpop.trf.xlu1 }
 0x80f   : > { %7247 = vmatmul.mubr.msk.bf16.vlgmr.msra.gmra.mrb[64].mxu1 %vm702_vm12, %v9996_v61  ;;  %v10008_v44 = vpop.trf.xlu0 }
 0x810   : > { %4524 = vmatprep.mubr.bf16.mxu1 %v11478_v3 }
 0x812   : > { %v10001_v35 = vpop.trf.xlu1 }
 0x813   : > { %v10013_v43 = vpop.trf.xlu0 }
 0x816   : > { %v10006_v1 = vpop.trf.xlu1 }
 0x817   : > { %7248 = vmatmul.mubr.msk.bf16.gmra.mrb[68].mxu1 %vm702_vm12, %v10001_v35  ;;  %v10020_v48 = vpop.trf.xlu0 }
 0x818   : > { %4534 = vmatprep.mubr.bf16.mxu1 %v11478_v3 }
 0x81a   : > { %v10015_v42 = vpop.trf.xlu1 }
 0x81b   : > { %v10026_v45 = vpop.trf.xlu0 }
 0x81e   : > { %v10022_v50 = vpop.trf.xlu1 }
 0x81f   : > { %7249 = vmatmul.mubr.msk.bf16.gmra.mrb[72].mxu1 %vm702_vm12, %v10006_v1  ;;  %v10031_v54 = vpop.trf.xlu0 }
 0x820   : > { %4544 = vmatprep.mubr.bf16.mxu1 %v11478_v3 }
 0x822   : > { %v10029_v37 = vpop.trf.xlu1 }
 0x823   : > { %v10038_v41 = vpop.trf.xlu0 }
 0x826   : > { %v10036_v7 = vpop.trf.xlu1 }
 0x827   : > { %7250 = vmatmul.mubr.msk.bf16.gmra.mrb[76].mxu1 %vm702_vm12, %v10015_v42  ;;  %v10045_v55 = vpop.trf.xlu0 }
 0x828   : > { %4554 = vmatprep.mubr.bf16.mxu1 %v11478_v3 }
 0x82a   : > { %v10043_v31 = vpop.trf.xlu1 }
 0x82b   : > { %v10049_v4 = vpop.trf.xlu0 }
 0x82f   : > { %7251 = vmatmul.mubr.msk.bf16.gmra.mrb[80].mxu1 %vm702_vm12, %v10022_v50 }
 0x830   : > { %4564 = vmatprep.mubr.bf16.mxu1 %v11478_v3 }
 0x837   : > { %7252 = vmatmul.mubr.msk.bf16.gmra.mrb[84].mxu1 %vm702_vm12, %v10029_v37 }
 0x838   : > { %4574 = vmatprep.mubr.bf16.mxu1 %v11478_v3 }
 0x83f   : > { %7253 = vmatmul.mubr.msk.bf16.gmra.mrb[88].mxu1 %vm702_vm12, %v10036_v7 }
 0x840   : > { %4584 = vmatprep.mubr.bf16.mxu1 %v11478_v3 }
 0x847   : > { %v4245_v24 = vpop.permute.xlu1 %4244  ;;  %7254 = vmatmul.mubr.msk.bf16.gmra.mrb[92].mxu1 %vm702_vm12, %v10043_v31 }
 0x848   : > { %v4348_v6 = vadd.f32 %v4347_v26, %v4245_v24  ;;  %v4350_v29 = vadd.f32 %v4349_v62, %v4245_v24  ;;  %4594 = vmatprep.mubr.bf16.mxu1 %v11478_v3 }
 0x84a   : > { %v4394_v21 = vpack.c.bf16 %v4348_v6, %v4344_v59  ;;  %v4395_v30 = vpack.c.bf16 %v4350_v29, %v4346_v20 }
 0x84b   : > { %v4250_v58 = vpop.permute.xlu1 %4249 }
 0x84c   : > { %4675 = vmatprep.subr.bf16.mxu1 %v4395_v30  ;;  %v4354_v46 = vadd.f32 %v4353_v53, %v4250_v58  ;;  %v4356_v11 = vadd.f32 %v4355_v17, %v4250_v58  ;;  %v10096_v53 = vpop.f32.mrb[61].mxu1 }
 0x84d   : > { %4676 = vmatpush1.bf16.msra.mxu1 %v4394_v21  ;;  %v4255_v18 = vpop.permute.xlu0 %4254  ;;  %11643 = vst [vmem:[#allocation25_spill] sm:$0xff] %v10096_v53 }
 0x84e   : > { %v4358_v28 = vadd.f32 %v4357_v47, %v4255_v18  ;;  %v4360_v23 = vadd.f32 %v4359_v63, %v4255_v18 }
 0x84f   : > { %v4068_v40 = vpop.permute.xlu1 %4067  ;;  %7255 = vmatmul.mubr.msk.bf16.gmra.mrb[96].mxu1 %vm702_vm12, %v10008_v44 }
 0x850   : > { %v4396_v51 = vpack.c.bf16 %v4358_v28, %v4354_v46  ;;  %v4397_v60 = vpack.c.bf16 %v4360_v23, %v4356_v11  ;;  %4604 = vmatprep.mubr.bf16.mxu1 %v11478_v3  ;;  %v10058_v13 = vadd.f32 %v9963_v39, %v4068_v40  ;;  %v10061_v5 = vadd.f32 %v9965_v9, %v4068_v40 }
 0x851   : > { %v4063_v19 = vpop.permute.xlu0 %4062 }
 0x852   : > { %11633 = vst [vmem:[#allocation15_spill] sm:$0xff] %v10058_v13  ;;  %v10064_v52 = vadd.f32 %v9959_v8, %v4063_v19  ;;  %v10067_v10 = vadd.f32 %v9961_v0, %v4063_v19  ;;  %4677 = vmatprep.subr.bf16.mxu1 %v4397_v60 }
 0x853   : > { %v4078_v12 = vpop.permute.xlu1 %4077  ;;  %4678 = vmatpush1.bf16.msra.mxu1 %v4396_v51 }
 0x854   : > { %11634 = vst [vmem:[#allocation16_spill] sm:$0xff] %v10064_v52  ;;  %v4391_v9 = vpack.c.bf16 %v10061_v5, %v10067_v10  ;;  %v10080_v26 = vadd.f32 %v9974_v32, %v4078_v12  ;;  %v10083_v0 = vadd.f32 %v9976_v34, %v4078_v12 }
 0x855   : > { %v4073_v8 = vpop.permute.xlu0 %4072 }
 0x856   : > { %11638 = vst [vmem:[#allocation20_spill] sm:$0xff] %v10080_v26  ;;  %11639 = vst [vmem:[#allocation21_spill] sm:$0xff] %v10083_v0  ;;  %v10086_v62 = vadd.f32 %v9970_v16, %v4073_v8  ;;  %v10089_v15 = vadd.f32 %v9972_v2, %v4073_v8  ;;  %v10102_v16 = vpop.f32.mrb[62].mxu1 }
 0x857   : > { %7256 = vmatmul.mubr.msk.bf16.gmra.mrb[100].mxu1 %vm702_vm12, %v10013_v43  ;;  %11644 = vst [vmem:[#allocation26_spill] sm:$0xff] %v10102_v16  ;;  %v10104_v17 = vpop.f32.mrb[63].mxu1 }
 0x858   : > { %11640 = vst [vmem:[#allocation22_spill] sm:$0xff] %v10086_v62  ;;  %11641 = vst [vmem:[#allocation23_spill] sm:$0xff] %v10089_v15  ;;  %4614 = vmatprep.mubr.bf16.mxu1 %v11478_v3 }
 0x859   : > { %11645 = vst [vmem:[#allocation27_spill] sm:$0xff] %v10104_v17 }
 0x85f   : > { %7257 = vmatmul.mubr.msk.bf16.gmra.mrb[104].mxu1 %vm702_vm12, %v10020_v48 }
 0x860   : > { %4624 = vmatprep.mubr.bf16.mxu1 %v11478_v3 }
 0x867   : > { %7258 = vmatmul.mubr.msk.bf16.gmra.mrb[108].mxu1 %vm702_vm12, %v10026_v45 }
 0x868   : > { %4634 = vmatprep.mubr.bf16.mxu1 %v11478_v3 }
 0x86f   : > { %7259 = vmatmul.mubr.msk.bf16.gmra.mrb[112].mxu1 %vm702_vm12, %v10031_v54 }
 0x870   : > { %4644 = vmatprep.mubr.bf16.mxu1 %v11478_v3 }
 0x877   : > { %7260 = vmatmul.mubr.msk.bf16.gmra.mrb[116].mxu1 %vm702_vm12, %v10038_v41 }
 0x878   : > { %4654 = vmatprep.mubr.bf16.mxu1 %v11478_v3 }
 0x87f   : > { %7261 = vmatmul.mubr.msk.bf16.gmra.mrb[120].mxu1 %vm702_vm12, %v10045_v55 }
 0x880   : > { %4664 = vmatprep.mubr.bf16.mxu1 %v11478_v3 }
 0x887   : > { %7262 = vmatmul.mubr.msk.bf16.gmra.mrb[124].mxu1 %vm702_vm12, %v10049_v4 }
 0x888   : > { %4707 = vmatprep.mubr.bf16.mxu1 %v11478_v3 }
 0x88f   : > { %7263 = vmatmul.mubr.msk.bf16.vlgmr.msra.gmra.mrb[128].mxu1 %vm702_vm12, %v9996_v61 }
 0x890   : > { %4717 = vmatprep.mubr.bf16.mxu1 %v11478_v3 }
 0x897   : > { %7264 = vmatmul.mubr.msk.bf16.gmra.mrb[132].mxu1 %vm702_vm12, %v10001_v35 }
 0x898   : > { %4727 = vmatprep.mubr.bf16.mxu1 %v11478_v3 }
 0x89f   : > { %7265 = vmatmul.mubr.msk.bf16.gmra.mrb[136].mxu1 %vm702_vm12, %v10006_v1 }
 0x8a0   : > { %4737 = vmatprep.mubr.bf16.mxu1 %v11478_v3 }
 0x8a7   : > { %7266 = vmatmul.mubr.msk.bf16.gmra.mrb[140].mxu1 %vm702_vm12, %v10015_v42 }
 0x8a8   : > { %4747 = vmatprep.mubr.bf16.mxu1 %v11478_v3 }
 0x8af   : > { %7267 = vmatmul.mubr.msk.bf16.gmra.mrb[144].mxu1 %vm702_vm12, %v10022_v50 }
 0x8b0   : > { %4757 = vmatprep.mubr.bf16.mxu1 %v11478_v3 }
 0x8b7   : > { %7268 = vmatmul.mubr.msk.bf16.gmra.mrb[148].mxu1 %vm702_vm12, %v10029_v37 }
 0x8b8   : > { %4767 = vmatprep.mubr.bf16.mxu1 %v11478_v3 }
 0x8bf   : > { %7269 = vmatmul.mubr.msk.bf16.gmra.mrb[152].mxu1 %vm702_vm12, %v10036_v7 }
 0x8c0   : > { %4777 = vmatprep.mubr.bf16.mxu1 %v11478_v3 }
 0x8c7   : > { %7270 = vmatmul.mubr.msk.bf16.gmra.mrb[156].mxu1 %vm702_vm12, %v10043_v31 }
 0x8c8   : > { %4787 = vmatprep.mubr.bf16.mxu1 %v11478_v3 }
 0x8cf   : > { %7271 = vmatmul.mubr.msk.bf16.gmra.mrb[160].mxu1 %vm702_vm12, %v10008_v44 }
 0x8d0   : > { %4797 = vmatprep.mubr.bf16.mxu1 %v11478_v3 }
 0x8d7   : > { %7272 = vmatmul.mubr.msk.bf16.gmra.mrb[164].mxu1 %vm702_vm12, %v10013_v43 }
 0x8d8   : > { %4807 = vmatprep.mubr.bf16.mxu1 %v11478_v3 }
 0x8df   : > { %7273 = vmatmul.mubr.msk.bf16.gmra.mrb[168].mxu1 %vm702_vm12, %v10020_v48 }
 0x8e0   : > { %4817 = vmatprep.mubr.bf16.mxu1 %v11478_v3 }
 0x8e2   : > { %v10157_v2 = vpop.f32.mrb[64].mxu1 }
 0x8e3   : > { %v10159_v47 = vpop.f32.mrb[65].mxu1 }
 0x8e4   : > { %v4868_v63 = vmax.f32 %v10157_v2, %v10159_v47  ;;  %v10163_v61 = vpop.f32.mrb[66].mxu1 }
 0x8e5   : > { %v10165_v35 = vpop.f32.mrb[67].mxu1 }
 0x8e6   : > { %v4871_v14 = vmax.f32 %v10163_v61, %v10165_v35  ;;  %4869 = vmax.xlane.f32.xlu1 %v4868_v63 }
 0x8e7   : > { %7274 = vmatmul.mubr.msk.bf16.gmra.mrb[172].mxu1 %vm702_vm12, %v10026_v45 }
 0x8e8   : > { %4872 = vmax.xlane.f32.xlu0 %v4871_v14  ;;  %4827 = vmatprep.mubr.bf16.mxu1 %v11478_v3 }
 0x8ea   : > { %v10172_v1 = vpop.f32.mrb[68].mxu1 }
 0x8eb   : > { %v10174_v44 = vpop.f32.mrb[69].mxu1 }
 0x8ec   : > { %v4874_v43 = vmax.f32 %v10172_v1, %v10174_v44  ;;  %v10178_v42 = vpop.f32.mrb[70].mxu1 }
 0x8ed   : > { %v10180_v48 = vpop.f32.mrb[71].mxu1 }
 0x8ee   : > { %v4877_v50 = vmax.f32 %v10178_v42, %v10180_v48  ;;  %4875 = vmax.xlane.f32.xlu0 %v4874_v43 }
 0x8ef   : > { %7275 = vmatmul.mubr.msk.bf16.gmra.mrb[176].mxu1 %vm702_vm12, %v10031_v54 }
 0x8f0   : > { %4878 = vmax.xlane.f32.xlu1 %v4877_v50  ;;  %4837 = vmatprep.mubr.bf16.mxu1 %v11478_v3 }
 0x8f2   : > { %v10187_v45 = vpop.f32.mrb[72].mxu1 }
 0x8f3   : > { %v10189_v37 = vpop.f32.mrb[73].mxu1 }
 0x8f4   : > { %v4880_v7 = vmax.f32 %v10187_v45, %v10189_v37  ;;  %v10193_v31 = vpop.f32.mrb[74].mxu1 }
 0x8f5   : > { %v10195_v24 = vpop.f32.mrb[75].mxu1 }
 0x8f6   : > { %v4883_v59 = vmax.f32 %v10193_v31, %v10195_v24  ;;  %4881 = vmax.xlane.f32.xlu0 %v4880_v7 }
 0x8f7   : > { %7276 = vmatmul.mubr.msk.bf16.gmra.mrb[180].mxu1 %vm702_vm12, %v10038_v41 }
 0x8f8   : > { %4884 = vmax.xlane.f32.xlu1 %v4883_v59  ;;  %4847 = vmatprep.mubr.bf16.mxu1 %v11478_v3 }
 0x8fa   : > { %v10202_v54 = vpop.f32.mrb[76].mxu1 }
 0x8fb   : > { %v10204_v20 = vpop.f32.mrb[77].mxu1 }
 0x8fc   : > { %v4886_v6 = vmax.f32 %v10202_v54, %v10204_v20  ;;  %v10208_v29 = vpop.f32.mrb[78].mxu1 }
 0x8fd   : > { %v10210_v21 = vpop.f32.mrb[79].mxu1 }
 0x8fe   : > { %v4889_v30 = vmax.f32 %v10208_v29, %v10210_v21  ;;  %4887 = vmax.xlane.f32.xlu0 %v4886_v6 }
 0x8ff   : > { %7277 = vmatmul.mubr.msk.bf16.gmra.mrb[184].mxu1 %vm702_vm12, %v10045_v55 }
 0x900   : > { %4890 = vmax.xlane.f32.xlu1 %v4889_v30  ;;  %4857 = vmatprep.mubr.bf16.mxu1 %v11478_v3 }
 0x902   : > { %v10217_v41 = vpop.f32.mrb[80].mxu1 }
 0x903   : > { %v10219_v58 = vpop.f32.mrb[81].mxu1 }
 0x904   : > { %v4892_v18 = vmax.f32 %v10217_v41, %v10219_v58  ;;  %v10223_v46 = vpop.f32.mrb[82].mxu1 }
 0x905   : > { %v10225_v11 = vpop.f32.mrb[83].mxu1 }
 0x906   : > { %v4895_v28 = vmax.f32 %v10223_v46, %v10225_v11  ;;  %4893 = vmax.xlane.f32.xlu0 %v4892_v18 }
 0x907   : > { %7278 = vmatmul.mubr.msk.bf16.gmra.mrb[188].mxu1 %vm702_vm12, %v10049_v4 }
 0x908   : > { %4896 = vmax.xlane.f32.xlu1 %v4895_v28  ;;  %5924 = vmatprep.mubr.bf16.mxu1 %v4391_v9 }
 0x90a   : > { %v10234_v55 = vpop.f32.mrb[84].mxu1 }
 0x90b   : > { %v10236_v23 = vpop.f32.mrb[85].mxu1 }
 0x90c   : > { %v4898_v40 = vmax.f32 %v10234_v55, %v10236_v23  ;;  %v10240_v51 = vpop.f32.mrb[86].mxu1 }
 0x90d   : > { %v10242_v60 = vpop.f32.mrb[87].mxu1 }
 0x90e   : > { %v4901_v19 = vmax.f32 %v10240_v51, %v10242_v60  ;;  %4899 = vmax.xlane.f32.xlu0 %v4898_v40 }
 0x910   : > { %4902 = vmax.xlane.f32.xlu1 %v4901_v19 }
 0x912   : > { %v10246_v4 = vpop.f32.mrb[88].mxu1 }
 0x913   : > { %v10248_v5 = vpop.f32.mrb[89].mxu1 }
 0x914   : > { %v4904_v10 = vmax.f32 %v10246_v4, %v10248_v5  ;;  %v10252_v12 = vpop.f32.mrb[90].mxu1 }
 0x915   : > { %v10254_v9 = vpop.f32.mrb[91].mxu1 }
 0x916   : > { %v4907_v8 = vmax.f32 %v10252_v12, %v10254_v9  ;;  %4905 = vmax.xlane.f32.xlu0 %v4904_v10 }
 0x918   : > { %4908 = vmax.xlane.f32.xlu1 %v4907_v8 }
 0x91a   : > { %v10258_v63 = vpop.f32.mrb[92].mxu1 }
 0x91b   : > { %v10260_v14 = vpop.f32.mrb[93].mxu1 }
 0x91c   : > { %v4910_v43 = vmax.f32 %v10258_v63, %v10260_v14  ;;  %v10264_v50 = vpop.f32.mrb[94].mxu1 }
 0x91d   : > { %v10266_v7 = vpop.f32.mrb[95].mxu1 }
 0x91e   : > { %v4913_v59 = vmax.f32 %v10264_v50, %v10266_v7  ;;  %4911 = vmax.xlane.f32.xlu0 %v4910_v43 }
 0x920   : > { %4914 = vmax.xlane.f32.xlu1 %v4913_v59 }
 0x922   : > { %v10270_v6 = vpop.f32.mrb[96].mxu1 }
 0x923   : > { %v10272_v30 = vpop.f32.mrb[97].mxu1 }
 0x924   : > { %v4916_v18 = vmax.f32 %v10270_v6, %v10272_v30  ;;  %v10276_v28 = vpop.f32.mrb[98].mxu1 }
 0x925   : > { %v10278_v40 = vpop.f32.mrb[99].mxu1 }
 0x926   : > { %v4919_v19 = vmax.f32 %v10276_v28, %v10278_v40  ;;  %4917 = vmax.xlane.f32.xlu0 %v4916_v18 }
 0x928   : > { %4920 = vmax.xlane.f32.xlu1 %v4919_v19 }
 0x92a   : > { %v10282_v10 = vpop.f32.mrb[100].mxu1 }
 0x92b   : > { %v10284_v8 = vpop.f32.mrb[101].mxu1 }
 0x92c   : > { %v4922_v43 = vmax.f32 %v10282_v10, %v10284_v8  ;;  %v10288_v59 = vpop.f32.mrb[102].mxu1 }
 0x92d   : > { %v10290_v3 = vpop.f32.mrb[103].mxu1 }
 0x92e   : > { %v4925_v34 = vmax.f32 %v10288_v59, %v10290_v3  ;;  %4923 = vmax.xlane.f32.xlu0 %v4922_v43 }
 0x930   : > { %4926 = vmax.xlane.f32.xlu1 %v4925_v34 }
 0x932   : > { %v10294_v32 = vpop.f32.mrb[104].mxu1 }
 0x933   : > { %v10296_v18 = vpop.f32.mrb[105].mxu1 }
 0x934   : > { %v4928_v19 = vmax.f32 %v10294_v32, %v10296_v18  ;;  %v10300_v39 = vpop.f32.mrb[106].mxu1 }
 0x935   : > { %v10302_v22 = vpop.f32.mrb[107].mxu1 }
 0x936   : > { %v4931_v49 = vmax.f32 %v10300_v39, %v10302_v22  ;;  %4929 = vmax.xlane.f32.xlu0 %v4928_v19 }
 0x938   : > { %4932 = vmax.xlane.f32.xlu1 %v4931_v49 }
 0x93a   : > { %v10306_v27 = vpop.f32.mrb[108].mxu1 }
 0x93b   : > { %v10308_v43 = vpop.f32.mrb[109].mxu1 }
 0x93c   : > { %v4934_v34 = vmax.f32 %v10306_v27, %v10308_v43  ;;  %v10312_v57 = vpop.f32.mrb[110].mxu1 }
 0x93d   : > { %v10314_v17 = vpop.f32.mrb[111].mxu1 }
 0x93e   : > { %v4937_v16 = vmax.f32 %v10312_v57, %v10314_v17  ;;  %4935 = vmax.xlane.f32.xlu0 %v4934_v34 }
 0x940   : > { %4938 = vmax.xlane.f32.xlu1 %v4937_v16 }
 0x942   : > { %v10318_v53 = vpop.f32.mrb[112].mxu1 }
 0x943   : > { %v10320_v19 = vpop.f32.mrb[113].mxu1 }
 0x944   : > { %v4940_v49 = vmax.f32 %v10318_v53, %v10320_v19  ;;  %v10324_v25 = vpop.f32.mrb[114].mxu1 }
 0x945   : > { %v10326_v62 = vpop.f32.mrb[115].mxu1 }
 0x946   : > { %11646 = vst [vmem:[#allocation28_spill] sm:$0xff] %v10326_v62  ;;  %v4943_v26 = vmax.f32 %v10324_v25, %v10326_v62  ;;  %4941 = vmax.xlane.f32.xlu0 %v4940_v49 }
 0x948   : > { %4944 = vmax.xlane.f32.xlu1 %v4943_v26 }
 0x94a   : > { %v10330_v15 = vpop.f32.mrb[116].mxu1 }
 0x94b   : > { %11647 = vst [vmem:[#allocation29_spill] sm:$0xff] %v10330_v15  ;;  %v10332_v34 = vpop.f32.mrb[117].mxu1 }
 0x94c   : > { %11648 = vst [vmem:[#allocation30_spill] sm:$0xff] %v10332_v34  ;;  %v4946_v16 = vmax.f32 %v10330_v15, %v10332_v34  ;;  %v10336_v0 = vpop.f32.mrb[118].mxu1 }
 0x94d   : > { %11649 = vst [vmem:[#allocation31_spill] sm:$0xff] %v10336_v0  ;;  %v10338_v52 = vpop.f32.mrb[119].mxu1 }
 0x94e   : > { %11650 = vst [vmem:[#allocation32_spill] sm:$0xff] %v10338_v52  ;;  %v4949_v13 = vmax.f32 %v10336_v0, %v10338_v52  ;;  %4947 = vmax.xlane.f32.xlu0 %v4946_v16 }
 0x950   : > { %4950 = vmax.xlane.f32.xlu1 %v4949_v13 }
 0x952   : > { %v10342_v33 = vpop.f32.mrb[120].mxu1 }
 0x953   : > { %11651 = vst [vmem:[#allocation33_spill] sm:$0xff] %v10342_v33  ;;  %v10344_v49 = vpop.f32.mrb[121].mxu1 }
 0x954   : > { %11652 = vst [vmem:[#allocation34_spill] sm:$0xff] %v10344_v49  ;;  %v4952_v26 = vmax.f32 %v10342_v33, %v10344_v49  ;;  %v10348_v38 = vpop.f32.mrb[122].mxu1 }
 0x955   : > { %11653 = vst [vmem:[#allocation35_spill] sm:$0xff] %v10348_v38  ;;  %v10350_v56 = vpop.f32.mrb[123].mxu1 }
 0x956   : > { %11654 = vst [vmem:[#allocation36_spill] sm:$0xff] %v10350_v56  ;;  %v4955_v36 = vmax.f32 %v10348_v38, %v10350_v56  ;;  %4953 = vmax.xlane.f32.xlu0 %v4952_v26 }
 0x958   : > { %4956 = vmax.xlane.f32.xlu1 %v4955_v36 }
 0x95a   : > { %v10354_v34 = vpop.f32.mrb[124].mxu1 }
 0x95b   : > { %11655 = vst [vmem:[#allocation37_spill] sm:$0xff] %v10354_v34  ;;  %v10356_v16 = vpop.f32.mrb[125].mxu1 }
 0x95c   : > { %11656 = vst [vmem:[#allocation38_spill] sm:$0xff] %v10356_v16  ;;  %v4958_v13 = vmax.f32 %v10354_v34, %v10356_v16  ;;  %v10360_v52 = vpop.f32.mrb[126].mxu1 }
 0x95d   : > { %11657 = vst [vmem:[#allocation39_spill] sm:$0xff] %v10360_v52  ;;  %v10362_v0 = vpop.f32.mrb[127].mxu1 }
 0x95e   : > { %11658 = vst [vmem:[#allocation40_spill] sm:$0xff] %v10362_v0  ;;  %v4961_v49 = vmax.f32 %v10360_v52, %v10362_v0  ;;  %4959 = vmax.xlane.f32.xlu0 %v4958_v13 }
 0x960   : > { %4962 = vmax.xlane.f32.xlu1 %v4961_v49 }
 0x962   : > { %v10366_v33 = vpop.f32.mrb[128].mxu1 }
 0x963   : > { %11659 = vst [vmem:[#allocation41_spill] sm:$0xff] %v10366_v33  ;;  %v10368_v26 = vpop.f32.mrb[129].mxu1 }
 0x964   : > { %11660 = vst [vmem:[#allocation42_spill] sm:$0xff] %v10368_v26  ;;  %v5380_v36 = vmax.f32 %v10366_v33, %v10368_v26  ;;  %v10372_v56 = vpop.f32.mrb[130].mxu1 }
 0x965   : > { %11661 = vst [vmem:[#allocation43_spill] sm:$0xff] %v10372_v56  ;;  %v10374_v38 = vpop.f32.mrb[131].mxu1 }
 0x966   : > { %11662 = vst [vmem:[#allocation44_spill] sm:$0xff] %v10374_v38  ;;  %v5383_v16 = vmax.f32 %v10372_v56, %v10374_v38  ;;  %5381 = vmax.xlane.f32.xlu0 %v5380_v36 }
 0x968   : > { %5384 = vmax.xlane.f32.xlu1 %v5383_v16 }
 0x96a   : > { %v10378_v34 = vpop.f32.mrb[132].mxu1 }
 0x96b   : > { %11663 = vst [vmem:[#allocation45_spill] sm:$0xff] %v10378_v34  ;;  %v10380_v13 = vpop.f32.mrb[133].mxu1 }
 0x96c   : > { %11664 = vst [vmem:[#allocation46_spill] sm:$0xff] %v10380_v13  ;;  %v5386_v49 = vmax.f32 %v10378_v34, %v10380_v13  ;;  %v10384_v0 = vpop.f32.mrb[134].mxu1 }
 0x96d   : > { %11665 = vst [vmem:[#allocation47_spill] sm:$0xff] %v10384_v0  ;;  %v10386_v52 = vpop.f32.mrb[135].mxu1 }
 0x96e   : > { %11666 = vst [vmem:[#allocation48_spill] sm:$0xff] %v10386_v52  ;;  %v5389_v26 = vmax.f32 %v10384_v0, %v10386_v52  ;;  %5387 = vmax.xlane.f32.xlu0 %v5386_v49 }
 0x970   : > { %5390 = vmax.xlane.f32.xlu1 %v5389_v26 }
 0x972   : > { %v10390_v33 = vpop.f32.mrb[136].mxu1 }
 0x973   : > { %11667 = vst [vmem:[#allocation49_spill] sm:$0xff] %v10390_v33  ;;  %v4870_v36 = vpop.xlane.xlu1 %4869  ;;  %v10392_v16 = vpop.f32.mrb[137].mxu1 }
 0x974   : > { %11668 = vst [vmem:[#allocation50_spill] sm:$0xff] %v10392_v16  ;;  %v4964_v38 = vsub.f32 %v10157_v2, %v4870_v36  ;;  %v4965_v56 = vsub.f32 %v10159_v47, %v4870_v36  ;;  %v5392_v13 = vmax.f32 %v10390_v33, %v10392_v16  ;;  %v10398_v34 = vpop.f32.mrb[138].mxu1 }
 0x975   : > { %v10400_v15 = vpop.f32.mrb[139].mxu1  ;;  %v4873_v62 = vpop.xlane.xlu0 %4872 }
 0x976   : > { %v5028_v52 = vmul.f32 1.442695, %v4964_v38  ;;  %v5030_v49 = vmul.f32 1.442695, %v4965_v56  ;;  %v5395_v26 = vmax.f32 %v10398_v34, %v10400_v15  ;;  %v4966_v0 = vsub.f32 %v10163_v61, %v4873_v62  ;;  %5393 = vmax.xlane.f32.xlu0 %v5392_v13 }
 0x977   : > { %v4967_v2 = vsub.f32 %v10165_v35, %v4873_v62 }
 0x978   : > { %7985 = vpow2.f32 %v5028_v52  ;;  %v5032_v47 = vmul.f32 1.442695, %v4966_v0  ;;  %5396 = vmax.xlane.f32.xlu1 %v5395_v26 }
 0x979   : > { %7987 = vpow2.f32 %v5030_v49  ;;  %v5034_v36 = vmul.f32 1.442695, %v4967_v2 }
 0x97a   : > { %7989 = vpow2.f32 %v5032_v47  ;;  %v10406_v16 = vpop.f32.mrb[140].mxu1 }
 0x97b   : > { %7991 = vpow2.f32 %v5034_v36  ;;  %v10408_v33 = vpop.f32.mrb[141].mxu1  ;;  %v4876_v56 = vpop.xlane.xlu0 %4875 }
 0x97c   : > { %v5398_v38 = vmax.f32 %v10406_v16, %v10408_v33  ;;  %v4968_v61 = vsub.f32 %v10172_v1, %v4876_v56  ;;  %v4969_v13 = vsub.f32 %v10174_v44, %v4876_v56  ;;  %v10414_v62 = vpop.f32.mrb[142].mxu1 }
 0x97d   : > { %11669 = vst [vmem:[#allocation51_spill] sm:$0xff] %v10414_v62  ;;  %v4879_v52 = vpop.xlane.xlu1 %4878  ;;  %v10416_v0 = vpop.f32.mrb[143].mxu1 }
 0x97e   : > { %11670 = vst [vmem:[#allocation52_spill] sm:$0xff] %v10416_v0  ;;  %v5036_v35 = vmul.f32 1.442695, %v4968_v61  ;;  %v5038_v49 = vmul.f32 1.442695, %v4969_v13  ;;  %v4970_v26 = vsub.f32 %v10178_v42, %v4879_v52  ;;  %v4971_v2 = vsub.f32 %v10180_v48, %v4879_v52  ;;  %5399 = vmax.xlane.f32.xlu0 %v5398_v38 }
 0x97f   : > { %v5401_v47 = vmax.f32 %v10414_v62, %v10416_v0 }
 0x980   : > { %7993 = vpow2.f32 %v5036_v35  ;;  %v5040_v36 = vmul.f32 1.442695, %v4970_v26  ;;  %v5042_v1 = vmul.f32 1.442695, %v4971_v2 }
 0x981   : > { %7995 = vpow2.f32 %v5038_v49  ;;  %5402 = vmax.xlane.f32.xlu1 %v5401_v47 }
 0x982   : > { %v10422_v44 = vpop.eup %7985  ;;  %7997 = vpow2.f32 %v5040_v36  ;;  %v10424_v56 = vpop.f32.mrb[144].mxu1 }
 0x983   : > { %11671 = vst [vmem:[#allocation53_spill] sm:$0xff] %v10422_v44  ;;  %v10426_v61 = vpop.eup %7987  ;;  %7999 = vpow2.f32 %v5042_v1  ;;  %v10428_v42 = vpop.f32.mrb[145].mxu1 }
 0x984   : > { %11672 = vst [vmem:[#allocation54_spill] sm:$0xff] %v10426_v61  ;;  %11673 = vst [vmem:[#allocation55_spill] sm:$0xff] %v10428_v42  ;;  %v4882_v48 = vpop.xlane.xlu0 %4881  ;;  %v10430_v38 = vpop.eup %7989  ;;  %v5404_v13 = vmax.f32 %v10424_v56, %v10428_v42  ;;  %v5156_v26 = vadd.f32 %v10426_v61, %v10422_v44 }
 0x985   : > { %11674 = vst [vmem:[#allocation56_spill] sm:$0xff] %v10430_v38  ;;  %v4972_v52 = vsub.f32 %v10187_v45, %v4882_v48  ;;  %v4973_v35 = vsub.f32 %v10189_v37, %v4882_v48  ;;  %v10436_v49 = vpop.f32.mrb[146].mxu1  ;;  %v10440_v2 = vpop.eup %7991 }
 0x986   : > { %11675 = vst [vmem:[#allocation57_spill] sm:$0xff] %v10440_v2  ;;  %v4885_v47 = vpop.xlane.xlu1 %4884  ;;  %v10442_v36 = vpop.f32.mrb[147].mxu1  ;;  %5157 = vadd.xlane.f32.xlu0 %v5156_v26  ;;  %v5159_v37 = vadd.f32 %v10440_v2, %v10430_v38 }
 0x987   : > { %v5044_v1 = vmul.f32 1.442695, %v4972_v52  ;;  %v5046_v0 = vmul.f32 1.442695, %v4973_v35  ;;  %v4974_v62 = vsub.f32 %v10193_v31, %v4885_v47  ;;  %v4975_v42 = vsub.f32 %v10195_v24, %v4885_v47 }
 0x988   : > { %v5407_v45 = vmax.f32 %v10436_v49, %v10442_v36  ;;  %5160 = vadd.xlane.f32.xlu1 %v5159_v37 }
 0x989   : > { %8001 = vpow2.f32 %v5044_v1  ;;  %v5048_v48 = vmul.f32 1.442695, %v4974_v62  ;;  %v5050_v44 = vmul.f32 1.442695, %v4975_v42 }
 0x98a   : > { %8003 = vpow2.f32 %v5046_v0  ;;  %v10450_v61 = vpop.eup %7993  ;;  %5405 = vmax.xlane.f32.xlu0 %v5404_v13  ;;  %v10452_v52 = vpop.f32.mrb[148].mxu1 }
 0x98b   : > { %11676 = vst [vmem:[#allocation58_spill] sm:$0xff] %v10450_v61  ;;  %8005 = vpow2.f32 %v5048_v48  ;;  %v10454_v31 = vpop.eup %7995  ;;  %v10456_v24 = vpop.f32.mrb[149].mxu1 }
 0x98c   : > { %11677 = vst [vmem:[#allocation59_spill] sm:$0xff] %v10454_v31  ;;  %8007 = vpow2.f32 %v5050_v44  ;;  %11678 = vst [vmem:[#allocation60_spill] sm:$0xff] %v10456_v24  ;;  %v4888_v35 = vpop.xlane.xlu0 %4887  ;;  %v10458_v26 = vpop.eup %7997  ;;  %v5410_v62 = vmax.f32 %v10452_v52, %v10456_v24  ;;  %v5162_v13 = vadd.f32 %v10454_v31, %v10450_v61  ;;  %5408 = vmax.xlane.f32.xlu1 %v5407_v45 }
 0x98d   : > { %11679 = vst [vmem:[#allocation61_spill] sm:$0xff] %v10458_v26  ;;  %v4976_v0 = vsub.f32 %v10202_v54, %v4888_v35  ;;  %v4977_v42 = vsub.f32 %v10204_v20, %v4888_v35  ;;  %v10464_v47 = vpop.f32.mrb[150].mxu1  ;;  %v10468_v1 = vpop.eup %7999 }
 0x98e   : > { %11680 = vst [vmem:[#allocation62_spill] sm:$0xff] %v10468_v1  ;;  %v4891_v44 = vpop.xlane.xlu1 %4890  ;;  %v10470_v37 = vpop.f32.mrb[151].mxu1  ;;  %5163 = vadd.xlane.f32.xlu0 %v5162_v13  ;;  %v5165_v20 = vadd.f32 %v10468_v1, %v10458_v26 }
 0x98f   : > { %v5052_v48 = vmul.f32 1.442695, %v4976_v0  ;;  %v5054_v38 = vmul.f32 1.442695, %v4977_v42  ;;  %v4978_v2 = vsub.f32 %v10208_v29, %v4891_v44  ;;  %v4979_v24 = vsub.f32 %v10210_v21, %v4891_v44 }
 0x990   : > { %v5413_v54 = vmax.f32 %v10464_v47, %v10470_v37  ;;  %5166 = vadd.xlane.f32.xlu1 %v5165_v20 }
 0x991   : > { %8009 = vpow2.f32 %v5052_v48  ;;  %v5056_v35 = vmul.f32 1.442695, %v4978_v2  ;;  %v5058_v61 = vmul.f32 1.442695, %v4979_v24 }
 0x992   : > { %8011 = vpow2.f32 %v5054_v38  ;;  %5411 = vmax.xlane.f32.xlu0 %v5410_v62  ;;  %v10480_v0 = vpop.f32.mrb[152].mxu1 }
 0x993   : > { %v10478_v45 = vpop.eup %8001  ;;  %8013 = vpow2.f32 %v5056_v35  ;;  %v10484_v21 = vpop.f32.mrb[153].mxu1 }
 0x994   : > { %11681 = vst [vmem:[#allocation63_spill] sm:$0xff] %v10478_v45  ;;  %v10482_v29 = vpop.eup %8003  ;;  %8015 = vpow2.f32 %v5058_v61  ;;  %v4894_v42 = vpop.xlane.xlu0 %4893  ;;  %v5416_v2 = vmax.f32 %v10480_v0, %v10484_v21  ;;  %5414 = vmax.xlane.f32.xlu1 %v5413_v54 }
 0x995   : > { %11682 = vst [vmem:[#allocation64_spill] sm:$0xff] %v10482_v29  ;;  %v10486_v13 = vpop.eup %8005  ;;  %v4980_v38 = vsub.f32 %v10217_v41, %v4894_v42  ;;  %v4981_v24 = vsub.f32 %v10219_v58, %v4894_v42  ;;  %v10492_v44 = vpop.f32.mrb[154].mxu1  ;;  %v5168_v62 = vadd.f32 %v10482_v29, %v10478_v45 }
 0x996   : > { %11683 = vst [vmem:[#allocation65_spill] sm:$0xff] %v10486_v13  ;;  %v10496_v48 = vpop.eup %8007  ;;  %v4897_v61 = vpop.xlane.xlu1 %4896 }
 0x997   : > { %11684 = vst [vmem:[#allocation66_spill] sm:$0xff] %v10496_v48  ;;  %v10498_v20 = vpop.f32.mrb[155].mxu1  ;;  %v5060_v35 = vmul.f32 1.442695, %v4980_v38  ;;  %v5062_v26 = vmul.f32 1.442695, %v4981_v24  ;;  %v4982_v1 = vsub.f32 %v10223_v46, %v4897_v61  ;;  %v4983_v31 = vsub.f32 %v10225_v11, %v4897_v61  ;;  %5169 = vadd.xlane.f32.xlu0 %v5168_v62 }
 0x998   : > { %v5419_v41 = vmax.f32 %v10492_v44, %v10498_v20  ;;  %v5171_v58 = vadd.f32 %v10496_v48, %v10486_v13 }
 0x999   : > { %8017 = vpow2.f32 %v5060_v35  ;;  %v5064_v42 = vmul.f32 1.442695, %v4982_v1  ;;  %v5066_v45 = vmul.f32 1.442695, %v4983_v31 }
 0x99a   : > { %8019 = vpow2.f32 %v5062_v26  ;;  %5172 = vadd.xlane.f32.xlu1 %v5171_v58  ;;  %v10508_v38 = vpop.f32.mrb[156].mxu1 }
 0x99b   : > { %v10506_v54 = vpop.eup %8009  ;;  %8021 = vpow2.f32 %v5064_v42  ;;  %5417 = vmax.xlane.f32.xlu0 %v5416_v2  ;;  %v10512_v11 = vpop.f32.mrb[157].mxu1 }
 0x99c   : > { %11685 = vst [vmem:[#allocation67_spill] sm:$0xff] %v10506_v54  ;;  %v10510_v46 = vpop.eup %8011  ;;  %8023 = vpow2.f32 %v5066_v45  ;;  %v4900_v24 = vpop.xlane.xlu0 %4899  ;;  %v5422_v1 = vmax.f32 %v10508_v38, %v10512_v11 }
 0x99d   : > { %11686 = vst [vmem:[#allocation68_spill] sm:$0xff] %v10510_v46  ;;  %v10514_v62 = vpop.eup %8013  ;;  %v4984_v31 = vsub.f32 %v10234_v55, %v4900_v24  ;;  %v4985_v26 = vsub.f32 %v10236_v23, %v4900_v24  ;;  %v10520_v61 = vpop.f32.mrb[158].mxu1  ;;  %v5174_v2 = vadd.f32 %v10510_v46, %v10506_v54 }
 0x99e   : > { %11687 = vst [vmem:[#allocation69_spill] sm:$0xff] %v10514_v62  ;;  %v10524_v35 = vpop.eup %8015  ;;  %5420 = vmax.xlane.f32.xlu1 %v5419_v41  ;;  %v4903_v45 = vpop.xlane.xlu1 %4902 }
 0x99f   : > { %11688 = vst [vmem:[#allocation70_spill] sm:$0xff] %v10524_v35  ;;  %v10526_v58 = vpop.f32.mrb[159].mxu1  ;;  %v5068_v42 = vmul.f32 1.442695, %v4984_v31  ;;  %v5070_v13 = vmul.f32 1.442695, %v4985_v26  ;;  %v4986_v48 = vsub.f32 %v10240_v51, %v4903_v45  ;;  %v4987_v29 = vsub.f32 %v10242_v60, %v4903_v45  ;;  %5175 = vadd.xlane.f32.xlu0 %v5174_v2 }
 0x9a0   : > { %v5425_v55 = vmax.f32 %v10520_v61, %v10526_v58  ;;  %v5177_v23 = vadd.f32 %v10524_v35, %v10514_v62 }
 0x9a1   : > { %8025 = vpow2.f32 %v5068_v42  ;;  %v5072_v24 = vmul.f32 1.442695, %v4986_v48  ;;  %v5074_v54 = vmul.f32 1.442695, %v4987_v29 }
 0x9a2   : > { %8027 = vpow2.f32 %v5070_v13  ;;  %5178 = vadd.xlane.f32.xlu1 %v5177_v23  ;;  %v10536_v31 = vpop.f32.mrb[160].mxu1 }
 0x9a3   : > { %v10534_v41 = vpop.eup %8017  ;;  %8029 = vpow2.f32 %v5072_v24  ;;  %5423 = vmax.xlane.f32.xlu0 %v5422_v1  ;;  %v10540_v60 = vpop.f32.mrb[161].mxu1 }
 0x9a4   : > { %11689 = vst [vmem:[#allocation71_spill] sm:$0xff] %v10534_v41  ;;  %v10538_v51 = vpop.eup %8019  ;;  %8031 = vpow2.f32 %v5074_v54  ;;  %v4906_v26 = vpop.xlane.xlu0 %4905  ;;  %v5428_v48 = vmax.f32 %v10536_v31, %v10540_v60 }
 0x9a5   : > { %11690 = vst [vmem:[#allocation72_spill] sm:$0xff] %v10538_v51  ;;  %v10542_v2 = vpop.eup %8021  ;;  %v4988_v29 = vsub.f32 %v10246_v4, %v4906_v26  ;;  %v4989_v13 = vsub.f32 %v10248_v5, %v4906_v26  ;;  %v10548_v45 = vpop.f32.mrb[162].mxu1  ;;  %v5180_v1 = vadd.f32 %v10538_v51, %v10534_v41 }
 0x9a6   : > { %11691 = vst [vmem:[#allocation73_spill] sm:$0xff] %v10542_v2  ;;  %v10552_v42 = vpop.eup %8023  ;;  %5426 = vmax.xlane.f32.xlu1 %v5425_v55  ;;  %v4909_v54 = vpop.xlane.xlu1 %4908 }
 0x9a7   : > { %11692 = vst [vmem:[#allocation74_spill] sm:$0xff] %v10552_v42  ;;  %v10554_v23 = vpop.f32.mrb[163].mxu1  ;;  %v5076_v24 = vmul.f32 1.442695, %v4988_v29  ;;  %v5078_v62 = vmul.f32 1.442695, %v4989_v13  ;;  %v4990_v35 = vsub.f32 %v10252_v12, %v4909_v54  ;;  %v4991_v46 = vsub.f32 %v10254_v9, %v4909_v54  ;;  %5181 = vadd.xlane.f32.xlu0 %v5180_v1 }
 0x9a8   : > { %v5431_v4 = vmax.f32 %v10548_v45, %v10554_v23  ;;  %v5183_v5 = vadd.f32 %v10552_v42, %v10542_v2 }
 0x9a9   : > { %8033 = vpow2.f32 %v5076_v24  ;;  %v5080_v26 = vmul.f32 1.442695, %v4990_v35  ;;  %v5082_v41 = vmul.f32 1.442695, %v4991_v46 }
 0x9aa   : > { %8035 = vpow2.f32 %v5078_v62  ;;  %5184 = vadd.xlane.f32.xlu1 %v5183_v5  ;;  %v10564_v29 = vpop.f32.mrb[164].mxu1 }
 0x9ab   : > { %v10562_v55 = vpop.eup %8025  ;;  %8037 = vpow2.f32 %v5080_v26  ;;  %5429 = vmax.xlane.f32.xlu0 %v5428_v48  ;;  %v10568_v9 = vpop.f32.mrb[165].mxu1 }
 0x9ac   : > { %11693 = vst [vmem:[#allocation75_spill] sm:$0xff] %v10562_v55  ;;  %v10566_v12 = vpop.eup %8027  ;;  %8039 = vpow2.f32 %v5082_v41  ;;  %v4912_v13 = vpop.xlane.xlu0 %4911  ;;  %v5434_v35 = vmax.f32 %v10564_v29, %v10568_v9 }
 0x9ad   : > { %11694 = vst [vmem:[#allocation76_spill] sm:$0xff] %v10566_v12  ;;  %v10570_v1 = vpop.eup %8029  ;;  %v4992_v46 = vsub.f32 %v10258_v63, %v4912_v13  ;;  %v4993_v62 = vsub.f32 %v10260_v14, %v4912_v13  ;;  %v10576_v54 = vpop.f32.mrb[166].mxu1  ;;  %v5186_v48 = vadd.f32 %v10566_v12, %v10562_v55 }
 0x9ae   : > { %11695 = vst [vmem:[#allocation77_spill] sm:$0xff] %v10570_v1  ;;  %v10580_v24 = vpop.eup %8031  ;;  %5432 = vmax.xlane.f32.xlu1 %v5431_v4  ;;  %v4915_v41 = vpop.xlane.xlu1 %4914 }
 0x9af   : > { %11696 = vst [vmem:[#allocation78_spill] sm:$0xff] %v10580_v24  ;;  %v10582_v5 = vpop.f32.mrb[167].mxu1  ;;  %v5084_v26 = vmul.f32 1.442695, %v4992_v46  ;;  %v5086_v2 = vmul.f32 1.442695, %v4993_v62  ;;  %v4994_v42 = vsub.f32 %v10264_v50, %v4915_v41  ;;  %v4995_v51 = vsub.f32 %v10266_v7, %v4915_v41  ;;  %5187 = vadd.xlane.f32.xlu0 %v5186_v48 }
 0x9b0   : > { %v5437_v63 = vmax.f32 %v10576_v54, %v10582_v5  ;;  %v5189_v14 = vadd.f32 %v10580_v24, %v10570_v1 }
 0x9b1   : > { %8041 = vpow2.f32 %v5084_v26  ;;  %v5088_v13 = vmul.f32 1.442695, %v4994_v42  ;;  %v5090_v55 = vmul.f32 1.442695, %v4995_v51 }
 0x9b2   : > { %8043 = vpow2.f32 %v5086_v2  ;;  %5190 = vadd.xlane.f32.xlu1 %v5189_v14  ;;  %v10592_v46 = vpop.f32.mrb[168].mxu1 }
 0x9b3   : > { %v10590_v4 = vpop.eup %8033  ;;  %8045 = vpow2.f32 %v5088_v13  ;;  %5435 = vmax.xlane.f32.xlu0 %v5434_v35  ;;  %v10596_v7 = vpop.f32.mrb[169].mxu1 }
 0x9b4   : > { %11697 = vst [vmem:[#allocation79_spill] sm:$0xff] %v10590_v4  ;;  %v10594_v50 = vpop.eup %8035  ;;  %8047 = vpow2.f32 %v5090_v55  ;;  %v4918_v62 = vpop.xlane.xlu0 %4917  ;;  %v5440_v42 = vmax.f32 %v10592_v46, %v10596_v7 }
 0x9b5   : > { %11698 = vst [vmem:[#allocation80_spill] sm:$0xff] %v10594_v50  ;;  %v10598_v48 = vpop.eup %8037  ;;  %v4996_v51 = vsub.f32 %v10270_v6, %v4918_v62  ;;  %v4997_v2 = vsub.f32 %v10272_v30, %v4918_v62  ;;  %v10604_v41 = vpop.f32.mrb[170].mxu1  ;;  %v5192_v35 = vadd.f32 %v10594_v50, %v10590_v4 }
 0x9b6   : > { %11699 = vst [vmem:[#allocation81_spill] sm:$0xff] %v10598_v48  ;;  %v10608_v26 = vpop.eup %8039  ;;  %5438 = vmax.xlane.f32.xlu1 %v5437_v63  ;;  %v4921_v55 = vpop.xlane.xlu1 %4920 }
 0x9b7   : > { %11700 = vst [vmem:[#allocation82_spill] sm:$0xff] %v10608_v26  ;;  %v10610_v14 = vpop.f32.mrb[171].mxu1  ;;  %v5092_v13 = vmul.f32 1.442695, %v4996_v51  ;;  %v5094_v1 = vmul.f32 1.442695, %v4997_v2  ;;  %v4998_v24 = vsub.f32 %v10276_v28, %v4921_v55  ;;  %v4999_v12 = vsub.f32 %v10278_v40, %v4921_v55  ;;  %5193 = vadd.xlane.f32.xlu0 %v5192_v35 }
 0x9b8   : > { %v5443_v6 = vmax.f32 %v10604_v41, %v10610_v14  ;;  %v5195_v30 = vadd.f32 %v10608_v26, %v10598_v48 }
 0x9b9   : > { %8049 = vpow2.f32 %v5092_v13  ;;  %v5096_v62 = vmul.f32 1.442695, %v4998_v24  ;;  %v5098_v4 = vmul.f32 1.442695, %v4999_v12 }
 0x9ba   : > { %8051 = vpow2.f32 %v5094_v1  ;;  %5196 = vadd.xlane.f32.xlu1 %v5195_v30  ;;  %v10620_v51 = vpop.f32.mrb[172].mxu1 }
 0x9bb   : > { %v10618_v63 = vpop.eup %8041  ;;  %8053 = vpow2.f32 %v5096_v62  ;;  %5441 = vmax.xlane.f32.xlu0 %v5440_v42  ;;  %v10624_v40 = vpop.f32.mrb[173].mxu1 }
 0x9bc   : > { %11701 = vst [vmem:[#allocation83_spill] sm:$0xff] %v10618_v63  ;;  %v10622_v28 = vpop.eup %8043  ;;  %8055 = vpow2.f32 %v5098_v4  ;;  %v4924_v2 = vpop.xlane.xlu0 %4923  ;;  %v5446_v24 = vmax.f32 %v10620_v51, %v10624_v40 }
 0x9bd   : > { %11702 = vst [vmem:[#allocation84_spill] sm:$0xff] %v10622_v28  ;;  %v10626_v35 = vpop.eup %8045  ;;  %v5000_v12 = vsub.f32 %v10282_v10, %v4924_v2  ;;  %v5001_v1 = vsub.f32 %v10284_v8, %v4924_v2  ;;  %v10632_v55 = vpop.f32.mrb[174].mxu1  ;;  %v5198_v42 = vadd.f32 %v10622_v28, %v10618_v63 }
 0x9be   : > { %11703 = vst [vmem:[#allocation85_spill] sm:$0xff] %v10626_v35  ;;  %11704 = vst [vmem:[#allocation86_spill] sm:$0xff] %v10632_v55  ;;  %v10636_v13 = vpop.eup %8047  ;;  %5444 = vmax.xlane.f32.xlu1 %v5443_v6  ;;  %v4927_v4 = vpop.xlane.xlu1 %4926 }
 0x9bf   : > { %11705 = vst [vmem:[#allocation87_spill] sm:$0xff] %v10636_v13  ;;  %v10638_v30 = vpop.f32.mrb[175].mxu1  ;;  %v5100_v62 = vmul.f32 1.442695, %v5000_v12  ;;  %v5102_v48 = vmul.f32 1.442695, %v5001_v1  ;;  %v5002_v26 = vsub.f32 %v10288_v59, %v4927_v4  ;;  %v5003_v50 = vsub.f32 %v10290_v3, %v4927_v4  ;;  %5199 = vadd.xlane.f32.xlu0 %v5198_v42 }
 0x9c0   : > { %11706 = vst [vmem:[#allocation88_spill] sm:$0xff] %v10638_v30  ;;  %v5449_v10 = vmax.f32 %v10632_v55, %v10638_v30  ;;  %v5201_v8 = vadd.f32 %v10636_v13, %v10626_v35 }
 0x9c1   : > { %8057 = vpow2.f32 %v5100_v62  ;;  %v5104_v2 = vmul.f32 1.442695, %v5002_v26  ;;  %v5106_v63 = vmul.f32 1.442695, %v5003_v50 }
 0x9c2   : > { %8059 = vpow2.f32 %v5102_v48  ;;  %5202 = vadd.xlane.f32.xlu1 %v5201_v8  ;;  %v10648_v12 = vpop.f32.mrb[176].mxu1 }
 0x9c3   : > { %v10646_v6 = vpop.eup %8049  ;;  %8061 = vpow2.f32 %v5104_v2  ;;  %5447 = vmax.xlane.f32.xlu0 %v5446_v24  ;;  %11708 = vst [vmem:[#allocation90_spill] sm:$0xff] %v10648_v12  ;;  %v10652_v3 = vpop.f32.mrb[177].mxu1 }
 0x9c4   : > { %11707 = vst [vmem:[#allocation89_spill] sm:$0xff] %v10646_v6  ;;  %v10650_v59 = vpop.eup %8051  ;;  %8063 = vpow2.f32 %v5106_v63  ;;  %11710 = vst [vmem:[#allocation92_spill] sm:$0xff] %v10652_v3  ;;  %v4930_v1 = vpop.xlane.xlu0 %4929  ;;  %v5452_v26 = vmax.f32 %v10648_v12, %v10652_v3 }
 0x9c5   : > { %11709 = vst [vmem:[#allocation91_spill] sm:$0xff] %v10650_v59  ;;  %v10654_v42 = vpop.eup %8053  ;;  %v5004_v50 = vsub.f32 %v10294_v32, %v4930_v1  ;;  %v5005_v48 = vsub.f32 %v10296_v18, %v4930_v1  ;;  %v10660_v4 = vpop.f32.mrb[178].mxu1  ;;  %v5204_v24 = vadd.f32 %v10650_v59, %v10646_v6 }
 0x9c6   : > { %11711 = vst [vmem:[#allocation93_spill] sm:$0xff] %v10654_v42  ;;  %11712 = vst [vmem:[#allocation94_spill] sm:$0xff] %v10660_v4  ;;  %v10664_v62 = vpop.eup %8055  ;;  %5450 = vmax.xlane.f32.xlu1 %v5449_v10  ;;  %v4933_v63 = vpop.xlane.xlu1 %4932 }
 0x9c7   : > { %11713 = vst [vmem:[#allocation95_spill] sm:$0xff] %v10664_v62  ;;  %v10666_v8 = vpop.f32.mrb[179].mxu1  ;;  %v5108_v2 = vmul.f32 1.442695, %v5004_v50  ;;  %v5110_v35 = vmul.f32 1.442695, %v5005_v48  ;;  %v5006_v13 = vsub.f32 %v10300_v39, %v4933_v63  ;;  %v5007_v28 = vsub.f32 %v10302_v22, %v4933_v63  ;;  %5205 = vadd.xlane.f32.xlu0 %v5204_v24 }
 0x9c8   : > { %11714 = vst [vmem:[#allocation96_spill] sm:$0xff] %v10666_v8  ;;  %v5455_v32 = vmax.f32 %v10660_v4, %v10666_v8  ;;  %v5207_v18 = vadd.f32 %v10664_v62, %v10654_v42 }
 0x9c9   : > { %8065 = vpow2.f32 %v5108_v2  ;;  %v5112_v1 = vmul.f32 1.442695, %v5006_v13  ;;  %v5114_v6 = vmul.f32 1.442695, %v5007_v28 }
 0x9ca   : > { %8067 = vpow2.f32 %v5110_v35  ;;  %5208 = vadd.xlane.f32.xlu1 %v5207_v18  ;;  %v10676_v50 = vpop.f32.mrb[180].mxu1 }
 0x9cb   : > { %v10674_v10 = vpop.eup %8057  ;;  %8069 = vpow2.f32 %v5112_v1  ;;  %5453 = vmax.xlane.f32.xlu0 %v5452_v26  ;;  %11716 = vst [vmem:[#allocation98_spill] sm:$0xff] %v10676_v50  ;;  %v10680_v22 = vpop.f32.mrb[181].mxu1 }
 0x9cc   : > { %11715 = vst [vmem:[#allocation97_spill] sm:$0xff] %v10674_v10  ;;  %v10678_v39 = vpop.eup %8059  ;;  %8071 = vpow2.f32 %v5114_v6  ;;  %11718 = vst [vmem:[#allocation100_spill] sm:$0xff] %v10680_v22  ;;  %v4936_v48 = vpop.xlane.xlu0 %4935  ;;  %v5458_v13 = vmax.f32 %v10676_v50, %v10680_v22  ;;  %v11744_v22 = vld [vmem:[#allocation33_spill] sm:$0xff] }
 0x9cd   : > { %11717 = vst [vmem:[#allocation99_spill] sm:$0xff] %v10678_v39  ;;  %v10682_v24 = vpop.eup %8061  ;;  %v5008_v28 = vsub.f32 %v10306_v27, %v4936_v48  ;;  %v5009_v35 = vsub.f32 %v10308_v43, %v4936_v48  ;;  %v10688_v63 = vpop.f32.mrb[182].mxu1  ;;  %v5210_v26 = vadd.f32 %v10678_v39, %v10674_v10 }
 0x9ce   : > { %11719 = vst [vmem:[#allocation101_spill] sm:$0xff] %v10682_v24  ;;  %11720 = vst [vmem:[#allocation102_spill] sm:$0xff] %v10688_v63  ;;  %v10692_v2 = vpop.eup %8063  ;;  %5456 = vmax.xlane.f32.xlu1 %v5455_v32  ;;  %v4939_v6 = vpop.xlane.xlu1 %4938 }
 0x9cf   : > { %11721 = vst [vmem:[#allocation103_spill] sm:$0xff] %v10692_v2  ;;  %v10694_v18 = vpop.f32.mrb[183].mxu1  ;;  %v5116_v1 = vmul.f32 1.442695, %v5008_v28  ;;  %v5118_v42 = vmul.f32 1.442695, %v5009_v35  ;;  %v5010_v62 = vsub.f32 %v10312_v57, %v4939_v6  ;;  %v5011_v59 = vsub.f32 %v10314_v17, %v4939_v6  ;;  %5211 = vadd.xlane.f32.xlu0 %v5210_v26 }
 0x9d0   : > { %11722 = vst [vmem:[#allocation104_spill] sm:$0xff] %v10694_v18  ;;  %v5461_v27 = vmax.f32 %v10688_v63, %v10694_v18  ;;  %v5213_v43 = vadd.f32 %v10692_v2, %v10682_v24 }
 0x9d1   : > { %8073 = vpow2.f32 %v5116_v1  ;;  %v5120_v48 = vmul.f32 1.442695, %v5010_v62  ;;  %v5122_v10 = vmul.f32 1.442695, %v5011_v59 }
 0x9d2   : > { %8075 = vpow2.f32 %v5118_v42  ;;  %5214 = vadd.xlane.f32.xlu1 %v5213_v43  ;;  %v10704_v28 = vpop.f32.mrb[184].mxu1 }
 0x9d3   : > { %v10702_v32 = vpop.eup %8065  ;;  %8077 = vpow2.f32 %v5120_v48  ;;  %5459 = vmax.xlane.f32.xlu0 %v5458_v13  ;;  %11724 = vst [vmem:[#allocation106_spill] sm:$0xff] %v10704_v28  ;;  %v10708_v17 = vpop.f32.mrb[185].mxu1 }
 0x9d4   : > { %11723 = vst [vmem:[#allocation105_spill] sm:$0xff] %v10702_v32  ;;  %v10706_v57 = vpop.eup %8067  ;;  %8079 = vpow2.f32 %v5122_v10  ;;  %11726 = vst [vmem:[#allocation108_spill] sm:$0xff] %v10708_v17  ;;  %v5464_v26 = vmax.f32 %v10704_v28, %v10708_v17  ;;  %v10714_v62 = vpop.f32.mrb[186].mxu1  ;;  %v11742_v28 = vld [vmem:[#allocation31_spill] sm:$0xff] }
 0x9d5   : > { %11725 = vst [vmem:[#allocation107_spill] sm:$0xff] %v10706_v57  ;;  %v10710_v35 = vpop.eup %8069  ;;  %11728 = vst [vmem:[#allocation110_spill] sm:$0xff] %v10714_v62  ;;  %v5216_v59 = vadd.f32 %v10706_v57, %v10702_v32  ;;  %v10720_v13 = vpop.f32.mrb[187].mxu1 }
 0x9d6   : > { %11727 = vst [vmem:[#allocation109_spill] sm:$0xff] %v10710_v35  ;;  %v10718_v42 = vpop.eup %8071  ;;  %5462 = vmax.xlane.f32.xlu1 %v5461_v27  ;;  %11730 = vst [vmem:[#allocation112_spill] sm:$0xff] %v10720_v13  ;;  %v5467_v10 = vmax.f32 %v10714_v62, %v10720_v13  ;;  %v11741_v13 = vld [vmem:[#allocation30_spill] sm:$0xff] }
 0x9d7   : > { %11729 = vst [vmem:[#allocation111_spill] sm:$0xff] %v10718_v42  ;;  %5217 = vadd.xlane.f32.xlu0 %v5216_v59  ;;  %v5219_v6 = vadd.f32 %v10718_v42, %v10710_v35 }
 0x9da   : > { %5220 = vadd.xlane.f32.xlu1 %v5219_v6  ;;  %v10728_v43 = vpop.f32.mrb[188].mxu1 }
 0x9db   : > { %v10726_v1 = vpop.eup %8073  ;;  %5465 = vmax.xlane.f32.xlu0 %v5464_v26  ;;  %11732 = vst [vmem:[#allocation114_spill] sm:$0xff] %v10728_v43  ;;  %v10732_v32 = vpop.f32.mrb[189].mxu1 }
 0x9dc   : > { %11731 = vst [vmem:[#allocation113_spill] sm:$0xff] %v10726_v1  ;;  %v10730_v48 = vpop.eup %8075  ;;  %11734 = vst [vmem:[#allocation116_spill] sm:$0xff] %v10732_v32  ;;  %v5470_v59 = vmax.f32 %v10728_v43, %v10732_v32  ;;  %v10738_v57 = vpop.f32.mrb[190].mxu1  ;;  %v11740_v43 = vld [vmem:[#allocation29_spill] sm:$0xff] }
 0x9dd   : > { %11733 = vst [vmem:[#allocation115_spill] sm:$0xff] %v10730_v48  ;;  %v10734_v27 = vpop.eup %8077  ;;  %11736 = vst [vmem:[#allocation118_spill] sm:$0xff] %v10738_v57  ;;  %v5222_v35 = vadd.f32 %v10730_v48, %v10726_v1  ;;  %v10744_v26 = vpop.f32.mrb[191].mxu1  ;;  %v4233_v1 = vld [vmem:[%s11466_s7 + $0x20] sm:$0xff] }
 0x9de   : > { %11735 = vst [vmem:[#allocation117_spill] sm:$0xff] %v10734_v27  ;;  %v10742_v6 = vpop.eup %8079  ;;  %5468 = vmax.xlane.f32.xlu1 %v5467_v10  ;;  %11738 = vst [vmem:[#allocation120_spill] sm:$0xff] %v10744_v26  ;;  %v5473_v42 = vmax.f32 %v10738_v57, %v10744_v26  ;;  %v4942_v32 = vpop.xlane.xlu0 %4941 }
 0x9df   : > { %11737 = vst [vmem:[#allocation119_spill] sm:$0xff] %v10742_v6  ;;  %5223 = vadd.xlane.f32.xlu0 %v5222_v35  ;;  %v5225_v24 = vadd.f32 %v10742_v6, %v10734_v27  ;;  %v4945_v48 = vpop.xlane.xlu1 %4944  ;;  %v5012_v10 = vsub.f32 %v10318_v53, %v4942_v32  ;;  %v4234_v35 = vld [vmem:[%s11466_s7 + $0x28] sm:$0xff]  ;;  %v5013_v26 = vsub.f32 %v10320_v19, %v4942_v32  ;;  %v11743_v19 = vld [vmem:[#allocation32_spill] sm:$0xff] }
 0x9e1   : > { %v5124_v6 = vmul.f32 1.442695, %v5012_v10  ;;  %v5126_v39 = vmul.f32 1.442695, %v5013_v26  ;;  %v11745_v10 = vld [vmem:[#allocation34_spill] sm:$0xff] }
 0x9e2   : > { %5226 = vadd.xlane.f32.xlu1 %v5225_v24  ;;  %v4948_v57 = vpop.xlane.xlu0 %4947  ;;  %v5014_v24 = vsub.f32 %v10324_v25, %v4945_v48 }
 0x9e3   : > { %5471 = vmax.xlane.f32.xlu0 %v5470_v59  ;;  %v11739_v59 = vld [vmem:[#allocation28_spill] sm:$0xff]  ;;  %v4951_v27 = vpop.xlane.xlu1 %4950  ;;  %v5016_v2 = vsub.f32 %v11740_v43, %v4948_v57  ;;  %v5017_v53 = vsub.f32 %v11741_v13, %v4948_v57  ;;  %8081 = vpow2.f32 %v5124_v6  ;;  %v11746_v57 = vld [vmem:[#allocation35_spill] sm:$0xff]  ;;  %v11748_v6 = vld [vmem:[#allocation37_spill] sm:$0xff] }
 0x9e4   : > { %v5128_v17 = vmul.f32 1.442695, %v5014_v24  ;;  %v5018_v18 = vsub.f32 %v11742_v28, %v4951_v27  ;;  %v5019_v32 = vsub.f32 %v11743_v19, %v4951_v27  ;;  %8083 = vpow2.f32 %v5126_v39  ;;  %v11747_v28 = vld [vmem:[#allocation36_spill] sm:$0xff]  ;;  %v11749_v39 = vld [vmem:[#allocation38_spill] sm:$0xff] }
 0x9e5   : > { %v5132_v25 = vmul.f32 1.442695, %v5016_v2 }
 0x9e6   : > { %5474 = vmax.xlane.f32.xlu1 %v5473_v42  ;;  %v5015_v42 = vsub.f32 %v11739_v59, %v4945_v48  ;;  %v4954_v62 = vpop.xlane.xlu0 %4953  ;;  %8085 = vpow2.f32 %v5128_v17  ;;  %v5136_v26 = vmul.f32 1.442695, %v5018_v18  ;;  %v5138_v24 = vmul.f32 1.442695, %v5019_v32  ;;  %v11750_v17 = vld [vmem:[#allocation39_spill] sm:$0xff] }
 0x9e7   : > { %v5020_v48 = vsub.f32 %v11744_v22, %v4954_v62  ;;  %v5021_v59 = vsub.f32 %v11745_v10, %v4954_v62 }
 0x9e8   : > { %v5130_v63 = vmul.f32 1.442695, %v5015_v42 }
 0x9e9   : > { %v5140_v27 = vmul.f32 1.442695, %v5020_v48  ;;  %v5142_v22 = vmul.f32 1.442695, %v5021_v59 }
 0x9ea   : > { %8087 = vpow2.f32 %v5130_v63  ;;  %v11751_v63 = vld [vmem:[#allocation40_spill] sm:$0xff] }
 0x9eb   : > { %v4960_v43 = vpop.xlane.xlu0 %4959  ;;  %8089 = vpow2.f32 %v5132_v25  ;;  %v11752_v25 = vld [vmem:[#allocation41_spill] sm:$0xff] }
 0x9ec   : > { %v5024_v2 = vsub.f32 %v11748_v6, %v4960_v43 }
 0x9f3   : > { %v5382_v19 = vpop.xlane.xlu0 %5381 }
 0x9f4   : > { %v5476_v48 = vsub.f32 %v11752_v25, %v5382_v19 }
 0x9f7   : > { %4259 = vperm.xlu1 %7733, %v4233_v1   ;;  %v4957_v1 = vpop.xlane.xlu1 %4956 }
 0x9f8   : > { %v5022_v13 = vsub.f32 %v11746_v57, %v4957_v1  ;;  %v5023_v42 = vsub.f32 %v11747_v28, %v4957_v1  ;;  %v5148_v1 = vmul.f32 1.442695, %v5024_v2 }
 0x9f9   : > { %4264 = vperm.xlu0 %7732, %v4234_v35   ;;  %v5134_v35 = vmul.f32 1.442695, %v5017_v53  ;;  %v5025_v53 = vsub.f32 %v11749_v39, %v4960_v43  ;;  %v10774_v43 = vpop.eup %8081 }
 0x9fa   : > { %v5144_v62 = vmul.f32 1.442695, %v5022_v13  ;;  %v5146_v10 = vmul.f32 1.442695, %v5023_v42  ;;  %v11754_v13 = vld [vmem:[#allocation43_spill] sm:$0xff]  ;;  %v11755_v42 = vld [vmem:[#allocation44_spill] sm:$0xff] }
 0x9fb   : > { %v4963_v50 = vpop.xlane.xlu1 %4962  ;;  %8091 = vpow2.f32 %v5134_v35  ;;  %v5150_v28 = vmul.f32 1.442695, %v5025_v53  ;;  %v11753_v35 = vld [vmem:[#allocation42_spill] sm:$0xff]  ;;  %v5388_v6 = vpop.xlane.xlu0 %5387  ;;  %v11757_v53 = vld [vmem:[#allocation45_spill] sm:$0xff] }
 0x9fc   : > { %8093 = vpow2.f32 %v5136_v26  ;;  %v5026_v18 = vsub.f32 %v11750_v17, %v4963_v50  ;;  %v5027_v32 = vsub.f32 %v11751_v63, %v4963_v50  ;;  %v5477_v59 = vsub.f32 %v11753_v35, %v5382_v19 }
 0x9fd   : > { %8095 = vpow2.f32 %v5138_v24  ;;  %v10777_v24 = vpop.eup %8083  ;;  %v5480_v19 = vsub.f32 %v11757_v53, %v5388_v6 }
 0x9fe   : > { %8097 = vpow2.f32 %v5140_v27  ;;  %v5152_v26 = vmul.f32 1.442695, %v5026_v18  ;;  %v5154_v50 = vmul.f32 1.442695, %v5027_v32  ;;  %v10780_v17 = vpop.eup %8085  ;;  %v11758_v18 = vld [vmem:[#allocation46_spill] sm:$0xff]  ;;  %v11760_v32 = vld [vmem:[#allocation47_spill] sm:$0xff] }
 0x9ff   : > { %v5385_v57 = vpop.xlane.xlu1 %5384  ;;  %8099 = vpow2.f32 %v5142_v22  ;;  %11756 = vst [vmem:[#allocation28_spill] sm:$0xff] %v10780_v17  ;;  %v5540_v22 = vmul.f32 1.442695, %v5476_v48  ;;  %v10783_v63 = vpop.eup %8087  ;;  %v5481_v25 = vsub.f32 %v11758_v18, %v5388_v6  ;;  %v11762_v48 = vld [vmem:[#allocation48_spill] sm:$0xff]  ;;  %v11765_v18 = vld [vmem:[#allocation49_spill] sm:$0xff] }
 0xa00   : > { %8101 = vpow2.f32 %v5144_v62  ;;  %v5478_v39 = vsub.f32 %v11754_v13, %v5385_v57  ;;  %v5479_v27 = vsub.f32 %v11755_v42, %v5385_v57  ;;  %v5542_v62 = vmul.f32 1.442695, %v5477_v59  ;;  %v10786_v35 = vpop.eup %8089 }
 0xa01   : > { %8103 = vpow2.f32 %v5146_v10  ;;  %11759 = vst [vmem:[#allocation29_spill] sm:$0xff] %v10786_v35  ;;  %v5550_v6 = vmul.f32 1.442695, %v5481_v25 }
 0xa02   : > { %8105 = vpow2.f32 %v5148_v1  ;;  %v5544_v10 = vmul.f32 1.442695, %v5478_v39  ;;  %v5546_v1 = vmul.f32 1.442695, %v5479_v27 }
 0xa03   : > { %v5391_v2 = vpop.xlane.xlu1 %5390  ;;  %8107 = vpow2.f32 %v5150_v28  ;;  %v5394_v57 = vpop.xlane.xlu0 %5393  ;;  %v5548_v28 = vmul.f32 1.442695, %v5480_v19 }
 0xa04   : > { %8109 = vpow2.f32 %v5152_v26  ;;  %v5482_v13 = vsub.f32 %v11760_v32, %v5391_v2  ;;  %v5483_v8 = vsub.f32 %v11762_v48, %v5391_v2  ;;  %v5484_v26 = vsub.f32 %v11765_v18, %v5394_v57  ;;  %v11768_v2 = vld [vmem:[#allocation50_spill] sm:$0xff] }
 0xa05   : > { %v10789_v42 = vpop.eup %8091  ;;  %8111 = vpow2.f32 %v5154_v50  ;;  %v5485_v48 = vsub.f32 %v11768_v2, %v5394_v57 }
 0xa06   : > { %11761 = vst [vmem:[#allocation30_spill] sm:$0xff] %v10789_v42  ;;  %v10792_v53 = vpop.eup %8093  ;;  %8113 = vpow2.f32 %v5540_v22  ;;  %v5552_v32 = vmul.f32 1.442695, %v5482_v13  ;;  %v5554_v27 = vmul.f32 1.442695, %v5483_v8 }
 0xa07   : > { %11763 = vst [vmem:[#allocation31_spill] sm:$0xff] %v10792_v53  ;;  %v10794_v59 = vpop.eup %8095  ;;  %8115 = vpow2.f32 %v5542_v62  ;;  %v5397_v39 = vpop.xlane.xlu1 %5396  ;;  %v5556_v25 = vmul.f32 1.442695, %v5484_v26  ;;  %v5558_v57 = vmul.f32 1.442695, %v5485_v48  ;;  %v11772_v48 = vld [vmem:[#allocation52_spill] sm:$0xff] }
 0xa08   : > { %11764 = vst [vmem:[#allocation32_spill] sm:$0xff] %v10794_v59  ;;  %v10797_v4 = vpop.eup %8097  ;;  %8117 = vpow2.f32 %v5544_v10  ;;  %v5486_v19 = vsub.f32 %v10398_v34, %v5397_v39  ;;  %v5487_v18 = vsub.f32 %v10400_v15, %v5397_v39  ;;  %v5228_v15 = vadd.f32 %v10777_v24, %v10774_v43 }
 0xa09   : > { %11766 = vst [vmem:[#allocation33_spill] sm:$0xff] %v10797_v4  ;;  %v10799_v50 = vpop.eup %8099  ;;  %8119 = vpow2.f32 %v5546_v1 }
 0xa0a   : > { %11767 = vst [vmem:[#allocation34_spill] sm:$0xff] %v10799_v50  ;;  %v10802_v22 = vpop.eup %8101  ;;  %8121 = vpow2.f32 %v5548_v28  ;;  %v5560_v2 = vmul.f32 1.442695, %v5486_v19 }
 0xa0b   : > { %v5400_v3 = vpop.xlane.xlu0 %5399  ;;  %v10805_v62 = vpop.eup %8103  ;;  %8123 = vpow2.f32 %v5550_v6  ;;  %v11771_v6 = vld [vmem:[#allocation51_spill] sm:$0xff] }
 0xa0c   : > { %v10808_v13 = vpop.eup %8105  ;;  %8125 = vpow2.f32 %v5552_v32  ;;  %v5488_v1 = vsub.f32 %v10406_v16, %v5400_v3  ;;  %v5489_v28 = vsub.f32 %v10408_v33, %v5400_v3  ;;  %v5562_v16 = vmul.f32 1.442695, %v5487_v18 }
 0xa0d   : > { %11769 = vst [vmem:[#allocation35_spill] sm:$0xff] %v10808_v13  ;;  %v10811_v12 = vpop.eup %8107  ;;  %8127 = vpow2.f32 %v5554_v27 }
 0xa0e   : > { %v5403_v10 = vpop.xlane.xlu1 %5402  ;;  %11770 = vst [vmem:[#allocation36_spill] sm:$0xff] %v10811_v12  ;;  %v10814_v34 = vpop.eup %8109  ;;  %v5564_v27 = vmul.f32 1.442695, %v5488_v1  ;;  %v5566_v19 = vmul.f32 1.442695, %v5489_v28  ;;  %v5234_v1 = vadd.f32 %v10789_v42, %v10786_v35  ;;  %v5237_v35 = vadd.f32 %v10794_v59, %v10792_v53 }
 0xa0f   : > { %v5490_v26 = vsub.f32 %v11771_v6, %v5403_v10  ;;  %v10819_v39 = vpop.eup %8111  ;;  %v5491_v55 = vsub.f32 %v11772_v48, %v5403_v10  ;;  %v5231_v6 = vadd.f32 %v10783_v63, %v10780_v17 }
 0xa10   : > { %v10821_v30 = vpop.eup %8113 }
 0xa11   : > { %v10824_v3 = vpop.eup %8115  ;;  %v5568_v18 = vmul.f32 1.442695, %v5490_v26 }
 0xa13   : > { %v5158_v8 = vpop.xlane.xlu0 %5157 }
 0xa14   : > { %8129 = vrcp.f32 %v5158_v8 }
 0xa15   : > { %8131 = vpow2.f32 %v5556_v25  ;;  %v5161_v32 = vpop.xlane.xlu1 %5160  ;;  %v10829_v25 = vpop.eup %8117 }
 0xa16   : > { %8133 = vrcp.f32 %v5161_v32  ;;  %v10833_v10 = vpop.eup %8119 }
 0xa17   : > { %v5406_v33 = vpop.xlane.xlu0 %5405  ;;  %8135 = vpow2.f32 %v5558_v57  ;;  %v10835_v32 = vpop.eup %8121  ;;  %v5570_v57 = vmul.f32 1.442695, %v5491_v55  ;;  %v5240_v55 = vadd.f32 %v10799_v50, %v10797_v4  ;;  %v11777_v50 = vld [vmem:[#allocation57_spill] sm:$0xff] }
 0xa18   : > { %5229 = vadd.xlane.f32.xlu0 %v5228_v15  ;;  %v5492_v8 = vsub.f32 %v10424_v56, %v5406_v33  ;;  %8137 = vpow2.f32 %v5560_v2  ;;  %11773 = vst [vmem:[#allocation37_spill] sm:$0xff] %v10835_v32  ;;  %v11774_v56 = vld [vmem:[#allocation55_spill] sm:$0xff]  ;;  %v10838_v17 = vpop.eup %8123 }
 0xa19   : > { %8139 = vpow2.f32 %v5562_v16  ;;  %v5409_v15 = vpop.xlane.xlu1 %5408  ;;  %v5493_v28 = vsub.f32 %v11774_v56, %v5406_v33  ;;  %11775 = vst [vmem:[#allocation38_spill] sm:$0xff] %v10838_v17  ;;  %v10843_v16 = vpop.eup %8125 }
 0xa1a   : > { %8141 = vpow2.f32 %v5564_v27  ;;  %v5572_v2 = vmul.f32 1.442695, %v5492_v8  ;;  %v5494_v26 = vsub.f32 %v10436_v49, %v5409_v15  ;;  %v10848_v27 = vpop.eup %8127 }
 0xa1b   : > { %5232 = vadd.xlane.f32.xlu1 %v5231_v6  ;;  %v5164_v48 = vpop.xlane.xlu0 %5163  ;;  %8143 = vpow2.f32 %v5566_v19  ;;  %v5495_v6 = vsub.f32 %v10442_v36, %v5409_v15  ;;  %v5574_v8 = vmul.f32 1.442695, %v5493_v28  ;;  %v5243_v36 = vadd.f32 %v10805_v62, %v10802_v22  ;;  %v11776_v28 = vld [vmem:[#allocation54_spill] sm:$0xff] }
 0xa1c   : > { %5235 = vadd.xlane.f32.xlu0 %v5234_v1  ;;  %8145 = vpow2.f32 %v5568_v18  ;;  %v5576_v56 = vmul.f32 1.442695, %v5494_v26  ;;  %v11778_v26 = vld [vmem:[#allocation53_spill] sm:$0xff] }
 0xa1d   : > { %8147 = vrcp.f32 %v5164_v48  ;;  %v5167_v33 = vpop.xlane.xlu1 %5166  ;;  %v5578_v4 = vmul.f32 1.442695, %v5495_v6 }
 0xa1e   : > { %v8130_v19 = vpop.eup %8129  ;;  %8149 = vpow2.f32 %v5570_v57 }
 0xa1f   : > { %5238 = vadd.xlane.f32.xlu1 %v5237_v35  ;;  %v5412_v49 = vpop.xlane.xlu0 %5411  ;;  %v10850_v1 = vpop.eup %8131  ;;  %8151 = vpow2.f32 %v5572_v2  ;;  %v5246_v35 = vadd.f32 %v10811_v12, %v10808_v13  ;;  %v5284_v53 = vmul.f32 %v8130_v19, %v11778_v26 }
 0xa20   : > { %5241 = vadd.xlane.f32.xlu0 %v5240_v55  ;;  %v5496_v18 = vsub.f32 %v10452_v52, %v5412_v49  ;;  %v8134_v15 = vpop.eup %8133  ;;  %8153 = vrcp.f32 %v5167_v33  ;;  %v5285_v55 = vmul.f32 %v8130_v19, %v11776_v28  ;;  %v11779_v52 = vld [vmem:[#allocation56_spill] sm:$0xff] }
 0xa21   : > { %v10857_v48 = vpop.eup %8135  ;;  %v5415_v57 = vpop.xlane.xlu1 %5414  ;;  %v5287_v2 = vmul.f32 %v8134_v15, %v11777_v50  ;;  %v5286_v59 = vmul.f32 %v8134_v15, %v11779_v52  ;;  %8155 = vpow2.f32 %v5574_v8  ;;  %v5249_v50 = vadd.f32 %v10819_v39, %v10814_v34  ;;  %v11780_v15 = vld [vmem:[#allocation60_spill] sm:$0xff] }
 0xa22   : > { %v10863_v42 = vpop.eup %8137  ;;  %v5580_v6 = vmul.f32 1.442695, %v5496_v18  ;;  %v5498_v33 = vsub.f32 %v10464_v47, %v5415_v57  ;;  %v5499_v13 = vsub.f32 %v10470_v37, %v5415_v57  ;;  %8157 = vpow2.f32 %v5576_v56 }
 0xa23   : > { %5244 = vadd.xlane.f32.xlu1 %v5243_v36  ;;  %v10867_v36 = vpop.eup %8139  ;;  %v5349_v28 = vpack.c.bf16 %v5287_v2, %v5285_v55  ;;  %v5348_v19 = vpack.c.bf16 %v5286_v59, %v5284_v53  ;;  %8159 = vpow2.f32 %v5578_v4  ;;  %v5497_v8 = vsub.f32 %v11780_v15, %v5412_v49  ;;  %v11781_v15 = vld [vmem:[#allocation59_spill] sm:$0xff] }
 0xa24   : > { %5247 = vadd.xlane.f32.xlu0 %v5246_v35  ;;  %v5170_v12 = vpop.xlane.xlu0 %5169  ;;  %v10871_v26 = vpop.eup %8141  ;;  %v5584_v18 = vmul.f32 1.442695, %v5498_v33  ;;  %v5668_v47 = vadd.f32 %v10824_v3, %v10821_v30  ;;  %v5586_v35 = vmul.f32 1.442695, %v5499_v13  ;;  %v5671_v55 = vadd.f32 %v10833_v10, %v10829_v25 }
 0xa25   : > { %v10876_v37 = vpop.eup %8143  ;;  %8161 = vrcp.f32 %v5170_v12  ;;  %5892 = vmatprep.subr.bf16.mxu1 %v5349_v28  ;;  %v5582_v12 = vmul.f32 1.442695, %v5497_v8  ;;  %v5674_v2 = vadd.f32 %v10838_v17, %v10835_v32 }
 0xa26   : > { %v10878_v57 = vpop.eup %8145  ;;  %8163 = vpow2.f32 %v5580_v6  ;;  %5893 = vmatpush1.bf16.msra.mxu1 %v5348_v19 }
 0xa27   : > { %5250 = vadd.xlane.f32.xlu1 %v5249_v50  ;;  %v5173_v56 = vpop.xlane.xlu1 %5172  ;;  %v8148_v4 = vpop.eup %8147  ;;  %8165 = vpow2.f32 %v5584_v18 }
 0xa28   : > { %5669 = vadd.xlane.f32.xlu0 %v5668_v47  ;;  %v5418_v53 = vpop.xlane.xlu0 %5417  ;;  %v10884_v13 = vpop.eup %8149  ;;  %8167 = vrcp.f32 %v5173_v56  ;;  %v5289_v8 = vmul.f32 %v8148_v4, %v11781_v15  ;;  %v11782_v47 = vld [vmem:[#allocation62_spill] sm:$0xff] }
 0xa29   : > { %v5500_v59 = vsub.f32 %v10480_v0, %v5418_v53  ;;  %v5501_v49 = vsub.f32 %v10484_v21, %v5418_v53  ;;  %v10888_v52 = vpop.eup %8151  ;;  %8169 = vpow2.f32 %v5586_v35  ;;  %v5677_v0 = vadd.f32 %v10848_v27, %v10843_v16  ;;  %v11783_v53 = vld [vmem:[#allocation58_spill] sm:$0xff] }
 0xa2a   : > { %v8154_v33 = vpop.eup %8153  ;;  %v5288_v35 = vmul.f32 %v8148_v4, %v11783_v53  ;;  %8171 = vpow2.f32 %v5582_v12 }
 0xa2b   : > { %5672 = vadd.xlane.f32.xlu1 %v5671_v55  ;;  %v5421_v6 = vpop.xlane.xlu1 %5420  ;;  %v5588_v21 = vmul.f32 1.442695, %v5500_v59  ;;  %v5590_v18 = vmul.f32 1.442695, %v5501_v49  ;;  %v5291_v56 = vmul.f32 %v8154_v33, %v11782_v47  ;;  %v11784_v55 = vld [vmem:[#allocation61_spill] sm:$0xff]  ;;  %v10898_v17 = vpop.eup %8155  ;;  %v5680_v59 = vadd.f32 %v10857_v48, %v10850_v1 }
 0xa2c   : > { %v5502_v50 = vsub.f32 %v10492_v44, %v5421_v6  ;;  %v5503_v28 = vsub.f32 %v10498_v20, %v5421_v6  ;;  %5675 = vadd.xlane.f32.xlu0 %v5674_v2  ;;  %v5176_v19 = vpop.xlane.xlu0 %5175  ;;  %v5290_v32 = vmul.f32 %v8154_v33, %v11784_v55  ;;  %v10902_v44 = vpop.eup %8157  ;;  %v11785_v55 = vld [vmem:[#allocation64_spill] sm:$0xff] }
 0xa2d   : > { %8173 = vrcp.f32 %v5176_v19  ;;  %v5351_v6 = vpack.c.bf16 %v5291_v56, %v5289_v8  ;;  %v10904_v15 = vpop.eup %8159 }
 0xa2e   : > { %v5592_v20 = vmul.f32 1.442695, %v5502_v50  ;;  %v5350_v49 = vpack.c.bf16 %v5290_v32, %v5288_v35  ;;  %8175 = vpow2.f32 %v5588_v21  ;;  %v5594_v4 = vmul.f32 1.442695, %v5503_v28 }
 0xa2f   : > { %5678 = vadd.xlane.f32.xlu1 %v5677_v0  ;;  %v5179_v2 = vpop.xlane.xlu1 %5178  ;;  %v8162_v47 = vpop.eup %8161  ;;  %8177 = vpow2.f32 %v5590_v18  ;;  %5894 = vmatprep.subr.bf16.mxu1 %v5351_v6  ;;  %v5683_v50 = vadd.f32 %v10867_v36, %v10863_v42  ;;  %v5686_v32 = vadd.f32 %v10876_v37, %v10871_v26 }
 0xa30   : > { %5681 = vadd.xlane.f32.xlu0 %v5680_v59  ;;  %v5424_v33 = vpop.xlane.xlu0 %5423  ;;  %v10910_v0 = vpop.eup %8163  ;;  %8179 = vrcp.f32 %v5179_v2  ;;  %5895 = vmatpush1.bf16.msra.mxu1 %v5350_v49  ;;  %v5293_v59 = vmul.f32 %v8162_v47, %v11785_v55  ;;  %v11787_v49 = vld [vmem:[#allocation63_spill] sm:$0xff] }
 0xa31   : > { %v5504_v12 = vsub.f32 %v10508_v38, %v5424_v33  ;;  %v5505_v53 = vsub.f32 %v10512_v11, %v5424_v33  ;;  %v10914_v21 = vpop.eup %8165  ;;  %8181 = vpow2.f32 %v5592_v20  ;;  %v5689_v38 = vadd.f32 %v10884_v13, %v10878_v57  ;;  %v11786_v20 = vld [vmem:[#allocation66_spill] sm:$0xff] }
 0xa32   : > { %v8168_v11 = vpop.eup %8167  ;;  %8183 = vpow2.f32 %v5594_v4  ;;  %v5292_v33 = vmul.f32 %v8162_v47, %v11787_v49 }
 0xa33   : > { %v5596_v28 = vmul.f32 1.442695, %v5504_v12  ;;  %v5598_v19 = vmul.f32 1.442695, %v5505_v53  ;;  %5684 = vadd.xlane.f32.xlu1 %v5683_v50  ;;  %v5427_v8 = vpop.xlane.xlu1 %5426  ;;  %v10921_v2 = vpop.eup %8169  ;;  %v5295_v6 = vmul.f32 %v8168_v11, %v11786_v20  ;;  %v11788_v12 = vld [vmem:[#allocation65_spill] sm:$0xff] }
 0xa34   : > { %v5506_v18 = vsub.f32 %v10520_v61, %v5427_v8  ;;  %v5507_v56 = vsub.f32 %v10526_v58, %v5427_v8  ;;  %5687 = vadd.xlane.f32.xlu0 %v5686_v32  ;;  %v5182_v35 = vpop.xlane.xlu0 %5181  ;;  %v5294_v53 = vmul.f32 %v8168_v11, %v11788_v12  ;;  %v5692_v61 = vadd.f32 %v10898_v17, %v10888_v52  ;;  %v10928_v55 = vpop.eup %8171 }
 0xa35   : > { %8185 = vpow2.f32 %v5596_v28  ;;  %v5353_v32 = vpack.c.bf16 %v5295_v6, %v5293_v59  ;;  %v5695_v11 = vadd.f32 %v10904_v15, %v10902_v44  ;;  %v5698_v12 = vadd.f32 %v10928_v55, %v10910_v0 }
 0xa36   : > { %8187 = vpow2.f32 %v5598_v19  ;;  %v5600_v50 = vmul.f32 1.442695, %v5506_v18  ;;  %v5602_v4 = vmul.f32 1.442695, %v5507_v56  ;;  %v5352_v8 = vpack.c.bf16 %v5294_v53, %v5292_v33  ;;  %v11789_v53 = vld [vmem:[#allocation68_spill] sm:$0xff] }
 0xa37   : > { %8189 = vrcp.f32 %v5182_v35  ;;  %5690 = vadd.xlane.f32.xlu1 %v5689_v38  ;;  %v5185_v58 = vpop.xlane.xlu1 %5184  ;;  %v8174_v20 = vpop.eup %8173  ;;  %5896 = vmatprep.subr.bf16.mxu1 %v5353_v32  ;;  %v5701_v38 = vadd.f32 %v10921_v2, %v10914_v21  ;;  %v11791_v32 = vld [vmem:[#allocation67_spill] sm:$0xff] }
 0xa38   : > { %8191 = vpow2.f32 %v5600_v50  ;;  %5693 = vadd.xlane.f32.xlu0 %v5692_v61  ;;  %v5430_v28 = vpop.xlane.xlu0 %5429  ;;  %v10934_v18 = vpop.eup %8175  ;;  %5897 = vmatpush1.bf16.msra.mxu1 %v5352_v8  ;;  %v5297_v50 = vmul.f32 %v8174_v20, %v11789_v53  ;;  %v11790_v61 = vld [vmem:[#allocation70_spill] sm:$0xff]  ;;  %v5296_v8 = vmul.f32 %v8174_v20, %v11791_v32 }
 0xa39   : > { %8193 = vpow2.f32 %v5602_v4  ;;  %v5508_v47 = vsub.f32 %v10536_v31, %v5430_v28  ;;  %v5509_v19 = vsub.f32 %v10540_v60, %v5430_v28  ;;  %v10938_v56 = vpop.eup %8177  ;;  %v11792_v28 = vld [vmem:[#allocation69_spill] sm:$0xff] }
 0xa3a   : > { %8195 = vrcp.f32 %v5185_v58  ;;  %v8180_v49 = vpop.eup %8179 }
 0xa3b   : > { %v5604_v35 = vmul.f32 1.442695, %v5508_v47  ;;  %v5606_v59 = vmul.f32 1.442695, %v5509_v19  ;;  %5696 = vadd.xlane.f32.xlu1 %v5695_v11  ;;  %v5433_v6 = vpop.xlane.xlu1 %5432  ;;  %v10945_v4 = vpop.eup %8181  ;;  %v5299_v58 = vmul.f32 %v8180_v49, %v11790_v61  ;;  %v5298_v47 = vmul.f32 %v8180_v49, %v11792_v28 }
 0xa3c   : > { %v5510_v31 = vsub.f32 %v10548_v45, %v5433_v6  ;;  %v5511_v60 = vsub.f32 %v10554_v23, %v5433_v6  ;;  %5702 = vadd.xlane.f32.xlu0 %v5701_v38  ;;  %v5188_v33 = vpop.xlane.xlu0 %5187  ;;  %v10950_v19 = vpop.eup %8183  ;;  %v5704_v11 = vadd.f32 %v10938_v56, %v10934_v18 }
 0xa3d   : > { %8197 = vpow2.f32 %v5604_v35  ;;  %v5355_v35 = vpack.c.bf16 %v5299_v58, %v5297_v50  ;;  %v5354_v53 = vpack.c.bf16 %v5298_v47, %v5296_v8 }
 0xa3e   : > { %8199 = vpow2.f32 %v5606_v59  ;;  %v5608_v45 = vmul.f32 1.442695, %v5510_v31  ;;  %v5610_v23 = vmul.f32 1.442695, %v5511_v60  ;;  %v5707_v60 = vadd.f32 %v10950_v19, %v10945_v4 }
 0xa3f   : > { %v10954_v38 = vpop.eup %8185  ;;  %8201 = vrcp.f32 %v5188_v33  ;;  %v5191_v6 = vpop.xlane.xlu1 %5190  ;;  %5699 = vadd.xlane.f32.xlu1 %v5698_v12  ;;  %5898 = vmatprep.subr.bf16.mxu1 %v5355_v35 }
 0xa40   : > { %11793 = vst [vmem:[#allocation39_spill] sm:$0xff] %v10954_v38  ;;  %v10956_v61 = vpop.eup %8187  ;;  %8203 = vpow2.f32 %v5608_v45  ;;  %5705 = vadd.xlane.f32.xlu0 %v5704_v11  ;;  %v5436_v20 = vpop.xlane.xlu0 %5435  ;;  %5899 = vmatpush1.bf16.msra.mxu1 %v5354_v53  ;;  %v11794_v45 = vld [vmem:[#allocation72_spill] sm:$0xff]  ;;  %v11795_v11 = vld [vmem:[#allocation71_spill] sm:$0xff]  ;;  %v11796_v53 = vld [vmem:[#allocation74_spill] sm:$0xff] }
 0xa41   : > { %v8190_v49 = vpop.eup %8189  ;;  %8205 = vpow2.f32 %v5610_v23  ;;  %v5512_v59 = vsub.f32 %v10564_v29, %v5436_v20  ;;  %v5513_v31 = vsub.f32 %v10568_v9, %v5436_v20  ;;  %v5710_v12 = vadd.f32 %v10956_v61, %v10954_v38 }
 0xa42   : > { %v10962_v33 = vpop.eup %8191  ;;  %8207 = vrcp.f32 %v5191_v6  ;;  %v5301_v23 = vmul.f32 %v8190_v49, %v11794_v45  ;;  %v5300_v6 = vmul.f32 %v8190_v49, %v11795_v11 }
 0xa43   : > { %v10966_v50 = vpop.eup %8193  ;;  %v5612_v58 = vmul.f32 1.442695, %v5512_v59  ;;  %v5614_v32 = vmul.f32 1.442695, %v5513_v31  ;;  %v5439_v8 = vpop.xlane.xlu1 %5438  ;;  %5708 = vadd.xlane.f32.xlu1 %v5707_v60  ;;  %v11797_v59 = vld [vmem:[#allocation73_spill] sm:$0xff] }
 0xa44   : > { %v8196_v28 = vpop.eup %8195  ;;  %v5514_v29 = vsub.f32 %v10576_v54, %v5439_v8  ;;  %v5515_v9 = vsub.f32 %v10582_v5, %v5439_v8  ;;  %5711 = vadd.xlane.f32.xlu0 %v5710_v12  ;;  %v5194_v47 = vpop.xlane.xlu0 %5193  ;;  %v5713_v35 = vadd.f32 %v10966_v50, %v10962_v33 }
 0xa45   : > { %8209 = vpow2.f32 %v5612_v58  ;;  %v5303_v20 = vmul.f32 %v8196_v28, %v11796_v53  ;;  %v5302_v31 = vmul.f32 %v8196_v28, %v11797_v59 }
 0xa46   : > { %8211 = vpow2.f32 %v5614_v32  ;;  %v5616_v60 = vmul.f32 1.442695, %v5514_v29  ;;  %v5618_v38 = vmul.f32 1.442695, %v5515_v9 }
 0xa47   : > { %v10976_v54 = vpop.eup %8197  ;;  %8213 = vrcp.f32 %v5194_v47  ;;  %v5197_v5 = vpop.xlane.xlu1 %5196  ;;  %5714 = vadd.xlane.f32.xlu1 %v5713_v35  ;;  %v5357_v12 = vpack.c.bf16 %v5303_v20, %v5301_v23  ;;  %v5356_v8 = vpack.c.bf16 %v5302_v31, %v5300_v6  ;;  %v11799_v20 = vld [vmem:[#allocation76_spill] sm:$0xff]  ;;  %v11800_v31 = vld [vmem:[#allocation78_spill] sm:$0xff] }
 0xa48   : > { %v10978_v45 = vpop.eup %8199  ;;  %8215 = vpow2.f32 %v5616_v60  ;;  %v5442_v49 = vpop.xlane.xlu0 %5441 }
 0xa49   : > { %v8202_v58 = vpop.eup %8201  ;;  %8217 = vpow2.f32 %v5618_v38  ;;  %5900 = vmatprep.subr.bf16.mxu1 %v5357_v12  ;;  %v5516_v11 = vsub.f32 %v10592_v46, %v5442_v49  ;;  %v5517_v32 = vsub.f32 %v10596_v7, %v5442_v49  ;;  %v5716_v28 = vadd.f32 %v10978_v45, %v10976_v54 }
 0xa4a   : > { %v10984_v29 = vpop.eup %8203  ;;  %8219 = vrcp.f32 %v5197_v5  ;;  %5901 = vmatpush1.bf16.msra.mxu1 %v5356_v8  ;;  %v5305_v59 = vmul.f32 %v8202_v58, %v11799_v20  ;;  %v11801_v5 = vld [vmem:[#allocation75_spill] sm:$0xff]  ;;  %v11802_v8 = vld [vmem:[#allocation77_spill] sm:$0xff] }
 0xa4b   : > { %11798 = vst [vmem:[#allocation40_spill] sm:$0xff] %v10984_v29  ;;  %v10986_v9 = vpop.eup %8205  ;;  %v5620_v47 = vmul.f32 1.442695, %v5516_v11  ;;  %v5622_v23 = vmul.f32 1.442695, %v5517_v32  ;;  %v5445_v6 = vpop.xlane.xlu1 %5444  ;;  %5717 = vadd.xlane.f32.xlu0 %v5716_v28  ;;  %v5304_v12 = vmul.f32 %v8202_v58, %v11801_v5 }
 0xa4c   : > { %v8208_v35 = vpop.eup %8207  ;;  %v5518_v38 = vsub.f32 %v10604_v41, %v5445_v6  ;;  %v5519_v46 = vsub.f32 %v10610_v14, %v5445_v6  ;;  %v5719_v7 = vadd.f32 %v10986_v9, %v10984_v29  ;;  %v5200_v53 = vpop.xlane.xlu0 %5199 }
 0xa4d   : > { %8221 = vpow2.f32 %v5620_v47  ;;  %v5307_v60 = vmul.f32 %v8208_v35, %v11800_v31  ;;  %v5306_v49 = vmul.f32 %v8208_v35, %v11802_v8 }
 0xa4e   : > { %8223 = vpow2.f32 %v5622_v23  ;;  %v5624_v11 = vmul.f32 1.442695, %v5518_v38  ;;  %v5626_v32 = vmul.f32 1.442695, %v5519_v46  ;;  %5720 = vadd.xlane.f32.xlu1 %v5719_v7 }
 0xa4f   : > { %v10996_v41 = vpop.eup %8209  ;;  %8225 = vrcp.f32 %v5200_v53  ;;  %v5203_v14 = vpop.xlane.xlu1 %5202  ;;  %v5359_v28 = vpack.c.bf16 %v5307_v60, %v5305_v59  ;;  %v5358_v6 = vpack.c.bf16 %v5306_v49, %v5304_v12  ;;  %v11806_v60 = vld [vmem:[#allocation86_spill] sm:$0xff]  ;;  %v11807_v12 = vld [vmem:[#allocation88_spill] sm:$0xff] }
 0xa50   : > { %11803 = vst [vmem:[#allocation41_spill] sm:$0xff] %v10996_v41  ;;  %v10998_v29 = vpop.eup %8211  ;;  %8227 = vpow2.f32 %v5624_v11  ;;  %v5448_v47 = vpop.xlane.xlu0 %5447  ;;  %v11808_v49 = vld [vmem:[#allocation80_spill] sm:$0xff] }
 0xa51   : > { %v8214_v20 = vpop.eup %8213  ;;  %8229 = vpow2.f32 %v5626_v32  ;;  %5902 = vmatprep.subr.bf16.mxu1 %v5359_v28  ;;  %v5520_v58 = vsub.f32 %v10620_v51, %v5448_v47  ;;  %v5521_v23 = vsub.f32 %v10624_v40, %v5448_v47  ;;  %v5722_v35 = vadd.f32 %v10998_v29, %v10996_v41  ;;  %v11809_v32 = vld [vmem:[#allocation82_spill] sm:$0xff]  ;;  %v11810_v28 = vld [vmem:[#allocation79_spill] sm:$0xff]  ;;  %v11811_v47 = vld [vmem:[#allocation81_spill] sm:$0xff] }
 0xa52   : > { %v11004_v38 = vpop.eup %8215  ;;  %8231 = vrcp.f32 %v5203_v14  ;;  %5903 = vmatpush1.bf16.msra.mxu1 %v5358_v6  ;;  %v5309_v11 = vmul.f32 %v8214_v20, %v11808_v49  ;;  %v5308_v6 = vmul.f32 %v8214_v20, %v11810_v28  ;;  %v11814_v20 = vld [vmem:[#allocation90_spill] sm:$0xff] }
 0xa53   : > { %11804 = vst [vmem:[#allocation42_spill] sm:$0xff] %v11004_v38  ;;  %v11006_v46 = vpop.eup %8217  ;;  %v5628_v7 = vmul.f32 1.442695, %v5520_v58  ;;  %v5630_v53 = vmul.f32 1.442695, %v5521_v23  ;;  %v5451_v59 = vpop.xlane.xlu1 %5450  ;;  %5723 = vadd.xlane.f32.xlu0 %v5722_v35 }
 0xa54   : > { %11805 = vst [vmem:[#allocation43_spill] sm:$0xff] %v11006_v46  ;;  %v8220_v31 = vpop.eup %8219  ;;  %v5522_v5 = vsub.f32 %v11806_v60, %v5451_v59  ;;  %v5523_v51 = vsub.f32 %v11807_v12, %v5451_v59  ;;  %v5725_v40 = vadd.f32 %v11006_v46, %v11004_v38  ;;  %v5206_v8 = vpop.xlane.xlu0 %5205 }
 0xa55   : > { %8233 = vpow2.f32 %v5628_v7  ;;  %v5311_v14 = vmul.f32 %v8220_v31, %v11809_v32  ;;  %v5310_v58 = vmul.f32 %v8220_v31, %v11811_v47  ;;  %v11815_v31 = vld [vmem:[#allocation92_spill] sm:$0xff] }
 0xa56   : > { %8235 = vpow2.f32 %v5630_v53  ;;  %v5632_v23 = vmul.f32 1.442695, %v5522_v5  ;;  %v5634_v35 = vmul.f32 1.442695, %v5523_v51  ;;  %5726 = vadd.xlane.f32.xlu1 %v5725_v40 }
 0xa57   : > { %v11016_v60 = vpop.eup %8221  ;;  %8237 = vrcp.f32 %v5206_v8  ;;  %v5209_v59 = vpop.xlane.xlu1 %5208  ;;  %v5361_v12 = vpack.c.bf16 %v5311_v14, %v5309_v11  ;;  %v5360_v38 = vpack.c.bf16 %v5310_v58, %v5308_v6  ;;  %v11818_v6 = vld [vmem:[#allocation94_spill] sm:$0xff]  ;;  %v11819_v58 = vld [vmem:[#allocation96_spill] sm:$0xff] }
 0xa58   : > { %11812 = vst [vmem:[#allocation44_spill] sm:$0xff] %v11016_v60  ;;  %v11018_v41 = vpop.eup %8223  ;;  %8239 = vpow2.f32 %v5632_v23  ;;  %v5454_v7 = vpop.xlane.xlu0 %5453 }
 0xa59   : > { %11813 = vst [vmem:[#allocation45_spill] sm:$0xff] %v11018_v41  ;;  %v8226_v49 = vpop.eup %8225  ;;  %8241 = vpow2.f32 %v5634_v35  ;;  %5904 = vmatprep.subr.bf16.mxu1 %v5361_v12  ;;  %v5524_v32 = vsub.f32 %v11814_v20, %v5454_v7  ;;  %v5525_v53 = vsub.f32 %v11815_v31, %v5454_v7  ;;  %v5728_v5 = vadd.f32 %v11018_v41, %v11016_v60  ;;  %v11820_v7 = vld [vmem:[#allocation84_spill] sm:$0xff]  ;;  %v11822_v31 = vld [vmem:[#allocation83_spill] sm:$0xff] }
 0xa5a   : > { %v11024_v51 = vpop.eup %8227  ;;  %8243 = vrcp.f32 %v5209_v59  ;;  %5905 = vmatpush1.bf16.msra.mxu1 %v5360_v38  ;;  %v5313_v20 = vmul.f32 %v8226_v49, %v11820_v7  ;;  %v11821_v59 = vld [vmem:[#allocation87_spill] sm:$0xff]  ;;  %v5312_v60 = vmul.f32 %v8226_v49, %v11822_v31  ;;  %v11826_v49 = vld [vmem:[#allocation98_spill] sm:$0xff] }
 0xa5b   : > { %11816 = vst [vmem:[#allocation46_spill] sm:$0xff] %v11024_v51  ;;  %v11026_v40 = vpop.eup %8229  ;;  %v5636_v8 = vmul.f32 1.442695, %v5524_v32  ;;  %v5638_v11 = vmul.f32 1.442695, %v5525_v53  ;;  %v5457_v14 = vpop.xlane.xlu1 %5456  ;;  %5729 = vadd.xlane.f32.xlu0 %v5728_v5  ;;  %v11823_v32 = vld [vmem:[#allocation85_spill] sm:$0xff] }
 0xa5c   : > { %11817 = vst [vmem:[#allocation47_spill] sm:$0xff] %v11026_v40  ;;  %v8232_v28 = vpop.eup %8231  ;;  %v5526_v47 = vsub.f32 %v11818_v6, %v5457_v14  ;;  %v5527_v23 = vsub.f32 %v11819_v58, %v5457_v14  ;;  %v5731_v35 = vadd.f32 %v11026_v40, %v11024_v51  ;;  %v5212_v12 = vpop.xlane.xlu0 %5211 }
 0xa5d   : > { %8245 = vpow2.f32 %v5636_v8  ;;  %v5315_v38 = vmul.f32 %v8232_v28, %v11821_v59  ;;  %v5314_v53 = vmul.f32 %v8232_v28, %v11823_v32  ;;  %v11827_v28 = vld [vmem:[#allocation100_spill] sm:$0xff] }
 0xa5e   : > { %8247 = vpow2.f32 %v5638_v11  ;;  %v5640_v5 = vmul.f32 1.442695, %v5526_v47  ;;  %v5642_v41 = vmul.f32 1.442695, %v5527_v23  ;;  %5732 = vadd.xlane.f32.xlu1 %v5731_v35  ;;  %v11831_v32 = vld [vmem:[#allocation104_spill] sm:$0xff] }
 0xa5f   : > { %v11036_v6 = vpop.eup %8233  ;;  %8249 = vrcp.f32 %v5212_v12  ;;  %v5215_v14 = vpop.xlane.xlu1 %5214  ;;  %v5363_v58 = vpack.c.bf16 %v5315_v38, %v5313_v20  ;;  %v5362_v51 = vpack.c.bf16 %v5314_v53, %v5312_v60 }
 0xa60   : > { %11824 = vst [vmem:[#allocation48_spill] sm:$0xff] %v11036_v6  ;;  %v11038_v40 = vpop.eup %8235  ;;  %8251 = vpow2.f32 %v5640_v5  ;;  %v5460_v8 = vpop.xlane.xlu0 %5459 }
 0xa61   : > { %11825 = vst [vmem:[#allocation49_spill] sm:$0xff] %v11038_v40  ;;  %v8238_v7 = vpop.eup %8237  ;;  %8253 = vpow2.f32 %v5642_v41  ;;  %5906 = vmatprep.subr.bf16.mxu1 %v5363_v58  ;;  %v5528_v59 = vsub.f32 %v11826_v49, %v5460_v8  ;;  %v5529_v11 = vsub.f32 %v11827_v28, %v5460_v8  ;;  %v5734_v47 = vadd.f32 %v11038_v40, %v11036_v6  ;;  %v11830_v41 = vld [vmem:[#allocation102_spill] sm:$0xff]  ;;  %v11832_v8 = vld [vmem:[#allocation91_spill] sm:$0xff]  ;;  %v11834_v28 = vld [vmem:[#allocation89_spill] sm:$0xff] }
 0xa62   : > { %v11044_v23 = vpop.eup %8239  ;;  %8255 = vrcp.f32 %v5215_v14  ;;  %5907 = vmatpush1.bf16.msra.mxu1 %v5362_v51  ;;  %v5317_v49 = vmul.f32 %v8238_v7, %v11832_v8  ;;  %v11833_v14 = vld [vmem:[#allocation95_spill] sm:$0xff]  ;;  %v5316_v6 = vmul.f32 %v8238_v7, %v11834_v28  ;;  %v11838_v7 = vld [vmem:[#allocation106_spill] sm:$0xff] }
 0xa63   : > { %11828 = vst [vmem:[#allocation50_spill] sm:$0xff] %v11044_v23  ;;  %v11046_v35 = vpop.eup %8241  ;;  %v5644_v60 = vmul.f32 1.442695, %v5528_v59  ;;  %v5646_v12 = vmul.f32 1.442695, %v5529_v11  ;;  %v5463_v20 = vpop.xlane.xlu1 %5462  ;;  %5735 = vadd.xlane.f32.xlu0 %v5734_v47  ;;  %v11835_v59 = vld [vmem:[#allocation93_spill] sm:$0xff] }
 0xa64   : > { %11829 = vst [vmem:[#allocation51_spill] sm:$0xff] %v11046_v35  ;;  %v8244_v38 = vpop.eup %8243  ;;  %v5530_v31 = vsub.f32 %v11830_v41, %v5463_v20  ;;  %v5531_v53 = vsub.f32 %v11831_v32, %v5463_v20  ;;  %v5737_v5 = vadd.f32 %v11046_v35, %v11044_v23  ;;  %v5218_v58 = vpop.xlane.xlu0 %5217 }
 0xa65   : > { %8257 = vpow2.f32 %v5644_v60  ;;  %v5319_v51 = vmul.f32 %v8244_v38, %v11833_v14  ;;  %v5318_v11 = vmul.f32 %v8244_v38, %v11835_v59  ;;  %v11839_v38 = vld [vmem:[#allocation108_spill] sm:$0xff] }
 0xa66   : > { %8259 = vpow2.f32 %v5646_v12  ;;  %v5648_v47 = vmul.f32 1.442695, %v5530_v31  ;;  %v5650_v40 = vmul.f32 1.442695, %v5531_v53  ;;  %5738 = vadd.xlane.f32.xlu1 %v5737_v5  ;;  %v11843_v59 = vld [vmem:[#allocation112_spill] sm:$0xff] }
 0xa67   : > { %v11056_v41 = vpop.eup %8245  ;;  %8261 = vrcp.f32 %v5218_v58  ;;  %v5221_v20 = vpop.xlane.xlu1 %5220  ;;  %v5365_v32 = vpack.c.bf16 %v5319_v51, %v5317_v49  ;;  %v5364_v23 = vpack.c.bf16 %v5318_v11, %v5316_v6 }
 0xa68   : > { %11836 = vst [vmem:[#allocation52_spill] sm:$0xff] %v11056_v41  ;;  %v11058_v35 = vpop.eup %8247  ;;  %8263 = vpow2.f32 %v5648_v47  ;;  %v5466_v60 = vpop.xlane.xlu0 %5465 }
 0xa69   : > { %11837 = vst [vmem:[#allocation55_spill] sm:$0xff] %v11058_v35  ;;  %v8250_v8 = vpop.eup %8249  ;;  %8265 = vpow2.f32 %v5650_v40  ;;  %5908 = vmatprep.subr.bf16.mxu1 %v5365_v32  ;;  %v5532_v14 = vsub.f32 %v11838_v7, %v5466_v60  ;;  %v5533_v12 = vsub.f32 %v11839_v38, %v5466_v60  ;;  %v5740_v31 = vadd.f32 %v11058_v35, %v11056_v41  ;;  %v11842_v40 = vld [vmem:[#allocation110_spill] sm:$0xff]  ;;  %v11844_v60 = vld [vmem:[#allocation99_spill] sm:$0xff]  ;;  %v11846_v38 = vld [vmem:[#allocation97_spill] sm:$0xff] }
 0xa6a   : > { %v11064_v53 = vpop.eup %8251  ;;  %8267 = vrcp.f32 %v5221_v20  ;;  %5909 = vmatpush1.bf16.msra.mxu1 %v5364_v23  ;;  %v5321_v7 = vmul.f32 %v8250_v8, %v11844_v60  ;;  %v11845_v20 = vld [vmem:[#allocation103_spill] sm:$0xff]  ;;  %v5320_v41 = vmul.f32 %v8250_v8, %v11846_v38  ;;  %v11850_v8 = vld [vmem:[#allocation114_spill] sm:$0xff] }
 0xa6b   : > { %11840 = vst [vmem:[#allocation54_spill] sm:$0xff] %v11064_v53  ;;  %v11066_v5 = vpop.eup %8253  ;;  %v5652_v6 = vmul.f32 1.442695, %v5532_v14  ;;  %v5654_v58 = vmul.f32 1.442695, %v5533_v12  ;;  %v5469_v49 = vpop.xlane.xlu1 %5468  ;;  %5741 = vadd.xlane.f32.xlu0 %v5740_v31  ;;  %v11847_v14 = vld [vmem:[#allocation101_spill] sm:$0xff] }
 0xa6c   : > { %11841 = vst [vmem:[#allocation57_spill] sm:$0xff] %v11066_v5  ;;  %v8256_v51 = vpop.eup %8255  ;;  %v5534_v28 = vsub.f32 %v11842_v40, %v5469_v49  ;;  %v5535_v11 = vsub.f32 %v11843_v59, %v5469_v49  ;;  %v5743_v47 = vadd.f32 %v11066_v5, %v11064_v53  ;;  %v5224_v32 = vpop.xlane.xlu0 %5223 }
 0xa6d   : > { %8269 = vpow2.f32 %v5652_v6  ;;  %v5323_v23 = vmul.f32 %v8256_v51, %v11845_v20  ;;  %v5322_v12 = vmul.f32 %v8256_v51, %v11847_v14  ;;  %v11851_v51 = vld [vmem:[#allocation116_spill] sm:$0xff] }
 0xa6e   : > { %8271 = vpow2.f32 %v5654_v58  ;;  %v5656_v31 = vmul.f32 1.442695, %v5534_v28  ;;  %v5658_v35 = vmul.f32 1.442695, %v5535_v11  ;;  %5744 = vadd.xlane.f32.xlu1 %v5743_v47  ;;  %v11854_v14 = vld [vmem:[#allocation120_spill] sm:$0xff] }
 0xa6f   : > { %v11076_v40 = vpop.eup %8257  ;;  %8273 = vrcp.f32 %v5224_v32  ;;  %v5227_v49 = vpop.xlane.xlu1 %5226  ;;  %v5367_v59 = vpack.c.bf16 %v5323_v23, %v5321_v7  ;;  %v5366_v53 = vpack.c.bf16 %v5322_v12, %v5320_v41 }
 0xa70   : > { %11848 = vst [vmem:[#allocation53_spill] sm:$0xff] %v11076_v40  ;;  %v11078_v5 = vpop.eup %8259  ;;  %8275 = vpow2.f32 %v5656_v31  ;;  %v5472_v6 = vpop.xlane.xlu0 %5471 }
 0xa71   : > { %11849 = vst [vmem:[#allocation56_spill] sm:$0xff] %v11078_v5  ;;  %v8262_v60 = vpop.eup %8261  ;;  %8277 = vpow2.f32 %v5658_v35  ;;  %5910 = vmatprep.subr.bf16.mxu1 %v5367_v59  ;;  %v5536_v20 = vsub.f32 %v11850_v8, %v5472_v6  ;;  %v5537_v58 = vsub.f32 %v11851_v51, %v5472_v6  ;;  %v5746_v28 = vadd.f32 %v11078_v5, %v11076_v40  ;;  %v11853_v35 = vld [vmem:[#allocation118_spill] sm:$0xff]  ;;  %v11855_v59 = vld [vmem:[#allocation107_spill] sm:$0xff]  ;;  %v11858_v40 = vld [vmem:[#allocation109_spill] sm:$0xff] }
 0xa72   : > { %v11084_v11 = vpop.eup %8263  ;;  %8279 = vrcp.f32 %v5227_v49  ;;  %5911 = vmatpush1.bf16.msra.mxu1 %v5366_v53  ;;  %v5325_v6 = vmul.f32 %v8262_v60, %v11855_v59  ;;  %v11856_v8 = vld [vmem:[#allocation111_spill] sm:$0xff]  ;;  %v11857_v53 = vld [vmem:[#allocation105_spill] sm:$0xff]  ;;  %v11860_v59 = vld [vmem:[#allocation14_spill] sm:$0xff] }
 0xa73   : > { %11852 = vst [vmem:[#allocation60_spill] sm:$0xff] %v11084_v11  ;;  %v11086_v47 = vpop.eup %8265  ;;  %v5660_v41 = vmul.f32 1.442695, %v5536_v20  ;;  %v5662_v32 = vmul.f32 1.442695, %v5537_v58  ;;  %v5475_v7 = vpop.xlane.xlu1 %5474  ;;  %5747 = vadd.xlane.f32.xlu0 %v5746_v28  ;;  %v5324_v51 = vmul.f32 %v8262_v60, %v11857_v53 }
 0xa74   : > { %v8268_v23 = vpop.eup %8267  ;;  %v5538_v38 = vsub.f32 %v11853_v35, %v5475_v7  ;;  %v5539_v12 = vsub.f32 %v11854_v14, %v5475_v7  ;;  %v5749_v31 = vadd.f32 %v11086_v47, %v11084_v11 }
 0xa75   : > { %8281 = vpow2.f32 %v5660_v41  ;;  %v5327_v49 = vmul.f32 %v8268_v23, %v11856_v8  ;;  %v5326_v20 = vmul.f32 %v8268_v23, %v11858_v40  ;;  %v11862_v8 = vld [vmem:[#allocation17_spill] sm:$0xff] }
 0xa76   : > { %8283 = vpow2.f32 %v5662_v32  ;;  %v5664_v58 = vmul.f32 1.442695, %v5538_v38  ;;  %v5666_v28 = vmul.f32 1.442695, %v5539_v12  ;;  %5750 = vadd.xlane.f32.xlu1 %v5749_v31  ;;  %v11863_v32 = vld [vmem:[#allocation18_spill] sm:$0xff]  ;;  %v11865_v38 = vld [vmem:[#allocation19_spill] sm:$0xff] }
 0xa77   : > { %v11096_v5 = vpop.eup %8269  ;;  %v4260_v35 = vpop.permute.xlu1 %4259  ;;  %v5369_v7 = vpack.c.bf16 %v5327_v49, %v5325_v6  ;;  %v5368_v14 = vpack.c.bf16 %v5326_v20, %v5324_v51 }
 0xa78   : > { %11859 = vst [vmem:[#allocation59_spill] sm:$0xff] %v11096_v5  ;;  %v11098_v46 = vpop.eup %8271  ;;  %8285 = vpow2.f32 %v5664_v58  ;;  %v11101_v41 = vadd.f32 %v11860_v59, %v4260_v35  ;;  %v11104_v11 = vadd.f32 %v11862_v8, %v4260_v35  ;;  %v4265_v60 = vpop.permute.xlu0 %4264  ;;  %v11869_v8 = vld [vmem:[#allocation113_spill] sm:$0xff] }
 0xa79   : > { %v8274_v40 = vpop.eup %8273  ;;  %8287 = vpow2.f32 %v5666_v28  ;;  %5912 = vmatprep.subr.bf16.mxu1 %v5369_v7  ;;  %v11107_v23 = vadd.f32 %v11863_v32, %v4265_v60  ;;  %v11110_v12 = vadd.f32 %v11865_v38, %v4265_v60  ;;  %v5752_v31 = vadd.f32 %v11098_v46, %v11096_v5  ;;  %v11867_v28 = vld [vmem:[#allocation115_spill] sm:$0xff] }
 0xa7a   : > { %11861 = vst [vmem:[#allocation62_spill] sm:$0xff] %v11101_v41  ;;  %v11114_v6 = vpop.eup %8275  ;;  %5913 = vmatpush1.bf16.msra.mxu1 %v5368_v14  ;;  %v5329_v35 = vmul.f32 %v8274_v40, %v11867_v28  ;;  %v11868_v7 = vld [vmem:[#allocation119_spill] sm:$0xff]  ;;  %v5328_v60 = vmul.f32 %v8274_v40, %v11869_v8  ;;  %v11870_v14 = vld [vmem:[#allocation117_spill] sm:$0xff] }
 0xa7b   : > { %11864 = vst [vmem:[#allocation58_spill] sm:$0xff] %v11107_v23  ;;  %11866 = vst [vmem:[#allocation61_spill] sm:$0xff] %v11114_v6  ;;  %v11116_v49 = vpop.eup %8277  ;;  %5753 = vadd.xlane.f32.xlu0 %v5752_v31  ;;  %v6503_v8 = vld [vmem:[%s11472_s13 + $0x48] sm:$0xff] }
 0xa7c   : > { %v8280_v20 = vpop.eup %8279  ;;  %v5755_v58 = vadd.f32 %v11116_v49, %v11114_v6 }
 0xa7d   : > { %v5331_v59 = vmul.f32 %v8280_v20, %v11868_v7  ;;  %v5330_v32 = vmul.f32 %v8280_v20, %v11870_v14  ;;  %v4235_v20 = vld [vmem:[%s11466_s7 + $0x30] sm:$0xff]  ;;  %v6155_v7 = vld [vmem:[%s11469_s10 + $0x18] sm:$0xff] }
 0xa7e   : > { %5756 = vadd.xlane.f32.xlu1 %v5755_v58  ;;  %v6153_v58 = vld [vmem:[%s11469_s10 + $0x8] sm:$0xff] }
 0xa7f   : > { %v11128_v38 = vpop.eup %8281  ;;  %v5371_v53 = vpack.c.bf16 %v5331_v59, %v5329_v35  ;;  %v5370_v41 = vpack.c.bf16 %v5330_v32, %v5328_v60  ;;  %v6154_v35 = vld [vmem:[%s11469_s10 + $0x10] sm:$0xff]  ;;  %v6502_v59 = vld [vmem:[%s11472_s13 + $0x40] sm:$0xff]  ;;  %v6505_v32 = vld [vmem:[%s11472_s13 + $0x58] sm:$0xff] }
 0xa80   : > { %11871 = vst [vmem:[#allocation64_spill] sm:$0xff] %v11128_v38  ;;  %v11130_v23 = vpop.eup %8283  ;;  %v6504_v60 = vld [vmem:[%s11472_s13 + $0x50] sm:$0xff] }
 0xa81   : > { %11872 = vst [vmem:[#allocation66_spill] sm:$0xff] %v11130_v23  ;;  %5914 = vmatprep.subr.bf16.mxu1 %v5371_v53  ;;  %v5758_v31 = vadd.f32 %v11130_v23, %v11128_v38  ;;  %v4236_v53 = vld [vmem:[%s11466_s7 + $0x38] sm:$0xff] }
 0xa82   : > { %v11134_v51 = vpop.eup %8285  ;;  %5915 = vmatpush1.bf16.msra.mxu1 %v5370_v41  ;;  %v6152_v41 = vld [vmem:[%s11469_s10] sm:$0xff] }
 0xa83   : > { %11873 = vst [vmem:[#allocation63_spill] sm:$0xff] %v11134_v51  ;;  %v11136_v28 = vpop.eup %8287  ;;  %5759 = vadd.xlane.f32.xlu0 %v5758_v31 }
 0xa84   : > { %11874 = vst [vmem:[#allocation65_spill] sm:$0xff] %v11136_v28  ;;  %v5761_v40 = vadd.f32 %v11136_v28, %v11134_v51 }
 0xa86   : > { %5762 = vadd.xlane.f32.xlu1 %v5761_v40  ;;  %v6494_v40 = vld [vmem:[%s11472_s13] sm:$0xff] }
 0xa97   : > { %4269 = vperm.xlu1 %7733, %v4235_v20  }
 0xa99   : > { %4274 = vperm.xlu0 %7732, %v4236_v53   ;;  %v6495_v53 = vld [vmem:[%s11472_s13 + $0x8] sm:$0xff] }
 0xa9b   : > { %6158 = vperm.xlu1 %7733, %v6152_v41  }
 0xa9d   : > { %6163 = vperm.xlu0 %7732, %v6153_v58   ;;  %v6496_v58 = vld [vmem:[%s11472_s13 + $0x10] sm:$0xff] }
 0xa9f   : > { %6168 = vperm.xlu1 %7733, %v6154_v35  }
 0xaa1   : > { %6173 = vperm.xlu0 %7732, %v6155_v7   ;;  %v6497_v7 = vld [vmem:[%s11472_s13 + $0x18] sm:$0xff] }
 0xaa3   : > { %6548 = vperm.xlu1 %7733, %v6502_v59  }
 0xaa5   : > { %6553 = vperm.xlu0 %7732, %v6503_v8   ;;  %v5230_v14 = vpop.xlane.xlu0 %5229  ;;  %v6498_v8 = vld [vmem:[%s11472_s13 + $0x20] sm:$0xff] }
 0xaa6   : > { %8289 = vrcp.f32 %v5230_v14 }
 0xaa7   : > { %6558 = vperm.xlu1 %7733, %v6504_v60  }
 0xaa8   : > { %v5233_v31 = vpop.xlane.xlu1 %5232 }
 0xaa9   : > { %8291 = vrcp.f32 %v5233_v31  ;;  %6563 = vperm.xlu0 %7732, %v6505_v32   ;;  %v5236_v20 = vpop.xlane.xlu0 %5235  ;;  %v6499_v32 = vld [vmem:[%s11472_s13 + $0x28] sm:$0xff] }
 0xaaa   : > { %8293 = vrcp.f32 %v5236_v20  ;;  %v6500_v20 = vld [vmem:[%s11472_s13 + $0x30] sm:$0xff] }
 0xaab   : > { %6508 = vperm.xlu1 %7733, %v6494_v40  }
 0xaac   : > { %v5239_v41 = vpop.xlane.xlu1 %5238 }
 0xaad   : > { %8295 = vrcp.f32 %v5239_v41  ;;  %6513 = vperm.xlu0 %7732, %v6495_v53   ;;  %v5242_v35 = vpop.xlane.xlu0 %5241 }
 0xaae   : > { %8297 = vrcp.f32 %v5242_v35  ;;  %v11875_v35 = vld [vmem:[#allocation28_spill] sm:$0xff] }
 0xaaf   : > { %6518 = vperm.xlu1 %7733, %v6496_v58  }
 0xab0   : > { %v5245_v59 = vpop.xlane.xlu1 %5244  ;;  %v8290_v60 = vpop.eup %8289 }
 0xab1   : > { %8299 = vrcp.f32 %v5245_v59  ;;  %6523 = vperm.xlu0 %7732, %v6497_v7   ;;  %v5248_v14 = vpop.xlane.xlu0 %5247  ;;  %v5333_v53 = vmul.f32 %v8290_v60, %v10777_v24  ;;  %v5332_v58 = vmul.f32 %v8290_v60, %v10774_v43  ;;  %v11877_v43 = vld [vmem:[#allocation32_spill] sm:$0xff] }
 0xab2   : > { %8301 = vrcp.f32 %v5248_v14 }
 0xab3   : > { %v8292_v31 = vpop.eup %8291  ;;  %6528 = vperm.xlu1 %7733, %v6498_v8   ;;  %v6501_v8 = vld [vmem:[%s11472_s13 + $0x38] sm:$0xff] }
 0xab4   : > { %v5251_v40 = vpop.xlane.xlu1 %5250  ;;  %v5335_v41 = vmul.f32 %v8292_v31, %v10783_v63  ;;  %v5334_v7 = vmul.f32 %v8292_v31, %v11875_v35  ;;  %v8294_v59 = vpop.eup %8293  ;;  %v11876_v63 = vld [vmem:[#allocation30_spill] sm:$0xff]  ;;  %v11878_v31 = vld [vmem:[#allocation29_spill] sm:$0xff] }
 0xab5   : > { %8303 = vrcp.f32 %v5251_v40  ;;  %6533 = vperm.xlu0 %7732, %v6499_v32   ;;  %v5670_v51 = vpop.xlane.xlu0 %5669  ;;  %v5337_v23 = vmul.f32 %v8294_v59, %v11876_v63  ;;  %v5336_v35 = vmul.f32 %v8294_v59, %v11878_v31  ;;  %v11879_v40 = vld [vmem:[#allocation31_spill] sm:$0xff] }
 0xab6   : > { %v5373_v38 = vpack.c.bf16 %v5335_v41, %v5333_v53  ;;  %v5372_v14 = vpack.c.bf16 %v5334_v7, %v5332_v58  ;;  %8305 = vrcp.f32 %v5670_v51 }
 0xab7   : > { %v8296_v28 = vpop.eup %8295  ;;  %6538 = vperm.xlu1 %7733, %v6500_v20  }
 0xab8   : > { %v5673_v24 = vpop.xlane.xlu1 %5672  ;;  %5916 = vmatprep.subr.bf16.mxu1 %v5373_v38  ;;  %v5339_v60 = vmul.f32 %v8296_v28, %v11877_v43  ;;  %v5338_v32 = vmul.f32 %v8296_v28, %v11879_v40  ;;  %v8298_v6 = vpop.eup %8297  ;;  %v11880_v38 = vld [vmem:[#allocation34_spill] sm:$0xff]  ;;  %v11881_v43 = vld [vmem:[#allocation33_spill] sm:$0xff] }
 0xab9   : > { %8307 = vrcp.f32 %v5673_v24  ;;  %6543 = vperm.xlu0 %7732, %v6501_v8   ;;  %5917 = vmatpush1.bf16.msra.mxu1 %v5372_v14  ;;  %v5676_v53 = vpop.xlane.xlu0 %5675  ;;  %v5341_v7 = vmul.f32 %v8298_v6, %v11880_v38  ;;  %v5340_v5 = vmul.f32 %v8298_v6, %v11881_v43 }
 0xaba   : > { %8309 = vrcp.f32 %v5676_v53  ;;  %v5375_v41 = vpack.c.bf16 %v5339_v60, %v5337_v23  ;;  %v5374_v58 = vpack.c.bf16 %v5338_v32, %v5336_v35  ;;  %v11882_v60 = vld [vmem:[#allocation36_spill] sm:$0xff]  ;;  %v11883_v32 = vld [vmem:[#allocation35_spill] sm:$0xff] }
 0xabb   : > { %v8300_v20 = vpop.eup %8299 }
 0xabc   : > { %v5679_v51 = vpop.xlane.xlu1 %5678  ;;  %5918 = vmatprep.subr.bf16.mxu1 %v5375_v41  ;;  %v5343_v63 = vmul.f32 %v8300_v20, %v10805_v62  ;;  %v5342_v59 = vmul.f32 %v8300_v20, %v10802_v22  ;;  %v8302_v28 = vpop.eup %8301 }
 0xabd   : > { %8311 = vrcp.f32 %v5679_v51  ;;  %5919 = vmatpush1.bf16.msra.mxu1 %v5374_v58  ;;  %v5682_v8 = vpop.xlane.xlu0 %5681  ;;  %v5345_v35 = vmul.f32 %v8302_v28, %v11882_v60  ;;  %v5344_v62 = vmul.f32 %v8302_v28, %v11883_v32  ;;  %v11890_v32 = vld [vmem:[#allocation23_spill] sm:$0xff] }
 0xabe   : > { %v5377_v14 = vpack.c.bf16 %v5343_v63, %v5341_v7  ;;  %v5376_v24 = vpack.c.bf16 %v5342_v59, %v5340_v5  ;;  %8313 = vrcp.f32 %v5682_v8  ;;  %v11884_v8 = vld [vmem:[#allocation38_spill] sm:$0xff] }
 0xabf   : > { %v8304_v31 = vpop.eup %8303 }
 0xac0   : > { %v5685_v23 = vpop.xlane.xlu1 %5684  ;;  %5920 = vmatprep.subr.bf16.mxu1 %v5377_v14  ;;  %v5347_v40 = vmul.f32 %v8304_v31, %v10819_v39  ;;  %v5346_v6 = vmul.f32 %v8304_v31, %v10814_v34  ;;  %v8306_v53 = vpop.eup %8305  ;;  %v11885_v31 = vld [vmem:[#allocation15_spill] sm:$0xff] }
 0xac1   : > { %8315 = vrcp.f32 %v5685_v23  ;;  %5921 = vmatpush1.bf16.msra.mxu1 %v5376_v24  ;;  %v5688_v22 = vpop.xlane.xlu0 %5687  ;;  %v5797_v38 = vmul.f32 %v8306_v53, %v10824_v3  ;;  %v5796_v39 = vmul.f32 %v8306_v53, %v10821_v30  ;;  %v11886_v23 = vld [vmem:[#allocation16_spill] sm:$0xff]  ;;  %v11888_v30 = vld [vmem:[#allocation37_spill] sm:$0xff] }
 0xac2   : > { %8317 = vrcp.f32 %v5688_v22  ;;  %v5379_v41 = vpack.c.bf16 %v5347_v40, %v5345_v35  ;;  %v5378_v58 = vpack.c.bf16 %v5346_v6, %v5344_v62  ;;  %v11887_v60 = vpack.c.bf16 %v11885_v31, %v11886_v23  ;;  %v11889_v40 = vld [vmem:[#allocation21_spill] sm:$0xff] }
 0xac3   : > { %v8308_v5 = vpop.eup %8307  ;;  %v11891_v62 = vpack.c.bf16 %v11889_v40, %v11890_v32 }
 0xac4   : > { %v8310_v20 = vpop.eup %8309  ;;  %v5691_v51 = vpop.xlane.xlu1 %5690  ;;  %5922 = vmatprep.subr.bf16.mxu1 %v5379_v41  ;;  %v5799_v7 = vmul.f32 %v8308_v5, %v10833_v10  ;;  %v5798_v63 = vmul.f32 %v8308_v5, %v10829_v25 }
 0xac5   : > { %8319 = vrcp.f32 %v5691_v51  ;;  %5923 = vmatpush1.bf16.msra.mxu1 %v5378_v58  ;;  %v5694_v34 = vpop.xlane.xlu0 %5693  ;;  %v5801_v14 = vmul.f32 %v8310_v20, %v11884_v8  ;;  %v5800_v10 = vmul.f32 %v8310_v20, %v11888_v30 }
 0xac6   : > { %v5861_v43 = vpack.c.bf16 %v5799_v7, %v5797_v38  ;;  %v5860_v59 = vpack.c.bf16 %v5798_v63, %v5796_v39  ;;  %8321 = vrcp.f32 %v5694_v34 }
 0xac7   : > { %v8312_v28 = vpop.eup %8311 }
 0xac8   : > { %v5697_v24 = vpop.xlane.xlu1 %5696  ;;  %5925 = vmatmul.mubr.bf16.vlgmr.msra.gmra.mrb[192].mxu1 %v11887_v60  ;;  %5945 = vmatprep.subr.bf16.mxu1 %v5861_v43  ;;  %v5803_v3 = vmul.f32 %v8312_v28, %v10848_v27  ;;  %v5802_v25 = vmul.f32 %v8312_v28, %v10843_v16  ;;  %v8314_v35 = vpop.eup %8313  ;;  %v11893_v28 = vld [vmem:[#allocation22_spill] sm:$0xff] }
 0xac9   : > { %8323 = vrcp.f32 %v5697_v24  ;;  %5934 = vmatprep.mubr.bf16.mxu1 %v11891_v62  ;;  %5946 = vmatpush1.bf16.msra.mxu1 %v5860_v59  ;;  %v5703_v6 = vpop.xlane.xlu0 %5702  ;;  %v5805_v27 = vmul.f32 %v8314_v35, %v10857_v48  ;;  %v5804_v16 = vmul.f32 %v8314_v35, %v10850_v1  ;;  %v11892_v59 = vld [vmem:[#allocation20_spill] sm:$0xff] }
 0xaca   : > { %v5863_v53 = vpack.c.bf16 %v5803_v3, %v5801_v14  ;;  %v5862_v22 = vpack.c.bf16 %v5802_v25, %v5800_v10  ;;  %8325 = vrcp.f32 %v5703_v6  ;;  %v11894_v8 = vpack.c.bf16 %v11892_v59, %v11893_v28 }
 0xacb   : > { %v8316_v41 = vpop.eup %8315  ;;  %v11895_v14 = vpack.c.bf16 %v11110_v12, %v11104_v11 }
 0xacc   : > { %v8318_v58 = vpop.eup %8317  ;;  %v5700_v5 = vpop.xlane.xlu1 %5699  ;;  %5947 = vmatprep.subr.bf16.mxu1 %v5863_v53  ;;  %v5807_v20 = vmul.f32 %v8316_v41, %v10867_v36  ;;  %v5806_v51 = vmul.f32 %v8316_v41, %v10863_v42 }
 0xacd   : > { %8327 = vrcp.f32 %v5700_v5  ;;  %5948 = vmatpush1.bf16.msra.mxu1 %v5862_v22  ;;  %v5706_v38 = vpop.xlane.xlu0 %5705  ;;  %v5809_v34 = vmul.f32 %v8318_v58, %v10876_v37  ;;  %v5808_v1 = vmul.f32 %v8318_v58, %v10871_v26 }
 0xace   : > { %8329 = vrcp.f32 %v5706_v38  ;;  %v5865_v7 = vpack.c.bf16 %v5807_v20, %v5805_v27  ;;  %v5864_v39 = vpack.c.bf16 %v5806_v51, %v5804_v16 }
 0xacf   : > { %v8320_v63 = vpop.eup %8319 }
 0xad0   : > { %v5709_v43 = vpop.xlane.xlu1 %5708  ;;  %5935 = vmatmul.mubr.bf16.gmra.mrb[196].mxu1 %v11894_v8  ;;  %5949 = vmatprep.subr.bf16.mxu1 %v5865_v7  ;;  %v5811_v48 = vmul.f32 %v8320_v63, %v10884_v13  ;;  %v5810_v42 = vmul.f32 %v8320_v63, %v10878_v57  ;;  %v8322_v36 = vpop.eup %8321  ;;  %v11897_v63 = vld [vmem:[#allocation40_spill] sm:$0xff] }
 0xad1   : > { %8331 = vrcp.f32 %v5709_v43  ;;  %5950 = vmatpush1.bf16.msra.mxu1 %v5864_v39  ;;  %5977 = vmatprep.mubr.bf16.mxu1 %v11895_v14  ;;  %v5712_v37 = vpop.xlane.xlu0 %5711  ;;  %v5813_v13 = vmul.f32 %v8322_v36, %v10898_v17  ;;  %v5812_v57 = vmul.f32 %v8322_v36, %v10888_v52  ;;  %v11899_v36 = vld [vmem:[#allocation41_spill] sm:$0xff]  ;;  %v11900_v14 = vld [vmem:[#allocation42_spill] sm:$0xff] }
 0xad2   : > { %v5867_v24 = vpack.c.bf16 %v5811_v48, %v5809_v34  ;;  %v5866_v31 = vpack.c.bf16 %v5810_v42, %v5808_v1  ;;  %8333 = vrcp.f32 %v5712_v37  ;;  %v11898_v42 = vld [vmem:[#allocation43_spill] sm:$0xff] }
 0xad3   : > { %v8324_v23 = vpop.eup %8323 }
 0xad4   : > { %v5715_v60 = vpop.xlane.xlu1 %5714  ;;  %5951 = vmatprep.subr.bf16.mxu1 %v5867_v24  ;;  %v5815_v26 = vmul.f32 %v8324_v23, %v10904_v15  ;;  %v5814_v3 = vmul.f32 %v8324_v23, %v10902_v44  ;;  %v8326_v30 = vpop.eup %8325 }
 0xad5   : > { %8335 = vrcp.f32 %v5715_v60  ;;  %5952 = vmatpush1.bf16.msra.mxu1 %v5866_v31  ;;  %v5819_v32 = vmul.f32 %v8326_v30, %v10921_v2  ;;  %v5818_v15 = vmul.f32 %v8326_v30, %v10914_v21  ;;  %v11903_v30 = vld [vmem:[#allocation44_spill] sm:$0xff] }
 0xad6   : > { %v5869_v11 = vpack.c.bf16 %v5815_v26, %v5813_v13  ;;  %v5868_v12 = vpack.c.bf16 %v5814_v3, %v5812_v57  ;;  %v11901_v26 = vld [vmem:[#allocation45_spill] sm:$0xff]  ;;  %v11902_v3 = vld [vmem:[#allocation47_spill] sm:$0xff] }
 0xad7   : > { %v8328_v10 = vpop.eup %8327 }
 0xad8   : > { %v8330_v25 = vpop.eup %8329  ;;  %5953 = vmatprep.subr.bf16.mxu1 %v5869_v11  ;;  %v5718_v35 = vpop.xlane.xlu0 %5717  ;;  %v5817_v40 = vmul.f32 %v8328_v10, %v10928_v55  ;;  %v5816_v17 = vmul.f32 %v8328_v10, %v10910_v0 }
 0xad9   : > { %5954 = vmatpush1.bf16.msra.mxu1 %v5868_v12  ;;  %8337 = vrcp.f32 %v5718_v35  ;;  %v5821_v53 = vmul.f32 %v8330_v25, %v10938_v56  ;;  %v5820_v55 = vmul.f32 %v8330_v25, %v10934_v18  ;;  %v11896_v56 = vld [vmem:[#allocation39_spill] sm:$0xff]  ;;  %v11904_v12 = vld [vmem:[#allocation46_spill] sm:$0xff] }
 0xada   : > { %v5871_v52 = vpack.c.bf16 %v5819_v32, %v5817_v40  ;;  %v5870_v44 = vpack.c.bf16 %v5818_v15, %v5816_v17 }
 0xadb   : > { %v8332_v62 = vpop.eup %8331  ;;  %v5721_v6 = vpop.xlane.xlu1 %5720 }
 0xadc   : > { %8339 = vrcp.f32 %v5721_v6  ;;  %5955 = vmatprep.subr.bf16.mxu1 %v5871_v52  ;;  %v5823_v22 = vmul.f32 %v8332_v62, %v10950_v19  ;;  %v5822_v2 = vmul.f32 %v8332_v62, %v10945_v4  ;;  %v8334_v41 = vpop.eup %8333  ;;  %v11905_v52 = vld [vmem:[#allocation49_spill] sm:$0xff]  ;;  %v11906_v62 = vld [vmem:[#allocation51_spill] sm:$0xff] }
 0xadd   : > { %5956 = vmatpush1.bf16.msra.mxu1 %v5870_v44  ;;  %v5825_v27 = vmul.f32 %v8334_v41, %v10956_v61  ;;  %v5824_v16 = vmul.f32 %v8334_v41, %v11896_v56 }
 0xade   : > { %v5873_v0 = vpack.c.bf16 %v5823_v22, %v5821_v53  ;;  %v5872_v21 = vpack.c.bf16 %v5822_v2, %v5820_v55  ;;  %v11907_v53 = vld [vmem:[#allocation48_spill] sm:$0xff]  ;;  %v11908_v55 = vld [vmem:[#allocation50_spill] sm:$0xff] }
 0xadf   : > { %v8336_v58 = vpop.eup %8335 }
 0xae0   : > { %5957 = vmatprep.subr.bf16.mxu1 %v5873_v0  ;;  %v5724_v5 = vpop.xlane.xlu0 %5723  ;;  %v5827_v20 = vmul.f32 %v8336_v58, %v10966_v50  ;;  %v5826_v51 = vmul.f32 %v8336_v58, %v10962_v33 }
 0xae1   : > { %5958 = vmatpush1.bf16.msra.mxu1 %v5872_v21  ;;  %8341 = vrcp.f32 %v5724_v5 }
 0xae2   : > { %v5875_v18 = vpack.c.bf16 %v5827_v20, %v5825_v27  ;;  %v5874_v19 = vpack.c.bf16 %v5826_v51, %v5824_v16  ;;  %v11909_v20 = vld [vmem:[#allocation55_spill] sm:$0xff]  ;;  %v11910_v16 = vld [vmem:[#allocation57_spill] sm:$0xff] }
 0xae3   : > { %v5727_v4 = vpop.xlane.xlu1 %5726  ;;  %v8338_v38 = vpop.eup %8337 }
 0xae4   : > { %8343 = vrcp.f32 %v5727_v4  ;;  %5959 = vmatprep.subr.bf16.mxu1 %v5875_v18  ;;  %v5829_v39 = vmul.f32 %v8338_v38, %v10978_v45  ;;  %v5828_v50 = vmul.f32 %v8338_v38, %v10976_v54  ;;  %v11911_v18 = vld [vmem:[#allocation52_spill] sm:$0xff]  ;;  %v11912_v4 = vld [vmem:[#allocation54_spill] sm:$0xff] }
 0xae5   : > { %5960 = vmatpush1.bf16.msra.mxu1 %v5874_v19 }
 0xae6   : > { %v8340_v7 = vpop.eup %8339 }
 0xae7   : > { %v5831_v61 = vmul.f32 %v8340_v7, %v10986_v9  ;;  %v5830_v34 = vmul.f32 %v8340_v7, %v11897_v63 }
 0xae8   : > { %v5730_v43 = vpop.xlane.xlu0 %5729 }
 0xae9   : > { %v5877_v33 = vpack.c.bf16 %v5831_v61, %v5829_v39  ;;  %v5876_v59 = vpack.c.bf16 %v5830_v34, %v5828_v50  ;;  %8345 = vrcp.f32 %v5730_v43  ;;  %v11913_v43 = vld [vmem:[#allocation56_spill] sm:$0xff] }
 0xaeb   : > { %v5733_v28 = vpop.xlane.xlu1 %5732  ;;  %5961 = vmatprep.subr.bf16.mxu1 %v5877_v33  ;;  %v8342_v8 = vpop.eup %8341 }
 0xaec   : > { %8347 = vrcp.f32 %v5733_v28  ;;  %5962 = vmatpush1.bf16.msra.mxu1 %v5876_v59  ;;  %v5833_v1 = vmul.f32 %v8342_v8, %v10998_v29  ;;  %v5832_v9 = vmul.f32 %v8342_v8, %v11899_v36  ;;  %v11914_v28 = vld [vmem:[#allocation53_spill] sm:$0xff] }
 0xaee   : > { %v8344_v48 = vpop.eup %8343 }
 0xaef   : > { %v5835_v45 = vmul.f32 %v8344_v48, %v11898_v42  ;;  %v5834_v54 = vmul.f32 %v8344_v48, %v11900_v14  ;;  %v11915_v48 = vld [vmem:[#allocation60_spill] sm:$0xff] }
 0xaf0   : > { %v5736_v37 = vpop.xlane.xlu0 %5735 }
 0xaf1   : > { %v5879_v24 = vpack.c.bf16 %v5835_v45, %v5833_v1  ;;  %v5878_v31 = vpack.c.bf16 %v5834_v54, %v5832_v9  ;;  %8349 = vrcp.f32 %v5736_v37 }
 0xaf3   : > { %v5739_v23 = vpop.xlane.xlu1 %5738  ;;  %5963 = vmatprep.subr.bf16.mxu1 %v5879_v24  ;;  %v8346_v60 = vpop.eup %8345 }
 0xaf4   : > { %8351 = vrcp.f32 %v5739_v23  ;;  %5964 = vmatpush1.bf16.msra.mxu1 %v5878_v31  ;;  %v5837_v57 = vmul.f32 %v8346_v60, %v11901_v26  ;;  %v5836_v11 = vmul.f32 %v8346_v60, %v11903_v30  ;;  %v11917_v60 = vld [vmem:[#allocation61_spill] sm:$0xff]  ;;  %v11918_v26 = vld [vmem:[#allocation24_spill] sm:$0xff] }
 0xaf6   : > { %v8348_v13 = vpop.eup %8347 }
 0xaf7   : > { %v5839_v29 = vmul.f32 %v8348_v13, %v11902_v3  ;;  %v5838_v10 = vmul.f32 %v8348_v13, %v11904_v12  ;;  %v11919_v3 = vld [vmem:[#allocation25_spill] sm:$0xff] }
 0xaf8   : > { %v5742_v25 = vpop.xlane.xlu0 %5741 }
 0xaf9   : > { %v5881_v35 = vpack.c.bf16 %v5839_v29, %v5837_v57  ;;  %v5880_v40 = vpack.c.bf16 %v5838_v10, %v5836_v11  ;;  %8353 = vrcp.f32 %v5742_v25  ;;  %v11920_v11 = vld [vmem:[#allocation26_spill] sm:$0xff]  ;;  %v11921_v10 = vld [vmem:[#allocation27_spill] sm:$0xff] }
 0xafb   : > { %v5745_v32 = vpop.xlane.xlu1 %5744  ;;  %5965 = vmatprep.subr.bf16.mxu1 %v5881_v35  ;;  %v8350_v17 = vpop.eup %8349 }
 0xafc   : > { %8355 = vrcp.f32 %v5745_v32  ;;  %5966 = vmatpush1.bf16.msra.mxu1 %v5880_v40  ;;  %v5841_v44 = vmul.f32 %v8350_v17, %v11905_v52  ;;  %v5840_v22 = vmul.f32 %v8350_v17, %v11907_v53 }
 0xafe   : > { %v8352_v15 = vpop.eup %8351 }
 0xaff   : > { %v5843_v6 = vmul.f32 %v8352_v15, %v11906_v62  ;;  %v5842_v2 = vmul.f32 %v8352_v15, %v11908_v55  ;;  %v11922_v15 = vld [vmem:[#allocation66_spill] sm:$0xff] }
 0xb00   : > { %v5748_v41 = vpop.xlane.xlu0 %5747 }
 0xb01   : > { %v5883_v0 = vpack.c.bf16 %v5843_v6, %v5841_v44  ;;  %v5882_v21 = vpack.c.bf16 %v5842_v2, %v5840_v22  ;;  %8357 = vrcp.f32 %v5748_v41  ;;  %v11923_v44 = vld [vmem:[#allocation65_spill] sm:$0xff]  ;;  %v11924_v6 = vld [vmem:[#allocation64_spill] sm:$0xff]  ;;  %v11925_v22 = vld [vmem:[#allocation63_spill] sm:$0xff] }
 0xb03   : > { %v5751_v58 = vpop.xlane.xlu1 %5750  ;;  %5967 = vmatprep.subr.bf16.mxu1 %v5883_v0  ;;  %v8354_v5 = vpop.eup %8353  ;;  %v11926_v0 = vld [vmem:[#allocation58_spill] sm:$0xff] }
 0xb04   : > { %8359 = vrcp.f32 %v5751_v58  ;;  %5968 = vmatpush1.bf16.msra.mxu1 %v5882_v21  ;;  %v5845_v56 = vmul.f32 %v8354_v5, %v11909_v20  ;;  %v5844_v19 = vmul.f32 %v8354_v5, %v11911_v18  ;;  %v11927_v21 = vld [vmem:[#allocation62_spill] sm:$0xff]  ;;  %v11929_v5 = vmov 0  }
 0xb05   : > { %v11928_v58 = vpack.c.bf16 %v11926_v0, %v11927_v21 }
 0xb06   : > { %v8356_v27 = vpop.eup %8355 }
 0xb07   : > { %v5847_v51 = vmul.f32 %v8356_v27, %v11910_v16  ;;  %v5846_v38 = vmul.f32 %v8356_v27, %v11912_v4 }
 0xb08   : > { %v5754_v7 = vpop.xlane.xlu0 %5753 }
 0xb09   : > { %v5885_v39 = vpack.c.bf16 %v5847_v51, %v5845_v56  ;;  %v5884_v61 = vpack.c.bf16 %v5846_v38, %v5844_v19  ;;  %8361 = vrcp.f32 %v5754_v7 }
 0xb0b   : > { %v5757_v50 = vpop.xlane.xlu1 %5756  ;;  %5969 = vmatprep.subr.bf16.mxu1 %v5885_v39  ;;  %v8358_v63 = vpop.eup %8357 }
 0xb0c   : > { %8363 = vrcp.f32 %v5757_v50  ;;  %5970 = vmatpush1.bf16.msra.mxu1 %v5884_v61  ;;  %v5849_v33 = vmul.f32 %v8358_v63, %v11913_v43  ;;  %v5848_v8 = vmul.f32 %v8358_v63, %v11914_v28 }
 0xb0e   : > { %v8360_v34 = vpop.eup %8359 }
 0xb0f   : > { %v5851_v59 = vmul.f32 %v8360_v34, %v11086_v47  ;;  %v5850_v1 = vmul.f32 %v8360_v34, %v11915_v48  ;;  %v11916_v47 = vld [vmem:[#allocation59_spill] sm:$0xff] }
 0xb10   : > { %v5760_v42 = vpop.xlane.xlu0 %5759 }
 0xb11   : > { %v5887_v45 = vpack.c.bf16 %v5851_v59, %v5849_v33  ;;  %v5886_v36 = vpack.c.bf16 %v5850_v1, %v5848_v8  ;;  %8365 = vrcp.f32 %v5760_v42 }
 0xb13   : > { %v5763_v9 = vpop.xlane.xlu1 %5762  ;;  %5971 = vmatprep.subr.bf16.mxu1 %v5887_v45  ;;  %v8362_v14 = vpop.eup %8361 }
 0xb14   : > { %8367 = vrcp.f32 %v5763_v9  ;;  %5972 = vmatpush1.bf16.msra.mxu1 %v5886_v36  ;;  %v5853_v24 = vmul.f32 %v8362_v14, %v11098_v46  ;;  %v5852_v23 = vmul.f32 %v8362_v14, %v11916_v47  ;;  %v7833_v36 = vld [vmem:[%s11468_s9] sm:$0xff]   ;;  %v7834_v9 = vld [vmem:[%s11468_s9 + $0x8] sm:$0xff]   ;;  %v11930_v14 = vld [vmem:[#allocation12_spill] sm:$0xff] }
 0xb15   : > { %v11933_v47 = vld [vmem:[#allocation11_spill] sm:$0xff] }
 0xb16   : > { %v8364_v54 = vpop.eup %8363 }
 0xb17   : > { %v4270_v37 = vpop.permute.xlu1 %4269  ;;  %v5855_v31 = vmul.f32 %v8364_v54, %v11116_v49  ;;  %v5854_v13 = vmul.f32 %v8364_v54, %v11917_v60  ;;  %v7835_v54 = vld [vmem:[%s11467_s8] sm:$0xff]   ;;  %v7838_v60 = vld [vmem:[%s11471_s12 + $0x8] sm:$0xff]  }
 0xb18   : > { %v4374_v57 = vadd.f32 %v11918_v26, %v4270_v37  ;;  %v4376_v29 = vadd.f32 %v11919_v3, %v4270_v37  ;;  %v4275_v30 = vpop.permute.xlu0 %4274  ;;  %v11931_v37 = vld [vmem:[#allocation10_spill] sm:$0xff]  ;;  %v7840_v26 = vld [vmem:[%s11471_s12 + $0x18] sm:$0xff]   ;;  %v7842_v3 = vld [vmem:[%s11471_s12 + $0x28] sm:$0xff]  }
 0xb19   : > { %v4378_v12 = vadd.f32 %v11920_v11, %v4275_v30  ;;  %v4380_v25 = vadd.f32 %v11921_v10, %v4275_v30  ;;  %v5889_v35 = vpack.c.bf16 %v5855_v31, %v5853_v24  ;;  %v5888_v40 = vpack.c.bf16 %v5854_v13, %v5852_v23  ;;  %v11932_v24 = vld [vmem:[#allocation13_spill] sm:$0xff]  ;;  %v7836_v31 = vld [vmem:[%s11467_s8 + $0x8] sm:$0xff]   ;;  %v7837_v23 = vld [vmem:[%s11471_s12] sm:$0xff]  }
 0xb1a   : > { %v7839_v13 = vld [vmem:[%s11471_s12 + $0x10] sm:$0xff]  }
 0xb1b   : > { %v4400_v32 = vpack.c.bf16 %v4378_v12, %v4374_v57  ;;  %v4401_v17 = vpack.c.bf16 %v4380_v25, %v4376_v29  ;;  %5973 = vmatprep.subr.bf16.mxu1 %v5889_v35  ;;  %v8366_v46 = vpop.eup %8365  ;;  %v7841_v57 = vld [vmem:[%s11471_s12 + $0x20] sm:$0xff]   ;;  %v6159_v30 = vpop.permute.xlu1 %6158 }
 0xb1c   : > { %5974 = vmatpush1.bf16.msra.mxu1 %v5888_v40  ;;  %v5857_v52 = vmul.f32 %v8366_v46, %v11922_v15  ;;  %v5856_v53 = vmul.f32 %v8366_v46, %v11924_v6  ;;  %v6164_v12 = vpop.permute.xlu0 %6163 }
 0xb1e   : > { %v8368_v49 = vpop.eup %8367 }
 0xb1f   : > { %v5859_v62 = vmul.f32 %v8368_v49, %v11923_v44  ;;  %v5858_v55 = vmul.f32 %v8368_v49, %v11925_v22 }
 0xb21   : > { %v5891_v2 = vpack.c.bf16 %v5859_v62, %v5857_v52  ;;  %v5890_v41 = vpack.c.bf16 %v5858_v55, %v5856_v53  ;;  %v6169_v52 = vpop.permute.xlu1 %6168  ;;  %v6174_v62 = vpop.permute.xlu0 %6173 }
 0xb23   : > { %5975 = vmatprep.subr.bf16.mxu1 %v5891_v2 }
 0xb24   : > { %5976 = vmatpush1.bf16.msra.mxu1 %v5890_v41 }
 0xb27   : > { %5978 = vmatmul.mubr.bf16.vlgmr.msra.gmra.mrb[200].mxu1 %v11928_v58  ;;  %v7843_v58 = vld [vmem:[%s11934_s16] sm:$0xff]  }
 0xb28   : > { %5987 = vmatprep.mubr.bf16.mxu1 %v4401_v17 }
 0xb2f   : > { %5988 = vmatmul.mubr.bf16.gmra.mrb[204].mxu1 %v4400_v32 }
 0xb30   : > { %6062 = vmatprep.mubr.bf16.mxu1 %v11929_v5 }
 0xb9b   : > { %v5926_v27 = vpop.f32.mrb[192].mxu1 }
 0xb9c   : > { %v5928_v20 = vpop.f32.mrb[193].mxu1 }
 0xb9d   : > { %v5930_v56 = vpop.f32.mrb[194].mxu1 }
 0xb9e   : > { %v6002_v16 = vpack.c.bf16 %v5930_v56, %v5926_v27  ;;  %v5932_v51 = vpop.f32.mrb[195].mxu1  ;;  %v7844_v27 = vld [vmem:[%s11935_s26 + $0x8] sm:$0xff]   ;;  %v7846_v56 = vld [vmem:[%s11935_s26 + $0x18] sm:$0xff]  }
 0xb9f   : > { %v6003_v18 = vpack.c.bf16 %v5932_v51, %v5928_v20  ;;  %v7845_v20 = vld [vmem:[%s11935_s26 + $0x10] sm:$0xff]   ;;  %v7848_v51 = vld [vmem:[%s11935_s26 + $0x28] sm:$0xff]  }
 0xba3   : > { %v5936_v19 = vpop.f32.mrb[196].mxu1 }
 0xba4   : > { %v5938_v4 = vpop.f32.mrb[197].mxu1 }
 0xba5   : > { %v5940_v38 = vpop.f32.mrb[198].mxu1 }
 0xba6   : > { %v6004_v7 = vpack.c.bf16 %v5940_v38, %v5936_v19  ;;  %v5942_v39 = vpop.f32.mrb[199].mxu1  ;;  %v11377_v19 = vpop.permute.xlu0 %6553 }
 0xba7   : > { %v6005_v61 = vpack.c.bf16 %v5942_v39, %v5938_v4 }
 0xbfa   : > { %v5979_v50 = vpop.f32.mrb[200].mxu1 }
 0xbfb   : > { %v5981_v63 = vpop.f32.mrb[201].mxu1 }
 0xbfc   : > { %v5983_v34 = vpop.f32.mrb[202].mxu1 }
 0xbfd   : > { %v6010_v43 = vpack.c.bf16 %v5983_v34, %v5979_v50  ;;  %v5985_v33 = vpop.f32.mrb[203].mxu1  ;;  %v11381_v50 = vpop.permute.xlu0 %6563 }
 0xbfe   : > { %v6011_v59 = vpack.c.bf16 %v5985_v33, %v5981_v63 }
 0xc00   : > { %6030 = vmatprep.subr.bf16.mxu1 %v6011_v59 }
 0xc01   : > { %6031 = vmatpush1.bf16.msra.mxu1 %v6010_v43  ;;  %v6514_v33 = vpop.permute.xlu0 %6513 }
 0xc02   : > { %v5989_v28 = vpop.f32.mrb[204].mxu1 }
 0xc03   : > { %v5991_v8 = vpop.f32.mrb[205].mxu1 }
 0xc04   : > { %v5993_v48 = vpop.f32.mrb[206].mxu1 }
 0xc05   : > { %v6012_v1 = vpack.c.bf16 %v5993_v48, %v5989_v28  ;;  %v5995_v42 = vpop.f32.mrb[207].mxu1 }
 0xc06   : > { %v6013_v45 = vpack.c.bf16 %v5995_v42, %v5991_v8 }
 0xc08   : > { %6032 = vmatprep.subr.bf16.mxu1 %v6013_v45 }
 0xc09   : > { %6033 = vmatpush1.bf16.msra.mxu1 %v6012_v1 }
 0xc0a   : > { %6099 = vmatprep.subr.bf16.mxu1 %v6003_v18  ;;  %v6549_v18 = vpop.permute.xlu1 %6548 }
 0xc0c   : > { %7281 = vmatmul.mubr.msk.bf16.vlgmr.msra.gmra.mrb[208].mxu1 %vm702_vm12, %v7833_v36 }
 0xc0d   : > { %6100 = vmatpush1.bf16.msra.mxu1 %v6002_v16  ;;  %6072 = vmatprep.mubr.bf16.mxu1 %v11929_v5  ;;  %v7847_v16 = vld [vmem:[%s11935_s26 + $0x20] sm:$0xff]  }
 0xc0e   : > { %6101 = vmatprep.subr.bf16.mxu1 %v6005_v61 }
 0xc11   : > { %6102 = vmatpush1.bf16.msra.mxu1 %v6004_v7  ;;  %v11379_v7 = vpop.permute.xlu1 %6558 }
 0xc12   : > { %6260 = vmatprep.subr.bf16.mxu1 %v11930_v14 }
 0xc14   : > { %7282 = vmatmul.mubr.msk.bf16.gmra.mrb[212].mxu1 %vm702_vm12, %v7834_v9 }
 0xc15   : > { %6131 = vmatprep.mubr.bf16.mxu1 %v11929_v5  ;;  %v6509_v63 = vpop.permute.xlu1 %6508 }
 0xc1c   : > { %7285 = vmatmul.mubr.msk.bf16.vlgmr.msra.gmra.mrb[208].mxu1 %vm702_vm12, %v7835_v54 }
 0xc1d   : > { %6261 = vmatpush1.bf16.msra.mxu1 %v11931_v37  ;;  %6141 = vmatprep.mubr.bf16.mxu1 %v11929_v5 }
 0xc1e   : > { %6262 = vmatprep.subr.bf16.mxu1 %v11932_v24 }
 0xc21   : > { %6263 = vmatpush1.bf16.msra.mxu1 %v11933_v47 }
 0xc24   : > { %7286 = vmatmul.mubr.msk.bf16.gmra.mrb[212].mxu1 %vm702_vm12, %v7836_v31  ;;  %v6519_v31 = vpop.permute.xlu1 %6518 }
 0xc25   : > { %6292 = vmatprep.mubr.bf16.mxu1 %v11929_v5 }
 0xc2c   : > { %7293 = vmatmul.mubr.msk.bf16.vlgmr.msra.gmra.mrb[216].mxu1 %vm702_vm12, %v7837_v23  ;;  %v6524_v23 = vpop.permute.xlu0 %6523 }
 0xc2d   : > { %6302 = vmatprep.mubr.bf16.mxu1 %v11929_v5 }
 0xc34   : > { %7294 = vmatmul.mubr.msk.bf16.gmra.mrb[220].mxu1 %vm702_vm12, %v7838_v60 }
 0xc35   : > { %6312 = vmatprep.mubr.bf16.mxu1 %v11929_v5 }
 0xc3c   : > { %7295 = vmatmul.mubr.msk.bf16.gmra.mrb[224].mxu1 %vm702_vm12, %v7839_v13 }
 0xc3d   : > { %6322 = vmatprep.mubr.bf16.mxu1 %v11929_v5 }
 0xc44   : > { %7296 = vmatmul.mubr.msk.bf16.gmra.mrb[228].mxu1 %vm702_vm12, %v7840_v26 }
 0xc45   : > { %6332 = vmatprep.mubr.bf16.mxu1 %v11929_v5 }
 0xc4c   : > { %7297 = vmatmul.mubr.msk.bf16.gmra.mrb[232].mxu1 %vm702_vm12, %v7841_v57 }
 0xc4d   : > { %6342 = vmatprep.mubr.bf16.mxu1 %v11929_v5 }
 0xc54   : > { %7298 = vmatmul.mubr.msk.bf16.gmra.mrb[236].mxu1 %vm702_vm12, %v7842_v3 }
 0xc55   : > { %6433 = vmatprep.mubr.bf16.mxu1 %v11929_v5 }
 0xcef   : > { %v6133_v29 = vpop.f32.mrb[208].mxu1 }
 0xcf0   : > { %v6135_v11 = vpop.f32.mrb[209].mxu1  ;;  %v6176_v25 = vadd.f32 %v6159_v30, %v6133_v29 }
 0xcf1   : > { %v6137_v10 = vpop.f32.mrb[210].mxu1  ;;  %v6177_v32 = vadd.f32 %v6159_v30, %v6135_v11 }
 0xcf2   : > { %v6178_v35 = vadd.f32 %v6164_v12, %v6137_v10  ;;  %v6139_v40 = vpop.f32.mrb[211].mxu1 }
 0xcf3   : > { %v6179_v17 = vadd.f32 %v6164_v12, %v6139_v40 }
 0xcf4   : > { %v6196_v46 = vpack.c.bf16 %v6178_v35, %v6176_v25 }
 0xcf5   : > { %v6197_v49 = vpack.c.bf16 %v6179_v17, %v6177_v32 }
 0xcf7   : > { %v6143_v15 = vpop.f32.mrb[212].mxu1  ;;  %6401 = vmatprep.subr.bf16.mxu1 %v6197_v49 }
 0xcf8   : > { %v6145_v44 = vpop.f32.mrb[213].mxu1  ;;  %6402 = vmatpush1.bf16.msra.mxu1 %v6196_v46  ;;  %v6180_v53 = vadd.f32 %v6169_v52, %v6143_v15 }
 0xcf9   : > { %v6147_v6 = vpop.f32.mrb[214].mxu1  ;;  %v6181_v2 = vadd.f32 %v6169_v52, %v6145_v44 }
 0xcfa   : > { %v6182_v22 = vadd.f32 %v6174_v62, %v6147_v6  ;;  %v6149_v55 = vpop.f32.mrb[215].mxu1 }
 0xcfb   : > { %v6183_v41 = vadd.f32 %v6174_v62, %v6149_v55 }
 0xcfc   : > { %v6198_v0 = vpack.c.bf16 %v6182_v22, %v6180_v53 }
 0xcfd   : > { %v6199_v21 = vpack.c.bf16 %v6183_v41, %v6181_v2 }
 0xcff   : > { %6403 = vmatprep.subr.bf16.mxu1 %v6199_v21  ;;  %v6529_v21 = vpop.permute.xlu1 %6528 }
 0xd00   : > { %6404 = vmatpush1.bf16.msra.mxu1 %v6198_v0 }
 0xd03   : > { %7305 = vmatmul.mubr.msk.bf16.vlgmr.msra.gmra.mrb[216].mxu1 %vm702_vm12, %v7843_v58 }
 0xd04   : > { %6443 = vmatprep.mubr.bf16.mxu1 %v11929_v5 }
 0xd0b   : > { %7306 = vmatmul.mubr.msk.bf16.gmra.mrb[220].mxu1 %vm702_vm12, %v7844_v27 }
 0xd0c   : > { %6453 = vmatprep.mubr.bf16.mxu1 %v11929_v5 }
 0xd13   : > { %7307 = vmatmul.mubr.msk.bf16.gmra.mrb[224].mxu1 %vm702_vm12, %v7845_v20 }
 0xd14   : > { %6463 = vmatprep.mubr.bf16.mxu1 %v11929_v5 }
 0xd1b   : > { %7308 = vmatmul.mubr.msk.bf16.gmra.mrb[228].mxu1 %vm702_vm12, %v7846_v56 }
 0xd1c   : > { %6473 = vmatprep.mubr.bf16.mxu1 %v11929_v5 }
 0xd23   : > { %7309 = vmatmul.mubr.msk.bf16.gmra.mrb[232].mxu1 %vm702_vm12, %v7847_v16  ;;  %v6534_v16 = vpop.permute.xlu0 %6533 }
 0xd24   : > { %6483 = vmatprep.mubr.bf16.mxu1 %v11929_v5 }
 0xd2b   : > { %7310 = vmatmul.mubr.msk.bf16.gmra.mrb[236].mxu1 %vm702_vm12, %v7848_v51 }
 0xdd6   : > { %v6435_v4 = vpop.f32.mrb[216].mxu1 }
 0xdd7   : > { %v6437_v38 = vpop.f32.mrb[217].mxu1  ;;  %v6566_v5 = vadd.f32 %v6509_v63, %v6435_v4 }
 0xdd8   : > { %v6439_v39 = vpop.f32.mrb[218].mxu1  ;;  %v6567_v59 = vadd.f32 %v6509_v63, %v6437_v38 }
 0xdd9   : > { %v6441_v61 = vpop.f32.mrb[219].mxu1  ;;  %v6568_v8 = vadd.f32 %v6514_v33, %v6439_v39  ;;  %v7311_v1 = vmul.f32 -1.442695, %v6566_v5 }
 0xdda   : > { %v7312_v42 = vmul.f32 -1.442695, %v6567_v59  ;;  %v6569_v36 = vadd.f32 %v6514_v33, %v6441_v61 }
 0xddb   : > { %v7313_v45 = vmul.f32 -1.442695, %v6568_v8  ;;  %8369 = vpow2.f32 %v7311_v1 }
 0xddc   : > { %8371 = vpow2.f32 %v7312_v42  ;;  %v7314_v24 = vmul.f32 -1.442695, %v6569_v36 }
 0xddd   : > { %8373 = vpow2.f32 %v7313_v45 }
 0xdde   : > { %v6445_v34 = vpop.f32.mrb[220].mxu1  ;;  %8375 = vpow2.f32 %v7314_v24 }
 0xddf   : > { %v6447_v43 = vpop.f32.mrb[221].mxu1  ;;  %v6570_v47 = vadd.f32 %v6519_v31, %v6445_v34 }
 0xde0   : > { %v6449_v28 = vpop.f32.mrb[222].mxu1  ;;  %v6571_v60 = vadd.f32 %v6519_v31, %v6447_v43 }
 0xde1   : > { %v6451_v48 = vpop.f32.mrb[223].mxu1  ;;  %v6572_v13 = vadd.f32 %v6524_v23, %v6449_v28  ;;  %v7315_v29 = vmul.f32 -1.442695, %v6570_v47  ;;  %v6539_v47 = vpop.permute.xlu1 %6538 }
 0xde2   : > { %v6573_v57 = vadd.f32 %v6524_v23, %v6451_v48  ;;  %v7316_v12 = vmul.f32 -1.442695, %v6571_v60 }
 0xde3   : > { %v7317_v35 = vmul.f32 -1.442695, %v6572_v13  ;;  %8377 = vpow2.f32 %v7315_v29 }
 0xde4   : > { %v7318_v32 = vmul.f32 -1.442695, %v6573_v57  ;;  %8379 = vpow2.f32 %v7316_v12  ;;  %v6544_v57 = vpop.permute.xlu0 %6543 }
 0xde5   : > { %v8370_v11 = vpop.eup %8369  ;;  %8381 = vpow2.f32 %v7317_v35 }
 0xde6   : > { %v6455_v9 = vpop.f32.mrb[224].mxu1  ;;  %v8372_v25 = vpop.eup %8371  ;;  %v6614_v17 = vadd.f32 1.0, %v8370_v11  ;;  %8383 = vpow2.f32 %v7318_v32 }
 0xde7   : > { %v6457_v14 = vpop.f32.mrb[225].mxu1  ;;  %v8374_v40 = vpop.eup %8373  ;;  %v6615_v46 = vadd.f32 1.0, %v8372_v25  ;;  %v6574_v20 = vadd.f32 %v6529_v21, %v6455_v9 }
 0xde8   : > { %v6459_v54 = vpop.f32.mrb[226].mxu1  ;;  %v6616_v49 = vadd.f32 1.0, %v8374_v40  ;;  %v8376_v62 = vpop.eup %8375  ;;  %8385 = vrcp.f32 %v6614_v17  ;;  %v6575_v51 = vadd.f32 %v6529_v21, %v6457_v14 }
 0xde9   : > { %v11383_v37 = vpop.f32.mrb[227].mxu1  ;;  %8387 = vrcp.f32 %v6615_v46  ;;  %v6617_v58 = vadd.f32 1.0, %v8376_v62  ;;  %v6576_v4 = vadd.f32 %v6534_v16, %v6459_v54 }
 0xdea   : > { %8389 = vrcp.f32 %v6616_v49  ;;  %v6577_v45 = vadd.f32 %v6534_v16, %v11383_v37 }
 0xdee   : > { %v11385_v26 = vpop.f32.mrb[228].mxu1 }
 0xdef   : > { %v11387_v3 = vpop.f32.mrb[229].mxu1  ;;  %v6578_v60 = vadd.f32 %v6539_v47, %v11385_v26 }
 0xdf0   : > { %v11389_v30 = vpop.f32.mrb[230].mxu1  ;;  %v6579_v29 = vadd.f32 %v6539_v47, %v11387_v3 }
 0xdf1   : > { %v11391_v10 = vpop.f32.mrb[231].mxu1  ;;  %v6580_v25 = vadd.f32 %v6544_v57, %v11389_v30 }
 0xdf2   : > { %v6581_v40 = vadd.f32 %v6544_v57, %v11391_v10  ;;  %v8453_v57 = vld [vmem:[#allocation4 + $0x20] sm:$0xff] }
 0xdf6   : > { %v6475_v15 = vpop.f32.mrb[232].mxu1 }
 0xdf7   : > { %v6582_v52 = vadd.f32 %v6549_v18, %v6475_v15  ;;  %v6477_v44 = vpop.f32.mrb[233].mxu1 }
 0xdf8   : > { %v6583_v6 = vadd.f32 %v6549_v18, %v6477_v44  ;;  %v6479_v53 = vpop.f32.mrb[234].mxu1  ;;  %v11395_v18 = vpop.eup %8377 }
 0xdf9   : > { %v7319_v22 = vmul.f32 -1.442695, %v6582_v52  ;;  %v6584_v55 = vadd.f32 %v11377_v19, %v6479_v53  ;;  %v6481_v2 = vpop.f32.mrb[235].mxu1  ;;  %v11397_v39 = vpop.eup %8379  ;;  %v6618_v10 = vadd.f32 1.0, %v11395_v18 }
 0xdfa   : > { %v7320_v41 = vmul.f32 -1.442695, %v6583_v6  ;;  %v6585_v0 = vadd.f32 %v11377_v19, %v6481_v2  ;;  %v11400_v63 = vpop.eup %8381  ;;  %v6619_v53 = vadd.f32 1.0, %v11397_v39 }
 0xdfb   : > { %8391 = vpow2.f32 %v7319_v22  ;;  %v7321_v27 = vmul.f32 -1.442695, %v6584_v55  ;;  %v11403_v43 = vpop.eup %8383 }
 0xdfc   : > { %8393 = vpow2.f32 %v7320_v41  ;;  %v7322_v56 = vmul.f32 -1.442695, %v6585_v0  ;;  %v11406_v8 = vpop.eup %8385  ;;  %v6620_v41 = vadd.f32 1.0, %v11400_v63  ;;  %v8451_v63 = vld [vmem:[#allocation4 + $0x10] sm:$0xff] }
 0xdfd   : > { %8395 = vpow2.f32 %v7321_v27  ;;  %v11409_v42 = vpop.eup %8387  ;;  %v6621_v27 = vadd.f32 1.0, %v11403_v43 }
 0xdfe   : > { %8397 = vpow2.f32 %v7322_v56  ;;  %v6485_v38 = vpop.f32.mrb[236].mxu1  ;;  %v11412_v36 = vpop.eup %8389 }
 0xdff   : > { %8399 = vrcp.f32 %v6617_v58  ;;  %v6586_v19 = vadd.f32 %v11379_v7, %v6485_v38  ;;  %v6487_v61 = vpop.f32.mrb[237].mxu1 }
 0xe00   : > { %8401 = vtanh.f32 %v6574_v20  ;;  %v6587_v34 = vadd.f32 %v11379_v7, %v6487_v61  ;;  %v6489_v5 = vpop.f32.mrb[238].mxu1  ;;  %v8449_v20 = vld [vmem:[#allocation4] sm:$0xff] }
 0xe01   : > { %8403 = vtanh.f32 %v6575_v51  ;;  %v7323_v33 = vmul.f32 -1.442695, %v6586_v19  ;;  %v6588_v59 = vadd.f32 %v11381_v50, %v6489_v5  ;;  %v6491_v28 = vpop.f32.mrb[239].mxu1 }
 0xe02   : > { %8405 = vtanh.f32 %v6576_v4  ;;  %v7324_v48 = vmul.f32 -1.442695, %v6587_v34  ;;  %v6589_v1 = vadd.f32 %v11381_v50, %v6491_v28  ;;  %v8450_v4 = vld [vmem:[#allocation4 + $0x8] sm:$0xff] }
 0xe03   : > { %8407 = vpow2.f32 %v7323_v33  ;;  %v7325_v7 = vmul.f32 -1.442695, %v6588_v59  ;;  %v8452_v59 = vld [vmem:[#allocation4 + $0x18] sm:$0xff] }
 0xe04   : > { %8409 = vpow2.f32 %v7324_v48  ;;  %v7326_v9 = vmul.f32 -1.442695, %v6589_v1 }
 0xe05   : > { %v8392_v14 = vpop.eup %8391  ;;  %8411 = vpow2.f32 %v7325_v7 }
 0xe06   : > { %v8394_v54 = vpop.eup %8393  ;;  %v6670_v24 = vadd.f32 1.0, %v8392_v14  ;;  %8413 = vpow2.f32 %v7326_v9 }
 0xe07   : > { %v8396_v31 = vpop.eup %8395  ;;  %8415 = vtanh.f32 %v6577_v45  ;;  %v6671_v23 = vadd.f32 1.0, %v8394_v54 }
 0xe08   : > { %v8398_v50 = vpop.eup %8397  ;;  %8417 = vrcp.f32 %v6670_v24  ;;  %v6672_v37 = vadd.f32 1.0, %v8396_v31 }
 0xe09   : > { %v11415_v13 = vpop.eup %8399  ;;  %8419 = vrcp.f32 %v6671_v23  ;;  %v6673_v11 = vadd.f32 1.0, %v8398_v50 }
 0xe0a   : > { %v8402_v12 = vpop.eup %8401  ;;  %8421 = vrcp.f32 %v6672_v37 }
 0xe0b   : > { %v8404_v35 = vpop.eup %8403  ;;  %8423 = vrcp.f32 %v6673_v11 }
 0xe0c   : > { %v8406_v32 = vpop.eup %8405  ;;  %8425 = vtanh.f32 %v6578_v60 }
 0xe0d   : > { %v8408_v26 = vpop.eup %8407  ;;  %8427 = vtanh.f32 %v6579_v29 }
 0xe0e   : > { %v8410_v17 = vpop.eup %8409  ;;  %8429 = vtanh.f32 %v6580_v25  ;;  %v6674_v46 = vadd.f32 1.0, %v8408_v26  ;;  %v8454_v25 = vld [vmem:[#allocation4 + $0x28] sm:$0xff]  ;;  %v8455_v26 = vld [vmem:[#allocation4 + $0x30] sm:$0xff] }
 0xe0f   : > { %v8412_v49 = vpop.eup %8411  ;;  %8431 = vtanh.f32 %v6581_v40  ;;  %v6675_v3 = vadd.f32 1.0, %v8410_v17 }
 0xe10   : > { %v8414_v15 = vpop.eup %8413  ;;  %8433 = vrcp.f32 %v6674_v46  ;;  %v6676_v52 = vadd.f32 1.0, %v8412_v49 }
 0xe11   : > { %v8416_v44 = vpop.eup %8415  ;;  %8435 = vrcp.f32 %v6675_v3  ;;  %v6677_v30 = vadd.f32 1.0, %v8414_v15  ;;  %v8456_v3 = vld [vmem:[#allocation4 + $0x38] sm:$0xff] }
 0xe12   : > { %v8418_v62 = vpop.eup %8417  ;;  %8437 = vrcp.f32 %v6676_v52 }
 0xe13   : > { %v8420_v6 = vpop.eup %8419  ;;  %v6694_v22 = vmul.f32 %v8418_v62, %v8402_v12  ;;  %v6702_v55 = vsub.f32 1.0, %v8418_v62  ;;  %8439 = vrcp.f32 %v6677_v30 }
 0xe14   : > { %v8422_v2 = vpop.eup %8421  ;;  %v6695_v0 = vmul.f32 %v8420_v6, %v8404_v35  ;;  %v6703_v21 = vsub.f32 1.0, %v8420_v6  ;;  %8441 = vrcp.f32 %v6618_v10 }
 0xe15   : > { %v8424_v58 = vpop.eup %8423  ;;  %v6710_v56 = vmul.f32 %v8449_v20, %v6702_v55  ;;  %v6696_v16 = vmul.f32 %v8422_v2, %v8406_v32  ;;  %v6704_v51 = vsub.f32 1.0, %v8422_v2  ;;  %8443 = vrcp.f32 %v6619_v53 }
 0xe16   : > { %v8426_v18 = vpop.eup %8425  ;;  %v6711_v38 = vmul.f32 %v8450_v4, %v6703_v21  ;;  %v6697_v39 = vmul.f32 %v8424_v58, %v8416_v44  ;;  %v6705_v19 = vsub.f32 1.0, %v8424_v58  ;;  %8445 = vrcp.f32 %v6620_v41 }
 0xe17   : > { %v8428_v61 = vpop.eup %8427  ;;  %v6718_v34 = vadd.f32 %v6710_v56, %v6694_v22  ;;  %v6712_v5 = vmul.f32 %v8451_v63, %v6704_v51  ;;  %8447 = vrcp.f32 %v6621_v27 }
 0xe18   : > { %v8430_v33 = vpop.eup %8429  ;;  %v6719_v43 = vadd.f32 %v6711_v38, %v6695_v0  ;;  %v6713_v28 = vmul.f32 %v8452_v59, %v6705_v19 }
 0xe19   : > { %v8432_v48 = vpop.eup %8431  ;;  %v6726_v1 = vmul.f32 %v11406_v8, %v6718_v34  ;;  %6734 = vst [vmem:[#allocation4] sm:$0xff] %v6718_v34  ;;  %6766 = vst [vmem:[%s8625_s11 + $0x80] sm:$0xff] %v6718_v34  ;;  %v6720_v45 = vadd.f32 %v6712_v5, %v6696_v16 }
 0xe1a   : > { %v8434_v7 = vpop.eup %8433  ;;  %v6727_v9 = vmul.f32 %v11409_v42, %v6719_v43  ;;  %6735 = vst [vmem:[#allocation4 + $0x8] sm:$0xff] %v6719_v43  ;;  %6767 = vst [vmem:[%s8625_s11 + $0x88] sm:$0xff] %v6719_v43  ;;  %v6721_v14 = vadd.f32 %v6713_v28, %v6697_v39 }
 0xe1b   : > { %v8436_v54 = vpop.eup %8435  ;;  %6750 = vst [vmem:[%s8625_s11] sm:$0xff] %v6726_v1  ;;  %v6728_v24 = vmul.f32 %v11412_v36, %v6720_v45  ;;  %6736 = vst [vmem:[#allocation4 + $0x10] sm:$0xff] %v6720_v45  ;;  %v6698_v31 = vmul.f32 %v8434_v7, %v8426_v18  ;;  %v6706_v8 = vsub.f32 1.0, %v8434_v7 }
 0xe1c   : > { %6768 = vst [vmem:[%s8625_s11 + $0x90] sm:$0xff] %v6720_v45  ;;  %v8438_v47 = vpop.eup %8437  ;;  %6751 = vst [vmem:[%s8625_s11 + $0x8] sm:$0xff] %v6727_v9  ;;  %v6729_v23 = vmul.f32 %v11415_v13, %v6721_v14  ;;  %v6699_v42 = vmul.f32 %v8436_v54, %v8428_v61  ;;  %v6707_v50 = vsub.f32 1.0, %v8436_v54 }
 0xe1d   : > { %6737 = vst [vmem:[#allocation4 + $0x18] sm:$0xff] %v6721_v14  ;;  %6769 = vst [vmem:[%s8625_s11 + $0x98] sm:$0xff] %v6721_v14  ;;  %v8440_v60 = vpop.eup %8439  ;;  %v6742_v37 = vpack.c.bf16 %v6728_v24, %v6726_v1  ;;  %v6714_v29 = vmul.f32 %v8453_v57, %v6706_v8  ;;  %v6700_v11 = vmul.f32 %v8438_v47, %v8430_v33  ;;  %v6708_v36 = vsub.f32 1.0, %v8438_v47 }
 0xe1e   : > { %6752 = vst [vmem:[%s8625_s11 + $0x10] sm:$0xff] %v6728_v24  ;;  %v6743_v12 = vpack.c.bf16 %v6729_v23, %v6727_v9  ;;  %6753 = vst [vmem:[%s8625_s11 + $0x18] sm:$0xff] %v6729_v23  ;;  %v6715_v35 = vmul.f32 %v8454_v25, %v6707_v50  ;;  %v6701_v40 = vmul.f32 %v8440_v60, %v8432_v48  ;;  %v6709_v32 = vsub.f32 1.0, %v8440_v60  ;;  %v8442_v46 = vpop.eup %8441 }
 0xe1f   : > { %6746 = vst [vmem:[#allocation2 + $0x8] sm:$0xff] %v6742_v37  ;;  %v6722_v13 = vadd.f32 %v6714_v29, %v6698_v31  ;;  %v6716_v17 = vmul.f32 %v8455_v26, %v6708_v36  ;;  %v8444_v52 = vpop.eup %8443 }
 0xe20   : > { %6747 = vst [vmem:[#allocation2 + $0x10] sm:$0xff] %v6743_v12  ;;  %v6723_v49 = vadd.f32 %v6715_v35, %v6699_v42  ;;  %v6717_v15 = vmul.f32 %v8456_v3, %v6709_v32  ;;  %v8446_v62 = vpop.eup %8445 }
 0xe21   : > { %v6730_v44 = vmul.f32 %v8442_v46, %v6722_v13  ;;  %6738 = vst [vmem:[#allocation4 + $0x20] sm:$0xff] %v6722_v13  ;;  %6770 = vst [vmem:[%s8625_s11 + $0xa0] sm:$0xff] %v6722_v13  ;;  %v6724_v30 = vadd.f32 %v6716_v17, %v6700_v11  ;;  %v8448_v53 = vpop.eup %8447 }
 0xe22   : > { %v6731_v10 = vmul.f32 %v8444_v52, %v6723_v49  ;;  %6739 = vst [vmem:[#allocation4 + $0x28] sm:$0xff] %v6723_v49  ;;  %6771 = vst [vmem:[%s8625_s11 + $0xa8] sm:$0xff] %v6723_v49  ;;  %v6725_v6 = vadd.f32 %v6717_v15, %v6701_v40 }
 0xe23   : > { %6754 = vst [vmem:[%s8625_s11 + $0x20] sm:$0xff] %v6730_v44  ;;  %v6732_v22 = vmul.f32 %v8446_v62, %v6724_v30  ;;  %6740 = vst [vmem:[#allocation4 + $0x30] sm:$0xff] %v6724_v30 }
 0xe24   : > { %6772 = vst [vmem:[%s8625_s11 + $0xb0] sm:$0xff] %v6724_v30  ;;  %6755 = vst [vmem:[%s8625_s11 + $0x28] sm:$0xff] %v6731_v10  ;;  %v6733_v55 = vmul.f32 %v8448_v53, %v6725_v6 }
 0xe25   : > { %6741 = vst [vmem:[#allocation4 + $0x38] sm:$0xff] %v6725_v6  ;;  %6773 = vst [vmem:[%s8625_s11 + $0xb8] sm:$0xff] %v6725_v6  ;;  %v6744_v2 = vpack.c.bf16 %v6732_v22, %v6730_v44 }
 0xe26   : > { %6756 = vst [vmem:[%s8625_s11 + $0x30] sm:$0xff] %v6732_v22  ;;  %v6745_v41 = vpack.c.bf16 %v6733_v55, %v6731_v10  ;;  %6757 = vst [vmem:[%s8625_s11 + $0x38] sm:$0xff] %v6733_v55 }
 0xe27   : > { %6748 = vst [vmem:[#allocation2 + $0x28] sm:$0xff] %v6744_v2 }
 0xe28   : > { %6749 = vst [vmem:[#allocation2 + $0x30] sm:$0xff] %v6745_v41 }
 0xe29 PF: > { %s11936_s18 = sld [smem:[#allocation7_spill]]  ;;  %s11937_s29 = sld [smem:[#allocation5_spill]] }
 0xe2a   : > { %s11938_s30 = sld [smem:[#allocation6_spill]]  ;;  %s11939_s15 = sld [smem:[#allocation8_spill]] }
 0xe2b   : > { %s11940_s16 = sld [smem:[#allocation9_spill]] }
 0xe2f   : > { %s24_s17 = sadd.s32 1, %s11936_s18  }
 0xe30   : > { %p21_p8 = scmp.ge.s32.totalorder %s24_s17, 10  }
 0xe32   :  { %23 = sbr.rel (!%p21_p8) target bundleno = 3 (0x3), region = 120 }

</bundles_post_ra>
